<compile_context>
chip_gen: v5e
topology: v5e:2x2
jax: 0.10.0
libtpu: 0.0.40
codegen_flags: <defaults>
</compile_context>

<pallas_src>
import numpy as np
import jax
import jax.numpy as jnp
from jax.experimental import pallas as pl
from jax.experimental.pallas import tpu as pltpu


# ----------------------------------------------------------------------------
# Small helpers
# ----------------------------------------------------------------------------
def _mxu_rows():
    """MXU row width: 128 on v5e and earlier, 256 on v6e/v7x."""
    try:
        kind = jax.devices()[0].device_kind.lower()
    except Exception:
        return 128
    return 256 if ("v6" in kind or "v7" in kind) else 128


def _round_up(x, m):
    return pl.cdiv(x, m) * m


def _vmem_limit(*tile_bytes):
    """Explicit scoped-VMEM budget from actual tile sizes (+4 MiB headroom), clamped to
    [32 MiB, 48 MiB] — raises v5e's 16 MiB default, stays well inside v7x's 64 MiB."""
    need = sum(int(t) for t in tile_bytes) + (4 << 20)
    return int(min(48 << 20, max(32 << 20, need)))


def _const_spec(shape):
    """Operand with a constant index map: DMA'd once, VMEM-resident, single-buffered."""
    return pl.BlockSpec(shape, lambda i: (0,) * len(shape),
                        pipeline_mode=pl.Buffered(1))


# ----------------------------------------------------------------------------
# Kernel 1: adaptive avg-pool (pooling-matrix matmul) + 1x1 conv + BN + ReLU
#   x_ref     : (B, C, HW)   batch tile, native NCHW with spatial flattened (f32 or bf16)
#   p_ref     : (16, HW)     adaptive-avg-pool matrix (same dtype as x)
#   wc_ref    : (C, 128)     1x1 conv weight transposed (bf16)
#   scale_ref : (1, 128)     folded BN scale = gamma / sqrt(var + eps)  (f32)
#   bias_ref  : (1, 128)     folded BN bias  = beta - mean * scale      (f32)
#   o_ref     : (B*16, 128)  spatial-major features, row = b*16 + p, col = channel (bf16)
# ----------------------------------------------------------------------------
def conv_head_kernel(x_ref, p_ref, wc_ref, scale_ref, bias_ref, o_ref):
    B, C, HW = x_ref.shape
    P16 = p_ref.shape[0]
    # One batched NT matmul over the whole block (no per-sample loop, no concatenate):
    #   pooled[b, p, c] = sum_hw P[p, hw] * x[b, c, hw]
    pmat = jnp.broadcast_to(p_ref[...][None, :, :], (B, P16, HW))
    pooled = jax.lax.dot_general(
        pmat, x_ref[...],
        dimension_numbers=(((2,), (2,)), ((0,), (0,))),
        preferred_element_type=jnp.float32)                       # (B, 16, C) f32
    pooled = pooled.reshape(B * P16, C)                           # merge major dims (16 % 8 == 0 -> free)
    # Conv as one MXU matmul for the whole batch tile: M = B*16 rows.
    z = jnp.dot(pooled.astype(wc_ref.dtype), wc_ref[...],
                preferred_element_type=jnp.float32)               # (B*16, 128)
    z = jnp.maximum(z * scale_ref[...] + bias_ref[...], 0.0)      # BN (eval) + ReLU
    o_ref[...] = z.astype(o_ref.dtype)


# ----------------------------------------------------------------------------
# Kernel 2: fc1 (2048 -> 1024) + ReLU + [dropout: identity in eval] + fc2 (lane-padded)
#   x_ref  : (M, 2048)     bf16 activations (flatten order handled via permuted fc1 weight)
#   w1_ref : (2048, 1024)  bf16 (row-permuted fc1.weight.T)
#   b1_ref : (1, 1024)     f32
#   w2_ref : (1024, NCp)   bf16 (fc2.weight.T, zero-padded to a multiple of 128 lanes)
#   b2_ref : (1, NCp)      f32
#   o_ref  : (M, NCp)      f32
# ----------------------------------------------------------------------------
def fc_kernel(x_ref, w1_ref, b1_ref, w2_ref, b2_ref, o_ref):
    h = jnp.dot(x_ref[...], w1_ref[...], preferred_element_type=jnp.float32) + b1_ref[...]
    h = jnp.maximum(h, 0.0).astype(jnp.bfloat16)
    # TODO(synk): F.dropout(p=0.7) is identity in eval mode (training=False); no RNG applied.
    o_ref[...] = jnp.dot(h, w2_ref[...], preferred_element_type=jnp.float32) + b2_ref[...]


def adaptive_pool_matrix(H, W, out_h=4, out_w=4):
    """Exact F.adaptive_avg_pool2d region boundaries as a (16, H*W) numpy matrix."""
    P = np.zeros((out_h * out_w, H * W), np.float32)
    for i in range(out_h):
        hs = (i * H) // out_h
        he = -((-(i + 1) * H) // out_h)  # ceil
        for j in range(out_w):
            ws = (j * W) // out_w
            we = -((-(j + 1) * W) // out_w)
            area = float((he - hs) * (we - ws))
            for h in range(hs, he):
                for w in range(ws, we):
                    P[i * out_w + j, h * W + w] = 1.0 / area
    return P


def make_torch_params(key, in_channels, num_classes):
    """Random parameters mirroring the PyTorch module (eval mode)."""
    ks = jax.random.split(key, 8)
    return dict(
        conv_w=jax.random.normal(ks[0], (128, in_channels), jnp.float32) * 0.1,  # Conv2d(C,128,1).weight[:,:,0,0]
        bn_gamma=jax.random.uniform(ks[1], (128,), jnp.float32, 0.5, 1.5),
        bn_beta=jax.random.normal(ks[2], (128,), jnp.float32) * 0.1,
        bn_mean=jax.random.normal(ks[3], (128,), jnp.float32) * 0.1,
        bn_var=jax.random.uniform(ks[4], (128,), jnp.float32, 0.5, 1.5),
        fc1_w=jax.random.normal(ks[5], (1024, 2048), jnp.float32) * 0.02,
        fc1_b=jax.random.normal(ks[6], (1024,), jnp.float32) * 0.02,
        fc2_w=jax.random.normal(ks[7], (num_classes, 1024), jnp.float32) * 0.02,
        fc2_b=jnp.zeros((num_classes,), jnp.float32),
    )


def prepare_params(p, num_classes):
    """One-time host-side prep: fold BN, permute fc1 rows, pad fc2 lanes, cast to bf16."""
    eps = 1e-3  # BasicConv2d uses BatchNorm2d(..., eps=0.001)
    scale = p["bn_gamma"] / jnp.sqrt(p["bn_var"] + eps)
    bias = p["bn_beta"] - p["bn_mean"] * scale

    # fc1.weight.T rows are indexed by torch.flatten order c*16 + p.  Our kernel-1 output
    # flattens as p*128 + c (spatial-major, lane-dense), so permute the rows to match.
    w1t = p["fc1_w"].T                                                   # (2048, 1024)
    w1p = w1t.reshape(128, 16, 1024).transpose(1, 0, 2).reshape(2048, 1024)

    nc = int(num_classes)
    nc_pad = pl.cdiv(nc, 128) * 128
    w2p = jnp.zeros((1024, nc_pad), jnp.float32).at[:, :nc].set(p["fc2_w"].T)
    b2p = jnp.zeros((1, nc_pad), jnp.float32).at[0, :nc].set(p["fc2_b"])

    return dict(
        wc_t=p["conv_w"].T.astype(jnp.bfloat16),                         # (C, 128)
        bn_scale=scale.reshape(1, 128),
        bn_bias=bias.reshape(1, 128),
        w1p=w1p.astype(jnp.bfloat16),                                    # (2048, 1024)
        b1=p["fc1_b"].reshape(1, 1024),
        w2p=w2p.astype(jnp.bfloat16),                                    # (1024, nc_pad)
        b2p=b2p,                                                         # (1, nc_pad)
        num_classes=nc,
    )


def inception_aux_ori(x_nchw, kp):
    N, C, H, W = x_nchw.shape
    HW = H * W
    nc = kp["num_classes"]
    nc_pad = kp["w2p"].shape[1]
    mxu_rows = _mxu_rows()
    xi = jnp.dtype(x_nchw.dtype).itemsize

    # ---- kernel-1 batch tile: fill the MXU rows (b_blk*16 = 128 on v5e, 256 on v6e/v7x)
    #      but keep the "parallel" grid >= 2 steps so both v7x TensorCores stay busy. ----
    pref_b = max(1, mxu_rows // 16)
    b_blk = max(1, min(pref_b, N // 2))
    n_pad = _round_up(N, b_blk)

    x3 = x_nchw.reshape(N, C, HW)                       # free reshape of native NCHW
    if n_pad != N:
        x3 = jnp.pad(x3, ((0, n_pad - N), (0, 0), (0, 0)))

    # Pooling matrix baked at the input dtype (no runtime cast of x; bf16 x is accepted as-is).
    P = jnp.asarray(adaptive_pool_matrix(H, W), dtype=x_nchw.dtype)

    vmem1 = _vmem_limit(
        2 * b_blk * C * HW * xi,        # x tile, double-buffered
        16 * HW * xi,                   # pooling matrix (single-buffered)
        C * 128 * 2,                    # conv weight bf16 (single-buffered)
        2 * 128 * 4,                    # BN scale + bias
        2 * b_blk * 16 * 128 * 2,       # out tile, double-buffered
    )

    # ---- kernel 1: adaptive-avg-pool + 1x1 conv + BN + ReLU ----
    feats = pl.pallas_call(
        conv_head_kernel,
        out_shape=jax.ShapeDtypeStruct((n_pad * 16, 128), jnp.bfloat16),
        grid=(n_pad // b_blk,),
        in_specs=[
            pl.BlockSpec((b_blk, C, HW), lambda i: (i, 0, 0)),
            _const_spec((16, HW)),
            _const_spec((C, 128)),
            _const_spec((1, 128)),
            _const_spec((1, 128)),
        ],
        out_specs=pl.BlockSpec((b_blk * 16, 128), lambda i: (i, 0)),
        compiler_params=pltpu.CompilerParams(
            dimension_semantics=("parallel",),
            vmem_limit_bytes=vmem1,
        ),
    )(x3, P, kp["wc_t"], kp["bn_scale"], kp["bn_bias"])

    # torch.flatten(x, 1): free contiguous reshape (ordering absorbed by the w1 permutation)
    xfc = feats.reshape(n_pad, 2048)

    # ---- kernel-2 batch tile: up to mxu_rows rows, multiple of 8 sublanes,
    #      >= 2 grid steps once the batch is large enough to split. ----
    if n_pad >= 16:
        m_blk = min(mxu_rows, _round_up(pl.cdiv(n_pad, 2), 8))
    else:
        m_blk = _round_up(n_pad, 8)
    n_pad2 = _round_up(n_pad, m_blk)
    if n_pad2 != n_pad:
        xfc = jnp.pad(xfc, ((0, n_pad2 - n_pad), (0, 0)))

    vmem2 = _vmem_limit(
        2 * m_blk * 2048 * 2,           # x tile, double-buffered
        2048 * 1024 * 2,                # w1 bf16, single-buffered
        1024 * 4,                       # b1
        1024 * nc_pad * 2,              # w2 bf16, single-buffered
        nc_pad * 4,                     # b2
        2 * m_blk * nc_pad * 4,         # out tile, double-buffered
    )

    # ---- kernel 2: fc1 + ReLU + (dropout = identity) + fc2, batch-tiled, weights resident ----
    logits = pl.pallas_call(
        fc_kernel,
        out_shape=jax.ShapeDtypeStruct((n_pad2, nc_pad), jnp.float32),
        grid=(n_pad2 // m_blk,),
        in_specs=[
            pl.BlockSpec((m_blk, 2048), lambda i: (i, 0)),
            _const_spec((2048, 1024)),
            _const_spec((1, 1024)),
            _const_spec((1024, nc_pad)),
            _const_spec((1, nc_pad)),
        ],
        out_specs=pl.BlockSpec((m_blk, nc_pad), lambda i: (i, 0)),
        compiler_params=pltpu.CompilerParams(
            dimension_semantics=("parallel",),
            vmem_limit_bytes=vmem2,
        ),
    )(xfc, kp["w1p"], kp["b1"], kp["w2p"], kp["b2p"])

    # strip batch padding and lane padding
    return logits[:N, :nc]


if __name__ == "__main__":
    key = jax.random.PRNGKey(0)
    k_x, k_p = jax.random.split(key)

    N, C, H, W = 2, 4, 16, 16
    num_classes = 10

    x = jax.random.normal(k_x, (N, C, H, W), jnp.float32)   # NCHW, like PyTorch (bf16 also accepted)
    raw = make_torch_params(k_p, C, num_classes)
    kp = prepare_params(raw, num_classes)

    fn = jax.jit(lambda xx: inception_aux_ori(xx, kp))
    out = fn(x)
    jax.block_until_ready(out)
    assert out.shape == (N, num_classes) and out.dtype == jnp.float32
    print("KERNEL_OK")
</pallas_src>

<mosaic_0001>
module attributes {stable_mosaic.version = 11 : i64} {
  func.func @conv_head_kernel(%arg0: i32, %arg1: memref<1x4x256xf32, #tpu.memory_space<vmem>>, %arg2: memref<16x256xf32, #tpu.memory_space<vmem>>, %arg3: memref<4x128xbf16, #tpu.memory_space<vmem>>, %arg4: memref<1x128xf32, #tpu.memory_space<vmem>>, %arg5: memref<1x128xf32, #tpu.memory_space<vmem>>, %arg6: memref<16x128xbf16, #tpu.memory_space<vmem>>) attributes {dimension_semantics = [#tpu.dimension_semantics<parallel>], iteration_bounds = array<i64: 2>, scalar_prefetch = 0 : i64, scratch_operands = 0 : i64, tpu.core_type = #tpu.core_type<tc>, window_params = [{transform_indices = @transform_0, window_bounds = array<i64: 1, 4, 256>}, {pipeline_mode = #tpu.pipeline_mode<synchronous>, transform_indices = @transform_1, window_bounds = array<i64: 16, 256>}, {pipeline_mode = #tpu.pipeline_mode<synchronous>, transform_indices = @transform_2, window_bounds = array<i64: 4, 128>}, {pipeline_mode = #tpu.pipeline_mode<synchronous>, transform_indices = @transform_3, window_bounds = array<i64: 1, 128>}, {pipeline_mode = #tpu.pipeline_mode<synchronous>, transform_indices = @transform_4, window_bounds = array<i64: 1, 128>}, {transform_indices = @transform_5, window_bounds = array<i64: 16, 128>}]} {
    %c0 = arith.constant 0 : index
    %c0_0 = arith.constant 0 : index
    %0 = vector.load %arg2[%c0, %c0_0] : memref<16x256xf32, #tpu.memory_space<vmem>>, vector<16x256xf32>
    %1 = vector.shape_cast %0 : vector<16x256xf32> to vector<1x16x256xf32>
    %c0_1 = arith.constant 0 : index
    %c0_2 = arith.constant 0 : index
    %c0_3 = arith.constant 0 : index
    %2 = vector.load %arg1[%c0_1, %c0_2, %c0_3] : memref<1x4x256xf32, #tpu.memory_space<vmem>>, vector<1x4x256xf32>
    %cst = arith.constant dense<0.000000e+00> : vector<1x16x4xf32>
    %3 = tpu.matmul %1, %2, %cst {dimension_numbers = #tpu.dot_dimension_numbers<[2], [2], [1], [1], [0, 0, 0, 1, 1, 1], [0], [0]>} : vector<1x16x256xf32>, vector<1x4x256xf32>, vector<1x16x4xf32> -> vector<1x16x4xf32>
    %4 = vector.shape_cast %3 : vector<1x16x4xf32> to vector<16x4xf32>
    %5 = arith.truncf %4 : vector<16x4xf32> to vector<16x4xbf16>
    %c0_4 = arith.constant 0 : index
    %c0_5 = arith.constant 0 : index
    %6 = vector.load %arg3[%c0_4, %c0_5] : memref<4x128xbf16, #tpu.memory_space<vmem>>, vector<4x128xbf16>
    %cst_6 = arith.constant dense<0.000000e+00> : vector<16x128xf32>
    %7 = tpu.matmul %5, %6, %cst_6 {dimension_numbers = #tpu.dot_dimension_numbers<[1], [0], [0], [1], [0, 0, 1, 1], [], []>} : vector<16x4xbf16>, vector<4x128xbf16>, vector<16x128xf32> -> vector<16x128xf32>
    %c0_7 = arith.constant 0 : index
    %c0_8 = arith.constant 0 : index
    %8 = vector.load %arg4[%c0_7, %c0_8] : memref<1x128xf32, #tpu.memory_space<vmem>>, vector<1x128xf32>
    %9 = vector.broadcast %8 : vector<1x128xf32> to vector<16x128xf32>
    %10 = arith.mulf %7, %9 : vector<16x128xf32>
    %c0_9 = arith.constant 0 : index
    %c0_10 = arith.constant 0 : index
    %11 = vector.load %arg5[%c0_9, %c0_10] : memref<1x128xf32, #tpu.memory_space<vmem>>, vector<1x128xf32>
    %12 = vector.broadcast %11 : vector<1x128xf32> to vector<16x128xf32>
    %13 = arith.addf %10, %12 : vector<16x128xf32>
    %cst_11 = arith.constant 0.000000e+00 : f32
    %14 = vector.broadcast %cst_11 : f32 to vector<16x128xf32>
    %15 = arith.maximumf %13, %14 : vector<16x128xf32>
    %16 = arith.truncf %15 : vector<16x128xf32> to vector<16x128xbf16>
    %c0_12 = arith.constant 0 : index
    %c0_13 = arith.constant 0 : index
    %17 = vector.load %arg6[%c0_12, %c0_13] : memref<16x128xbf16, #tpu.memory_space<vmem>>, vector<16x128xbf16>
    tpu.vector_store %arg6[%c0_12, %c0_13], %16 {strides = array<i32>} : memref<16x128xbf16, #tpu.memory_space<vmem>>, vector<16x128xbf16>,
    return
  }
  func.func @transform_0(%arg0: i32) -> (i32, i32, i32) {
    %c0_i32 = arith.constant 0 : i32
    %c0_i32_0 = arith.constant 0 : i32
    %c0_i32_1 = arith.constant 0 : i32
    return %arg0, %c0_i32, %c0_i32_0 : i32, i32, i32
  }
  func.func @transform_1(%arg0: i32) -> (i32, i32) {
    %c0_i32 = arith.constant 0 : i32
    %c0_i32_0 = arith.constant 0 : i32
    %c0_i32_1 = arith.constant 0 : i32
    return %c0_i32, %c0_i32_0 : i32, i32
  }
  func.func @transform_2(%arg0: i32) -> (i32, i32) {
    %c0_i32 = arith.constant 0 : i32
    %c0_i32_0 = arith.constant 0 : i32
    %c0_i32_1 = arith.constant 0 : i32
    return %c0_i32, %c0_i32_0 : i32, i32
  }
  func.func @transform_3(%arg0: i32) -> (i32, i32) {
    %c0_i32 = arith.constant 0 : i32
    %c0_i32_0 = arith.constant 0 : i32
    %c0_i32_1 = arith.constant 0 : i32
    return %c0_i32, %c0_i32_0 : i32, i32
  }
  func.func @transform_4(%arg0: i32) -> (i32, i32) {
    %c0_i32 = arith.constant 0 : i32
    %c0_i32_0 = arith.constant 0 : i32
    %c0_i32_1 = arith.constant 0 : i32
    return %c0_i32, %c0_i32_0 : i32, i32
  }
  func.func @transform_5(%arg0: i32) -> (i32, i32) {
    %c0_i32 = arith.constant 0 : i32
    %c0_i32_0 = arith.constant 0 : i32
    return %arg0, %c0_i32 : i32, i32
  }
}

module attributes {stable_mosaic.version = 11 : i64} {
  func.func @fc_kernel(%arg0: i32, %arg1: memref<8x2048xbf16, #tpu.memory_space<vmem>>, %arg2: memref<2048x1024xbf16, #tpu.memory_space<vmem>>, %arg3: memref<1x1024xf32, #tpu.memory_space<vmem>>, %arg4: memref<1024x128xbf16, #tpu.memory_space<vmem>>, %arg5: memref<1x128xf32, #tpu.memory_space<vmem>>, %arg6: memref<8x128xf32, #tpu.memory_space<vmem>>) attributes {dimension_semantics = [#tpu.dimension_semantics<parallel>], iteration_bounds = array<i64: 1>, scalar_prefetch = 0 : i64, scratch_operands = 0 : i64, tpu.core_type = #tpu.core_type<tc>, window_params = [{transform_indices = @transform_0, window_bounds = array<i64: 8, 2048>}, {pipeline_mode = #tpu.pipeline_mode<synchronous>, transform_indices = @transform_1, window_bounds = array<i64: 2048, 1024>}, {pipeline_mode = #tpu.pipeline_mode<synchronous>, transform_indices = @transform_2, window_bounds = array<i64: 1, 1024>}, {pipeline_mode = #tpu.pipeline_mode<synchronous>, transform_indices = @transform_3, window_bounds = array<i64: 1024, 128>}, {pipeline_mode = #tpu.pipeline_mode<synchronous>, transform_indices = @transform_4, window_bounds = array<i64: 1, 128>}, {transform_indices = @transform_5, window_bounds = array<i64: 8, 128>}]} {
    %c0 = arith.constant 0 : index
    %c0_0 = arith.constant 0 : index
    %0 = vector.load %arg1[%c0, %c0_0] : memref<8x2048xbf16, #tpu.memory_space<vmem>>, vector<8x2048xbf16>
    %c0_1 = arith.constant 0 : index
    %c0_2 = arith.constant 0 : index
    %1 = vector.load %arg2[%c0_1, %c0_2] : memref<2048x1024xbf16, #tpu.memory_space<vmem>>, vector<2048x1024xbf16>
    %cst = arith.constant dense<0.000000e+00> : vector<8x1024xf32>
    %2 = tpu.matmul %0, %1, %cst {dimension_numbers = #tpu.dot_dimension_numbers<[1], [0], [0], [1], [0, 0, 1, 1], [], []>} : vector<8x2048xbf16>, vector<2048x1024xbf16>, vector<8x1024xf32> -> vector<8x1024xf32>
    %c0_3 = arith.constant 0 : index
    %c0_4 = arith.constant 0 : index
    %3 = vector.load %arg3[%c0_3, %c0_4] : memref<1x1024xf32, #tpu.memory_space<vmem>>, vector<1x1024xf32>
    %4 = vector.broadcast %3 : vector<1x1024xf32> to vector<8x1024xf32>
    %5 = arith.addf %2, %4 : vector<8x1024xf32>
    %cst_5 = arith.constant 0.000000e+00 : f32
    %6 = vector.broadcast %cst_5 : f32 to vector<8x1024xf32>
    %7 = arith.maximumf %5, %6 : vector<8x1024xf32>
    %8 = arith.truncf %7 : vector<8x1024xf32> to vector<8x1024xbf16>
    %c0_6 = arith.constant 0 : index
    %c0_7 = arith.constant 0 : index
    %9 = vector.load %arg4[%c0_6, %c0_7] : memref<1024x128xbf16, #tpu.memory_space<vmem>>, vector<1024x128xbf16>
    %cst_8 = arith.constant dense<0.000000e+00> : vector<8x128xf32>
    %10 = tpu.matmul %8, %9, %cst_8 {dimension_numbers = #tpu.dot_dimension_numbers<[1], [0], [0], [1], [0, 0, 1, 1], [], []>} : vector<8x1024xbf16>, vector<1024x128xbf16>, vector<8x128xf32> -> vector<8x128xf32>
    %c0_9 = arith.constant 0 : index
    %c0_10 = arith.constant 0 : index
    %11 = vector.load %arg5[%c0_9, %c0_10] : memref<1x128xf32, #tpu.memory_space<vmem>>, vector<1x128xf32>
    %12 = vector.broadcast %11 : vector<1x128xf32> to vector<8x128xf32>
    %13 = arith.addf %10, %12 : vector<8x128xf32>
    %c0_11 = arith.constant 0 : index
    %c0_12 = arith.constant 0 : index
    %14 = vector.load %arg6[%c0_11, %c0_12] : memref<8x128xf32, #tpu.memory_space<vmem>>, vector<8x128xf32>
    tpu.vector_store %arg6[%c0_11, %c0_12], %13 {strides = array<i32>} : memref<8x128xf32, #tpu.memory_space<vmem>>, vector<8x128xf32>,
    return
  }
  func.func @transform_0(%arg0: i32) -> (i32, i32) {
    %c0_i32 = arith.constant 0 : i32
    %c0_i32_0 = arith.constant 0 : i32
    return %arg0, %c0_i32 : i32, i32
  }
  func.func @transform_1(%arg0: i32) -> (i32, i32) {
    %c0_i32 = arith.constant 0 : i32
    %c0_i32_0 = arith.constant 0 : i32
    %c0_i32_1 = arith.constant 0 : i32
    return %c0_i32, %c0_i32_0 : i32, i32
  }
  func.func @transform_2(%arg0: i32) -> (i32, i32) {
    %c0_i32 = arith.constant 0 : i32
    %c0_i32_0 = arith.constant 0 : i32
    %c0_i32_1 = arith.constant 0 : i32
    return %c0_i32, %c0_i32_0 : i32, i32
  }
  func.func @transform_3(%arg0: i32) -> (i32, i32) {
    %c0_i32 = arith.constant 0 : i32
    %c0_i32_0 = arith.constant 0 : i32
    %c0_i32_1 = arith.constant 0 : i32
    return %c0_i32, %c0_i32_0 : i32, i32
  }
  func.func @transform_4(%arg0: i32) -> (i32, i32) {
    %c0_i32 = arith.constant 0 : i32
    %c0_i32_0 = arith.constant 0 : i32
    %c0_i32_1 = arith.constant 0 : i32
    return %c0_i32, %c0_i32_0 : i32, i32
  }
  func.func @transform_5(%arg0: i32) -> (i32, i32) {
    %c0_i32 = arith.constant 0 : i32
    %c0_i32_0 = arith.constant 0 : i32
    return %arg0, %c0_i32 : i32, i32
  }
}

</mosaic_0001>

<bundles_post_ra>
// kernel: _lambda_.2
= control target key start
LH: loop header
LB: loop body
LE: loop exit
PB: predicated region body
PF: predicated region fallthrough
CT: control target
= control target key end

     0   :  { %10 = vsyncpa [#allocation3], 0  ;;  %s809_s0 = inlined_call_operand.vmem [shape: f32[2,4,256], index: 0, kind: input, shape index: {}]   ;;  %s810_s1 = inlined_call_operand.hbm [shape: f32[16,256], index: 1, kind: input, shape index: {}]   ;;  %s811_s2 = inlined_call_operand.hbm [shape: bf16[4,128], index: 2, kind: input, shape index: {}]   ;;  %s812_s3 = inlined_call_operand.hbm [shape: f32[1,128], index: 3, kind: input, shape index: {}]   ;;  %s813_s4 = inlined_call_operand.hbm [shape: f32[1,128], index: 4, kind: input, shape index: {}]   ;;  %s814_s5 = inlined_call_operand.vmem [shape: bf16[32,128], index: 5, kind: output, shape index: {}]  }
   0x1   :  { %11 = vsyncpa [#allocation5], 0 }
   0x2   :  { %12 = vsyncpa [#allocation8], 0  ;;  %s740_s18 = smov 0  }
   0x3 LB: > { %s185_s21 = sshll.u32 %s811_s2, 4  ;;  %s749_s22 = sadd.s32 4294967295, %s702_s18   ;;  %s702_s18 = sphi %s740_s18, %s18_s18   ;;  %s186_s21 = int_to_ptr.hbm [resolvable:$true] %s185_s21 }
   0x4   : > { %p486_p0 = scmp.ge.s32.totalorder %s702_s18, 1  ;;  %p159_p1 = scmp.lt.s32.totalorder %s702_s18, 3 }
   0x5   : > { %p540_p2 = scmp.eq.s32.totalorder %s749_s22, 0  ;;  %s704_s24 = smov [#allocation4]  }
   0x6   : > { %p754_p3 = pnand %p486_p0, %p159_p1  ;;  %s187_s25 = sshll.u32 %s704_s24, 4  ;;  %s188_s25 = int_to_ptr.vmem [resolvable:$true] %s187_s25 }
   0x7   : > { %s170_s28 = sshll.u32 %s810_s1, 4  ;;  %s705_s30 = smov [#allocation2]   ;;  %s171_s28 = int_to_ptr.hbm [resolvable:$true] %s170_s28 }
   0x8   : > { %p527_p4 = pneg %p754_p3  ;;  %s172_s6 = sshll.u32 %s705_s30, 4  ;;  %s173_s6 = int_to_ptr.vmem [resolvable:$true] %s172_s6 }
   0x9   : > { %s197_s9 = sshll.u32 %s812_s3, 4  ;;  %s706_s10 = smov 256   ;;  %s198_s9 = int_to_ptr.hbm [resolvable:$true] %s197_s9 }
   0xa   : > { %p765_p5 = pnand %p540_p2, %p527_p4  ;;  %s707_s11 = smov 16  }
   0xb   : > { %s708_s12 = smov [#allocation6]   ;;  %s209_s16 = sshll.u32 %s813_s4, 4  ;;  %s210_s16 = int_to_ptr.hbm [resolvable:$true] %s209_s16 }
   0xc   : > { %533 = dma.hbm_to_vmem [thread:$0]  (!%p765_p5), %s186_s21, 32, %s188_s25, [#allocation5]  }
   0xd   : > { %530 = dma.hbm_to_vmem [thread:$0]  (!%p765_p5), %s171_s28, 512, %s173_s6, [#allocation3], %s706_s10, %s706_s10, %s707_s11  }
   0xe   : > { %s199_s13 = sshll.u32 %s708_s12, 4  ;;  %s709_s17 = smov [#allocation7]   ;;  %s200_s13 = int_to_ptr.vmem [resolvable:$true] %s199_s13 }
   0xf   : > { %536 = dma.hbm_to_vmem [thread:$0]  (!%p765_p5), %s198_s9, 16, %s200_s13, [#allocation5]  }
  0x10   : > { %s211_s19 = sshll.u32 %s709_s17, 4  ;;  %232 = sbr.rel (%p754_p3) target bundleno = 331 (0x14b), region = 40  ;;  %s212_s19 = int_to_ptr.vmem [resolvable:$true] %s211_s19 }
  0x11   : > { %539 = dma.hbm_to_vmem [thread:$0]  (!%p765_p5), %s210_s16, 16, %s212_s19, [#allocation8]  }
  0x15   : > { %689 = dma.done.wait (%p540_p2), [#allocation3], 512  }
  0x16   : > { %691 = vsyncadd (%p540_p2), [#allocation3], 4294966784 }
  0x17   : > { %693 = dma.done.wait (%p540_p2), [#allocation5], 48  }
  0x18   : > { %695 = vsyncadd (%p540_p2), [#allocation5], 4294967248 }
  0x19   : > { %697 = dma.done.wait (%p540_p2), [#allocation8], 16  }
  0x1a   : > { %699 = vsyncadd (%p540_p2), [#allocation8], 4294967280  ;;  %p276_p6 = scmp.lt.s32.totalorder %s749_s22, 1  ;;  %v288_v3 = vld [vmem:[#allocation2] sm:$0xff]  ;;  %v289_v4 = vld [vmem:[#allocation2 + $0x8] sm:$0xff]  ;;  %vm351_vm0 = vcmask 1041408  }
  0x1b   : > { %v290_v5 = vld [vmem:[#allocation2 + $0x10] sm:$0xff]  ;;  %v291_v6 = vld [vmem:[#allocation2 + $0x18] sm:$0xff]  ;;  %v346_v7 = vld [vmem:[#allocation4] sm:$0x3]  ;;  %vm347_vm1 = vcmask 31744   ;;  %s499_s26 = sshll.u32 %s749_s22, 1 }
  0x1c   : > { %s277_s20 = scalar_select %p276_p6, %s749_s22, 1  ;;  %v353_v8 = vsel %vm351_vm0, %v346_v7, 0  ;;  %v562_v17 = vld [vmem:[#allocation6] ss:$0 sm:$0xff]  ;;  %v563_v19 = vld [vmem:[#allocation7] ss:$0 sm:$0xff] }
  0x1d   : > { %362 = vmatpush.bf16.msra.mxu2 %v353_v8  ;;  %p282_p7 = scmp.lt.s32.totalorder %s499_s26, 3 }
  0x1e   : > { %s504_s21 = sshll.u32 %s277_s20, 3 }
  0x1f   : > { %s280_s25 = scalar_lea.vmem %s809_s0, %s504_s21  ;;  %s818_s26 = smov (!%p282_p7, %s499_s26), 3 }
  0x20   : > { %v292_v0 = vld [vmem:[%s280_s25] sm:$0xff]  ;;  %s500_s27 = sshll.u32 %s818_s26, 2 }
  0x21   : > { %294 = vst [vmem:[#allocation1] ss:$2 sm:$0xff] %v292_v0  ;;  %s285_s30 = scalar_lea.vmem %s814_s5, %s500_s27 }
  0x28   : > { %v295_v1 = vld.sshfl [vmem:[#allocation1] sm:$0xff pattern:$0x75316420]  ;;  %v296_v2 = vld.sshfl [vmem:[#allocation1 + $0x8] sm:$0xff pattern:$0x75316420] }
  0x29   : > { %314 = vmatpush.xpose.msra.mxu0 %v295_v1  ;;  %337 = vmatpush.xpose.msra.mxu1 %v296_v2 }
  0x2a   : > { %510 = vmatpush.xpose.msra.mxu3 %v295_v1 }
  0x2c   : > { %315 = vmatmul.f32.vlgmr.msra.gmra.mxu0 %v288_v3  ;;  %338 = vmatmul.f32.vlgmr.msra.gmra.mxu1 %v289_v4 }
  0x2d   : > { %318 = vmatmul.f32.vlgmr.msra.gmra.mxu3 %v290_v5 }
  0x34   : > { %341 = vmatmul.f32.gmra.mxu1 %v291_v6 }
  0xa9   : > { %v339_v9 = vpop.f32.mrf.mxu1  ;;  %v316_v10 = vpop.f32.mrf.mxu0 }
  0xaa   : > { %v340_v13 = vadd.f32 %v339_v9, %v316_v10 }
  0xb0   : > { %v319_v11 = vpop.f32.mrf.mxu3 }
  0xb1   : > { %v342_v12 = vpop.f32.mrf.mxu1 }
  0xb2   : > { %v343_v14 = vadd.f32 %v342_v12, %v319_v11 }
  0xb4   : > { %v345_v15 = vpack.c.bf16 %v343_v14, %v340_v13 }
  0xb6   : > { %501 = vmatmul.msk.bf16.vlgmr.msra.gmra.mxu2 %vm347_vm1, %v345_v15 }
 0x139   : > { %v364_v16 = vpop.f32.mrf.mxu2 }
 0x13a   : > { %v373_v18 = vmul.f32 %v562_v17, %v364_v16 }
 0x13c   : > { %v379_v21 = vadd.f32 %v563_v19, %v373_v18 }
 0x13e   : > { %v381_v24 = vmax.f32 %v379_v21, 0.0 }
 0x141   : > { %v366_v20 = vpop.f32.mrf.mxu2 }
 0x142   : > { %v374_v22 = vmul.f32 %v562_v17, %v366_v20 }
 0x144   : > { %v380_v23 = vadd.f32 %v563_v19, %v374_v22 }
 0x146   : > { %v382_v25 = vmax.f32 %v380_v23, 0.0 }
 0x148   : > { %v508_v26 = vpack.c.bf16 %v382_v25, %v381_v24 }
 0x14a   : > { %509 = vst [vmem:[%s285_s30] sm:$0xff] %v508_v26  }
 0x14b PF: > { %s18_s18 = sadd.s32 1, %s702_s18  }
 0x14c   : > { %p15_p8 = scmp.ge.s32.totalorder %s18_s18, 4  }
 0x14e   :  { %17 = sbr.rel (!%p15_p8) target bundleno = 3 (0x3), region = 87 }
 0x153   :  { %409 = vsyncpa [#allocation3], 1 }
 0x154   :  { %411 = vsyncpa [#allocation3 + $0x1], 1 }
 0x155   :  { %412 = vsyncpa [#allocation5], 1 }
 0x156   :  { %413 = vsyncpa [#allocation8], 1 }

// kernel: _lambda_.3
= control target key start
LH: loop header
LB: loop body
LE: loop exit
PB: predicated region body
PF: predicated region fallthrough
CT: control target
= control target key end

     0   :  { %10 = vsyncpa [#allocation3], 0  ;;  %s14467_s0 = inlined_call_operand.vmem [shape: bf16[8,2048], index: 0, kind: input, shape index: {}]   ;;  %s14468_s1 = inlined_call_operand.hbm [shape: bf16[2048,1024], index: 1, kind: input, shape index: {}]   ;;  %s14469_s2 = inlined_call_operand.hbm [shape: f32[1,1024], index: 2, kind: input, shape index: {}]   ;;  %s14470_s3 = inlined_call_operand.hbm [shape: bf16[1024,128], index: 3, kind: input, shape index: {}]   ;;  %s14471_s4 = inlined_call_operand.vmem [shape: f32[1,128], index: 4, kind: input, shape index: {}]   ;;  %s14472_s5 = inlined_call_operand.vmem [shape: f32[8,128], index: 5, kind: output, shape index: {}]  }
   0x1   :  { %11 = vsyncpa [#allocation5], 0  ;;  %s32_s20 = sshll.u32 %s14469_s2, 4  ;;  %s14128_s21 = smov [#allocation4]   ;;  %s33_s20 = int_to_ptr.hbm [resolvable:$true] %s32_s20 }
   0x2   :  { %s34_s22 = sshll.u32 %s14128_s21, 4  ;;  %s18_s25 = sshll.u32 %s14468_s1, 4  ;;  %s35_s22 = int_to_ptr.vmem [resolvable:$true] %s34_s22  ;;  %s19_s25 = int_to_ptr.hbm [resolvable:$true] %s18_s25 }
   0x3   :  { %37 = dma.hbm_to_vmem [thread:$0]  %s33_s20, 128, %s35_s22, [#allocation5]  }
   0x4   :  { %s14129_s26 = smov [#allocation2]   ;;  %s14130_s28 = smov 512  }
   0x5   :  { %s20_s27 = sshll.u32 %s14129_s26, 4  ;;  %s14131_s29 = smov 32   ;;  %s21_s27 = int_to_ptr.vmem [resolvable:$true] %s20_s27 }
   0x6   :  { %26 = dma.hbm_to_vmem [thread:$0]  %s19_s25, 131072, %s21_s27, [#allocation3], %s14130_s28, %s14130_s28, %s14131_s29  }
   0x7   :  { %s42_s2 = sshll.u32 %s14470_s3, 4  ;;  %s14132_s7 = smov [#allocation6]   ;;  %s43_s2 = int_to_ptr.hbm [resolvable:$true] %s42_s2 }
   0x8   :  { %s44_s8 = sshll.u32 %s14132_s7, 4  ;;  %s14133_s9 = smov 64   ;;  %s45_s8 = int_to_ptr.vmem [resolvable:$true] %s44_s8 }
   0x9   :  { %s14134_s10 = smov 4  }
   0xa   :  { %50 = dma.hbm_to_vmem [thread:$0]  %s43_s2, 8192, %s45_s8, [#allocation5], %s14133_s9, %s14133_s9, %s14134_s10  }
   0xb   :  { %14124 = dma.done.wait [#allocation3], 131072  }
   0xc   :  { %14125 = vsyncadd [#allocation3], 4294836224 }
   0xd   :  { %14126 = dma.done.wait [#allocation5], 8320  }
   0xe   :  { %14127 = vsyncadd [#allocation5], 4294958976  ;;  %v8824_v0 = vld [vmem:[#allocation2 + $0x1c0] sm:$0xf] }
   0xf   :  { %v13010_v1 = vld [vmem:[#allocation2 + $0x1dc] sm:$0xf0] }
  0x10   :  { %v9080_v2 = vld [vmem:[#allocation2 + $0x3c0] sm:$0xf]  ;;  %v8825_v3 = vor.u32 %v13010_v1, %v8824_v0 }
  0x11   :  { %v13074_v4 = vld [vmem:[#allocation2 + $0x3dc] sm:$0xf0] }
  0x12   :  { %v9336_v5 = vld [vmem:[#allocation2 + $0x5c0] sm:$0xf]  ;;  %v9081_v7 = vor.u32 %v13074_v4, %v9080_v2  ;;  %6291 = vmatpush.bf16.msra.mxu0 %v8825_v3 }
  0x13   :  { %v13138_v6 = vld [vmem:[#allocation2 + $0x5dc] sm:$0xf0] }
  0x14   :  { %v9337_v8 = vor.u32 %v13138_v6, %v9336_v5  ;;  %v9592_v9 = vld [vmem:[#allocation2 + $0x7c0] sm:$0xf]  ;;  %6304 = vmatpush.bf16.msra.mxu1 %v9081_v7 }
  0x15   :  { %v13202_v10 = vld [vmem:[#allocation2 + $0x7dc] sm:$0xf0] }
  0x16   :  { %v8792_v11 = vld [vmem:[#allocation2 + $0x180] sm:$0xf]  ;;  %v9593_v12 = vor.u32 %v13202_v10, %v9592_v9  ;;  %6317 = vmatpush.bf16.msra.mxu2 %v9337_v8 }
  0x17   :  { %v13002_v13 = vld [vmem:[#allocation2 + $0x19c] sm:$0xf0] }
  0x18   :  { %v9048_v14 = vld [vmem:[#allocation2 + $0x380] sm:$0xf]  ;;  %v8793_v16 = vor.u32 %v13002_v13, %v8792_v11  ;;  %6330 = vmatpush.bf16.msra.mxu3 %v9593_v12 }
  0x19   :  { %v13066_v15 = vld [vmem:[#allocation2 + $0x39c] sm:$0xf0] }
  0x1a   :  { %v9049_v17 = vor.u32 %v13066_v15, %v9048_v14  ;;  %v9304_v18 = vld [vmem:[#allocation2 + $0x580] sm:$0xf]  ;;  %6292 = vmatpush.bf16.msra.mxu0 %v8793_v16 }
  0x1b   :  { %v13130_v19 = vld [vmem:[#allocation2 + $0x59c] sm:$0xf0] }
  0x1c   :  { %v9560_v20 = vld [vmem:[#allocation2 + $0x780] sm:$0xf]  ;;  %v9305_v21 = vor.u32 %v13130_v19, %v9304_v18  ;;  %6305 = vmatpush.bf16.msra.mxu1 %v9049_v17 }
  0x1d   :  { %v13194_v22 = vld [vmem:[#allocation2 + $0x79c] sm:$0xf0] }
  0x1e   :  { %v8760_v23 = vld [vmem:[#allocation2 + $0x140] sm:$0xf]  ;;  %v9561_v25 = vor.u32 %v13194_v22, %v9560_v20  ;;  %6318 = vmatpush.bf16.msra.mxu2 %v9305_v21 }
  0x1f   :  { %v12994_v24 = vld [vmem:[#allocation2 + $0x15c] sm:$0xf0] }
  0x20   :  { %v9016_v26 = vld [vmem:[#allocation2 + $0x340] sm:$0xf]  ;;  %v8761_v29 = vor.u32 %v12994_v24, %v8760_v23  ;;  %6331 = vmatpush.bf16.msra.mxu3 %v9561_v25 }
  0x21   :  { %v13058_v27 = vld [vmem:[#allocation2 + $0x35c] sm:$0xf0] }
  0x22   :  { %v9272_v28 = vld [vmem:[#allocation2 + $0x540] sm:$0xf]  ;;  %v9017_v33 = vor.u32 %v13058_v27, %v9016_v26  ;;  %6293 = vmatpush.bf16.msra.mxu0 %v8761_v29 }
  0x23   :  { %v13122_v30 = vld [vmem:[#allocation2 + $0x55c] sm:$0xf0] }
  0x24   :  { %v9528_v31 = vld [vmem:[#allocation2 + $0x740] sm:$0xf]  ;;  %v9273_v34 = vor.u32 %v13122_v30, %v9272_v28  ;;  %6306 = vmatpush.bf16.msra.mxu1 %v9017_v33 }
  0x25   :  { %v13186_v32 = vld [vmem:[#allocation2 + $0x75c] sm:$0xf0] }
  0x26   :  { %v8728_v35 = vld [vmem:[#allocation2 + $0x100] sm:$0xf]  ;;  %v9529_v38 = vor.u32 %v13186_v32, %v9528_v31  ;;  %6319 = vmatpush.bf16.msra.mxu2 %v9273_v34 }
  0x27   :  { %v12986_v36 = vld [vmem:[#allocation2 + $0x11c] sm:$0xf0] }
  0x28   :  { %v8984_v37 = vld [vmem:[#allocation2 + $0x300] sm:$0xf]  ;;  %v8729_v44 = vor.u32 %v12986_v36, %v8728_v35  ;;  %6332 = vmatpush.bf16.msra.mxu3 %v9529_v38 }
  0x29   :  { %v13050_v39 = vld [vmem:[#allocation2 + $0x31c] sm:$0xf0] }
  0x2a   :  { %v9240_v40 = vld [vmem:[#allocation2 + $0x500] sm:$0xf]  ;;  %v8985_v45 = vor.u32 %v13050_v39, %v8984_v37  ;;  %6294 = vmatpush.bf16.msra.mxu0 %v8729_v44 }
  0x2b   :  { %v13114_v41 = vld [vmem:[#allocation2 + $0x51c] sm:$0xf0] }
  0x2c   :  { %v9496_v42 = vld [vmem:[#allocation2 + $0x700] sm:$0xf]  ;;  %v9241_v46 = vor.u32 %v13114_v41, %v9240_v40  ;;  %6307 = vmatpush.bf16.msra.mxu1 %v8985_v45 }
  0x2d   :  { %v13178_v43 = vld [vmem:[#allocation2 + $0x71c] sm:$0xf0] }
  0x2e   :  { %v8696_v47 = vld [vmem:[#allocation2 + $0xc0] sm:$0xf]  ;;  %v9497_v50 = vor.u32 %v13178_v43, %v9496_v42  ;;  %6320 = vmatpush.bf16.msra.mxu2 %v9241_v46 }
  0x2f   :  { %v12978_v48 = vld [vmem:[#allocation2 + $0xdc] sm:$0xf0] }
  0x30   :  { %v8952_v49 = vld [vmem:[#allocation2 + $0x2c0] sm:$0xf]  ;;  %v8697_v56 = vor.u32 %v12978_v48, %v8696_v47  ;;  %6333 = vmatpush.bf16.msra.mxu3 %v9497_v50 }
  0x31   :  { %v13042_v51 = vld [vmem:[#allocation2 + $0x2dc] sm:$0xf0] }
  0x32   :  { %v9208_v52 = vld [vmem:[#allocation2 + $0x4c0] sm:$0xf]  ;;  %v8953_v57 = vor.u32 %v13042_v51, %v8952_v49  ;;  %6295 = vmatpush.bf16.msra.mxu0 %v8697_v56 }
  0x33   :  { %v13106_v53 = vld [vmem:[#allocation2 + $0x4dc] sm:$0xf0] }
  0x34   :  { %v9464_v54 = vld [vmem:[#allocation2 + $0x6c0] sm:$0xf]  ;;  %v9209_v58 = vor.u32 %v13106_v53, %v9208_v52  ;;  %6308 = vmatpush.bf16.msra.mxu1 %v8953_v57 }
  0x35   :  { %v13170_v55 = vld [vmem:[#allocation2 + $0x6dc] sm:$0xf0] }
  0x36   :  { %v8664_v59 = vld [vmem:[#allocation2 + $0x80] sm:$0xf]  ;;  %v9465_v62 = vor.u32 %v13170_v55, %v9464_v54  ;;  %6321 = vmatpush.bf16.msra.mxu2 %v9209_v58 }
  0x37   :  { %v12970_v60 = vld [vmem:[#allocation2 + $0x9c] sm:$0xf0] }
  0x38   :  { %v8920_v61 = vld [vmem:[#allocation2 + $0x280] sm:$0xf]  ;;  %v8665_v4 = vor.u32 %v12970_v60, %v8664_v59  ;;  %6334 = vmatpush.bf16.msra.mxu3 %v9465_v62 }
  0x39   :  { %v13034_v63 = vld [vmem:[#allocation2 + $0x29c] sm:$0xf0] }
  0x3a   :  { %v9176_v0 = vld [vmem:[#allocation2 + $0x480] sm:$0xf]  ;;  %v8921_v5 = vor.u32 %v13034_v63, %v8920_v61  ;;  %6296 = vmatpush.bf16.msra.mxu0 %v8665_v4 }
  0x3b   :  { %v13098_v1 = vld [vmem:[#allocation2 + $0x49c] sm:$0xf0] }
  0x3c   :  { %v9432_v2 = vld [vmem:[#allocation2 + $0x680] sm:$0xf]  ;;  %v9177_v6 = vor.u32 %v13098_v1, %v9176_v0  ;;  %6309 = vmatpush.bf16.msra.mxu1 %v8921_v5 }
  0x3d   :  { %v13162_v3 = vld [vmem:[#allocation2 + $0x69c] sm:$0xf0] }
  0x3e   :  { %v8632_v7 = vld [vmem:[#allocation2 + $0x40] sm:$0xf]  ;;  %v9433_v10 = vor.u32 %v13162_v3, %v9432_v2  ;;  %6322 = vmatpush.bf16.msra.mxu2 %v9177_v6  ;;  %v66_v2 = vld [vmem:[%s14467_s0 + $0x8] sm:$0xff] }
  0x3f   :  { %v12962_v8 = vld [vmem:[#allocation2 + $0x5c] sm:$0xf0] }
  0x40   :  { %v8888_v9 = vld [vmem:[#allocation2 + $0x240] sm:$0xf]  ;;  %v8633_v16 = vor.u32 %v12962_v8, %v8632_v7  ;;  %6335 = vmatpush.bf16.msra.mxu3 %v9433_v10  ;;  %v1125_v8 = vunpack.c.l.b16 %v66_v2  ;;  %v1126_v10 = vunpack.c.h.b16 %v66_v2 }
  0x41   :  { %v13026_v11 = vld [vmem:[#allocation2 + $0x25c] sm:$0xf0] }
  0x42   :  { %v9144_v12 = vld [vmem:[#allocation2 + $0x440] sm:$0xf]  ;;  %v8889_v19 = vor.u32 %v13026_v11, %v8888_v9  ;;  %6297 = vmatpush.bf16.msra.mxu0 %v8633_v16 }
  0x43   :  { %v13090_v13 = vld [vmem:[#allocation2 + $0x45c] sm:$0xf0] }
  0x44   :  { %v9400_v14 = vld [vmem:[#allocation2 + $0x640] sm:$0xf]  ;;  %v9145_v20 = vor.u32 %v13090_v13, %v9144_v12  ;;  %6310 = vmatpush.bf16.msra.mxu1 %v8889_v19 }
  0x45   :  { %v13154_v15 = vld [vmem:[#allocation2 + $0x65c] sm:$0xf0] }
  0x46   :  { %v8600_v17 = vld [vmem:[#allocation2] sm:$0xf]  ;;  %v9401_v24 = vor.u32 %v13154_v15, %v9400_v14  ;;  %6323 = vmatpush.bf16.msra.mxu2 %v9145_v20  ;;  %v14184_v20 = vpack.c.b16 %v1126_v10, %v1126_v10 }
  0x47   :  { %v12954_v18 = vld [vmem:[#allocation2 + $0x1c] sm:$0xf0] }
  0x48   :  { %v8856_v21 = vld [vmem:[#allocation2 + $0x200] sm:$0xf]  ;;  %v8601_v31 = vor.u32 %v12954_v18, %v8600_v17  ;;  %6336 = vmatpush.bf16.msra.mxu3 %v9401_v24  ;;  %v14180_v18 = vpack.c.b16 %v1125_v8, %v1125_v8 }
  0x49   :  { %v13018_v22 = vld [vmem:[#allocation2 + $0x21c] sm:$0xf0] }
  0x4a   :  { %v9112_v23 = vld [vmem:[#allocation2 + $0x400] sm:$0xf]  ;;  %v8857_v35 = vor.u32 %v13018_v22, %v8856_v21  ;;  %6298 = vmatpush.bf16.msra.mxu0 %v8601_v31 }
  0x4b   :  { %v13082_v25 = vld [vmem:[#allocation2 + $0x41c] sm:$0xf0] }
  0x4c   :  { %v9368_v26 = vld [vmem:[#allocation2 + $0x600] sm:$0xf]  ;;  %v9113_v36 = vor.u32 %v13082_v25, %v9112_v23  ;;  %6311 = vmatpush.bf16.msra.mxu1 %v8857_v35 }
  0x4d   :  { %v13146_v27 = vld [vmem:[#allocation2 + $0x61c] sm:$0xf0] }
  0x4e   :  { %v9848_v28 = vld [vmem:[#allocation2 + $0x9c0] sm:$0xf]  ;;  %v9369_v39 = vor.u32 %v13146_v27, %v9368_v26  ;;  %6324 = vmatpush.bf16.msra.mxu2 %v9113_v36 }
  0x4f   :  { %v13266_v29 = vld [vmem:[#allocation2 + $0x9dc] sm:$0xf0] }
  0x50   :  { %v10104_v30 = vld [vmem:[#allocation2 + $0xbc0] sm:$0xf]  ;;  %v9849_v40 = vor.u32 %v13266_v29, %v9848_v28  ;;  %6337 = vmatpush.bf16.msra.mxu3 %v9369_v39 }
  0x51   :  { %v13330_v32 = vld [vmem:[#allocation2 + $0xbdc] sm:$0xf0]  ;;  %6325 = vmatmul.bf16.vlgmr.msra.gmra.mxu2 %v14180_v18 }
  0x52   :  { %v10360_v33 = vld [vmem:[#allocation2 + $0xdc0] sm:$0xf]  ;;  %v10105_v41 = vor.u32 %v13330_v32, %v10104_v30  ;;  %6343 = vmatpush.bf16.msrb.mxu0 %v9849_v40 }
  0x53   :  { %v13394_v34 = vld [vmem:[#allocation2 + $0xddc] sm:$0xf0]  ;;  %6338 = vmatmul.bf16.vlgmr.msra.gmra.mxu3 %v14184_v20 }
  0x54   :  { %v10616_v37 = vld [vmem:[#allocation2 + $0xfc0] sm:$0xf]  ;;  %v10361_v42 = vor.u32 %v13394_v34, %v10360_v33  ;;  %6356 = vmatpush.bf16.msrb.mxu1 %v10105_v41 }
  0x55   :  { %v13458_v38 = vld [vmem:[#allocation2 + $0xfdc] sm:$0xf0] }
  0x56   :  { %v9816_v43 = vld [vmem:[#allocation2 + $0x980] sm:$0xf]  ;;  %v10617_v46 = vor.u32 %v13458_v38, %v10616_v37  ;;  %6369 = vmatpush.bf16.msrb.mxu2 %v10361_v42 }
  0x57   :  { %v13258_v44 = vld [vmem:[#allocation2 + $0x99c] sm:$0xf0] }
  0x58   :  { %v10072_v45 = vld [vmem:[#allocation2 + $0xb80] sm:$0xf]  ;;  %v9817_v52 = vor.u32 %v13258_v44, %v9816_v43  ;;  %6382 = vmatpush.bf16.msrb.mxu3 %v10617_v46 }
  0x59   :  { %v13322_v47 = vld [vmem:[#allocation2 + $0xb9c] sm:$0xf0] }
  0x5a   :  { %v10328_v48 = vld [vmem:[#allocation2 + $0xd80] sm:$0xf]  ;;  %v10073_v54 = vor.u32 %v13322_v47, %v10072_v45  ;;  %6344 = vmatpush.bf16.msrb.mxu0 %v9817_v52 }
  0x5b   :  { %v13386_v49 = vld [vmem:[#allocation2 + $0xd9c] sm:$0xf0] }
  0x5c   :  { %v10584_v50 = vld [vmem:[#allocation2 + $0xf80] sm:$0xf]  ;;  %v10329_v55 = vor.u32 %v13386_v49, %v10328_v48  ;;  %6357 = vmatpush.bf16.msrb.mxu1 %v10073_v54 }
  0x5d   :  { %v13450_v51 = vld [vmem:[#allocation2 + $0xf9c] sm:$0xf0] }
  0x5e   :  { %v9784_v53 = vld [vmem:[#allocation2 + $0x940] sm:$0xf]  ;;  %v10585_v59 = vor.u32 %v13450_v51, %v10584_v50  ;;  %6370 = vmatpush.bf16.msrb.mxu2 %v10329_v55 }
  0x5f   :  { %v13250_v56 = vld [vmem:[#allocation2 + $0x95c] sm:$0xf0] }
  0x60   :  { %v10040_v57 = vld [vmem:[#allocation2 + $0xb40] sm:$0xf]  ;;  %v9785_v0 = vor.u32 %v13250_v56, %v9784_v53  ;;  %6383 = vmatpush.bf16.msrb.mxu3 %v10585_v59 }
  0x61   :  { %v13314_v58 = vld [vmem:[#allocation2 + $0xb5c] sm:$0xf0] }
  0x62   :  { %v10296_v60 = vld [vmem:[#allocation2 + $0xd40] sm:$0xf]  ;;  %v10041_v1 = vor.u32 %v13314_v58, %v10040_v57  ;;  %6345 = vmatpush.bf16.msrb.mxu0 %v9785_v0 }
  0x63   :  { %v13378_v61 = vld [vmem:[#allocation2 + $0xd5c] sm:$0xf0] }
  0x64   :  { %v10552_v62 = vld [vmem:[#allocation2 + $0xf40] sm:$0xf]  ;;  %v10297_v4 = vor.u32 %v13378_v61, %v10296_v60  ;;  %6358 = vmatpush.bf16.msrb.mxu1 %v10041_v1 }
  0x65   :  { %v13442_v63 = vld [vmem:[#allocation2 + $0xf5c] sm:$0xf0] }
  0x66   :  { %v65_v3 = vld [vmem:[%s14467_s0] sm:$0xff]  ;;  %v10553_v11 = vor.u32 %v13442_v63, %v10552_v62  ;;  %6371 = vmatpush.bf16.msrb.mxu2 %v10297_v4 }
  0x67   :  { %v9752_v5 = vld [vmem:[#allocation2 + $0x900] sm:$0xf]  ;;  %v1123_v9 = vunpack.c.l.b16 %v65_v3  ;;  %v1124_v15 = vunpack.c.h.b16 %v65_v3  ;;  %v68_v3 = vld [vmem:[%s14467_s0 + $0x18] sm:$0xff] }
  0x68   :  { %v13242_v6 = vld [vmem:[#allocation2 + $0x91c] sm:$0xf0]  ;;  %6384 = vmatpush.bf16.msrb.mxu3 %v10553_v11 }
  0x69   :  { %v10008_v7 = vld [vmem:[#allocation2 + $0xb00] sm:$0xf]  ;;  %v14182_v19 = vpack.c.b16 %v1123_v9, %v1123_v9  ;;  %v9753_v21 = vor.u32 %v13242_v6, %v9752_v5  ;;  %v14186_v22 = vpack.c.b16 %v1124_v15, %v1124_v15  ;;  %v1129_v15 = vunpack.c.l.b16 %v68_v3 }
  0x6a   :  { %v13306_v12 = vld [vmem:[#allocation2 + $0xb1c] sm:$0xf0] }
  0x6b   :  { %v10264_v13 = vld [vmem:[#allocation2 + $0xd00] sm:$0xf]  ;;  %v10009_v23 = vor.u32 %v13306_v12, %v10008_v7  ;;  %6299 = vmatmul.bf16.vlgmr.msra.gmra.mxu0 %v14182_v19  ;;  %6312 = vmatmul.bf16.vlgmr.msra.gmra.mxu1 %v14186_v22  ;;  %v67_v7 = vld [vmem:[%s14467_s0 + $0x10] sm:$0xff] }
  0x6c   :  { %v13370_v14 = vld [vmem:[#allocation2 + $0xd1c] sm:$0xf0]  ;;  %6346 = vmatpush.bf16.msrb.mxu0 %v9753_v21 }
  0x6d   :  { %v10520_v16 = vld [vmem:[#allocation2 + $0xf00] sm:$0xf]  ;;  %v10265_v24 = vor.u32 %v13370_v14, %v10264_v13  ;;  %6359 = vmatpush.bf16.msrb.mxu1 %v10009_v23 }
  0x6e   :  { %v13434_v17 = vld [vmem:[#allocation2 + $0xf1c] sm:$0xf0] }
  0x6f   :  { %v9720_v25 = vld [vmem:[#allocation2 + $0x8c0] sm:$0xf]  ;;  %v10521_v28 = vor.u32 %v13434_v17, %v10520_v16  ;;  %6372 = vmatpush.bf16.msrb.mxu2 %v10265_v24  ;;  %v1127_v24 = vunpack.c.l.b16 %v67_v7 }
  0x70   :  { %v13234_v26 = vld [vmem:[#allocation2 + $0x8dc] sm:$0xf0] }
  0x71   :  { %v9976_v27 = vld [vmem:[#allocation2 + $0xac0] sm:$0xf]  ;;  %v9721_v34 = vor.u32 %v13234_v26, %v9720_v25  ;;  %6385 = vmatpush.bf16.msrb.mxu3 %v10521_v28  ;;  %v1130_v25 = vunpack.c.h.b16 %v68_v3  ;;  %v1128_v28 = vunpack.c.h.b16 %v67_v7 }
  0x72   :  { %v13298_v29 = vld [vmem:[#allocation2 + $0xadc] sm:$0xf0] }
  0x73   :  { %v10232_v30 = vld [vmem:[#allocation2 + $0xcc0] sm:$0xf]  ;;  %v9977_v35 = vor.u32 %v13298_v29, %v9976_v27  ;;  %6347 = vmatpush.bf16.msrb.mxu0 %v9721_v34 }
  0x74   :  { %v13362_v31 = vld [vmem:[#allocation2 + $0xcdc] sm:$0xf0] }
  0x75   :  { %v10488_v32 = vld [vmem:[#allocation2 + $0xec0] sm:$0xf]  ;;  %v10233_v36 = vor.u32 %v13362_v31, %v10232_v30  ;;  %6360 = vmatpush.bf16.msrb.mxu1 %v9977_v35 }
  0x76   :  { %v13426_v33 = vld [vmem:[#allocation2 + $0xedc] sm:$0xf0] }
  0x77   :  { %v9688_v37 = vld [vmem:[#allocation2 + $0x880] sm:$0xf]  ;;  %v10489_v40 = vor.u32 %v13426_v33, %v10488_v32  ;;  %6373 = vmatpush.bf16.msrb.mxu2 %v10233_v36 }
  0x78   :  { %v13226_v38 = vld [vmem:[#allocation2 + $0x89c] sm:$0xf0] }
  0x79   :  { %v9944_v39 = vld [vmem:[#allocation2 + $0xa80] sm:$0xf]  ;;  %v9689_v46 = vor.u32 %v13226_v38, %v9688_v37  ;;  %6386 = vmatpush.bf16.msrb.mxu3 %v10489_v40  ;;  %v14198_v38 = vpack.c.b16 %v1129_v15, %v1129_v15 }
  0x7a   :  { %v13290_v41 = vld [vmem:[#allocation2 + $0xa9c] sm:$0xf0] }
  0x7b   :  { %v10200_v42 = vld [vmem:[#allocation2 + $0xc80] sm:$0xf]  ;;  %v9945_v47 = vor.u32 %v13290_v41, %v9944_v39  ;;  %6348 = vmatpush.bf16.msrb.mxu0 %v9689_v46  ;;  %v14200_v41 = vpack.c.b16 %v1127_v24, %v1127_v24 }
  0x7c   :  { %v13354_v43 = vld [vmem:[#allocation2 + $0xc9c] sm:$0xf0] }
  0x7d   :  { %v10456_v44 = vld [vmem:[#allocation2 + $0xe80] sm:$0xf]  ;;  %v10201_v48 = vor.u32 %v13354_v43, %v10200_v42  ;;  %6361 = vmatpush.bf16.msrb.mxu1 %v9945_v47  ;;  %v14202_v42 = vpack.c.b16 %v1130_v25, %v1130_v25 }
  0x7e   :  { %v13418_v45 = vld [vmem:[#allocation2 + $0xe9c] sm:$0xf0] }
  0x7f   :  { %v9656_v49 = vld [vmem:[#allocation2 + $0x840] sm:$0xf]  ;;  %v10457_v52 = vor.u32 %v13418_v45, %v10456_v44  ;;  %6374 = vmatpush.bf16.msrb.mxu2 %v10201_v48  ;;  %v14204_v44 = vpack.c.b16 %v1128_v28, %v1128_v28 }
  0x80   :  { %v13218_v50 = vld [vmem:[#allocation2 + $0x85c] sm:$0xf0] }
  0x81   :  { %v9912_v51 = vld [vmem:[#allocation2 + $0xa40] sm:$0xf]  ;;  %v9657_v59 = vor.u32 %v13218_v50, %v9656_v49  ;;  %6387 = vmatpush.bf16.msrb.mxu3 %v10457_v52 }
  0x82   :  { %v13282_v53 = vld [vmem:[#allocation2 + $0xa5c] sm:$0xf0] }
  0x83   :  { %v10168_v54 = vld [vmem:[#allocation2 + $0xc40] sm:$0xf]  ;;  %v9913_v63 = vor.u32 %v13282_v53, %v9912_v51  ;;  %6349 = vmatpush.bf16.msrb.mxu0 %v9657_v59 }
  0x84   :  { %v13346_v55 = vld [vmem:[#allocation2 + $0xc5c] sm:$0xf0] }
  0x85   :  { %v10424_v56 = vld [vmem:[#allocation2 + $0xe40] sm:$0xf]  ;;  %v10169_v0 = vor.u32 %v13346_v55, %v10168_v54  ;;  %6362 = vmatpush.bf16.msrb.mxu1 %v9913_v63 }
  0x86   :  { %v13410_v57 = vld [vmem:[#allocation2 + $0xe5c] sm:$0xf0] }
  0x87   :  { %v9624_v58 = vld [vmem:[#allocation2 + $0x800] sm:$0xf]  ;;  %v10425_v4 = vor.u32 %v13410_v57, %v10424_v56  ;;  %6375 = vmatpush.bf16.msrb.mxu2 %v10169_v0 }
  0x88   :  { %v13210_v60 = vld [vmem:[#allocation2 + $0x81c] sm:$0xf0] }
  0x89   :  { %v9880_v61 = vld [vmem:[#allocation2 + $0xa00] sm:$0xf]  ;;  %v9625_v11 = vor.u32 %v13210_v60, %v9624_v58  ;;  %6388 = vmatpush.bf16.msrb.mxu3 %v10425_v4 }
  0x8a   :  { %v13274_v62 = vld [vmem:[#allocation2 + $0xa1c] sm:$0xf0] }
  0x8b   :  { %v10136_v1 = vld [vmem:[#allocation2 + $0xc00] sm:$0xf]  ;;  %v9881_v16 = vor.u32 %v13274_v62, %v9880_v61  ;;  %6350 = vmatpush.bf16.msrb.mxu0 %v9625_v11 }
  0x8c   :  { %v13338_v2 = vld [vmem:[#allocation2 + $0xc1c] sm:$0xf0] }
  0x8d   :  { %v10392_v5 = vld [vmem:[#allocation2 + $0xe00] sm:$0xf]  ;;  %v10137_v17 = vor.u32 %v13338_v2, %v10136_v1  ;;  %6363 = vmatpush.bf16.msrb.mxu1 %v9881_v16 }
  0x8e   :  { %v13402_v6 = vld [vmem:[#allocation2 + $0xe1c] sm:$0xf0]  ;;  %6351 = vmatmul.bf16.vlgmr.msrb.gmra.mxu0 %v14200_v41 }
  0x8f   :  { %v10872_v8 = vld [vmem:[#allocation2 + $0x11c0] sm:$0xf]  ;;  %v10393_v26 = vor.u32 %v13402_v6, %v10392_v5  ;;  %6376 = vmatpush.bf16.msrb.mxu2 %v10137_v17 }
  0x90   :  { %v13522_v9 = vld [vmem:[#allocation2 + $0x11dc] sm:$0xf0]  ;;  %6364 = vmatmul.bf16.vlgmr.msrb.gmra.mxu1 %v14204_v44 }
  0x91   :  { %v11128_v10 = vld [vmem:[#allocation2 + $0x13c0] sm:$0xf]  ;;  %v10873_v27 = vor.u32 %v13522_v9, %v10872_v8  ;;  %6389 = vmatpush.bf16.msrb.mxu3 %v10393_v26 }
  0x92   :  { %v13586_v12 = vld [vmem:[#allocation2 + $0x13dc] sm:$0xf0]  ;;  %6377 = vmatmul.bf16.vlgmr.msrb.gmra.mxu2 %v14198_v38 }
  0x93   :  { %v11384_v13 = vld [vmem:[#allocation2 + $0x15c0] sm:$0xf]  ;;  %v11129_v29 = vor.u32 %v13586_v12, %v11128_v10  ;;  %6395 = vmatpush.bf16.msra.mxu0 %v10873_v27 }
  0x94   :  { %v13650_v14 = vld [vmem:[#allocation2 + $0x15dc] sm:$0xf0]  ;;  %6390 = vmatmul.bf16.vlgmr.msrb.gmra.mxu3 %v14202_v42 }
  0x95   :  { %v11640_v21 = vld [vmem:[#allocation2 + $0x17c0] sm:$0xf]  ;;  %v11385_v30 = vor.u32 %v13650_v14, %v11384_v13  ;;  %6408 = vmatpush.bf16.msra.mxu1 %v11129_v29 }
  0x96   :  { %v13714_v23 = vld [vmem:[#allocation2 + $0x17dc] sm:$0xf0] }
  0x97   :  { %v10840_v31 = vld [vmem:[#allocation2 + $0x1180] sm:$0xf]  ;;  %v11641_v34 = vor.u32 %v13714_v23, %v11640_v21  ;;  %6421 = vmatpush.bf16.msra.mxu2 %v11385_v30 }
  0x98   :  { %v13514_v32 = vld [vmem:[#allocation2 + $0x119c] sm:$0xf0] }
  0x99   :  { %v11096_v33 = vld [vmem:[#allocation2 + $0x1380] sm:$0xf]  ;;  %v10841_v43 = vor.u32 %v13514_v32, %v10840_v31  ;;  %6434 = vmatpush.bf16.msra.mxu3 %v11641_v34 }
  0x9a   :  { %v13578_v35 = vld [vmem:[#allocation2 + $0x139c] sm:$0xf0] }
  0x9b   :  { %v11352_v36 = vld [vmem:[#allocation2 + $0x1580] sm:$0xf]  ;;  %v11097_v45 = vor.u32 %v13578_v35, %v11096_v33  ;;  %6396 = vmatpush.bf16.msra.mxu0 %v10841_v43 }
  0x9c   :  { %v13642_v37 = vld [vmem:[#allocation2 + $0x159c] sm:$0xf0] }
  0x9d   :  { %v11608_v39 = vld [vmem:[#allocation2 + $0x1780] sm:$0xf]  ;;  %v11353_v46 = vor.u32 %v13642_v37, %v11352_v36  ;;  %6409 = vmatpush.bf16.msra.mxu1 %v11097_v45 }
  0x9e   :  { %v13706_v40 = vld [vmem:[#allocation2 + $0x179c] sm:$0xf0] }
  0x9f   :  { %v10808_v47 = vld [vmem:[#allocation2 + $0x1140] sm:$0xf]  ;;  %v11609_v50 = vor.u32 %v13706_v40, %v11608_v39  ;;  %6422 = vmatpush.bf16.msra.mxu2 %v11353_v46 }
  0xa0   :  { %v13506_v48 = vld [vmem:[#allocation2 + $0x115c] sm:$0xf0] }
  0xa1   :  { %v11064_v49 = vld [vmem:[#allocation2 + $0x1340] sm:$0xf]  ;;  %v10809_v56 = vor.u32 %v13506_v48, %v10808_v47  ;;  %6435 = vmatpush.bf16.msra.mxu3 %v11609_v50 }
  0xa2   :  { %v13570_v51 = vld [vmem:[#allocation2 + $0x135c] sm:$0xf0] }
  0xa3   :  { %v11320_v52 = vld [vmem:[#allocation2 + $0x1540] sm:$0xf]  ;;  %v11065_v57 = vor.u32 %v13570_v51, %v11064_v49  ;;  %6397 = vmatpush.bf16.msra.mxu0 %v10809_v56 }
  0xa4   :  { %v13634_v53 = vld [vmem:[#allocation2 + $0x155c] sm:$0xf0] }
  0xa5   :  { %v11576_v54 = vld [vmem:[#allocation2 + $0x1740] sm:$0xf]  ;;  %v11321_v58 = vor.u32 %v13634_v53, %v11320_v52  ;;  %6410 = vmatpush.bf16.msra.mxu1 %v11065_v57 }
  0xa6   :  { %v13698_v55 = vld [vmem:[#allocation2 + $0x175c] sm:$0xf0] }
  0xa7   :  { %v10776_v59 = vld [vmem:[#allocation2 + $0x1100] sm:$0xf]  ;;  %v11577_v62 = vor.u32 %v13698_v55, %v11576_v54  ;;  %6423 = vmatpush.bf16.msra.mxu2 %v11321_v58 }
  0xa8   :  { %v13498_v60 = vld [vmem:[#allocation2 + $0x111c] sm:$0xf0] }
  0xa9   :  { %v11032_v61 = vld [vmem:[#allocation2 + $0x1300] sm:$0xf]  ;;  %v10777_v4 = vor.u32 %v13498_v60, %v10776_v59  ;;  %6436 = vmatpush.bf16.msra.mxu3 %v11577_v62 }
  0xaa   :  { %v13562_v63 = vld [vmem:[#allocation2 + $0x131c] sm:$0xf0] }
  0xab   :  { %v11288_v0 = vld [vmem:[#allocation2 + $0x1500] sm:$0xf]  ;;  %v11033_v5 = vor.u32 %v13562_v63, %v11032_v61  ;;  %6398 = vmatpush.bf16.msra.mxu0 %v10777_v4  ;;  %v70_v61 = vld [vmem:[%s14467_s0 + $0x28] sm:$0xff] }
  0xac   :  { %v13626_v1 = vld [vmem:[#allocation2 + $0x151c] sm:$0xf0] }
  0xad   :  { %v11544_v2 = vld [vmem:[#allocation2 + $0x1700] sm:$0xf]  ;;  %v11289_v6 = vor.u32 %v13626_v1, %v11288_v0  ;;  %6411 = vmatpush.bf16.msra.mxu1 %v11033_v5 }
  0xae   :  { %v13690_v3 = vld [vmem:[#allocation2 + $0x171c] sm:$0xf0] }
  0xaf   :  { %v10744_v7 = vld [vmem:[#allocation2 + $0x10c0] sm:$0xf]  ;;  %v11545_v10 = vor.u32 %v13690_v3, %v11544_v2  ;;  %6424 = vmatpush.bf16.msra.mxu2 %v11289_v6 }
  0xb0   :  { %v13490_v8 = vld [vmem:[#allocation2 + $0x10dc] sm:$0xf0] }
  0xb1   :  { %v11000_v9 = vld [vmem:[#allocation2 + $0x12c0] sm:$0xf]  ;;  %v10745_v16 = vor.u32 %v13490_v8, %v10744_v7  ;;  %6437 = vmatpush.bf16.msra.mxu3 %v11545_v10  ;;  %v1133_v10 = vunpack.c.l.b16 %v70_v61 }
  0xb2   :  { %v13554_v11 = vld [vmem:[#allocation2 + $0x12dc] sm:$0xf0] }
  0xb3   :  { %v11256_v12 = vld [vmem:[#allocation2 + $0x14c0] sm:$0xf]  ;;  %v11001_v17 = vor.u32 %v13554_v11, %v11000_v9  ;;  %6399 = vmatpush.bf16.msra.mxu0 %v10745_v16 }
  0xb4   :  { %v13618_v13 = vld [vmem:[#allocation2 + $0x14dc] sm:$0xf0] }
  0xb5   :  { %v11512_v14 = vld [vmem:[#allocation2 + $0x16c0] sm:$0xf]  ;;  %v11257_v21 = vor.u32 %v13618_v13, %v11256_v12  ;;  %6412 = vmatpush.bf16.msra.mxu1 %v11001_v17 }
  0xb6   :  { %v13682_v15 = vld [vmem:[#allocation2 + $0x16dc] sm:$0xf0] }
  0xb7   :  { %v10712_v23 = vld [vmem:[#allocation2 + $0x1080] sm:$0xf]  ;;  %v11513_v26 = vor.u32 %v13682_v15, %v11512_v14  ;;  %6425 = vmatpush.bf16.msra.mxu2 %v11257_v21  ;;  %v1134_v14 = vunpack.c.h.b16 %v70_v61 }
  0xb8   :  { %v13482_v24 = vld [vmem:[#allocation2 + $0x109c] sm:$0xf0] }
  0xb9   :  { %v10968_v25 = vld [vmem:[#allocation2 + $0x1280] sm:$0xf]  ;;  %v10713_v32 = vor.u32 %v13482_v24, %v10712_v23  ;;  %6438 = vmatpush.bf16.msra.mxu3 %v11513_v26 }
  0xba   :  { %v13546_v27 = vld [vmem:[#allocation2 + $0x129c] sm:$0xf0] }
  0xbb   :  { %v11224_v28 = vld [vmem:[#allocation2 + $0x1480] sm:$0xf]  ;;  %v10969_v34 = vor.u32 %v13546_v27, %v10968_v25  ;;  %6400 = vmatpush.bf16.msra.mxu0 %v10713_v32 }
  0xbc   :  { %v13610_v29 = vld [vmem:[#allocation2 + $0x149c] sm:$0xf0] }
  0xbd   :  { %v11480_v30 = vld [vmem:[#allocation2 + $0x1680] sm:$0xf]  ;;  %v11225_v35 = vor.u32 %v13610_v29, %v11224_v28  ;;  %6413 = vmatpush.bf16.msra.mxu1 %v10969_v34  ;;  %v14218_v29 = vpack.c.b16 %v1133_v10, %v1133_v10 }
  0xbe   :  { %v13674_v31 = vld [vmem:[#allocation2 + $0x169c] sm:$0xf0] }
  0xbf   :  { %v10680_v33 = vld [vmem:[#allocation2 + $0x1040] sm:$0xf]  ;;  %v11481_v40 = vor.u32 %v13674_v31, %v11480_v30  ;;  %6426 = vmatpush.bf16.msra.mxu2 %v11225_v35 }
  0xc0   :  { %v13474_v36 = vld [vmem:[#allocation2 + $0x105c] sm:$0xf0] }
  0xc1   :  { %v10936_v37 = vld [vmem:[#allocation2 + $0x1240] sm:$0xf]  ;;  %v10681_v49 = vor.u32 %v13474_v36, %v10680_v33  ;;  %6439 = vmatpush.bf16.msra.mxu3 %v11481_v40  ;;  %v14222_v33 = vpack.c.b16 %v1134_v14, %v1134_v14 }
  0xc2   :  { %v13538_v39 = vld [vmem:[#allocation2 + $0x125c] sm:$0xf0] }
  0xc3   :  { %v11192_v43 = vld [vmem:[#allocation2 + $0x1440] sm:$0xf]  ;;  %v10937_v53 = vor.u32 %v13538_v39, %v10936_v37  ;;  %6401 = vmatpush.bf16.msra.mxu0 %v10681_v49 }
  0xc4   :  { %v13602_v45 = vld [vmem:[#allocation2 + $0x145c] sm:$0xf0] }
  0xc5   :  { %v11448_v46 = vld [vmem:[#allocation2 + $0x1640] sm:$0xf]  ;;  %v11193_v54 = vor.u32 %v13602_v45, %v11192_v43  ;;  %6414 = vmatpush.bf16.msra.mxu1 %v10937_v53 }
  0xc6   :  { %v13666_v47 = vld [vmem:[#allocation2 + $0x165c] sm:$0xf0] }
  0xc7   :  { %v10648_v48 = vld [vmem:[#allocation2 + $0x1000] sm:$0xf]  ;;  %v11449_v58 = vor.u32 %v13666_v47, %v11448_v46  ;;  %6427 = vmatpush.bf16.msra.mxu2 %v11193_v54 }
  0xc8   :  { %v13466_v50 = vld [vmem:[#allocation2 + $0x101c] sm:$0xf0] }
  0xc9   :  { %v10904_v51 = vld [vmem:[#allocation2 + $0x1200] sm:$0xf]  ;;  %v10649_v1 = vor.u32 %v13466_v50, %v10648_v48  ;;  %6440 = vmatpush.bf16.msra.mxu3 %v11449_v58 }
  0xca   :  { %v13530_v52 = vld [vmem:[#allocation2 + $0x121c] sm:$0xf0] }
  0xcb   :  { %v11160_v55 = vld [vmem:[#allocation2 + $0x1400] sm:$0xf]  ;;  %v10905_v6 = vor.u32 %v13530_v52, %v10904_v51  ;;  %6402 = vmatpush.bf16.msra.mxu0 %v10649_v1 }
  0xcc   :  { %v13594_v56 = vld [vmem:[#allocation2 + $0x141c] sm:$0xf0] }
  0xcd   :  { %v69_v57 = vld [vmem:[%s14467_s0 + $0x20] sm:$0xff]  ;;  %v11161_v7 = vor.u32 %v13594_v56, %v11160_v55  ;;  %6415 = vmatpush.bf16.msra.mxu1 %v10905_v6 }
  0xce   :  { %v11416_v59 = vld [vmem:[#allocation2 + $0x1600] sm:$0xf]  ;;  %v1131_v5 = vunpack.c.l.b16 %v69_v57  ;;  %v1132_v11 = vunpack.c.h.b16 %v69_v57 }
  0xcf   :  { %v13658_v60 = vld [vmem:[#allocation2 + $0x161c] sm:$0xf0]  ;;  %6428 = vmatpush.bf16.msra.mxu2 %v11161_v7 }
  0xd0   :  { %v11896_v62 = vld [vmem:[#allocation2 + $0x19c0] sm:$0xf]  ;;  %v11417_v12 = vor.u32 %v13658_v60, %v11416_v59  ;;  %v14216_v25 = vpack.c.b16 %v1131_v5, %v1131_v5  ;;  %v14220_v30 = vpack.c.b16 %v1132_v11, %v1132_v11 }
  0xd1   :  { %v13778_v63 = vld [vmem:[#allocation2 + $0x19dc] sm:$0xf0] }
  0xd2   :  { %v12152_v0 = vld [vmem:[#allocation2 + $0x1bc0] sm:$0xf]  ;;  %v11897_v13 = vor.u32 %v13778_v63, %v11896_v62  ;;  %6441 = vmatpush.bf16.msra.mxu3 %v11417_v12  ;;  %6403 = vmatmul.bf16.vlgmr.msra.gmra.mxu0 %v14216_v25 }
  0xd3   :  { %v13842_v2 = vld [vmem:[#allocation2 + $0x1bdc] sm:$0xf0]  ;;  %6429 = vmatmul.bf16.vlgmr.msra.gmra.mxu2 %v14218_v29  ;;  %6416 = vmatmul.bf16.vlgmr.msra.gmra.mxu1 %v14220_v30 }
  0xd4   :  { %v12408_v3 = vld [vmem:[#allocation2 + $0x1dc0] sm:$0xf]  ;;  %v12153_v15 = vor.u32 %v13842_v2, %v12152_v0  ;;  %6447 = vmatpush.bf16.msrb.mxu0 %v11897_v13 }
  0xd5   :  { %v13906_v4 = vld [vmem:[#allocation2 + $0x1ddc] sm:$0xf0]  ;;  %6442 = vmatmul.bf16.vlgmr.msra.gmra.mxu3 %v14222_v33 }
  0xd6   :  { %v12664_v8 = vld [vmem:[#allocation2 + $0x1fc0] sm:$0xf]  ;;  %v12409_v16 = vor.u32 %v13906_v4, %v12408_v3  ;;  %6460 = vmatpush.bf16.msrb.mxu1 %v12153_v15 }
  0xd7   :  { %v13970_v9 = vld [vmem:[#allocation2 + $0x1fdc] sm:$0xf0] }
  0xd8   :  { %v11864_v17 = vld [vmem:[#allocation2 + $0x1980] sm:$0xf]  ;;  %v12665_v24 = vor.u32 %v13970_v9, %v12664_v8  ;;  %6473 = vmatpush.bf16.msrb.mxu2 %v12409_v16 }
  0xd9   :  { %v13770_v21 = vld [vmem:[#allocation2 + $0x199c] sm:$0xf0] }
  0xda   :  { %v12120_v23 = vld [vmem:[#allocation2 + $0x1b80] sm:$0xf]  ;;  %v11865_v34 = vor.u32 %v13770_v21, %v11864_v17  ;;  %6486 = vmatpush.bf16.msrb.mxu3 %v12665_v24 }
  0xdb   :  { %v13834_v26 = vld [vmem:[#allocation2 + $0x1b9c] sm:$0xf0] }
  0xdc   :  { %v12376_v27 = vld [vmem:[#allocation2 + $0x1d80] sm:$0xf]  ;;  %v12121_v35 = vor.u32 %v13834_v26, %v12120_v23  ;;  %6448 = vmatpush.bf16.msrb.mxu0 %v11865_v34 }
  0xdd   :  { %v13898_v28 = vld [vmem:[#allocation2 + $0x1d9c] sm:$0xf0] }
  0xde   :  { %v12632_v31 = vld [vmem:[#allocation2 + $0x1f80] sm:$0xf]  ;;  %v12377_v36 = vor.u32 %v13898_v28, %v12376_v27  ;;  %6461 = vmatpush.bf16.msrb.mxu1 %v12121_v35 }
  0xdf   :  { %v13962_v32 = vld [vmem:[#allocation2 + $0x1f9c] sm:$0xf0] }
  0xe0   :  { %v11832_v37 = vld [vmem:[#allocation2 + $0x1940] sm:$0xf]  ;;  %v12633_v43 = vor.u32 %v13962_v32, %v12632_v31  ;;  %6474 = vmatpush.bf16.msrb.mxu2 %v12377_v36 }
  0xe1   :  { %v13762_v39 = vld [vmem:[#allocation2 + $0x195c] sm:$0xf0] }
  0xe2   :  { %v12088_v40 = vld [vmem:[#allocation2 + $0x1b40] sm:$0xf]  ;;  %v11833_v50 = vor.u32 %v13762_v39, %v11832_v37  ;;  %6487 = vmatpush.bf16.msrb.mxu3 %v12633_v43 }
  0xe3   :  { %v13826_v45 = vld [vmem:[#allocation2 + $0x1b5c] sm:$0xf0] }
  0xe4   :  { %v12344_v46 = vld [vmem:[#allocation2 + $0x1d40] sm:$0xf]  ;;  %v12089_v51 = vor.u32 %v13826_v45, %v12088_v40  ;;  %6449 = vmatpush.bf16.msrb.mxu0 %v11833_v50 }
  0xe5   :  { %v13890_v47 = vld [vmem:[#allocation2 + $0x1d5c] sm:$0xf0] }
  0xe6   :  { %v12600_v48 = vld [vmem:[#allocation2 + $0x1f40] sm:$0xf]  ;;  %v12345_v52 = vor.u32 %v13890_v47, %v12344_v46  ;;  %6462 = vmatpush.bf16.msrb.mxu1 %v12089_v51 }
  0xe7   :  { %v13954_v49 = vld [vmem:[#allocation2 + $0x1f5c] sm:$0xf0] }
  0xe8   :  { %v11800_v53 = vld [vmem:[#allocation2 + $0x1900] sm:$0xf]  ;;  %v12601_v56 = vor.u32 %v13954_v49, %v12600_v48  ;;  %6475 = vmatpush.bf16.msrb.mxu2 %v12345_v52 }
  0xe9   :  { %v13754_v54 = vld [vmem:[#allocation2 + $0x191c] sm:$0xf0] }
  0xea   :  { %v12056_v55 = vld [vmem:[#allocation2 + $0x1b00] sm:$0xf]  ;;  %v11801_v62 = vor.u32 %v13754_v54, %v11800_v53  ;;  %6488 = vmatpush.bf16.msrb.mxu3 %v12601_v56 }
  0xeb   :  { %v13818_v57 = vld [vmem:[#allocation2 + $0x1b1c] sm:$0xf0] }
  0xec   :  { %v12312_v58 = vld [vmem:[#allocation2 + $0x1d00] sm:$0xf]  ;;  %v12057_v63 = vor.u32 %v13818_v57, %v12056_v55  ;;  %6450 = vmatpush.bf16.msrb.mxu0 %v11801_v62  ;;  %v71_v55 = vld [vmem:[%s14467_s0 + $0x30] sm:$0xff]  ;;  %v13070_v62 = vld [vmem:[#allocation2 + $0x3c4] sm:$0xf] }
  0xed   :  { %v13882_v59 = vld [vmem:[#allocation2 + $0x1d1c] sm:$0xf0] }
  0xee   :  { %v12568_v60 = vld [vmem:[#allocation2 + $0x1f00] sm:$0xf]  ;;  %v12313_v0 = vor.u32 %v13882_v59, %v12312_v58  ;;  %6463 = vmatpush.bf16.msrb.mxu1 %v12057_v63  ;;  %v72_v59 = vld [vmem:[%s14467_s0 + $0x38] sm:$0xff] }
  0xef   :  { %v13946_v61 = vld [vmem:[#allocation2 + $0x1f1c] sm:$0xf0] }
  0xf0   :  { %v11768_v1 = vld [vmem:[#allocation2 + $0x18c0] sm:$0xf]  ;;  %v12569_v4 = vor.u32 %v13946_v61, %v12568_v60  ;;  %6476 = vmatpush.bf16.msrb.mxu2 %v12313_v0  ;;  %v13006_v60 = vld [vmem:[#allocation2 + $0x1c4] sm:$0xf] }
  0xf1   :  { %v13746_v2 = vld [vmem:[#allocation2 + $0x18dc] sm:$0xf0]  ;;  %v8826_v61 = vld [vmem:[#allocation2 + $0x1e0] sm:$0xf0] }
  0xf2   :  { %v12024_v3 = vld [vmem:[#allocation2 + $0x1ac0] sm:$0xf]  ;;  %v11769_v10 = vor.u32 %v13746_v2, %v11768_v1  ;;  %6489 = vmatpush.bf16.msrb.mxu3 %v12569_v4  ;;  %v9082_v0 = vld [vmem:[#allocation2 + $0x3e0] sm:$0xf0] }
  0xf3   :  { %v13810_v5 = vld [vmem:[#allocation2 + $0x1adc] sm:$0xf0]  ;;  %v13134_v1 = vld [vmem:[#allocation2 + $0x5c4] sm:$0xf] }
  0xf4   :  { %v12280_v6 = vld [vmem:[#allocation2 + $0x1cc0] sm:$0xf]  ;;  %v12025_v11 = vor.u32 %v13810_v5, %v12024_v3  ;;  %6451 = vmatpush.bf16.msrb.mxu0 %v11769_v10  ;;  %v9338_v2 = vld [vmem:[#allocation2 + $0x5e0] sm:$0xf0]  ;;  %v1135_v3 = vunpack.c.l.b16 %v71_v55 }
  0xf5   :  { %v13874_v7 = vld [vmem:[#allocation2 + $0x1cdc] sm:$0xf0] }
  0xf6   :  { %v12536_v8 = vld [vmem:[#allocation2 + $0x1ec0] sm:$0xf]  ;;  %v12281_v12 = vor.u32 %v13874_v7, %v12280_v6  ;;  %6464 = vmatpush.bf16.msrb.mxu1 %v12025_v11  ;;  %v13198_v6 = vld [vmem:[#allocation2 + $0x7c4] sm:$0xf]  ;;  %v8829_v11 = vor.u32 %v13006_v60, %v8826_v61 }
  0xf7   :  { %v13938_v9 = vld [vmem:[#allocation2 + $0x1edc] sm:$0xf0]  ;;  %v9594_v7 = vld [vmem:[#allocation2 + $0x7e0] sm:$0xf0] }
  0xf8   :  { %v11736_v13 = vld [vmem:[#allocation2 + $0x1880] sm:$0xf]  ;;  %v12537_v16 = vor.u32 %v13938_v9, %v12536_v8  ;;  %6477 = vmatpush.bf16.msrb.mxu2 %v12281_v12  ;;  %v1137_v8 = vunpack.c.l.b16 %v72_v59  ;;  %v1136_v9 = vunpack.c.h.b16 %v71_v55  ;;  %v1138_v12 = vunpack.c.h.b16 %v72_v59  ;;  %v12982_v55 = vld [vmem:[#allocation2 + $0x104] sm:$0xf] }
  0xf9   :  { %v13738_v14 = vld [vmem:[#allocation2 + $0x189c] sm:$0xf0]  ;;  %v8986_v59 = vld [vmem:[#allocation2 + $0x320] sm:$0xf0] }
  0xfa   :  { %v11992_v15 = vld [vmem:[#allocation2 + $0x1a80] sm:$0xf]  ;;  %v11737_v27 = vor.u32 %v13738_v14, %v11736_v13  ;;  %6490 = vmatpush.bf16.msrb.mxu3 %v12537_v16  ;;  %v9085_v13 = vor.u32 %v13070_v62, %v9082_v0  ;;  %v9341_v14 = vor.u32 %v13134_v1, %v9338_v2  ;;  %v8794_v16 = vld [vmem:[#allocation2 + $0x1a0] sm:$0xf0] }
  0xfb   :  { %v13802_v17 = vld [vmem:[#allocation2 + $0x1a9c] sm:$0xf0]  ;;  %v13110_v60 = vld [vmem:[#allocation2 + $0x504] sm:$0xf] }
  0xfc   :  { %v12248_v21 = vld [vmem:[#allocation2 + $0x1c80] sm:$0xf]  ;;  %v11993_v28 = vor.u32 %v13802_v17, %v11992_v15  ;;  %6452 = vmatpush.bf16.msrb.mxu0 %v11737_v27  ;;  %v12998_v15 = vld [vmem:[#allocation2 + $0x184] sm:$0xf] }
  0xfd   :  { %v13866_v23 = vld [vmem:[#allocation2 + $0x1c9c] sm:$0xf0]  ;;  %v13062_v17 = vld [vmem:[#allocation2 + $0x384] sm:$0xf] }
  0xfe   :  { %v12504_v24 = vld [vmem:[#allocation2 + $0x1e80] sm:$0xf]  ;;  %v12249_v31 = vor.u32 %v13866_v23, %v12248_v21  ;;  %6465 = vmatpush.bf16.msrb.mxu1 %v11993_v28  ;;  %v9597_v21 = vor.u32 %v13198_v6, %v9594_v7  ;;  %v14234_v23 = vpack.c.b16 %v1135_v3, %v1135_v3  ;;  %v9306_v27 = vld [vmem:[#allocation2 + $0x5a0] sm:$0xf0]  ;;  %v14236_v28 = vpack.c.b16 %v1137_v8, %v1137_v8 }
  0xff   :  { %v13930_v26 = vld [vmem:[#allocation2 + $0x1e9c] sm:$0xf0]  ;;  %v9242_v61 = vld [vmem:[#allocation2 + $0x520] sm:$0xf0] }
 0x100   :  { %v11704_v32 = vld [vmem:[#allocation2 + $0x1840] sm:$0xf]  ;;  %v12505_v36 = vor.u32 %v13930_v26, %v12504_v24  ;;  %6478 = vmatpush.bf16.msrb.mxu2 %v12249_v31  ;;  %v9050_v24 = vld [vmem:[#allocation2 + $0x3a0] sm:$0xf0]  ;;  %v14238_v31 = vpack.c.b16 %v1136_v9, %v1136_v9  ;;  %v9245_v2 = vor.u32 %v13110_v60, %v9242_v61 }
 0x101   :  { %v13730_v34 = vld [vmem:[#allocation2 + $0x185c] sm:$0xf0]  ;;  %v13126_v26 = vld [vmem:[#allocation2 + $0x584] sm:$0xf] }
 0x102   :  { %v11960_v35 = vld [vmem:[#allocation2 + $0x1a40] sm:$0xf]  ;;  %v11705_v47 = vor.u32 %v13730_v34, %v11704_v32  ;;  %6491 = vmatpush.bf16.msrb.mxu3 %v12505_v36  ;;  %v13190_v32 = vld [vmem:[#allocation2 + $0x784] sm:$0xf]  ;;  %v8797_v36 = vor.u32 %v12998_v15, %v8794_v16 }
 0x103   :  { %v13794_v37 = vld [vmem:[#allocation2 + $0x1a5c] sm:$0xf0]  ;;  %v9562_v34 = vld [vmem:[#allocation2 + $0x7a0] sm:$0xf0] }
 0x104   :  { %v12216_v39 = vld [vmem:[#allocation2 + $0x1c40] sm:$0xf]  ;;  %v11961_v51 = vor.u32 %v13794_v37, %v11960_v35  ;;  %6453 = vmatpush.bf16.msrb.mxu0 %v11705_v47  ;;  %v14240_v35 = vpack.c.b16 %v1138_v12, %v1138_v12  ;;  %v9053_v37 = vor.u32 %v13062_v17, %v9050_v24  ;;  %v9018_v47 = vld [vmem:[#allocation2 + $0x360] sm:$0xf0] }
 0x105   :  { %v13858_v40 = vld [vmem:[#allocation2 + $0x1c5c] sm:$0xf0]  ;;  %v13174_v62 = vld [vmem:[#allocation2 + $0x704] sm:$0xf] }
 0x106   :  { %v12472_v43 = vld [vmem:[#allocation2 + $0x1e40] sm:$0xf]  ;;  %v12217_v52 = vor.u32 %v13858_v40, %v12216_v39  ;;  %6466 = vmatpush.bf16.msrb.mxu1 %v11961_v51  ;;  %v9309_v39 = vor.u32 %v13126_v26, %v9306_v27  ;;  %v12990_v40 = vld [vmem:[#allocation2 + $0x144] sm:$0xf] }
 0x107   :  { %v13922_v45 = vld [vmem:[#allocation2 + $0x1e5c] sm:$0xf0]  ;;  %v9530_v51 = vld [vmem:[#allocation2 + $0x760] sm:$0xf0] }
 0x108   :  { %v11672_v46 = vld [vmem:[#allocation2 + $0x1800] sm:$0xf]  ;;  %v12473_v56 = vor.u32 %v13922_v45, %v12472_v43  ;;  %6479 = vmatpush.bf16.msrb.mxu2 %v12217_v52  ;;  %v8762_v43 = vld [vmem:[#allocation2 + $0x160] sm:$0xf0] }
 0x109   :  { %v13722_v48 = vld [vmem:[#allocation2 + $0x181c] sm:$0xf0]  ;;  %v13054_v45 = vld [vmem:[#allocation2 + $0x344] sm:$0xf]  ;;  %v8765_v52 = vor.u32 %v12990_v40, %v8762_v43 }
 0x10a   :  { %v11928_v49 = vld [vmem:[#allocation2 + $0x1a00] sm:$0xf]  ;;  %v11673_v63 = vor.u32 %v13722_v48, %v11672_v46  ;;  %6492 = vmatpush.bf16.msrb.mxu3 %v12473_v56  ;;  %v9565_v46 = vor.u32 %v13190_v32, %v9562_v34  ;;  %v13118_v48 = vld [vmem:[#allocation2 + $0x544] sm:$0xf] }
 0x10b   :  { %v13786_v50 = vld [vmem:[#allocation2 + $0x1a1c] sm:$0xf0]  ;;  %v8730_v56 = vld [vmem:[#allocation2 + $0x120] sm:$0xf0] }
 0x10c   :  { %v12184_v53 = vld [vmem:[#allocation2 + $0x1c00] sm:$0xf]  ;;  %v11929_v4 = vor.u32 %v13786_v50, %v11928_v49  ;;  %6454 = vmatpush.bf16.msrb.mxu0 %v11673_v63  ;;  %v9274_v49 = vld [vmem:[#allocation2 + $0x560] sm:$0xf0]  ;;  %v8733_v0 = vor.u32 %v12982_v55, %v8730_v56 }
 0x10d   :  { %v13850_v54 = vld [vmem:[#allocation2 + $0x1c1c] sm:$0xf0]  ;;  %v13182_v50 = vld [vmem:[#allocation2 + $0x744] sm:$0xf] }
 0x10e   :  { %v12440_v57 = vld [vmem:[#allocation2 + $0x1e00] sm:$0xf]  ;;  %v12185_v5 = vor.u32 %v13850_v54, %v12184_v53  ;;  %6467 = vmatpush.bf16.msrb.mxu1 %v11929_v4  ;;  %v9021_v53 = vor.u32 %v13054_v45, %v9018_v47  ;;  %v9277_v54 = vor.u32 %v13118_v48, %v9274_v49  ;;  %v9498_v63 = vld [vmem:[#allocation2 + $0x720] sm:$0xf0] }
 0x10f   :  { %v13914_v58 = vld [vmem:[#allocation2 + $0x1e1c] sm:$0xf0]  ;;  %6455 = vmatmul.bf16.vlgmr.msrb.gmra.mxu0 %v14234_v23  ;;  %v12974_v3 = vld [vmem:[#allocation2 + $0xc4] sm:$0xf]  ;;  %v9501_v6 = vor.u32 %v13174_v62, %v9498_v63 }
 0x110   :  { %v12441_v10 = vor.u32 %v13914_v58, %v12440_v57  ;;  %6480 = vmatpush.bf16.msrb.mxu2 %v12185_v5  ;;  %6499 = vmatpush.bf16.msra.mxu0 %v8829_v11  ;;  %v13046_v57 = vld [vmem:[#allocation2 + $0x304] sm:$0xf]  ;;  %v9533_v58 = vor.u32 %v13182_v50, %v9530_v51 }
 0x111   :  { %6468 = vmatmul.bf16.vlgmr.msrb.gmra.mxu1 %v14238_v31  ;;  %v8989_v1 = vor.u32 %v13046_v57, %v8986_v59  ;;  %v8698_v4 = vld [vmem:[#allocation2 + $0xe0] sm:$0xf0] }
 0x112   :  { %6493 = vmatpush.bf16.msrb.mxu3 %v12441_v10  ;;  %6512 = vmatpush.bf16.msra.mxu1 %v9085_v13  ;;  %v13038_v5 = vld [vmem:[#allocation2 + $0x2c4] sm:$0xf]  ;;  %v8701_v12 = vor.u32 %v12974_v3, %v8698_v4 }
 0x113   :  { %6481 = vmatmul.bf16.vlgmr.msrb.gmra.mxu2 %v14236_v28  ;;  %v8954_v7 = vld [vmem:[#allocation2 + $0x2e0] sm:$0xf0] }
 0x114   :  { %6525 = vmatpush.bf16.msra.mxu2 %v9341_v14  ;;  %6500 = vmatpush.bf16.msra.mxu0 %v8797_v36  ;;  %v13102_v8 = vld [vmem:[#allocation2 + $0x4c4] sm:$0xf]  ;;  %v8957_v13 = vor.u32 %v13038_v5, %v8954_v7 }
 0x115   :  { %6494 = vmatmul.bf16.vlgmr.msrb.gmra.mxu3 %v14240_v35  ;;  %v9210_v9 = vld [vmem:[#allocation2 + $0x4e0] sm:$0xf0] }
 0x116   :  { %6538 = vmatpush.bf16.msra.mxu3 %v9597_v21  ;;  %6513 = vmatpush.bf16.msra.mxu1 %v9053_v37  ;;  %v13166_v10 = vld [vmem:[#allocation2 + $0x6c4] sm:$0xf]  ;;  %v9213_v14 = vor.u32 %v13102_v8, %v9210_v9 }
 0x117   :  { %v9466_v11 = vld [vmem:[#allocation2 + $0x6e0] sm:$0xf0] }
 0x118   :  { %6526 = vmatpush.bf16.msra.mxu2 %v9309_v39  ;;  %6501 = vmatpush.bf16.msra.mxu0 %v8765_v52  ;;  %v12966_v15 = vld [vmem:[#allocation2 + $0x84] sm:$0xf]  ;;  %v9469_v21 = vor.u32 %v13166_v10, %v9466_v11 }
 0x119   :  { %v8666_v16 = vld [vmem:[#allocation2 + $0xa0] sm:$0xf0] }
 0x11a   :  { %6539 = vmatpush.bf16.msra.mxu3 %v9565_v46  ;;  %6514 = vmatpush.bf16.msra.mxu1 %v9021_v53  ;;  %v13030_v17 = vld [vmem:[#allocation2 + $0x284] sm:$0xf]  ;;  %v8669_v36 = vor.u32 %v12966_v15, %v8666_v16 }
 0x11b   :  { %v8922_v24 = vld [vmem:[#allocation2 + $0x2a0] sm:$0xf0] }
 0x11c   :  { %6527 = vmatpush.bf16.msra.mxu2 %v9277_v54  ;;  %6502 = vmatpush.bf16.msra.mxu0 %v8733_v0  ;;  %v13094_v26 = vld [vmem:[#allocation2 + $0x484] sm:$0xf]  ;;  %v8925_v37 = vor.u32 %v13030_v17, %v8922_v24 }
 0x11d   :  { %v9178_v27 = vld [vmem:[#allocation2 + $0x4a0] sm:$0xf0] }
 0x11e   :  { %6540 = vmatpush.bf16.msra.mxu3 %v9533_v58  ;;  %6515 = vmatpush.bf16.msra.mxu1 %v8989_v1  ;;  %v13158_v32 = vld [vmem:[#allocation2 + $0x684] sm:$0xf]  ;;  %v9181_v39 = vor.u32 %v13094_v26, %v9178_v27 }
 0x11f   :  { %v9434_v34 = vld [vmem:[#allocation2 + $0x6a0] sm:$0xf0] }
 0x120   :  { %6528 = vmatpush.bf16.msra.mxu2 %v9245_v2  ;;  %6503 = vmatpush.bf16.msra.mxu0 %v8701_v12  ;;  %v12958_v40 = vld [vmem:[#allocation2 + $0x44] sm:$0xf]  ;;  %v9437_v46 = vor.u32 %v13158_v32, %v9434_v34 }
 0x121   :  { %v8634_v43 = vld [vmem:[#allocation2 + $0x60] sm:$0xf0] }
 0x122   :  { %6541 = vmatpush.bf16.msra.mxu3 %v9501_v6  ;;  %6516 = vmatpush.bf16.msra.mxu1 %v8957_v13  ;;  %v13022_v45 = vld [vmem:[#allocation2 + $0x244] sm:$0xf]  ;;  %v8637_v52 = vor.u32 %v12958_v40, %v8634_v43 }
 0x123   :  { %v8890_v47 = vld [vmem:[#allocation2 + $0x260] sm:$0xf0] }
 0x124   :  { %6529 = vmatpush.bf16.msra.mxu2 %v9213_v14  ;;  %v13086_v48 = vld [vmem:[#allocation2 + $0x444] sm:$0xf]  ;;  %6504 = vmatpush.bf16.msra.mxu0 %v8669_v36  ;;  %v8893_v55 = vor.u32 %v13022_v45, %v8890_v47 }
 0x125   :  { %v9146_v49 = vld [vmem:[#allocation2 + $0x460] sm:$0xf0] }
 0x126   :  { %6542 = vmatpush.bf16.msra.mxu3 %v9469_v21  ;;  %v13150_v50 = vld [vmem:[#allocation2 + $0x644] sm:$0xf]  ;;  %6517 = vmatpush.bf16.msra.mxu1 %v8925_v37  ;;  %v9149_v56 = vor.u32 %v13086_v48, %v9146_v49 }
 0x127   :  { %v9402_v51 = vld [vmem:[#allocation2 + $0x660] sm:$0xf0] }
 0x128   :  { %v12950_v53 = vld [vmem:[#allocation2 + $0x4] sm:$0xf]  ;;  %6530 = vmatpush.bf16.msra.mxu2 %v9181_v39  ;;  %v9405_v60 = vor.u32 %v13150_v50, %v9402_v51  ;;  %6505 = vmatpush.bf16.msra.mxu0 %v8637_v52 }
 0x129   :  { %v8602_v54 = vld [vmem:[#allocation2 + $0x20] sm:$0xf0] }
 0x12a   :  { %v13014_v57 = vld [vmem:[#allocation2 + $0x204] sm:$0xf]  ;;  %6543 = vmatpush.bf16.msra.mxu3 %v9437_v46  ;;  %v8605_v3 = vor.u32 %v12950_v53, %v8602_v54  ;;  %6518 = vmatpush.bf16.msra.mxu1 %v8893_v55 }
 0x12b   :  { %v8858_v58 = vld [vmem:[#allocation2 + $0x220] sm:$0xf0] }
 0x12c   :  { %v13078_v59 = vld [vmem:[#allocation2 + $0x404] sm:$0xf]  ;;  %6531 = vmatpush.bf16.msra.mxu2 %v9149_v56  ;;  %v8861_v7 = vor.u32 %v13014_v57, %v8858_v58  ;;  %6506 = vmatpush.bf16.msra.mxu0 %v8605_v3 }
 0x12d   :  { %v9114_v61 = vld [vmem:[#allocation2 + $0x420] sm:$0xf0] }
 0x12e   :  { %v13142_v62 = vld [vmem:[#allocation2 + $0x604] sm:$0xf]  ;;  %v9117_v8 = vor.u32 %v13078_v59, %v9114_v61  ;;  %6544 = vmatpush.bf16.msra.mxu3 %v9405_v60  ;;  %6519 = vmatpush.bf16.msra.mxu1 %v8861_v7 }
 0x12f   :  { %v9370_v63 = vld [vmem:[#allocation2 + $0x620] sm:$0xf0]  ;;  %6507 = vmatmul.bf16.vlgmr.msra.gmra.mxu0 %v14182_v19 }
 0x130   :  { %v13262_v0 = vld [vmem:[#allocation2 + $0x9c4] sm:$0xf]  ;;  %v9373_v11 = vor.u32 %v13142_v62, %v9370_v63  ;;  %6532 = vmatpush.bf16.msra.mxu2 %v9117_v8 }
 0x131   :  { %v9850_v1 = vld [vmem:[#allocation2 + $0x9e0] sm:$0xf0]  ;;  %6520 = vmatmul.bf16.vlgmr.msra.gmra.mxu1 %v14186_v22 }
 0x132   :  { %v13326_v2 = vld [vmem:[#allocation2 + $0xbc4] sm:$0xf]  ;;  %v9853_v12 = vor.u32 %v13262_v0, %v9850_v1  ;;  %6545 = vmatpush.bf16.msra.mxu3 %v9373_v11 }
 0x133   :  { %v10106_v4 = vld [vmem:[#allocation2 + $0xbe0] sm:$0xf0]  ;;  %6533 = vmatmul.bf16.vlgmr.msra.gmra.mxu2 %v14180_v18 }
 0x134   :  { %v13390_v5 = vld [vmem:[#allocation2 + $0xdc4] sm:$0xf]  ;;  %v10109_v13 = vor.u32 %v13326_v2, %v10106_v4  ;;  %6551 = vmatpush.bf16.msrb.mxu0 %v9853_v12 }
 0x135   :  { %v10362_v6 = vld [vmem:[#allocation2 + $0xde0] sm:$0xf0]  ;;  %6546 = vmatmul.bf16.vlgmr.msra.gmra.mxu3 %v14184_v20 }
 0x136   :  { %v13454_v9 = vld [vmem:[#allocation2 + $0xfc4] sm:$0xf]  ;;  %v10365_v14 = vor.u32 %v13390_v5, %v10362_v6  ;;  %6564 = vmatpush.bf16.msrb.mxu1 %v10109_v13 }
 0x137   :  { %v10618_v10 = vld [vmem:[#allocation2 + $0xfe0] sm:$0xf0] }
 0x138   :  { %v13254_v15 = vld [vmem:[#allocation2 + $0x984] sm:$0xf]  ;;  %v10621_v21 = vor.u32 %v13454_v9, %v10618_v10  ;;  %6577 = vmatpush.bf16.msrb.mxu2 %v10365_v14 }
 0x139   :  { %v9818_v16 = vld [vmem:[#allocation2 + $0x9a0] sm:$0xf0] }
 0x13a   :  { %v13318_v17 = vld [vmem:[#allocation2 + $0xb84] sm:$0xf]  ;;  %v9821_v36 = vor.u32 %v13254_v15, %v9818_v16  ;;  %6590 = vmatpush.bf16.msrb.mxu3 %v10621_v21 }
 0x13b   :  { %v10074_v24 = vld [vmem:[#allocation2 + $0xba0] sm:$0xf0] }
 0x13c   :  { %v13382_v26 = vld [vmem:[#allocation2 + $0xd84] sm:$0xf]  ;;  %v10077_v37 = vor.u32 %v13318_v17, %v10074_v24  ;;  %6552 = vmatpush.bf16.msrb.mxu0 %v9821_v36 }
 0x13d   :  { %v10330_v27 = vld [vmem:[#allocation2 + $0xda0] sm:$0xf0] }
 0x13e   :  { %v13446_v32 = vld [vmem:[#allocation2 + $0xf84] sm:$0xf]  ;;  %v10333_v39 = vor.u32 %v13382_v26, %v10330_v27  ;;  %6565 = vmatpush.bf16.msrb.mxu1 %v10077_v37 }
 0x13f   :  { %v10586_v34 = vld [vmem:[#allocation2 + $0xfa0] sm:$0xf0] }
 0x140   :  { %v13246_v40 = vld [vmem:[#allocation2 + $0x944] sm:$0xf]  ;;  %v10589_v46 = vor.u32 %v13446_v32, %v10586_v34  ;;  %6578 = vmatpush.bf16.msrb.mxu2 %v10333_v39 }
 0x141   :  { %v9786_v43 = vld [vmem:[#allocation2 + $0x960] sm:$0xf0] }
 0x142   :  { %v13310_v45 = vld [vmem:[#allocation2 + $0xb44] sm:$0xf]  ;;  %v9789_v52 = vor.u32 %v13246_v40, %v9786_v43  ;;  %6591 = vmatpush.bf16.msrb.mxu3 %v10589_v46  ;;  %v6300_v40 = vpop.f32.mrf.mxu0 }
 0x143   :  { %v10042_v47 = vld [vmem:[#allocation2 + $0xb60] sm:$0xf0] }
 0x144   :  { %v13374_v48 = vld [vmem:[#allocation2 + $0xd44] sm:$0xf]  ;;  %v10045_v53 = vor.u32 %v13310_v45, %v10042_v47  ;;  %6553 = vmatpush.bf16.msrb.mxu0 %v9789_v52 }
 0x145   :  { %v10298_v49 = vld [vmem:[#allocation2 + $0xd60] sm:$0xf0] }
 0x146   :  { %v13438_v50 = vld [vmem:[#allocation2 + $0xf44] sm:$0xf]  ;;  %v10301_v54 = vor.u32 %v13374_v48, %v10298_v49  ;;  %6566 = vmatpush.bf16.msrb.mxu1 %v10045_v53 }
 0x147   :  { %v10554_v51 = vld [vmem:[#allocation2 + $0xf60] sm:$0xf0] }
 0x148   :  { %v13238_v55 = vld [vmem:[#allocation2 + $0x904] sm:$0xf]  ;;  %v10557_v58 = vor.u32 %v13438_v50, %v10554_v51  ;;  %6579 = vmatpush.bf16.msrb.mxu2 %v10301_v54  ;;  %v6313_v50 = vpop.f32.mrf.mxu1 }
 0x149   :  { %v9754_v56 = vld [vmem:[#allocation2 + $0x920] sm:$0xf0] }
 0x14a   :  { %v13302_v57 = vld [vmem:[#allocation2 + $0xb04] sm:$0xf]  ;;  %v9757_v0 = vor.u32 %v13238_v55, %v9754_v56  ;;  %6592 = vmatpush.bf16.msrb.mxu3 %v10557_v58 }
 0x14b   :  { %v10010_v59 = vld [vmem:[#allocation2 + $0xb20] sm:$0xf0] }
 0x14c   :  { %v13366_v60 = vld [vmem:[#allocation2 + $0xd04] sm:$0xf]  ;;  %v10013_v2 = vor.u32 %v13302_v57, %v10010_v59  ;;  %6554 = vmatpush.bf16.msrb.mxu0 %v9757_v0 }
 0x14d   :  { %v10266_v61 = vld [vmem:[#allocation2 + $0xd20] sm:$0xf0] }
 0x14e   :  { %v13430_v62 = vld [vmem:[#allocation2 + $0xf04] sm:$0xf]  ;;  %v10269_v3 = vor.u32 %v13366_v60, %v10266_v61  ;;  %6567 = vmatpush.bf16.msrb.mxu1 %v10013_v2  ;;  %v6326_v2 = vpop.f32.mrf.mxu2 }
 0x14f   :  { %v10522_v63 = vld [vmem:[#allocation2 + $0xf20] sm:$0xf0] }
 0x150   :  { %v13230_v1 = vld [vmem:[#allocation2 + $0x8c4] sm:$0xf]  ;;  %v10525_v7 = vor.u32 %v13430_v62, %v10522_v63  ;;  %6580 = vmatpush.bf16.msrb.mxu2 %v10269_v3 }
 0x151   :  { %v9722_v4 = vld [vmem:[#allocation2 + $0x8e0] sm:$0xf0] }
 0x152   :  { %v13294_v5 = vld [vmem:[#allocation2 + $0xac4] sm:$0xf]  ;;  %v9725_v13 = vor.u32 %v13230_v1, %v9722_v4  ;;  %6593 = vmatpush.bf16.msrb.mxu3 %v10525_v7 }
 0x153   :  { %v9978_v6 = vld [vmem:[#allocation2 + $0xae0] sm:$0xf0] }
 0x154   :  { %v13358_v8 = vld [vmem:[#allocation2 + $0xcc4] sm:$0xf]  ;;  %v9981_v15 = vor.u32 %v13294_v5, %v9978_v6  ;;  %6555 = vmatpush.bf16.msrb.mxu0 %v9725_v13 }
 0x155   :  { %v10234_v9 = vld [vmem:[#allocation2 + $0xce0] sm:$0xf0] }
 0x156   :  { %v1097_v10 = vld [vmem:[#allocation4] sm:$0xff]  ;;  %v10237_v16 = vor.u32 %v13358_v8, %v10234_v9  ;;  %6568 = vmatpush.bf16.msrb.mxu1 %v9981_v15  ;;  %v6339_v8 = vpop.f32.mrf.mxu3 }
 0x157   :  { %v13422_v11 = vld [vmem:[#allocation2 + $0xec4] sm:$0xf]  ;;  %v1099_v24 = vperm.slane %v1097_v10, 0 }
 0x158   :  { %v10490_v12 = vld [vmem:[#allocation2 + $0xee0] sm:$0xf0]  ;;  %6581 = vmatpush.bf16.msrb.mxu2 %v10237_v16 }
 0x159   :  { %v13222_v14 = vld [vmem:[#allocation2 + $0x884] sm:$0xf]  ;;  %v10493_v26 = vor.u32 %v13422_v11, %v10490_v12  ;;  %v6301_v49 = vadd.f32 %v6300_v40, %v1099_v24 }
 0x15a   :  { %v9690_v17 = vld [vmem:[#allocation2 + $0x8a0] sm:$0xf0] }
 0x15b   :  { %v13286_v21 = vld [vmem:[#allocation2 + $0xa84] sm:$0xf]  ;;  %v9693_v39 = vor.u32 %v13222_v14, %v9690_v17  ;;  %6594 = vmatpush.bf16.msrb.mxu3 %v10493_v26  ;;  %v6314_v57 = vadd.f32 %v6313_v50, %v6301_v49  ;;  %v6302_v17 = vpop.f32.mrf.mxu0 }
 0x15c   :  { %v9946_v27 = vld [vmem:[#allocation2 + $0xaa0] sm:$0xf0] }
 0x15d   :  { %v13350_v32 = vld [vmem:[#allocation2 + $0xc84] sm:$0xf]  ;;  %v9949_v43 = vor.u32 %v13286_v21, %v9946_v27  ;;  %6556 = vmatpush.bf16.msrb.mxu0 %v9693_v39  ;;  %v6327_v7 = vadd.f32 %v6326_v2, %v6314_v57 }
 0x15e   :  { %v10202_v34 = vld [vmem:[#allocation2 + $0xca0] sm:$0xf0] }
 0x15f   :  { %v13414_v36 = vld [vmem:[#allocation2 + $0xe84] sm:$0xf]  ;;  %v10205_v45 = vor.u32 %v13350_v32, %v10202_v34  ;;  %6569 = vmatpush.bf16.msrb.mxu1 %v9949_v43  ;;  %v14250_v16 = vadd.f32 %v6339_v8, %v6327_v7  ;;  %v6315_v32 = vpop.f32.mrf.mxu1 }
 0x160   :  { %v10458_v37 = vld [vmem:[#allocation2 + $0xea0] sm:$0xf0] }
 0x161   :  { %v13214_v46 = vld [vmem:[#allocation2 + $0x844] sm:$0xf]  ;;  %v10461_v51 = vor.u32 %v13414_v36, %v10458_v37  ;;  %6582 = vmatpush.bf16.msrb.mxu2 %v10205_v45 }
 0x162   :  { %v9658_v47 = vld [vmem:[#allocation2 + $0x860] sm:$0xf0] }
 0x163   :  { %v13278_v48 = vld [vmem:[#allocation2 + $0xa44] sm:$0xf]  ;;  %v9661_v58 = vor.u32 %v13214_v46, %v9658_v47  ;;  %6595 = vmatpush.bf16.msrb.mxu3 %v10461_v51 }
 0x164   :  { %v9914_v52 = vld [vmem:[#allocation2 + $0xa60] sm:$0xf0] }
 0x165   :  { %v13342_v53 = vld [vmem:[#allocation2 + $0xc44] sm:$0xf]  ;;  %v9917_v61 = vor.u32 %v13278_v48, %v9914_v52  ;;  %6557 = vmatpush.bf16.msrb.mxu0 %v9661_v58  ;;  %v6328_v52 = vpop.f32.mrf.mxu2 }
 0x166   :  { %v10170_v54 = vld [vmem:[#allocation2 + $0xc60] sm:$0xf0] }
 0x167   :  { %v13406_v55 = vld [vmem:[#allocation2 + $0xe44] sm:$0xf]  ;;  %v10173_v62 = vor.u32 %v13342_v53, %v10170_v54  ;;  %6570 = vmatpush.bf16.msrb.mxu1 %v9917_v61  ;;  %v6341_v54 = vpop.f32.mrf.mxu3 }
 0x168   :  { %v10426_v56 = vld [vmem:[#allocation2 + $0xe60] sm:$0xf0] }
 0x169   :  { %v13206_v59 = vld [vmem:[#allocation2 + $0x804] sm:$0xf]  ;;  %v10429_v3 = vor.u32 %v13406_v55, %v10426_v56  ;;  %6583 = vmatpush.bf16.msrb.mxu2 %v10173_v62 }
 0x16a   :  { %v9626_v60 = vld [vmem:[#allocation2 + $0x820] sm:$0xf0] }
 0x16b   :  { %v13270_v63 = vld [vmem:[#allocation2 + $0xa04] sm:$0xf]  ;;  %v9629_v12 = vor.u32 %v13206_v59, %v9626_v60  ;;  %6596 = vmatpush.bf16.msrb.mxu3 %v10429_v3 }
 0x16c   :  { %v9882_v0 = vld [vmem:[#allocation2 + $0xa20] sm:$0xf0] }
 0x16d   :  { %v13334_v1 = vld [vmem:[#allocation2 + $0xc04] sm:$0xf]  ;;  %v9885_v21 = vor.u32 %v13270_v63, %v9882_v0  ;;  %6558 = vmatpush.bf16.msrb.mxu0 %v9629_v12 }
 0x16e   :  { %v10138_v4 = vld [vmem:[#allocation2 + $0xc20] sm:$0xf0] }
 0x16f   :  { %v13398_v5 = vld [vmem:[#allocation2 + $0xe04] sm:$0xf]  ;;  %v10141_v24 = vor.u32 %v13334_v1, %v10138_v4  ;;  %6571 = vmatpush.bf16.msrb.mxu1 %v9885_v21 }
 0x170   :  { %v10394_v6 = vld [vmem:[#allocation2 + $0xe20] sm:$0xf0]  ;;  %6559 = vmatmul.bf16.vlgmr.msrb.gmra.mxu0 %v14200_v41 }
 0x171   :  { %v13518_v9 = vld [vmem:[#allocation2 + $0x11c4] sm:$0xf]  ;;  %v10397_v34 = vor.u32 %v13398_v5, %v10394_v6  ;;  %6584 = vmatpush.bf16.msrb.mxu2 %v10141_v24 }
 0x172   :  { %v10874_v10 = vld [vmem:[#allocation2 + $0x11e0] sm:$0xf0]  ;;  %6572 = vmatmul.bf16.vlgmr.msrb.gmra.mxu1 %v14204_v44 }
 0x173   :  { %v13582_v11 = vld [vmem:[#allocation2 + $0x13c4] sm:$0xf]  ;;  %v10877_v36 = vor.u32 %v13518_v9, %v10874_v10  ;;  %6597 = vmatpush.bf16.msrb.mxu3 %v10397_v34  ;;  %v6365_v34 = vpop.f32.mrf.mxu1 }
 0x174   :  { %v11130_v13 = vld [vmem:[#allocation2 + $0x13e0] sm:$0xf0]  ;;  %6585 = vmatmul.bf16.vlgmr.msrb.gmra.mxu2 %v14198_v38 }
 0x175   :  { %v13646_v14 = vld [vmem:[#allocation2 + $0x15c4] sm:$0xf]  ;;  %v11133_v37 = vor.u32 %v13582_v11, %v11130_v13  ;;  %6603 = vmatpush.bf16.msra.mxu0 %v10877_v36 }
 0x176   :  { %v11386_v15 = vld [vmem:[#allocation2 + $0x15e0] sm:$0xf0]  ;;  %6598 = vmatmul.bf16.vlgmr.msrb.gmra.mxu3 %v14202_v42 }
 0x177   :  { %v13710_v26 = vld [vmem:[#allocation2 + $0x17c4] sm:$0xf]  ;;  %v11389_v39 = vor.u32 %v13646_v14, %v11386_v15  ;;  %6616 = vmatpush.bf16.msra.mxu1 %v11133_v37  ;;  %v6352_v15 = vpop.f32.mrf.mxu0 }
 0x178   :  { %v11642_v27 = vld [vmem:[#allocation2 + $0x17e0] sm:$0xf0]  ;;  %v6353_v32 = vadd.f32 %v6352_v15, %v14250_v16 }
 0x179   :  { %v13510_v40 = vld [vmem:[#allocation2 + $0x1184] sm:$0xf]  ;;  %v11645_v46 = vor.u32 %v13710_v26, %v11642_v27  ;;  %6629 = vmatpush.bf16.msra.mxu2 %v11389_v39 }
 0x17a   :  { %v10842_v43 = vld [vmem:[#allocation2 + $0x11a0] sm:$0xf0] }
 0x17b   :  { %v13574_v45 = vld [vmem:[#allocation2 + $0x1384] sm:$0xf]  ;;  %v10845_v53 = vor.u32 %v13510_v40, %v10842_v43  ;;  %6642 = vmatpush.bf16.msra.mxu3 %v11645_v46  ;;  %v6366_v46 = vadd.f32 %v6365_v34, %v6353_v32 }
 0x17c   :  { %v11098_v47 = vld [vmem:[#allocation2 + $0x13a0] sm:$0xf0] }
 0x17d   :  { %v13638_v48 = vld [vmem:[#allocation2 + $0x1584] sm:$0xf]  ;;  %v11101_v55 = vor.u32 %v13574_v45, %v11098_v47  ;;  %6604 = vmatpush.bf16.msra.mxu0 %v10845_v53  ;;  %v6378_v53 = vpop.f32.mrf.mxu2 }
 0x17e   :  { %v11354_v49 = vld [vmem:[#allocation2 + $0x15a0] sm:$0xf0] }
 0x17f   :  { %v13702_v50 = vld [vmem:[#allocation2 + $0x1784] sm:$0xf]  ;;  %v11357_v56 = vor.u32 %v13638_v48, %v11354_v49  ;;  %6617 = vmatpush.bf16.msra.mxu1 %v11101_v55 }
 0x180   :  { %v11610_v51 = vld [vmem:[#allocation2 + $0x17a0] sm:$0xf0] }
 0x181   :  { %v13502_v57 = vld [vmem:[#allocation2 + $0x1144] sm:$0xf]  ;;  %v11613_v60 = vor.u32 %v13702_v50, %v11610_v51  ;;  %6630 = vmatpush.bf16.msra.mxu2 %v11357_v56 }
 0x182   :  { %v10810_v58 = vld [vmem:[#allocation2 + $0x1160] sm:$0xf0] }
 0x183   :  { %v13566_v59 = vld [vmem:[#allocation2 + $0x1344] sm:$0xf]  ;;  %v10813_v2 = vor.u32 %v13502_v57, %v10810_v58  ;;  %6643 = vmatpush.bf16.msra.mxu3 %v11613_v60  ;;  %v6379_v57 = vadd.f32 %v6378_v53, %v6366_v46  ;;  %v6391_v58 = vpop.f32.mrf.mxu3 }
 0x184   :  { %v11066_v61 = vld [vmem:[#allocation2 + $0x1360] sm:$0xf0] }
 0x185   :  { %v13630_v62 = vld [vmem:[#allocation2 + $0x1544] sm:$0xf]  ;;  %v11069_v3 = vor.u32 %v13566_v59, %v11066_v61  ;;  %6605 = vmatpush.bf16.msra.mxu0 %v10813_v2 }
 0x186   :  { %v11322_v63 = vld [vmem:[#allocation2 + $0x1560] sm:$0xf0] }
 0x187   :  { %v13694_v0 = vld [vmem:[#allocation2 + $0x1744] sm:$0xf]  ;;  %v11325_v4 = vor.u32 %v13630_v62, %v11322_v63  ;;  %6618 = vmatpush.bf16.msra.mxu1 %v11069_v3  ;;  %v14257_v62 = vadd.f32 %v6391_v58, %v6379_v57  ;;  %v6354_v63 = vpop.f32.mrf.mxu0 }
 0x188   :  { %v11578_v1 = vld [vmem:[#allocation2 + $0x1760] sm:$0xf0] }
 0x189   :  { %v13494_v5 = vld [vmem:[#allocation2 + $0x1104] sm:$0xf]  ;;  %v11581_v8 = vor.u32 %v13694_v0, %v11578_v1  ;;  %6631 = vmatpush.bf16.msra.mxu2 %v11325_v4 }
 0x18a   :  { %v10778_v6 = vld [vmem:[#allocation2 + $0x1120] sm:$0xf0] }
 0x18b   :  { %v13558_v7 = vld [vmem:[#allocation2 + $0x1304] sm:$0xf]  ;;  %v10781_v14 = vor.u32 %v13494_v5, %v10778_v6  ;;  %6644 = vmatpush.bf16.msra.mxu3 %v11581_v8  ;;  %v6367_v5 = vpop.f32.mrf.mxu1 }
 0x18c   :  { %v11034_v9 = vld [vmem:[#allocation2 + $0x1320] sm:$0xf0] }
 0x18d   :  { %v13622_v10 = vld [vmem:[#allocation2 + $0x1504] sm:$0xf]  ;;  %v11037_v17 = vor.u32 %v13558_v7, %v11034_v9  ;;  %6606 = vmatpush.bf16.msra.mxu0 %v10781_v14 }
 0x18e   :  { %v11290_v11 = vld [vmem:[#allocation2 + $0x1520] sm:$0xf0] }
 0x18f   :  { %v13686_v12 = vld [vmem:[#allocation2 + $0x1704] sm:$0xf]  ;;  %v11293_v21 = vor.u32 %v13622_v10, %v11290_v11  ;;  %6619 = vmatpush.bf16.msra.mxu1 %v11037_v17 }
 0x190   :  { %v11546_v13 = vld [vmem:[#allocation2 + $0x1720] sm:$0xf0] }
 0x191   :  { %v13486_v24 = vld [vmem:[#allocation2 + $0x10c4] sm:$0xf]  ;;  %v11549_v36 = vor.u32 %v13686_v12, %v11546_v13  ;;  %6632 = vmatpush.bf16.msra.mxu2 %v11293_v21 }
 0x192   :  { %v10746_v26 = vld [vmem:[#allocation2 + $0x10e0] sm:$0xf0] }
 0x193   :  { %v13550_v27 = vld [vmem:[#allocation2 + $0x12c4] sm:$0xf]  ;;  %v10749_v47 = vor.u32 %v13486_v24, %v10746_v26  ;;  %6645 = vmatpush.bf16.msra.mxu3 %v11549_v36 }
 0x194   :  { %v11002_v37 = vld [vmem:[#allocation2 + $0x12e0] sm:$0xf0] }
 0x195   :  { %v13614_v39 = vld [vmem:[#allocation2 + $0x14c4] sm:$0xf]  ;;  %v11005_v48 = vor.u32 %v13550_v27, %v11002_v37  ;;  %6607 = vmatpush.bf16.msra.mxu0 %v10749_v47  ;;  %v6380_v27 = vpop.f32.mrf.mxu2 }
 0x196   :  { %v11258_v40 = vld [vmem:[#allocation2 + $0x14e0] sm:$0xf0] }
 0x197   :  { %v13678_v43 = vld [vmem:[#allocation2 + $0x16c4] sm:$0xf]  ;;  %v11261_v49 = vor.u32 %v13614_v39, %v11258_v40  ;;  %6620 = vmatpush.bf16.msra.mxu1 %v11005_v48  ;;  %v6393_v39 = vpop.f32.mrf.mxu3 }
 0x198   :  { %v11514_v45 = vld [vmem:[#allocation2 + $0x16e0] sm:$0xf0]  ;;  %v6404_v39 = vpop.f32.mrf.mxu0 }
 0x199   :  { %v13478_v50 = vld [vmem:[#allocation2 + $0x1084] sm:$0xf]  ;;  %v11517_v16 = vor.u32 %v13678_v43, %v11514_v45  ;;  %6633 = vmatpush.bf16.msra.mxu2 %v11261_v49 }
 0x19a   :  { %v10714_v51 = vld [vmem:[#allocation2 + $0x10a0] sm:$0xf0] }
 0x19b   :  { %v13542_v52 = vld [vmem:[#allocation2 + $0x1284] sm:$0xf]  ;;  %v10717_v61 = vor.u32 %v13478_v50, %v10714_v51  ;;  %6646 = vmatpush.bf16.msra.mxu3 %v11517_v16 }
 0x19c   :  { %v10970_v54 = vld [vmem:[#allocation2 + $0x12a0] sm:$0xf0] }
 0x19d   :  { %v13606_v55 = vld [vmem:[#allocation2 + $0x1484] sm:$0xf]  ;;  %v10973_v0 = vor.u32 %v13542_v52, %v10970_v54  ;;  %6608 = vmatpush.bf16.msra.mxu0 %v10717_v61 }
 0x19e   :  { %v11226_v56 = vld [vmem:[#allocation2 + $0x14a0] sm:$0xf0] }
 0x19f   :  { %v13670_v59 = vld [vmem:[#allocation2 + $0x1684] sm:$0xf]  ;;  %v11229_v1 = vor.u32 %v13606_v55, %v11226_v56  ;;  %6621 = vmatpush.bf16.msra.mxu1 %v10973_v0 }
 0x1a0   :  { %v11482_v60 = vld [vmem:[#allocation2 + $0x16a0] sm:$0xf0] }
 0x1a1   :  { %v13470_v2 = vld [vmem:[#allocation2 + $0x1044] sm:$0xf]  ;;  %v11485_v6 = vor.u32 %v13670_v59, %v11482_v60  ;;  %6634 = vmatpush.bf16.msra.mxu2 %v11229_v1 }
 0x1a2   :  { %v10682_v3 = vld [vmem:[#allocation2 + $0x1060] sm:$0xf0] }
 0x1a3   :  { %v13534_v4 = vld [vmem:[#allocation2 + $0x1244] sm:$0xf]  ;;  %v10685_v12 = vor.u32 %v13470_v2, %v10682_v3  ;;  %6647 = vmatpush.bf16.msra.mxu3 %v11485_v6 }
 0x1a4   :  { %v10938_v7 = vld [vmem:[#allocation2 + $0x1260] sm:$0xf0] }
 0x1a5   :  { %v13598_v8 = vld [vmem:[#allocation2 + $0x1444] sm:$0xf]  ;;  %v10941_v15 = vor.u32 %v13534_v4, %v10938_v7  ;;  %6609 = vmatpush.bf16.msra.mxu0 %v10685_v12 }
 0x1a6   :  { %v11194_v9 = vld [vmem:[#allocation2 + $0x1460] sm:$0xf0] }
 0x1a7   :  { %v13662_v10 = vld [vmem:[#allocation2 + $0x1644] sm:$0xf]  ;;  %v11197_v17 = vor.u32 %v13598_v8, %v11194_v9  ;;  %6622 = vmatpush.bf16.msra.mxu1 %v10941_v15 }
 0x1a8   :  { %v11450_v11 = vld [vmem:[#allocation2 + $0x1660] sm:$0xf0] }
 0x1a9   :  { %v13462_v13 = vld [vmem:[#allocation2 + $0x1004] sm:$0xf]  ;;  %v11453_v32 = vor.u32 %v13662_v10, %v11450_v11  ;;  %6635 = vmatpush.bf16.msra.mxu2 %v11197_v17 }
 0x1aa   :  { %v10650_v14 = vld [vmem:[#allocation2 + $0x1020] sm:$0xf0] }
 0x1ab   :  { %v13526_v21 = vld [vmem:[#allocation2 + $0x1204] sm:$0xf]  ;;  %v10653_v46 = vor.u32 %v13462_v13, %v10650_v14  ;;  %6648 = vmatpush.bf16.msra.mxu3 %v11453_v32 }
 0x1ac   :  { %v10906_v24 = vld [vmem:[#allocation2 + $0x1220] sm:$0xf0] }
 0x1ad   :  { %v13590_v26 = vld [vmem:[#allocation2 + $0x1404] sm:$0xf]  ;;  %v10909_v50 = vor.u32 %v13526_v21, %v10906_v24  ;;  %6610 = vmatpush.bf16.msra.mxu0 %v10653_v46 }
 0x1ae   :  { %v11162_v34 = vld [vmem:[#allocation2 + $0x1420] sm:$0xf0] }
 0x1af   :  { %v13654_v36 = vld [vmem:[#allocation2 + $0x1604] sm:$0xf]  ;;  %v11165_v51 = vor.u32 %v13590_v26, %v11162_v34  ;;  %6623 = vmatpush.bf16.msra.mxu1 %v10909_v50 }
 0x1b0   :  { %v11418_v37 = vld [vmem:[#allocation2 + $0x1620] sm:$0xf0]  ;;  %6611 = vmatmul.bf16.vlgmr.msra.gmra.mxu0 %v14216_v25 }
 0x1b1   :  { %v13774_v40 = vld [vmem:[#allocation2 + $0x19c4] sm:$0xf]  ;;  %v11421_v16 = vor.u32 %v13654_v36, %v11418_v37  ;;  %6636 = vmatpush.bf16.msra.mxu2 %v11165_v51 }
 0x1b2   :  { %v11898_v43 = vld [vmem:[#allocation2 + $0x19e0] sm:$0xf0]  ;;  %6624 = vmatmul.bf16.vlgmr.msra.gmra.mxu1 %v14220_v30 }
 0x1b3   :  { %v13838_v45 = vld [vmem:[#allocation2 + $0x1bc4] sm:$0xf]  ;;  %v11901_v54 = vor.u32 %v13774_v40, %v11898_v43  ;;  %6649 = vmatpush.bf16.msra.mxu3 %v11421_v16 }
 0x1b4   :  { %v12154_v47 = vld [vmem:[#allocation2 + $0x1be0] sm:$0xf0]  ;;  %6637 = vmatmul.bf16.vlgmr.msra.gmra.mxu2 %v14218_v29 }
 0x1b5   :  { %v13902_v48 = vld [vmem:[#allocation2 + $0x1dc4] sm:$0xf]  ;;  %v12157_v55 = vor.u32 %v13838_v45, %v12154_v47  ;;  %6655 = vmatpush.bf16.msrb.mxu0 %v11901_v54  ;;  %v6405_v45 = vadd.f32 %v6404_v39, %v14257_v62  ;;  %v6417_v47 = vpop.f32.mrf.mxu1 }
 0x1b6   :  { %v12410_v49 = vld [vmem:[#allocation2 + $0x1de0] sm:$0xf0]  ;;  %6650 = vmatmul.bf16.vlgmr.msra.gmra.mxu3 %v14222_v33 }
 0x1b7   :  { %v13966_v52 = vld [vmem:[#allocation2 + $0x1fc4] sm:$0xf]  ;;  %v12413_v56 = vor.u32 %v13902_v48, %v12410_v49  ;;  %6668 = vmatpush.bf16.msrb.mxu1 %v12157_v55  ;;  %v6418_v16 = vadd.f32 %v6417_v47, %v6405_v45 }
 0x1b8   :  { %v12666_v53 = vld [vmem:[#allocation2 + $0x1fe0] sm:$0xf0] }
 0x1b9   :  { %v13766_v57 = vld [vmem:[#allocation2 + $0x1984] sm:$0xf]  ;;  %v12669_v60 = vor.u32 %v13966_v52, %v12666_v53  ;;  %6681 = vmatpush.bf16.msrb.mxu2 %v12413_v56 }
 0x1ba   :  { %v11866_v58 = vld [vmem:[#allocation2 + $0x19a0] sm:$0xf0] }
 0x1bb   :  { %v13830_v59 = vld [vmem:[#allocation2 + $0x1b84] sm:$0xf]  ;;  %v11869_v3 = vor.u32 %v13766_v57, %v11866_v58  ;;  %6694 = vmatpush.bf16.msrb.mxu3 %v12669_v60 }
 0x1bc   :  { %v12122_v61 = vld [vmem:[#allocation2 + $0x1ba0] sm:$0xf0] }
 0x1bd   :  { %v13894_v63 = vld [vmem:[#allocation2 + $0x1d84] sm:$0xf]  ;;  %v12125_v4 = vor.u32 %v13830_v59, %v12122_v61  ;;  %6656 = vmatpush.bf16.msrb.mxu0 %v11869_v3 }
 0x1be   :  { %v12378_v0 = vld [vmem:[#allocation2 + $0x1da0] sm:$0xf0] }
 0x1bf   :  { %v13958_v1 = vld [vmem:[#allocation2 + $0x1f84] sm:$0xf]  ;;  %v12381_v5 = vor.u32 %v13894_v63, %v12378_v0  ;;  %6669 = vmatpush.bf16.msrb.mxu1 %v12125_v4 }
 0x1c0   :  { %v12634_v2 = vld [vmem:[#allocation2 + $0x1fa0] sm:$0xf0] }
 0x1c1   :  { %v13758_v6 = vld [vmem:[#allocation2 + $0x1944] sm:$0xf]  ;;  %v12637_v9 = vor.u32 %v13958_v1, %v12634_v2  ;;  %6682 = vmatpush.bf16.msrb.mxu2 %v12381_v5  ;;  %v6430_v2 = vpop.f32.mrf.mxu2 }
 0x1c2   :  { %v11834_v7 = vld [vmem:[#allocation2 + $0x1960] sm:$0xf0] }
 0x1c3   :  { %v13822_v8 = vld [vmem:[#allocation2 + $0x1b44] sm:$0xf]  ;;  %v11837_v15 = vor.u32 %v13758_v6, %v11834_v7  ;;  %6695 = vmatpush.bf16.msrb.mxu3 %v12637_v9  ;;  %v6431_v6 = vadd.f32 %v6430_v2, %v6418_v16  ;;  %v6443_v7 = vpop.f32.mrf.mxu3 }
 0x1c4   :  { %v12090_v10 = vld [vmem:[#allocation2 + $0x1b60] sm:$0xf0] }
 0x1c5   :  { %v13886_v11 = vld [vmem:[#allocation2 + $0x1d44] sm:$0xf]  ;;  %v12093_v17 = vor.u32 %v13822_v8, %v12090_v10  ;;  %6657 = vmatpush.bf16.msrb.mxu0 %v11837_v15  ;;  %v6406_v10 = vpop.f32.mrf.mxu0 }
 0x1c6   :  { %v12346_v12 = vld [vmem:[#allocation2 + $0x1d60] sm:$0xf0]  ;;  %v13067_v10 = vld [vmem:[#allocation2 + $0x3a4] sm:$0xf0] }
 0x1c7   :  { %v13950_v13 = vld [vmem:[#allocation2 + $0x1f44] sm:$0xf]  ;;  %v12349_v21 = vor.u32 %v13886_v11, %v12346_v12  ;;  %6670 = vmatpush.bf16.msrb.mxu1 %v12093_v17  ;;  %v6419_v12 = vpop.f32.mrf.mxu1 }
 0x1c8   :  { %v12602_v14 = vld [vmem:[#allocation2 + $0x1f60] sm:$0xf0]  ;;  %v13131_v12 = vld [vmem:[#allocation2 + $0x5a4] sm:$0xf0] }
 0x1c9   :  { %v13750_v24 = vld [vmem:[#allocation2 + $0x1904] sm:$0xf]  ;;  %v12605_v32 = vor.u32 %v13950_v13, %v12602_v14  ;;  %6683 = vmatpush.bf16.msrb.mxu2 %v12349_v21  ;;  %v14264_v13 = vadd.f32 %v6443_v7, %v6431_v6  ;;  %v6432_v16 = vpop.f32.mrf.mxu2  ;;  %v8800_v6 = vld [vmem:[#allocation2 + $0x188] sm:$0xf] }
 0x1ca   :  { %v11802_v26 = vld [vmem:[#allocation2 + $0x1920] sm:$0xf0]  ;;  %v13003_v7 = vld [vmem:[#allocation2 + $0x1a4] sm:$0xf0] }
 0x1cb   :  { %v13814_v27 = vld [vmem:[#allocation2 + $0x1b04] sm:$0xf]  ;;  %v11805_v46 = vor.u32 %v13750_v24, %v11802_v26  ;;  %6696 = vmatpush.bf16.msrb.mxu3 %v12605_v32  ;;  %v13115_v16 = vld [vmem:[#allocation2 + $0x524] sm:$0xf0] }
 0x1cc   :  { %v12058_v34 = vld [vmem:[#allocation2 + $0x1b20] sm:$0xf0] }
 0x1cd   :  { %v13878_v36 = vld [vmem:[#allocation2 + $0x1d04] sm:$0xf]  ;;  %v12061_v48 = vor.u32 %v13814_v27, %v12058_v34  ;;  %6658 = vmatpush.bf16.msrb.mxu0 %v11805_v46 }
 0x1ce   :  { %v12314_v37 = vld [vmem:[#allocation2 + $0x1d20] sm:$0xf0] }
 0x1cf   :  { %v13942_v40 = vld [vmem:[#allocation2 + $0x1f04] sm:$0xf]  ;;  %v12317_v49 = vor.u32 %v13878_v36, %v12314_v37  ;;  %6671 = vmatpush.bf16.msrb.mxu1 %v12061_v48 }
 0x1d0   :  { %v12570_v43 = vld [vmem:[#allocation2 + $0x1f20] sm:$0xf0] }
 0x1d1   :  { %v13742_v50 = vld [vmem:[#allocation2 + $0x18c4] sm:$0xf]  ;;  %v12573_v53 = vor.u32 %v13942_v40, %v12570_v43  ;;  %6684 = vmatpush.bf16.msrb.mxu2 %v12317_v49 }
 0x1d2   :  { %v11770_v51 = vld [vmem:[#allocation2 + $0x18e0] sm:$0xf0] }
 0x1d3   :  { %v13806_v52 = vld [vmem:[#allocation2 + $0x1ac4] sm:$0xf]  ;;  %v11773_v59 = vor.u32 %v13742_v50, %v11770_v51  ;;  %6697 = vmatpush.bf16.msrb.mxu3 %v12573_v53 }
 0x1d4   :  { %v12026_v54 = vld [vmem:[#allocation2 + $0x1ae0] sm:$0xf0] }
 0x1d5   :  { %v13870_v55 = vld [vmem:[#allocation2 + $0x1cc4] sm:$0xf]  ;;  %v12029_v62 = vor.u32 %v13806_v52, %v12026_v54  ;;  %6659 = vmatpush.bf16.msrb.mxu0 %v11773_v59  ;;  %v8832_v54 = vld [vmem:[#allocation2 + $0x1c8] sm:$0xf] }
 0x1d6   :  { %v12282_v56 = vld [vmem:[#allocation2 + $0x1ce0] sm:$0xf0]  ;;  %v13075_v59 = vld [vmem:[#allocation2 + $0x3e4] sm:$0xf0] }
 0x1d7   :  { %v13934_v57 = vld [vmem:[#allocation2 + $0x1ec4] sm:$0xf]  ;;  %v12285_v60 = vor.u32 %v13870_v55, %v12282_v56  ;;  %6672 = vmatpush.bf16.msrb.mxu1 %v12029_v62  ;;  %v13011_v55 = vld [vmem:[#allocation2 + $0x1e4] sm:$0xf0] }
 0x1d8   :  { %v12538_v58 = vld [vmem:[#allocation2 + $0x1ee0] sm:$0xf0]  ;;  %v9088_v56 = vld [vmem:[#allocation2 + $0x3c8] sm:$0xf] }
 0x1d9   :  { %v13734_v61 = vld [vmem:[#allocation2 + $0x1884] sm:$0xf]  ;;  %v12541_v1 = vor.u32 %v13934_v57, %v12538_v58  ;;  %6685 = vmatpush.bf16.msrb.mxu2 %v12285_v60  ;;  %v6445_v57 = vpop.f32.mrf.mxu3  ;;  %v9344_v62 = vld [vmem:[#allocation2 + $0x5c8] sm:$0xf] }
 0x1da   :  { %v11738_v63 = vld [vmem:[#allocation2 + $0x18a0] sm:$0xf0]  ;;  %v13139_v60 = vld [vmem:[#allocation2 + $0x5e4] sm:$0xf0] }
 0x1db   :  { %v13798_v0 = vld [vmem:[#allocation2 + $0x1a84] sm:$0xf]  ;;  %v11741_v11 = vor.u32 %v13734_v61, %v11738_v63  ;;  %6698 = vmatpush.bf16.msrb.mxu3 %v12541_v1  ;;  %v13203_v1 = vld [vmem:[#allocation2 + $0x7e4] sm:$0xf0] }
 0x1dc   :  { %v11994_v3 = vld [vmem:[#allocation2 + $0x1aa0] sm:$0xf0] }
 0x1dd   :  { %v13862_v4 = vld [vmem:[#allocation2 + $0x1c84] sm:$0xf]  ;;  %v11997_v14 = vor.u32 %v13798_v0, %v11994_v3  ;;  %6660 = vmatpush.bf16.msrb.mxu0 %v11741_v11  ;;  %v9600_v0 = vld [vmem:[#allocation2 + $0x7c8] sm:$0xf]  ;;  %v8833_v3 = vor.u32 %v13011_v55, %v8832_v54  ;;  %v6456_v54 = vpop.f32.mrf.mxu0 }
 0x1de   :  { %v12250_v5 = vld [vmem:[#allocation2 + $0x1ca0] sm:$0xf0]  ;;  %v9312_v11 = vld [vmem:[#allocation2 + $0x588] sm:$0xf]  ;;  %v6457_v57 = vadd.f32 %v6456_v54, %v14264_v13 }
 0x1df   :  { %v13926_v8 = vld [vmem:[#allocation2 + $0x1e84] sm:$0xf]  ;;  %v12253_v15 = vor.u32 %v13862_v4, %v12250_v5  ;;  %6673 = vmatpush.bf16.msrb.mxu1 %v11997_v14  ;;  %v9089_v4 = vor.u32 %v13075_v59, %v9088_v56  ;;  %v9345_v5 = vor.u32 %v13139_v60, %v9344_v62  ;;  %v9568_v14 = vld [vmem:[#allocation2 + $0x788] sm:$0xf]  ;;  %v6469_v59 = vpop.f32.mrf.mxu1 }
 0x1e0   :  { %v12506_v9 = vld [vmem:[#allocation2 + $0x1ea0] sm:$0xf0]  ;;  %v9504_v55 = vld [vmem:[#allocation2 + $0x708] sm:$0xf] }
 0x1e1   :  { %v13726_v17 = vld [vmem:[#allocation2 + $0x1844] sm:$0xf]  ;;  %v12509_v26 = vor.u32 %v13926_v8, %v12506_v9  ;;  %6686 = vmatpush.bf16.msrb.mxu2 %v12253_v15  ;;  %v9056_v8 = vld [vmem:[#allocation2 + $0x388] sm:$0xf]  ;;  %v9601_v9 = vor.u32 %v13203_v1, %v9600_v0 }
 0x1e2   :  { %v11706_v21 = vld [vmem:[#allocation2 + $0x1860] sm:$0xf0]  ;;  %v13195_v15 = vld [vmem:[#allocation2 + $0x7a4] sm:$0xf0] }
 0x1e3   :  { %v13790_v24 = vld [vmem:[#allocation2 + $0x1a44] sm:$0xf]  ;;  %v11709_v39 = vor.u32 %v13726_v17, %v11706_v21  ;;  %6699 = vmatpush.bf16.msrb.mxu3 %v12509_v26  ;;  %v8801_v17 = vor.u32 %v13003_v7, %v8800_v6  ;;  %v9057_v21 = vor.u32 %v13067_v10, %v9056_v8  ;;  %v8768_v26 = vld [vmem:[#allocation2 + $0x148] sm:$0xf] }
 0x1e4   :  { %v11962_v27 = vld [vmem:[#allocation2 + $0x1a60] sm:$0xf0]  ;;  %v13179_v56 = vld [vmem:[#allocation2 + $0x724] sm:$0xf0] }
 0x1e5   :  { %v13854_v32 = vld [vmem:[#allocation2 + $0x1c44] sm:$0xf]  ;;  %v11965_v45 = vor.u32 %v13790_v24, %v11962_v27  ;;  %6661 = vmatpush.bf16.msrb.mxu0 %v11709_v39  ;;  %v9313_v24 = vor.u32 %v13131_v12, %v9312_v11  ;;  %v12995_v27 = vld [vmem:[#allocation2 + $0x164] sm:$0xf0]  ;;  %v9505_v1 = vor.u32 %v13179_v56, %v9504_v55 }
 0x1e6   :  { %v12218_v34 = vld [vmem:[#allocation2 + $0x1c60] sm:$0xf0]  ;;  %v13123_v39 = vld [vmem:[#allocation2 + $0x564] sm:$0xf0] }
 0x1e7   :  { %v13918_v36 = vld [vmem:[#allocation2 + $0x1e44] sm:$0xf]  ;;  %v12221_v46 = vor.u32 %v13854_v32, %v12218_v34  ;;  %6674 = vmatpush.bf16.msrb.mxu1 %v11965_v45  ;;  %v9024_v32 = vld [vmem:[#allocation2 + $0x348] sm:$0xf]  ;;  %v9569_v34 = vor.u32 %v13195_v15, %v9568_v14  ;;  %v8769_v45 = vor.u32 %v12995_v27, %v8768_v26  ;;  %v6482_v15 = vpop.f32.mrf.mxu2  ;;  %v6495_v27 = vpop.f32.mrf.mxu3 }
 0x1e8   :  { %v12474_v37 = vld [vmem:[#allocation2 + $0x1e60] sm:$0xf0]  ;;  %v8960_v0 = vld [vmem:[#allocation2 + $0x2c8] sm:$0xf] }
 0x1e9   :  { %v13718_v40 = vld [vmem:[#allocation2 + $0x1804] sm:$0xf]  ;;  %v12477_v50 = vor.u32 %v13918_v36, %v12474_v37  ;;  %6687 = vmatpush.bf16.msrb.mxu2 %v12221_v46  ;;  %v13059_v36 = vld [vmem:[#allocation2 + $0x364] sm:$0xf0] }
 0x1ea   :  { %v11674_v43 = vld [vmem:[#allocation2 + $0x1820] sm:$0xf0]  ;;  %v9280_v37 = vld [vmem:[#allocation2 + $0x548] sm:$0xf]  ;;  %v9025_v46 = vor.u32 %v13059_v36, %v9024_v32  ;;  %v6458_v36 = vpop.f32.mrf.mxu0 }
 0x1eb   :  { %v13782_v47 = vld [vmem:[#allocation2 + $0x1a04] sm:$0xf]  ;;  %v11677_v58 = vor.u32 %v13718_v40, %v11674_v43  ;;  %6700 = vmatpush.bf16.msrb.mxu3 %v12477_v50  ;;  %v9536_v40 = vld [vmem:[#allocation2 + $0x748] sm:$0xf] }
 0x1ec   :  { %v11930_v48 = vld [vmem:[#allocation2 + $0x1a20] sm:$0xf0]  ;;  %v13187_v43 = vld [vmem:[#allocation2 + $0x764] sm:$0xf0] }
 0x1ed   :  { %v13846_v49 = vld [vmem:[#allocation2 + $0x1c04] sm:$0xf]  ;;  %v11933_v61 = vor.u32 %v13782_v47, %v11930_v48  ;;  %6662 = vmatpush.bf16.msrb.mxu0 %v11677_v58  ;;  %v9281_v47 = vor.u32 %v13123_v39, %v9280_v37  ;;  %v8736_v48 = vld [vmem:[#allocation2 + $0x108] sm:$0xf]  ;;  %v6471_v39 = vpop.f32.mrf.mxu1 }
 0x1ee   :  { %v12186_v51 = vld [vmem:[#allocation2 + $0x1c20] sm:$0xf0]  ;;  %v8992_v50 = vld [vmem:[#allocation2 + $0x308] sm:$0xf] }
 0x1ef   :  { %v13910_v52 = vld [vmem:[#allocation2 + $0x1e04] sm:$0xf]  ;;  %v12189_v63 = vor.u32 %v13846_v49, %v12186_v51  ;;  %6675 = vmatpush.bf16.msrb.mxu1 %v11933_v61  ;;  %v12987_v49 = vld [vmem:[#allocation2 + $0x124] sm:$0xf0]  ;;  %v9537_v51 = vor.u32 %v13187_v43, %v9536_v40 }
 0x1f0   :  { %v12442_v53 = vld [vmem:[#allocation2 + $0x1e20] sm:$0xf0]  ;;  %6663 = vmatmul.bf16.vlgmr.msrb.gmra.mxu0 %v14234_v23  ;;  %v8737_v58 = vor.u32 %v12987_v49, %v8736_v48  ;;  %v8704_v61 = vld [vmem:[#allocation2 + $0xc8] sm:$0xf] }
 0x1f1   :  { %v12445_v2 = vor.u32 %v13910_v52, %v12442_v53  ;;  %6688 = vmatpush.bf16.msrb.mxu2 %v12189_v63  ;;  %6707 = vmatpush.bf16.msra.mxu0 %v8833_v3  ;;  %v13051_v52 = vld [vmem:[#allocation2 + $0x324] sm:$0xf0] }
 0x1f2   :  { %6676 = vmatmul.bf16.vlgmr.msrb.gmra.mxu1 %v14238_v31  ;;  %v9248_v53 = vld [vmem:[#allocation2 + $0x508] sm:$0xf]  ;;  %v8993_v62 = vor.u32 %v13051_v52, %v8992_v50 }
 0x1f3   :  { %6701 = vmatpush.bf16.msrb.mxu3 %v12445_v2  ;;  %6720 = vmatpush.bf16.msra.mxu1 %v9089_v4  ;;  %v9249_v60 = vor.u32 %v13115_v16, %v9248_v53  ;;  %v12979_v63 = vld [vmem:[#allocation2 + $0xe4] sm:$0xf0]  ;;  %v6470_v2 = vadd.f32 %v6469_v59, %v6457_v57 }
 0x1f4   :  { %6689 = vmatmul.bf16.vlgmr.msrb.gmra.mxu2 %v14236_v28  ;;  %v13043_v3 = vld [vmem:[#allocation2 + $0x2e4] sm:$0xf0]  ;;  %v8705_v8 = vor.u32 %v12979_v63, %v8704_v61 }
 0x1f5   :  { %6733 = vmatpush.bf16.msra.mxu2 %v9345_v5  ;;  %6708 = vmatpush.bf16.msra.mxu0 %v8801_v17  ;;  %v9216_v4 = vld [vmem:[#allocation2 + $0x4c8] sm:$0xf]  ;;  %v8961_v13 = vor.u32 %v13043_v3, %v8960_v0  ;;  %v6483_v26 = vadd.f32 %v6482_v15, %v6470_v2  ;;  %v6484_v2 = vpop.f32.mrf.mxu2 }
 0x1f6   :  { %6702 = vmatmul.bf16.vlgmr.msrb.gmra.mxu3 %v14240_v35  ;;  %v13107_v5 = vld [vmem:[#allocation2 + $0x4e4] sm:$0xf0] }
 0x1f7   :  { %6746 = vmatpush.bf16.msra.mxu3 %v9601_v9  ;;  %6721 = vmatpush.bf16.msra.mxu1 %v9057_v21  ;;  %v9472_v6 = vld [vmem:[#allocation2 + $0x6c8] sm:$0xf]  ;;  %v9217_v9 = vor.u32 %v13107_v5, %v9216_v4  ;;  %v14271_v40 = vadd.f32 %v6495_v27, %v6483_v26 }
 0x1f8   :  { %v13171_v7 = vld [vmem:[#allocation2 + $0x6e4] sm:$0xf0] }
 0x1f9   :  { %6734 = vmatpush.bf16.msra.mxu2 %v9313_v24  ;;  %6709 = vmatpush.bf16.msra.mxu0 %v8769_v45  ;;  %v8672_v10 = vld [vmem:[#allocation2 + $0x88] sm:$0xf]  ;;  %v9473_v14 = vor.u32 %v13171_v7, %v9472_v6  ;;  %v6497_v6 = vpop.f32.mrf.mxu3 }
 0x1fa   :  { %v12971_v11 = vld [vmem:[#allocation2 + $0xa4] sm:$0xf0] }
 0x1fb   :  { %6747 = vmatpush.bf16.msra.mxu3 %v9569_v34  ;;  %6722 = vmatpush.bf16.msra.mxu1 %v9025_v46  ;;  %v8928_v12 = vld [vmem:[#allocation2 + $0x288] sm:$0xf]  ;;  %v8673_v37 = vor.u32 %v12971_v11, %v8672_v10 }
 0x1fc   :  { %v13035_v17 = vld [vmem:[#allocation2 + $0x2a4] sm:$0xf0] }
 0x1fd   :  { %6735 = vmatpush.bf16.msra.mxu2 %v9281_v47  ;;  %6710 = vmatpush.bf16.msra.mxu0 %v8737_v58  ;;  %v9184_v21 = vld [vmem:[#allocation2 + $0x488] sm:$0xf]  ;;  %v8929_v43 = vor.u32 %v13035_v17, %v8928_v12 }
 0x1fe   :  { %v13099_v24 = vld [vmem:[#allocation2 + $0x4a4] sm:$0xf0] }
 0x1ff   :  { %6748 = vmatpush.bf16.msra.mxu3 %v9537_v51  ;;  %6723 = vmatpush.bf16.msra.mxu1 %v8993_v62  ;;  %v9440_v32 = vld [vmem:[#allocation2 + $0x688] sm:$0xf]  ;;  %v9185_v45 = vor.u32 %v13099_v24, %v9184_v21 }
 0x200   :  { %v13163_v34 = vld [vmem:[#allocation2 + $0x6a4] sm:$0xf0] }
 0x201   :  { %6736 = vmatpush.bf16.msra.mxu2 %v9249_v60  ;;  %6711 = vmatpush.bf16.msra.mxu0 %v8705_v8  ;;  %v8640_v46 = vld [vmem:[#allocation2 + $0x48] sm:$0xf]  ;;  %v9441_v49 = vor.u32 %v13163_v34, %v9440_v32 }
 0x202   :  { %v12963_v47 = vld [vmem:[#allocation2 + $0x64] sm:$0xf0] }
 0x203   :  { %6749 = vmatpush.bf16.msra.mxu3 %v9505_v1  ;;  %6724 = vmatpush.bf16.msra.mxu1 %v8961_v13  ;;  %v8896_v48 = vld [vmem:[#allocation2 + $0x248] sm:$0xf]  ;;  %v8641_v54 = vor.u32 %v12963_v47, %v8640_v46 }
 0x204   :  { %v13027_v50 = vld [vmem:[#allocation2 + $0x264] sm:$0xf0] }
 0x205   :  { %6737 = vmatpush.bf16.msra.mxu2 %v9217_v9  ;;  %v9152_v51 = vld [vmem:[#allocation2 + $0x448] sm:$0xf]  ;;  %6712 = vmatpush.bf16.msra.mxu0 %v8673_v37  ;;  %v8897_v57 = vor.u32 %v13027_v50, %v8896_v48 }
 0x206   :  { %v13091_v52 = vld [vmem:[#allocation2 + $0x464] sm:$0xf0] }
 0x207   :  { %6750 = vmatpush.bf16.msra.mxu3 %v9473_v14  ;;  %v9408_v53 = vld [vmem:[#allocation2 + $0x648] sm:$0xf]  ;;  %6725 = vmatpush.bf16.msra.mxu1 %v8929_v43  ;;  %v9153_v58 = vor.u32 %v13091_v52, %v9152_v51 }
 0x208   :  { %v13155_v16 = vld [vmem:[#allocation2 + $0x664] sm:$0xf0] }
 0x209   :  { %v8608_v55 = vld [vmem:[#allocation2 + $0x8] sm:$0xf]  ;;  %6738 = vmatpush.bf16.msra.mxu2 %v9185_v45  ;;  %v9409_v61 = vor.u32 %v13155_v16, %v9408_v53  ;;  %6713 = vmatpush.bf16.msra.mxu0 %v8641_v54 }
 0x20a   :  { %v12955_v56 = vld [vmem:[#allocation2 + $0x24] sm:$0xf0] }
 0x20b   :  { %v8864_v59 = vld [vmem:[#allocation2 + $0x208] sm:$0xf]  ;;  %6751 = vmatpush.bf16.msra.mxu3 %v9441_v49  ;;  %v8609_v7 = vor.u32 %v12955_v56, %v8608_v55  ;;  %6726 = vmatpush.bf16.msra.mxu1 %v8897_v57 }
 0x20c   :  { %v13019_v62 = vld [vmem:[#allocation2 + $0x224] sm:$0xf0] }
 0x20d   :  { %v9120_v60 = vld [vmem:[#allocation2 + $0x408] sm:$0xf]  ;;  %6739 = vmatpush.bf16.msra.mxu2 %v9153_v58  ;;  %v8865_v10 = vor.u32 %v13019_v62, %v8864_v59  ;;  %6714 = vmatpush.bf16.msra.mxu0 %v8609_v7 }
 0x20e   :  { %v13083_v63 = vld [vmem:[#allocation2 + $0x424] sm:$0xf0] }
 0x20f   :  { %v9376_v0 = vld [vmem:[#allocation2 + $0x608] sm:$0xf]  ;;  %v9121_v11 = vor.u32 %v13083_v63, %v9120_v60  ;;  %6752 = vmatpush.bf16.msra.mxu3 %v9409_v61  ;;  %6727 = vmatpush.bf16.msra.mxu1 %v8865_v10  ;;  %v14046_v63 = vld [vmem:[#allocation4] sm:$0xff] }
 0x210   :  { %v13147_v1 = vld [vmem:[#allocation2 + $0x624] sm:$0xf0]  ;;  %6715 = vmatmul.bf16.vlgmr.msra.gmra.mxu0 %v14182_v19 }
 0x211   :  { %v9856_v3 = vld [vmem:[#allocation2 + $0x9c8] sm:$0xf]  ;;  %v9377_v15 = vor.u32 %v13147_v1, %v9376_v0  ;;  %6740 = vmatpush.bf16.msra.mxu2 %v9121_v11  ;;  %v1100_v0 = vperm.slane %v14046_v63, 1 }
 0x212   :  { %v13267_v4 = vld [vmem:[#allocation2 + $0x9e4] sm:$0xf0]  ;;  %6728 = vmatmul.bf16.vlgmr.msra.gmra.mxu1 %v14186_v22 }
 0x213   :  { %v10112_v5 = vld [vmem:[#allocation2 + $0xbc8] sm:$0xf]  ;;  %v9857_v17 = vor.u32 %v13267_v4, %v9856_v3  ;;  %6753 = vmatpush.bf16.msra.mxu3 %v9377_v15  ;;  %v6521_v15 = vpop.f32.mrf.mxu1 }
 0x214   :  { %v13331_v8 = vld [vmem:[#allocation2 + $0xbe4] sm:$0xf0]  ;;  %6741 = vmatmul.bf16.vlgmr.msra.gmra.mxu2 %v14180_v18 }
 0x215   :  { %v10368_v13 = vld [vmem:[#allocation2 + $0xdc8] sm:$0xf]  ;;  %v10113_v21 = vor.u32 %v13331_v8, %v10112_v5  ;;  %6759 = vmatpush.bf16.msrb.mxu0 %v9857_v17  ;;  %v6508_v8 = vpop.f32.mrf.mxu0 }
 0x216   :  { %v13395_v9 = vld [vmem:[#allocation2 + $0xde4] sm:$0xf0]  ;;  %6754 = vmatmul.bf16.vlgmr.msra.gmra.mxu3 %v14184_v20 }
 0x217   :  { %v10624_v12 = vld [vmem:[#allocation2 + $0xfc8] sm:$0xf]  ;;  %v10369_v24 = vor.u32 %v13395_v9, %v10368_v13  ;;  %6772 = vmatpush.bf16.msrb.mxu1 %v10113_v21 }
 0x218   :  { %v13459_v14 = vld [vmem:[#allocation2 + $0xfe4] sm:$0xf0] }
 0x219   :  { %v9824_v26 = vld [vmem:[#allocation2 + $0x988] sm:$0xf]  ;;  %v10625_v34 = vor.u32 %v13459_v14, %v10624_v12  ;;  %6785 = vmatpush.bf16.msrb.mxu2 %v10369_v24  ;;  %v6509_v14 = vadd.f32 %v6508_v8, %v1100_v0 }
 0x21a   :  { %v13259_v27 = vld [vmem:[#allocation2 + $0x9a4] sm:$0xf0] }
 0x21b   :  { %v10080_v32 = vld [vmem:[#allocation2 + $0xb88] sm:$0xf]  ;;  %v9825_v46 = vor.u32 %v13259_v27, %v9824_v26  ;;  %6798 = vmatpush.bf16.msrb.mxu3 %v10625_v34  ;;  %v6522_v34 = vadd.f32 %v6521_v15, %v6509_v14  ;;  %v6523_v63 = vpop.f32.mrf.mxu1 }
 0x21c   :  { %v13323_v36 = vld [vmem:[#allocation2 + $0xba4] sm:$0xf0] }
 0x21d   :  { %v10336_v37 = vld [vmem:[#allocation2 + $0xd88] sm:$0xf]  ;;  %v10081_v47 = vor.u32 %v13323_v36, %v10080_v32  ;;  %6760 = vmatpush.bf16.msrb.mxu0 %v9825_v46 }
 0x21e   :  { %v13387_v39 = vld [vmem:[#allocation2 + $0xda4] sm:$0xf0] }
 0x21f   :  { %v10592_v43 = vld [vmem:[#allocation2 + $0xf88] sm:$0xf]  ;;  %v10337_v48 = vor.u32 %v13387_v39, %v10336_v37  ;;  %6773 = vmatpush.bf16.msrb.mxu1 %v10081_v47  ;;  %v6534_v47 = vpop.f32.mrf.mxu2 }
 0x220   :  { %v13451_v45 = vld [vmem:[#allocation2 + $0xfa4] sm:$0xf0] }
 0x221   :  { %v9792_v49 = vld [vmem:[#allocation2 + $0x948] sm:$0xf]  ;;  %v10593_v52 = vor.u32 %v13451_v45, %v10592_v43  ;;  %6786 = vmatpush.bf16.msrb.mxu2 %v10337_v48 }
 0x222   :  { %v13251_v50 = vld [vmem:[#allocation2 + $0x964] sm:$0xf0] }
 0x223   :  { %v10048_v51 = vld [vmem:[#allocation2 + $0xb48] sm:$0xf]  ;;  %v9793_v57 = vor.u32 %v13251_v50, %v9792_v49  ;;  %6799 = vmatpush.bf16.msrb.mxu3 %v10593_v52  ;;  %v6535_v52 = vadd.f32 %v6534_v47, %v6522_v34 }
 0x224   :  { %v13315_v53 = vld [vmem:[#allocation2 + $0xb64] sm:$0xf0] }
 0x225   :  { %v10304_v16 = vld [vmem:[#allocation2 + $0xd48] sm:$0xf]  ;;  %v10049_v59 = vor.u32 %v13315_v53, %v10048_v51  ;;  %6761 = vmatpush.bf16.msrb.mxu0 %v9793_v57  ;;  %v6547_v53 = vpop.f32.mrf.mxu3  ;;  %v6510_v57 = vpop.f32.mrf.mxu0 }
 0x226   :  { %v13379_v54 = vld [vmem:[#allocation2 + $0xd64] sm:$0xf0] }
 0x227   :  { %v10560_v55 = vld [vmem:[#allocation2 + $0xf48] sm:$0xf]  ;;  %v10305_v62 = vor.u32 %v13379_v54, %v10304_v16  ;;  %6774 = vmatpush.bf16.msrb.mxu1 %v10049_v59  ;;  %v6536_v14 = vpop.f32.mrf.mxu2 }
 0x228   :  { %v13443_v56 = vld [vmem:[#allocation2 + $0xf64] sm:$0xf0] }
 0x229   :  { %v9760_v58 = vld [vmem:[#allocation2 + $0x908] sm:$0xf]  ;;  %v10561_v1 = vor.u32 %v13443_v56, %v10560_v55  ;;  %6787 = vmatpush.bf16.msrb.mxu2 %v10305_v62  ;;  %v14277_v56 = vadd.f32 %v6547_v53, %v6535_v52 }
 0x22a   :  { %v13243_v60 = vld [vmem:[#allocation2 + $0x924] sm:$0xf0] }
 0x22b   :  { %v10016_v61 = vld [vmem:[#allocation2 + $0xb08] sm:$0xf]  ;;  %v9761_v7 = vor.u32 %v13243_v60, %v9760_v58  ;;  %6800 = vmatpush.bf16.msrb.mxu3 %v10561_v1 }
 0x22c   :  { %v13307_v2 = vld [vmem:[#allocation2 + $0xb24] sm:$0xf0] }
 0x22d   :  { %v10272_v3 = vld [vmem:[#allocation2 + $0xd08] sm:$0xf]  ;;  %v10017_v13 = vor.u32 %v13307_v2, %v10016_v61  ;;  %6762 = vmatpush.bf16.msrb.mxu0 %v9761_v7 }
 0x22e   :  { %v13371_v4 = vld [vmem:[#allocation2 + $0xd24] sm:$0xf0] }
 0x22f   :  { %v10528_v5 = vld [vmem:[#allocation2 + $0xf08] sm:$0xf]  ;;  %v10273_v9 = vor.u32 %v13371_v4, %v10272_v3  ;;  %6775 = vmatpush.bf16.msrb.mxu1 %v10017_v13 }
 0x230   :  { %v13435_v6 = vld [vmem:[#allocation2 + $0xf24] sm:$0xf0] }
 0x231   :  { %v9728_v10 = vld [vmem:[#allocation2 + $0x8c8] sm:$0xf]  ;;  %v10529_v17 = vor.u32 %v13435_v6, %v10528_v5  ;;  %6788 = vmatpush.bf16.msrb.mxu2 %v10273_v9 }
 0x232   :  { %v13235_v11 = vld [vmem:[#allocation2 + $0x8e4] sm:$0xf0] }
 0x233   :  { %v9984_v12 = vld [vmem:[#allocation2 + $0xac8] sm:$0xf]  ;;  %v9729_v36 = vor.u32 %v13235_v11, %v9728_v10  ;;  %6801 = vmatpush.bf16.msrb.mxu3 %v10529_v17 }
 0x234   :  { %v13299_v21 = vld [vmem:[#allocation2 + $0xae4] sm:$0xf0] }
 0x235   :  { %v10240_v24 = vld [vmem:[#allocation2 + $0xcc8] sm:$0xf]  ;;  %v9985_v37 = vor.u32 %v13299_v21, %v9984_v12  ;;  %6763 = vmatpush.bf16.msrb.mxu0 %v9729_v36 }
 0x236   :  { %v13363_v26 = vld [vmem:[#allocation2 + $0xce4] sm:$0xf0] }
 0x237   :  { %v10496_v27 = vld [vmem:[#allocation2 + $0xec8] sm:$0xf]  ;;  %v10241_v39 = vor.u32 %v13363_v26, %v10240_v24  ;;  %6776 = vmatpush.bf16.msrb.mxu1 %v9985_v37  ;;  %v6549_v26 = vpop.f32.mrf.mxu3 }
 0x238   :  { %v13427_v32 = vld [vmem:[#allocation2 + $0xee4] sm:$0xf0] }
 0x239   :  { %v9696_v43 = vld [vmem:[#allocation2 + $0x888] sm:$0xf]  ;;  %v10497_v48 = vor.u32 %v13427_v32, %v10496_v27  ;;  %6789 = vmatpush.bf16.msrb.mxu2 %v10241_v39 }
 0x23a   :  { %v13227_v45 = vld [vmem:[#allocation2 + $0x8a4] sm:$0xf0] }
 0x23b   :  { %v9952_v46 = vld [vmem:[#allocation2 + $0xa88] sm:$0xf]  ;;  %v9697_v55 = vor.u32 %v13227_v45, %v9696_v43  ;;  %6802 = vmatpush.bf16.msrb.mxu3 %v10497_v48 }
 0x23c   :  { %v13291_v49 = vld [vmem:[#allocation2 + $0xaa4] sm:$0xf0] }
 0x23d   :  { %v10208_v50 = vld [vmem:[#allocation2 + $0xc88] sm:$0xf]  ;;  %v9953_v58 = vor.u32 %v13291_v49, %v9952_v46  ;;  %6764 = vmatpush.bf16.msrb.mxu0 %v9697_v55 }
 0x23e   :  { %v13355_v51 = vld [vmem:[#allocation2 + $0xca4] sm:$0xf0] }
 0x23f   :  { %v10464_v16 = vld [vmem:[#allocation2 + $0xe88] sm:$0xf]  ;;  %v10209_v59 = vor.u32 %v13355_v51, %v10208_v50  ;;  %6777 = vmatpush.bf16.msrb.mxu1 %v9953_v58 }
 0x240   :  { %v13419_v54 = vld [vmem:[#allocation2 + $0xea4] sm:$0xf0] }
 0x241   :  { %v9664_v62 = vld [vmem:[#allocation2 + $0x848] sm:$0xf]  ;;  %v10465_v0 = vor.u32 %v13419_v54, %v10464_v16  ;;  %6790 = vmatpush.bf16.msrb.mxu2 %v10209_v59 }
 0x242   :  { %v13219_v60 = vld [vmem:[#allocation2 + $0x864] sm:$0xf0] }
 0x243   :  { %v9920_v61 = vld [vmem:[#allocation2 + $0xa48] sm:$0xf]  ;;  %v9665_v6 = vor.u32 %v13219_v60, %v9664_v62  ;;  %6803 = vmatpush.bf16.msrb.mxu3 %v10465_v0 }
 0x244   :  { %v13283_v1 = vld [vmem:[#allocation2 + $0xa64] sm:$0xf0] }
 0x245   :  { %v10176_v2 = vld [vmem:[#allocation2 + $0xc48] sm:$0xf]  ;;  %v9921_v13 = vor.u32 %v13283_v1, %v9920_v61  ;;  %6765 = vmatpush.bf16.msrb.mxu0 %v9665_v6 }
 0x246   :  { %v13347_v3 = vld [vmem:[#allocation2 + $0xc64] sm:$0xf0] }
 0x247   :  { %v10432_v4 = vld [vmem:[#allocation2 + $0xe48] sm:$0xf]  ;;  %v10177_v9 = vor.u32 %v13347_v3, %v10176_v2  ;;  %6778 = vmatpush.bf16.msrb.mxu1 %v9921_v13 }
 0x248   :  { %v13411_v5 = vld [vmem:[#allocation2 + $0xe64] sm:$0xf0] }
 0x249   :  { %v9632_v7 = vld [vmem:[#allocation2 + $0x808] sm:$0xf]  ;;  %v10433_v15 = vor.u32 %v13411_v5, %v10432_v4  ;;  %6791 = vmatpush.bf16.msrb.mxu2 %v10177_v9 }
 0x24a   :  { %v13211_v8 = vld [vmem:[#allocation2 + $0x824] sm:$0xf0] }
 0x24b   :  { %v9888_v10 = vld [vmem:[#allocation2 + $0xa08] sm:$0xf]  ;;  %v9633_v36 = vor.u32 %v13211_v8, %v9632_v7  ;;  %6804 = vmatpush.bf16.msrb.mxu3 %v10433_v15 }
 0x24c   :  { %v13275_v11 = vld [vmem:[#allocation2 + $0xa24] sm:$0xf0] }
 0x24d   :  { %v10144_v12 = vld [vmem:[#allocation2 + $0xc08] sm:$0xf]  ;;  %v9889_v45 = vor.u32 %v13275_v11, %v9888_v10  ;;  %6766 = vmatpush.bf16.msrb.mxu0 %v9633_v36  ;;  %v6560_v36 = vpop.f32.mrf.mxu0 }
 0x24e   :  { %v13339_v17 = vld [vmem:[#allocation2 + $0xc24] sm:$0xf0] }
 0x24f   :  { %v10400_v21 = vld [vmem:[#allocation2 + $0xe08] sm:$0xf]  ;;  %v10145_v46 = vor.u32 %v13339_v17, %v10144_v12  ;;  %6779 = vmatpush.bf16.msrb.mxu1 %v9889_v45 }
 0x250   :  { %v13403_v24 = vld [vmem:[#allocation2 + $0xe24] sm:$0xf0]  ;;  %6767 = vmatmul.bf16.vlgmr.msrb.gmra.mxu0 %v14200_v41 }
 0x251   :  { %v10880_v27 = vld [vmem:[#allocation2 + $0x11c8] sm:$0xf]  ;;  %v10401_v49 = vor.u32 %v13403_v24, %v10400_v21  ;;  %6792 = vmatpush.bf16.msrb.mxu2 %v10145_v46 }
 0x252   :  { %v13523_v32 = vld [vmem:[#allocation2 + $0x11e4] sm:$0xf0]  ;;  %6780 = vmatmul.bf16.vlgmr.msrb.gmra.mxu1 %v14204_v44 }
 0x253   :  { %v11136_v34 = vld [vmem:[#allocation2 + $0x13c8] sm:$0xf]  ;;  %v10881_v50 = vor.u32 %v13523_v32, %v10880_v27  ;;  %6805 = vmatpush.bf16.msrb.mxu3 %v10401_v49 }
 0x254   :  { %v13587_v37 = vld [vmem:[#allocation2 + $0x13e4] sm:$0xf0]  ;;  %6793 = vmatmul.bf16.vlgmr.msrb.gmra.mxu2 %v14198_v38 }
 0x255   :  { %v11392_v39 = vld [vmem:[#allocation2 + $0x15c8] sm:$0xf]  ;;  %v11137_v51 = vor.u32 %v13587_v37, %v11136_v34  ;;  %6811 = vmatpush.bf16.msra.mxu0 %v10881_v50 }
 0x256   :  { %v13651_v43 = vld [vmem:[#allocation2 + $0x15e4] sm:$0xf0]  ;;  %6806 = vmatmul.bf16.vlgmr.msrb.gmra.mxu3 %v14202_v42 }
 0x257   :  { %v11648_v47 = vld [vmem:[#allocation2 + $0x17c8] sm:$0xf]  ;;  %v11393_v52 = vor.u32 %v13651_v43, %v11392_v39  ;;  %6824 = vmatpush.bf16.msra.mxu1 %v11137_v51 }
 0x258   :  { %v13715_v48 = vld [vmem:[#allocation2 + $0x17e4] sm:$0xf0] }
 0x259   :  { %v10848_v53 = vld [vmem:[#allocation2 + $0x1188] sm:$0xf]  ;;  %v11649_v55 = vor.u32 %v13715_v48, %v11648_v47  ;;  %6837 = vmatpush.bf16.msra.mxu2 %v11393_v52  ;;  %v6561_v47 = vadd.f32 %v6560_v36, %v14277_v56  ;;  %v6573_v48 = vpop.f32.mrf.mxu1 }
 0x25a   :  { %v13515_v16 = vld [vmem:[#allocation2 + $0x11a4] sm:$0xf0] }
 0x25b   :  { %v11104_v54 = vld [vmem:[#allocation2 + $0x1388] sm:$0xf]  ;;  %v10849_v61 = vor.u32 %v13515_v16, %v10848_v53  ;;  %6850 = vmatpush.bf16.msra.mxu3 %v11649_v55 }
 0x25c   :  { %v13579_v57 = vld [vmem:[#allocation2 + $0x13a4] sm:$0xf0] }
 0x25d   :  { %v11360_v58 = vld [vmem:[#allocation2 + $0x1588] sm:$0xf]  ;;  %v11105_v63 = vor.u32 %v13579_v57, %v11104_v54  ;;  %6812 = vmatpush.bf16.msra.mxu0 %v10849_v61  ;;  %v6574_v54 = vadd.f32 %v6573_v48, %v6561_v47  ;;  %v6586_v61 = vpop.f32.mrf.mxu2 }
 0x25e   :  { %v13643_v59 = vld [vmem:[#allocation2 + $0x15a4] sm:$0xf0] }
 0x25f   :  { %v11616_v62 = vld [vmem:[#allocation2 + $0x1788] sm:$0xf]  ;;  %v11361_v0 = vor.u32 %v13643_v59, %v11360_v58  ;;  %6825 = vmatpush.bf16.msra.mxu1 %v11105_v63 }
 0x260   :  { %v13707_v60 = vld [vmem:[#allocation2 + $0x17a4] sm:$0xf0] }
 0x261   :  { %v10816_v1 = vld [vmem:[#allocation2 + $0x1148] sm:$0xf]  ;;  %v11617_v4 = vor.u32 %v13707_v60, %v11616_v62  ;;  %6838 = vmatpush.bf16.msra.mxu2 %v11361_v0 }
 0x262   :  { %v13507_v2 = vld [vmem:[#allocation2 + $0x1164] sm:$0xf0] }
 0x263   :  { %v11072_v3 = vld [vmem:[#allocation2 + $0x1348] sm:$0xf]  ;;  %v10817_v9 = vor.u32 %v13507_v2, %v10816_v1  ;;  %6851 = vmatpush.bf16.msra.mxu3 %v11617_v4  ;;  %v6587_v2 = vadd.f32 %v6586_v61, %v6574_v54 }
 0x264   :  { %v13571_v5 = vld [vmem:[#allocation2 + $0x1364] sm:$0xf0] }
 0x265   :  { %v11328_v6 = vld [vmem:[#allocation2 + $0x1548] sm:$0xf]  ;;  %v11073_v10 = vor.u32 %v13571_v5, %v11072_v3  ;;  %6813 = vmatpush.bf16.msra.mxu0 %v10817_v9  ;;  %v6599_v3 = vpop.f32.mrf.mxu3  ;;  %v6588_v47 = vpop.f32.mrf.mxu2 }
 0x266   :  { %v13635_v7 = vld [vmem:[#allocation2 + $0x1564] sm:$0xf0] }
 0x267   :  { %v11584_v8 = vld [vmem:[#allocation2 + $0x1748] sm:$0xf]  ;;  %v11329_v11 = vor.u32 %v13635_v7, %v11328_v6  ;;  %6826 = vmatpush.bf16.msra.mxu1 %v11073_v10  ;;  %v14284_v7 = vadd.f32 %v6599_v3, %v6587_v2 }
 0x268   :  { %v13699_v13 = vld [vmem:[#allocation2 + $0x1764] sm:$0xf0] }
 0x269   :  { %v10784_v12 = vld [vmem:[#allocation2 + $0x1108] sm:$0xf]  ;;  %v11585_v17 = vor.u32 %v13699_v13, %v11584_v8  ;;  %6839 = vmatpush.bf16.msra.mxu2 %v11329_v11  ;;  %v6562_v8 = vpop.f32.mrf.mxu0 }
 0x26a   :  { %v13499_v14 = vld [vmem:[#allocation2 + $0x1124] sm:$0xf0] }
 0x26b   :  { %v11040_v15 = vld [vmem:[#allocation2 + $0x1308] sm:$0xf]  ;;  %v10785_v34 = vor.u32 %v13499_v14, %v10784_v12  ;;  %6852 = vmatpush.bf16.msra.mxu3 %v11585_v17  ;;  %v6575_v14 = vpop.f32.mrf.mxu1 }
 0x26c   :  { %v13563_v21 = vld [vmem:[#allocation2 + $0x1324] sm:$0xf0] }
 0x26d   :  { %v11296_v24 = vld [vmem:[#allocation2 + $0x1508] sm:$0xf]  ;;  %v11041_v37 = vor.u32 %v13563_v21, %v11040_v15  ;;  %6814 = vmatpush.bf16.msra.mxu0 %v10785_v34 }
 0x26e   :  { %v13627_v26 = vld [vmem:[#allocation2 + $0x1524] sm:$0xf0] }
 0x26f   :  { %v11552_v27 = vld [vmem:[#allocation2 + $0x1708] sm:$0xf]  ;;  %v11297_v39 = vor.u32 %v13627_v26, %v11296_v24  ;;  %6827 = vmatpush.bf16.msra.mxu1 %v11041_v37 }
 0x270   :  { %v13691_v32 = vld [vmem:[#allocation2 + $0x1724] sm:$0xf0] }
 0x271   :  { %v10752_v43 = vld [vmem:[#allocation2 + $0x10c8] sm:$0xf]  ;;  %v11553_v49 = vor.u32 %v13691_v32, %v11552_v27  ;;  %6840 = vmatpush.bf16.msra.mxu2 %v11297_v39 }
 0x272   :  { %v13491_v45 = vld [vmem:[#allocation2 + $0x10e4] sm:$0xf0] }
 0x273   :  { %v11008_v46 = vld [vmem:[#allocation2 + $0x12c8] sm:$0xf]  ;;  %v10753_v55 = vor.u32 %v13491_v45, %v10752_v43  ;;  %6853 = vmatpush.bf16.msra.mxu3 %v11553_v49 }
 0x274   :  { %v13555_v50 = vld [vmem:[#allocation2 + $0x12e4] sm:$0xf0] }
 0x275   :  { %v11264_v51 = vld [vmem:[#allocation2 + $0x14c8] sm:$0xf]  ;;  %v11009_v57 = vor.u32 %v13555_v50, %v11008_v46  ;;  %6815 = vmatpush.bf16.msra.mxu0 %v10753_v55 }
 0x276   :  { %v13619_v52 = vld [vmem:[#allocation2 + $0x14e4] sm:$0xf0] }
 0x277   :  { %v11520_v53 = vld [vmem:[#allocation2 + $0x16c8] sm:$0xf]  ;;  %v11265_v58 = vor.u32 %v13619_v52, %v11264_v51  ;;  %6828 = vmatpush.bf16.msra.mxu1 %v11009_v57  ;;  %v6601_v52 = vpop.f32.mrf.mxu3 }
 0x278   :  { %v13683_v16 = vld [vmem:[#allocation2 + $0x16e4] sm:$0xf0] }
 0x279   :  { %v10720_v59 = vld [vmem:[#allocation2 + $0x1088] sm:$0xf]  ;;  %v11521_v56 = vor.u32 %v13683_v16, %v11520_v53  ;;  %6841 = vmatpush.bf16.msra.mxu2 %v11265_v58 }
 0x27a   :  { %v13483_v62 = vld [vmem:[#allocation2 + $0x10a4] sm:$0xf0] }
 0x27b   :  { %v10976_v60 = vld [vmem:[#allocation2 + $0x1288] sm:$0xf]  ;;  %v10721_v6 = vor.u32 %v13483_v62, %v10720_v59  ;;  %6854 = vmatpush.bf16.msra.mxu3 %v11521_v56 }
 0x27c   :  { %v13547_v63 = vld [vmem:[#allocation2 + $0x12a4] sm:$0xf0] }
 0x27d   :  { %v11232_v0 = vld [vmem:[#allocation2 + $0x1488] sm:$0xf]  ;;  %v10977_v13 = vor.u32 %v13547_v63, %v10976_v60  ;;  %6816 = vmatpush.bf16.msra.mxu0 %v10721_v6 }
 0x27e   :  { %v13611_v1 = vld [vmem:[#allocation2 + $0x14a4] sm:$0xf0] }
 0x27f   :  { %v11488_v4 = vld [vmem:[#allocation2 + $0x1688] sm:$0xf]  ;;  %v11233_v9 = vor.u32 %v13611_v1, %v11232_v0  ;;  %6829 = vmatpush.bf16.msra.mxu1 %v10977_v13 }
 0x280   :  { %v13675_v5 = vld [vmem:[#allocation2 + $0x16a4] sm:$0xf0] }
 0x281   :  { %v10688_v10 = vld [vmem:[#allocation2 + $0x1048] sm:$0xf]  ;;  %v11489_v15 = vor.u32 %v13675_v5, %v11488_v4  ;;  %6842 = vmatpush.bf16.msra.mxu2 %v11233_v9 }
 0x282   :  { %v13475_v11 = vld [vmem:[#allocation2 + $0x1064] sm:$0xf0] }
 0x283   :  { %v10944_v12 = vld [vmem:[#allocation2 + $0x1248] sm:$0xf]  ;;  %v10689_v32 = vor.u32 %v13475_v11, %v10688_v10  ;;  %6855 = vmatpush.bf16.msra.mxu3 %v11489_v15 }
 0x284   :  { %v13539_v17 = vld [vmem:[#allocation2 + $0x1264] sm:$0xf0] }
 0x285   :  { %v11200_v21 = vld [vmem:[#allocation2 + $0x1448] sm:$0xf]  ;;  %v10945_v37 = vor.u32 %v13539_v17, %v10944_v12  ;;  %6817 = vmatpush.bf16.msra.mxu0 %v10689_v32 }
 0x286   :  { %v13603_v24 = vld [vmem:[#allocation2 + $0x1464] sm:$0xf0] }
 0x287   :  { %v11456_v26 = vld [vmem:[#allocation2 + $0x1648] sm:$0xf]  ;;  %v11201_v39 = vor.u32 %v13603_v24, %v11200_v21  ;;  %6830 = vmatpush.bf16.msra.mxu1 %v10945_v37 }
 0x288   :  { %v13667_v27 = vld [vmem:[#allocation2 + $0x1664] sm:$0xf0] }
 0x289   :  { %v10656_v34 = vld [vmem:[#allocation2 + $0x1008] sm:$0xf]  ;;  %v11457_v48 = vor.u32 %v13667_v27, %v11456_v26  ;;  %6843 = vmatpush.bf16.msra.mxu2 %v11201_v39 }
 0x28a   :  { %v13467_v36 = vld [vmem:[#allocation2 + $0x1024] sm:$0xf0] }
 0x28b   :  { %v10912_v43 = vld [vmem:[#allocation2 + $0x1208] sm:$0xf]  ;;  %v10657_v55 = vor.u32 %v13467_v36, %v10656_v34  ;;  %6856 = vmatpush.bf16.msra.mxu3 %v11457_v48 }
 0x28c   :  { %v13531_v45 = vld [vmem:[#allocation2 + $0x1224] sm:$0xf0] }
 0x28d   :  { %v11168_v46 = vld [vmem:[#allocation2 + $0x1408] sm:$0xf]  ;;  %v10913_v62 = vor.u32 %v13531_v45, %v10912_v43  ;;  %6818 = vmatpush.bf16.msra.mxu0 %v10657_v55 }
 0x28e   :  { %v13595_v49 = vld [vmem:[#allocation2 + $0x1424] sm:$0xf0] }
 0x28f   :  { %v11424_v50 = vld [vmem:[#allocation2 + $0x1608] sm:$0xf]  ;;  %v11169_v60 = vor.u32 %v13595_v49, %v11168_v46  ;;  %6831 = vmatpush.bf16.msra.mxu1 %v10913_v62 }
 0x290   :  { %v13659_v51 = vld [vmem:[#allocation2 + $0x1624] sm:$0xf0]  ;;  %6819 = vmatmul.bf16.vlgmr.msra.gmra.mxu0 %v14216_v25 }
 0x291   :  { %v11904_v53 = vld [vmem:[#allocation2 + $0x19c8] sm:$0xf]  ;;  %v11425_v63 = vor.u32 %v13659_v51, %v11424_v50  ;;  %6844 = vmatpush.bf16.msra.mxu2 %v11169_v60 }
 0x292   :  { %v13779_v16 = vld [vmem:[#allocation2 + $0x19e4] sm:$0xf0]  ;;  %6832 = vmatmul.bf16.vlgmr.msra.gmra.mxu1 %v14220_v30 }
 0x293   :  { %v12160_v54 = vld [vmem:[#allocation2 + $0x1bc8] sm:$0xf]  ;;  %v11905_v0 = vor.u32 %v13779_v16, %v11904_v53  ;;  %6857 = vmatpush.bf16.msra.mxu3 %v11425_v63  ;;  %v6612_v53 = vpop.f32.mrf.mxu0 }
 0x294   :  { %v13843_v57 = vld [vmem:[#allocation2 + $0x1be4] sm:$0xf0]  ;;  %6845 = vmatmul.bf16.vlgmr.msra.gmra.mxu2 %v14218_v29  ;;  %v6613_v55 = vadd.f32 %v6612_v53, %v14284_v7 }
 0x295   :  { %v12416_v58 = vld [vmem:[#allocation2 + $0x1dc8] sm:$0xf]  ;;  %v12161_v1 = vor.u32 %v13843_v57, %v12160_v54  ;;  %6863 = vmatpush.bf16.msrb.mxu0 %v11905_v0 }
 0x296   :  { %v13907_v59 = vld [vmem:[#allocation2 + $0x1de4] sm:$0xf0]  ;;  %6858 = vmatmul.bf16.vlgmr.msra.gmra.mxu3 %v14222_v33 }
 0x297   :  { %v12672_v61 = vld [vmem:[#allocation2 + $0x1fc8] sm:$0xf]  ;;  %v12417_v2 = vor.u32 %v13907_v59, %v12416_v58  ;;  %6876 = vmatpush.bf16.msrb.mxu1 %v12161_v1  ;;  %v6625_v58 = vpop.f32.mrf.mxu1 }
 0x298   :  { %v13971_v56 = vld [vmem:[#allocation2 + $0x1fe4] sm:$0xf0]  ;;  %v6626_v0 = vadd.f32 %v6625_v58, %v6613_v55 }
 0x299   :  { %v11872_v3 = vld [vmem:[#allocation2 + $0x1988] sm:$0xf]  ;;  %v12673_v6 = vor.u32 %v13971_v56, %v12672_v61  ;;  %6889 = vmatpush.bf16.msrb.mxu2 %v12417_v2 }
 0x29a   :  { %v13771_v4 = vld [vmem:[#allocation2 + $0x19a4] sm:$0xf0] }
 0x29b   :  { %v12128_v5 = vld [vmem:[#allocation2 + $0x1b88] sm:$0xf]  ;;  %v11873_v12 = vor.u32 %v13771_v4, %v11872_v3  ;;  %6902 = vmatpush.bf16.msrb.mxu3 %v12673_v6 }
 0x29c   :  { %v13835_v8 = vld [vmem:[#allocation2 + $0x1ba4] sm:$0xf0] }
 0x29d   :  { %v12384_v13 = vld [vmem:[#allocation2 + $0x1d88] sm:$0xf]  ;;  %v12129_v14 = vor.u32 %v13835_v8, %v12128_v5  ;;  %6864 = vmatpush.bf16.msrb.mxu0 %v11873_v12  ;;  %v6638_v12 = vpop.f32.mrf.mxu2 }
 0x29e   :  { %v13899_v9 = vld [vmem:[#allocation2 + $0x1da4] sm:$0xf0] }
 0x29f   :  { %v12640_v10 = vld [vmem:[#allocation2 + $0x1f88] sm:$0xf]  ;;  %v12385_v15 = vor.u32 %v13899_v9, %v12384_v13  ;;  %6877 = vmatpush.bf16.msrb.mxu1 %v12129_v14 }
 0x2a0   :  { %v13963_v11 = vld [vmem:[#allocation2 + $0x1fa4] sm:$0xf0] }
 0x2a1   :  { %v11840_v17 = vld [vmem:[#allocation2 + $0x1948] sm:$0xf]  ;;  %v12641_v26 = vor.u32 %v13963_v11, %v12640_v10  ;;  %6890 = vmatpush.bf16.msrb.mxu2 %v12385_v15 }
 0x2a2   :  { %v13763_v21 = vld [vmem:[#allocation2 + $0x1964] sm:$0xf0] }
 0x2a3   :  { %v12096_v24 = vld [vmem:[#allocation2 + $0x1b48] sm:$0xf]  ;;  %v11841_v39 = vor.u32 %v13763_v21, %v11840_v17  ;;  %6903 = vmatpush.bf16.msrb.mxu3 %v12641_v26  ;;  %v6639_v21 = vadd.f32 %v6638_v12, %v6626_v0  ;;  %v9602_v12 = vld [vmem:[#allocation2 + $0x7e8] sm:$0xf0] }
 0x2a4   :  { %v13827_v27 = vld [vmem:[#allocation2 + $0x1b64] sm:$0xf0] }
 0x2a5   :  { %v12352_v32 = vld [vmem:[#allocation2 + $0x1d48] sm:$0xf]  ;;  %v12097_v43 = vor.u32 %v13827_v27, %v12096_v24  ;;  %6865 = vmatpush.bf16.msrb.mxu0 %v11841_v39  ;;  %v6651_v24 = vpop.f32.mrf.mxu3 }
 0x2a6   :  { %v13891_v34 = vld [vmem:[#allocation2 + $0x1d64] sm:$0xf0] }
 0x2a7   :  { %v12608_v36 = vld [vmem:[#allocation2 + $0x1f48] sm:$0xf]  ;;  %v12353_v45 = vor.u32 %v13891_v34, %v12352_v32  ;;  %6878 = vmatpush.bf16.msrb.mxu1 %v12097_v43  ;;  %v6614_v32 = vpop.f32.mrf.mxu0 }
 0x2a8   :  { %v13955_v37 = vld [vmem:[#allocation2 + $0x1f64] sm:$0xf0] }
 0x2a9   :  { %v11808_v46 = vld [vmem:[#allocation2 + $0x1908] sm:$0xf]  ;;  %v12609_v49 = vor.u32 %v13955_v37, %v12608_v36  ;;  %6891 = vmatpush.bf16.msrb.mxu2 %v12353_v45  ;;  %v6627_v36 = vpop.f32.mrf.mxu1  ;;  %v14291_v37 = vadd.f32 %v6651_v24, %v6639_v21  ;;  %v12999_v24 = vld [vmem:[#allocation2 + $0x18c] sm:$0xf] }
 0x2aa   :  { %v13755_v47 = vld [vmem:[#allocation2 + $0x1924] sm:$0xf0]  ;;  %v13127_v36 = vld [vmem:[#allocation2 + $0x58c] sm:$0xf] }
 0x2ab   :  { %v12064_v48 = vld [vmem:[#allocation2 + $0x1b08] sm:$0xf]  ;;  %v11809_v57 = vor.u32 %v13755_v47, %v11808_v46  ;;  %6904 = vmatpush.bf16.msrb.mxu3 %v12609_v49 }
 0x2ac   :  { %v13819_v50 = vld [vmem:[#allocation2 + $0x1b24] sm:$0xf0] }
 0x2ad   :  { %v12320_v51 = vld [vmem:[#allocation2 + $0x1d08] sm:$0xf]  ;;  %v12065_v59 = vor.u32 %v13819_v50, %v12064_v48  ;;  %6866 = vmatpush.bf16.msrb.mxu0 %v11809_v57 }
 0x2ae   :  { %v13883_v52 = vld [vmem:[#allocation2 + $0x1d24] sm:$0xf0] }
 0x2af   :  { %v12576_v16 = vld [vmem:[#allocation2 + $0x1f08] sm:$0xf]  ;;  %v12321_v62 = vor.u32 %v13883_v52, %v12320_v51  ;;  %6879 = vmatpush.bf16.msrb.mxu1 %v12065_v59 }
 0x2b0   :  { %v13947_v54 = vld [vmem:[#allocation2 + $0x1f24] sm:$0xf0] }
 0x2b1   :  { %v11776_v60 = vld [vmem:[#allocation2 + $0x18c8] sm:$0xf]  ;;  %v12577_v63 = vor.u32 %v13947_v54, %v12576_v16  ;;  %6892 = vmatpush.bf16.msrb.mxu2 %v12321_v62 }
 0x2b2   :  { %v13747_v61 = vld [vmem:[#allocation2 + $0x18e4] sm:$0xf0] }
 0x2b3   :  { %v12032_v56 = vld [vmem:[#allocation2 + $0x1ac8] sm:$0xf]  ;;  %v11777_v6 = vor.u32 %v13747_v61, %v11776_v60  ;;  %6905 = vmatpush.bf16.msrb.mxu3 %v12577_v63 }
 0x2b4   :  { %v13811_v1 = vld [vmem:[#allocation2 + $0x1ae4] sm:$0xf0] }
 0x2b5   :  { %v12288_v2 = vld [vmem:[#allocation2 + $0x1cc8] sm:$0xf]  ;;  %v12033_v7 = vor.u32 %v13811_v1, %v12032_v56  ;;  %6867 = vmatpush.bf16.msrb.mxu0 %v11777_v6  ;;  %v6640_v1 = vpop.f32.mrf.mxu2 }
 0x2b6   :  { %v13875_v3 = vld [vmem:[#allocation2 + $0x1ce4] sm:$0xf0]  ;;  %v13111_v1 = vld [vmem:[#allocation2 + $0x50c] sm:$0xf] }
 0x2b7   :  { %v12544_v4 = vld [vmem:[#allocation2 + $0x1ec8] sm:$0xf]  ;;  %v12289_v8 = vor.u32 %v13875_v3, %v12288_v2  ;;  %6880 = vmatpush.bf16.msrb.mxu1 %v12033_v7  ;;  %v13007_v2 = vld [vmem:[#allocation2 + $0x1cc] sm:$0xf] }
 0x2b8   :  { %v13939_v5 = vld [vmem:[#allocation2 + $0x1ee4] sm:$0xf0]  ;;  %v8834_v3 = vld [vmem:[#allocation2 + $0x1e8] sm:$0xf0] }
 0x2b9   :  { %v11744_v13 = vld [vmem:[#allocation2 + $0x1888] sm:$0xf]  ;;  %v12545_v11 = vor.u32 %v13939_v5, %v12544_v4  ;;  %6893 = vmatpush.bf16.msrb.mxu2 %v12289_v8  ;;  %v13071_v4 = vld [vmem:[#allocation2 + $0x3cc] sm:$0xf]  ;;  %v6653_v5 = vpop.f32.mrf.mxu3 }
 0x2ba   :  { %v13739_v9 = vld [vmem:[#allocation2 + $0x18a4] sm:$0xf0]  ;;  %v9090_v7 = vld [vmem:[#allocation2 + $0x3e8] sm:$0xf0] }
 0x2bb   :  { %v12000_v10 = vld [vmem:[#allocation2 + $0x1a88] sm:$0xf]  ;;  %v11745_v34 = vor.u32 %v13739_v9, %v11744_v13  ;;  %6906 = vmatpush.bf16.msrb.mxu3 %v12545_v11  ;;  %v13135_v8 = vld [vmem:[#allocation2 + $0x5cc] sm:$0xf] }
 0x2bc   :  { %v13803_v14 = vld [vmem:[#allocation2 + $0x1aa4] sm:$0xf0]  ;;  %v9346_v13 = vld [vmem:[#allocation2 + $0x5e8] sm:$0xf0] }
 0x2bd   :  { %v12256_v15 = vld [vmem:[#allocation2 + $0x1c88] sm:$0xf]  ;;  %v12001_v39 = vor.u32 %v13803_v14, %v12000_v10  ;;  %6868 = vmatpush.bf16.msrb.mxu0 %v11745_v34  ;;  %v13199_v11 = vld [vmem:[#allocation2 + $0x7cc] sm:$0xf]  ;;  %v9349_v21 = vor.u32 %v13135_v8, %v9346_v13  ;;  %v6677_v8 = vpop.f32.mrf.mxu1 }
 0x2be   :  { %v13867_v17 = vld [vmem:[#allocation2 + $0x1ca4] sm:$0xf0]  ;;  %v9605_v32 = vor.u32 %v13199_v11, %v9602_v12  ;;  %v9058_v34 = vld [vmem:[#allocation2 + $0x3a8] sm:$0xf0] }
 0x2bf   :  { %v12512_v26 = vld [vmem:[#allocation2 + $0x1e88] sm:$0xf]  ;;  %v12257_v43 = vor.u32 %v13867_v17, %v12256_v15  ;;  %6881 = vmatpush.bf16.msrb.mxu1 %v12001_v39  ;;  %v8837_v15 = vor.u32 %v13007_v2, %v8834_v3  ;;  %v9093_v17 = vor.u32 %v13071_v4, %v9090_v7  ;;  %v9314_v39 = vld [vmem:[#allocation2 + $0x5a8] sm:$0xf0]  ;;  %v6664_v3 = vpop.f32.mrf.mxu0 }
 0x2c0   :  { %v13931_v27 = vld [vmem:[#allocation2 + $0x1ea4] sm:$0xf0]  ;;  %v9250_v2 = vld [vmem:[#allocation2 + $0x528] sm:$0xf0] }
 0x2c1   :  { %v11712_v45 = vld [vmem:[#allocation2 + $0x1848] sm:$0xf]  ;;  %v12513_v48 = vor.u32 %v13931_v27, %v12512_v26  ;;  %6894 = vmatpush.bf16.msrb.mxu2 %v12257_v43  ;;  %v8802_v26 = vld [vmem:[#allocation2 + $0x1a8] sm:$0xf0] }
 0x2c2   :  { %v13731_v46 = vld [vmem:[#allocation2 + $0x1864] sm:$0xf0]  ;;  %v13063_v27 = vld [vmem:[#allocation2 + $0x38c] sm:$0xf] }
 0x2c3   :  { %v11968_v47 = vld [vmem:[#allocation2 + $0x1a48] sm:$0xf]  ;;  %v11713_v16 = vor.u32 %v13731_v46, %v11712_v45  ;;  %6907 = vmatpush.bf16.msrb.mxu3 %v12513_v48  ;;  %v13191_v43 = vld [vmem:[#allocation2 + $0x78c] sm:$0xf]  ;;  %v8805_v46 = vor.u32 %v12999_v24, %v8802_v26  ;;  %v9317_v48 = vor.u32 %v13127_v36, %v9314_v39 }
 0x2c4   :  { %v13795_v49 = vld [vmem:[#allocation2 + $0x1a64] sm:$0xf0]  ;;  %v9570_v45 = vld [vmem:[#allocation2 + $0x7a8] sm:$0xf0] }
 0x2c5   :  { %v12224_v50 = vld [vmem:[#allocation2 + $0x1c48] sm:$0xf]  ;;  %v11969_v57 = vor.u32 %v13795_v49, %v11968_v47  ;;  %6869 = vmatpush.bf16.msrb.mxu0 %v11713_v16  ;;  %v9061_v47 = vor.u32 %v13063_v27, %v9058_v34  ;;  %v12991_v49 = vld [vmem:[#allocation2 + $0x14c] sm:$0xf] }
 0x2c6   :  { %v13859_v51 = vld [vmem:[#allocation2 + $0x1c64] sm:$0xf0]  ;;  %v13119_v16 = vld [vmem:[#allocation2 + $0x54c] sm:$0xf] }
 0x2c7   :  { %v12480_v52 = vld [vmem:[#allocation2 + $0x1e48] sm:$0xf]  ;;  %v12225_v58 = vor.u32 %v13859_v51, %v12224_v50  ;;  %6882 = vmatpush.bf16.msrb.mxu1 %v11969_v57  ;;  %v8770_v50 = vld [vmem:[#allocation2 + $0x168] sm:$0xf0] }
 0x2c8   :  { %v13923_v53 = vld [vmem:[#allocation2 + $0x1e64] sm:$0xf0]  ;;  %v13055_v51 = vld [vmem:[#allocation2 + $0x34c] sm:$0xf] }
 0x2c9   :  { %v11680_v54 = vld [vmem:[#allocation2 + $0x1808] sm:$0xf]  ;;  %v12481_v61 = vor.u32 %v13923_v53, %v12480_v52  ;;  %6895 = vmatpush.bf16.msrb.mxu2 %v12225_v58  ;;  %v9573_v52 = vor.u32 %v13191_v43, %v9570_v45  ;;  %v9026_v53 = vld [vmem:[#allocation2 + $0x368] sm:$0xf0]  ;;  %v8773_v58 = vor.u32 %v12991_v49, %v8770_v50 }
 0x2ca   :  { %v13723_v55 = vld [vmem:[#allocation2 + $0x1824] sm:$0xf0]  ;;  %v9538_v57 = vld [vmem:[#allocation2 + $0x768] sm:$0xf0] }
 0x2cb   :  { %v11936_v59 = vld [vmem:[#allocation2 + $0x1a08] sm:$0xf]  ;;  %v11681_v6 = vor.u32 %v13723_v55, %v11680_v54  ;;  %6908 = vmatpush.bf16.msrb.mxu3 %v12481_v61  ;;  %v9282_v54 = vld [vmem:[#allocation2 + $0x568] sm:$0xf0] }
 0x2cc   :  { %v13787_v62 = vld [vmem:[#allocation2 + $0x1a24] sm:$0xf0]  ;;  %v13183_v55 = vld [vmem:[#allocation2 + $0x74c] sm:$0xf] }
 0x2cd   :  { %v12192_v60 = vld [vmem:[#allocation2 + $0x1c08] sm:$0xf]  ;;  %v11937_v9 = vor.u32 %v13787_v62, %v11936_v59  ;;  %6870 = vmatpush.bf16.msrb.mxu0 %v11681_v6  ;;  %v9029_v59 = vor.u32 %v13055_v51, %v9026_v53  ;;  %v9285_v62 = vor.u32 %v13119_v16, %v9282_v54  ;;  %v8738_v61 = vld [vmem:[#allocation2 + $0x128] sm:$0xf0]  ;;  %v6665_v6 = vadd.f32 %v6664_v3, %v14291_v37  ;;  %v6703_v51 = vpop.f32.mrf.mxu3  ;;  %v6666_v16 = vpop.f32.mrf.mxu0 }
 0x2ce   :  { %v13851_v56 = vld [vmem:[#allocation2 + $0x1c24] sm:$0xf0]  ;;  %v13175_v4 = vld [vmem:[#allocation2 + $0x70c] sm:$0xf] }
 0x2cf   :  { %v12448_v63 = vld [vmem:[#allocation2 + $0x1e08] sm:$0xf]  ;;  %v12193_v10 = vor.u32 %v13851_v56, %v12192_v60  ;;  %6883 = vmatpush.bf16.msrb.mxu1 %v11937_v9  ;;  %v12983_v60 = vld [vmem:[#allocation2 + $0x10c] sm:$0xf]  ;;  %v9253_v9 = vor.u32 %v13111_v1, %v9250_v2 }
 0x2d0   :  { %v13915_v0 = vld [vmem:[#allocation2 + $0x1e24] sm:$0xf0]  ;;  %6871 = vmatmul.bf16.vlgmr.msrb.gmra.mxu0 %v14234_v23  ;;  %v13047_v56 = vld [vmem:[#allocation2 + $0x30c] sm:$0xf]  ;;  %v8741_v7 = vor.u32 %v12983_v60, %v8738_v61 }
 0x2d1   :  { %v12449_v14 = vor.u32 %v13915_v0, %v12448_v63  ;;  %6896 = vmatpush.bf16.msrb.mxu2 %v12193_v10  ;;  %6915 = vmatpush.bf16.msra.mxu0 %v8837_v15  ;;  %v9541_v63 = vor.u32 %v13183_v55, %v9538_v57  ;;  %v8994_v0 = vld [vmem:[#allocation2 + $0x328] sm:$0xf0]  ;;  %v6678_v15 = vadd.f32 %v6677_v8, %v6665_v6  ;;  %v6679_v55 = vpop.f32.mrf.mxu1 }
 0x2d2   :  { %6884 = vmatmul.bf16.vlgmr.msrb.gmra.mxu1 %v14238_v31  ;;  %v9506_v5 = vld [vmem:[#allocation2 + $0x728] sm:$0xf0]  ;;  %v8997_v13 = vor.u32 %v13047_v56, %v8994_v0 }
 0x2d3   :  { %6909 = vmatpush.bf16.msrb.mxu3 %v12449_v14  ;;  %6928 = vmatpush.bf16.msra.mxu1 %v9093_v17  ;;  %v12975_v10 = vld [vmem:[#allocation2 + $0xcc] sm:$0xf]  ;;  %v9509_v14 = vor.u32 %v13175_v4, %v9506_v5 }
 0x2d4   :  { %6897 = vmatmul.bf16.vlgmr.msrb.gmra.mxu2 %v14236_v28  ;;  %v8706_v11 = vld [vmem:[#allocation2 + $0xe8] sm:$0xf0] }
 0x2d5   :  { %6941 = vmatpush.bf16.msra.mxu2 %v9349_v21  ;;  %6916 = vmatpush.bf16.msra.mxu0 %v8805_v46  ;;  %v13039_v12 = vld [vmem:[#allocation2 + $0x2cc] sm:$0xf]  ;;  %v6690_v46 = vpop.f32.mrf.mxu2 }
 0x2d6   :  { %6910 = vmatmul.bf16.vlgmr.msrb.gmra.mxu3 %v14240_v35  ;;  %v8962_v17 = vld [vmem:[#allocation2 + $0x2e8] sm:$0xf0]  ;;  %v6691_v50 = vadd.f32 %v6690_v46, %v6678_v15 }
 0x2d7   :  { %6954 = vmatpush.bf16.msra.mxu3 %v9605_v32  ;;  %6929 = vmatpush.bf16.msra.mxu1 %v9061_v47  ;;  %v13103_v21 = vld [vmem:[#allocation2 + $0x4cc] sm:$0xf]  ;;  %v8709_v32 = vor.u32 %v12975_v10, %v8706_v11  ;;  %v8965_v37 = vor.u32 %v13039_v12, %v8962_v17 }
 0x2d8   :  { %v9218_v24 = vld [vmem:[#allocation2 + $0x4e8] sm:$0xf0]  ;;  %v14298_v57 = vadd.f32 %v6703_v51, %v6691_v50 }
 0x2d9   :  { %6942 = vmatpush.bf16.msra.mxu2 %v9317_v48  ;;  %6917 = vmatpush.bf16.msra.mxu0 %v8773_v58  ;;  %v13167_v26 = vld [vmem:[#allocation2 + $0x6cc] sm:$0xf]  ;;  %v9221_v34 = vor.u32 %v13103_v21, %v9218_v24 }
 0x2da   :  { %v9474_v27 = vld [vmem:[#allocation2 + $0x6e8] sm:$0xf0] }
 0x2db   :  { %6955 = vmatpush.bf16.msra.mxu3 %v9573_v52  ;;  %6930 = vmatpush.bf16.msra.mxu1 %v9029_v59  ;;  %v12967_v36 = vld [vmem:[#allocation2 + $0x8c] sm:$0xf]  ;;  %v9477_v45 = vor.u32 %v13167_v26, %v9474_v27  ;;  %v6705_v27 = vpop.f32.mrf.mxu3 }
 0x2dc   :  { %v8674_v39 = vld [vmem:[#allocation2 + $0xa8] sm:$0xf0] }
 0x2dd   :  { %6943 = vmatpush.bf16.msra.mxu2 %v9285_v62  ;;  %6918 = vmatpush.bf16.msra.mxu0 %v8741_v7  ;;  %v13031_v43 = vld [vmem:[#allocation2 + $0x28c] sm:$0xf]  ;;  %v8677_v54 = vor.u32 %v12967_v36, %v8674_v39  ;;  %v6692_v17 = vpop.f32.mrf.mxu2 }
 0x2de   :  { %v8930_v47 = vld [vmem:[#allocation2 + $0x2a8] sm:$0xf0] }
 0x2df   :  { %6956 = vmatpush.bf16.msra.mxu3 %v9541_v63  ;;  %6931 = vmatpush.bf16.msra.mxu1 %v8997_v13  ;;  %v13095_v48 = vld [vmem:[#allocation2 + $0x48c] sm:$0xf]  ;;  %v8933_v58 = vor.u32 %v13031_v43, %v8930_v47 }
 0x2e0   :  { %v9186_v49 = vld [vmem:[#allocation2 + $0x4a8] sm:$0xf0] }
 0x2e1   :  { %6944 = vmatpush.bf16.msra.mxu2 %v9253_v9  ;;  %v13159_v52 = vld [vmem:[#allocation2 + $0x68c] sm:$0xf]  ;;  %6919 = vmatpush.bf16.msra.mxu0 %v8709_v32  ;;  %v9189_v59 = vor.u32 %v13095_v48, %v9186_v49 }
 0x2e2   :  { %v9442_v53 = vld [vmem:[#allocation2 + $0x6a8] sm:$0xf0] }
 0x2e3   :  { %6957 = vmatpush.bf16.msra.mxu3 %v9509_v14  ;;  %6932 = vmatpush.bf16.msra.mxu1 %v8965_v37  ;;  %v12959_v62 = vld [vmem:[#allocation2 + $0x4c] sm:$0xf]  ;;  %v9445_v56 = vor.u32 %v13159_v52, %v9442_v53 }
 0x2e4   :  { %v8642_v60 = vld [vmem:[#allocation2 + $0x68] sm:$0xf0] }
 0x2e5   :  { %6945 = vmatpush.bf16.msra.mxu2 %v9221_v34  ;;  %v13023_v61 = vld [vmem:[#allocation2 + $0x24c] sm:$0xf]  ;;  %6920 = vmatpush.bf16.msra.mxu0 %v8677_v54  ;;  %v8645_v4 = vor.u32 %v12959_v62, %v8642_v60 }
 0x2e6   :  { %v8898_v63 = vld [vmem:[#allocation2 + $0x268] sm:$0xf0] }
 0x2e7   :  { %6958 = vmatpush.bf16.msra.mxu3 %v9477_v45  ;;  %v13087_v0 = vld [vmem:[#allocation2 + $0x44c] sm:$0xf]  ;;  %6933 = vmatpush.bf16.msra.mxu1 %v8933_v58  ;;  %v8901_v7 = vor.u32 %v13023_v61, %v8898_v63 }
 0x2e8   :  { %v9154_v1 = vld [vmem:[#allocation2 + $0x468] sm:$0xf0] }
 0x2e9   :  { %v13151_v2 = vld [vmem:[#allocation2 + $0x64c] sm:$0xf]  ;;  %6946 = vmatpush.bf16.msra.mxu2 %v9189_v59  ;;  %v9157_v8 = vor.u32 %v13087_v0, %v9154_v1  ;;  %6921 = vmatpush.bf16.msra.mxu0 %v8645_v4 }
 0x2ea   :  { %v9410_v3 = vld [vmem:[#allocation2 + $0x668] sm:$0xf0] }
 0x2eb   :  { %v12951_v5 = vld [vmem:[#allocation2 + $0xc] sm:$0xf]  ;;  %6959 = vmatpush.bf16.msra.mxu3 %v9445_v56  ;;  %v9413_v11 = vor.u32 %v13151_v2, %v9410_v3  ;;  %6934 = vmatpush.bf16.msra.mxu1 %v8901_v7 }
 0x2ec   :  { %v8610_v6 = vld [vmem:[#allocation2 + $0x28] sm:$0xf0] }
 0x2ed   :  { %v13015_v13 = vld [vmem:[#allocation2 + $0x20c] sm:$0xf]  ;;  %v8613_v32 = vor.u32 %v12951_v5, %v8610_v6  ;;  %6947 = vmatpush.bf16.msra.mxu2 %v9157_v8 }
 0x2ee   :  { %v8866_v9 = vld [vmem:[#allocation2 + $0x228] sm:$0xf0] }
 0x2ef   :  { %v13079_v10 = vld [vmem:[#allocation2 + $0x40c] sm:$0xf]  ;;  %v8869_v39 = vor.u32 %v13015_v13, %v8866_v9  ;;  %6960 = vmatpush.bf16.msra.mxu3 %v9413_v11  ;;  %6922 = vmatpush.bf16.msra.mxu0 %v8613_v32 }
 0x2f0   :  { %v9122_v12 = vld [vmem:[#allocation2 + $0x428] sm:$0xf0] }
 0x2f1   :  { %v13143_v14 = vld [vmem:[#allocation2 + $0x60c] sm:$0xf]  ;;  %v9125_v43 = vor.u32 %v13079_v10, %v9122_v12  ;;  %6935 = vmatpush.bf16.msra.mxu1 %v8869_v39 }
 0x2f2   :  { %v9378_v15 = vld [vmem:[#allocation2 + $0x628] sm:$0xf0]  ;;  %6923 = vmatmul.bf16.vlgmr.msra.gmra.mxu0 %v14182_v19 }
 0x2f3   :  { %v13263_v21 = vld [vmem:[#allocation2 + $0x9cc] sm:$0xf]  ;;  %v9381_v47 = vor.u32 %v13143_v14, %v9378_v15  ;;  %6948 = vmatpush.bf16.msra.mxu2 %v9125_v43  ;;  %v14047_v14 = vld [vmem:[#allocation4] sm:$0xff] }
 0x2f4   :  { %v9858_v24 = vld [vmem:[#allocation2 + $0x9e8] sm:$0xf0]  ;;  %6936 = vmatmul.bf16.vlgmr.msra.gmra.mxu1 %v14186_v22  ;;  %v1101_v15 = vperm.slane %v14047_v14, 2 }
 0x2f5   :  { %v13327_v26 = vld [vmem:[#allocation2 + $0xbcc] sm:$0xf]  ;;  %v9861_v48 = vor.u32 %v13263_v21, %v9858_v24  ;;  %6961 = vmatpush.bf16.msra.mxu3 %v9381_v47 }
 0x2f6   :  { %v10114_v37 = vld [vmem:[#allocation2 + $0xbe8] sm:$0xf0]  ;;  %6949 = vmatmul.bf16.vlgmr.msra.gmra.mxu2 %v14180_v18 }
 0x2f7   :  { %v13391_v34 = vld [vmem:[#allocation2 + $0xdcc] sm:$0xf]  ;;  %v10117_v49 = vor.u32 %v13327_v26, %v10114_v37  ;;  %6967 = vmatpush.bf16.msrb.mxu0 %v9861_v48  ;;  %v6729_v48 = vpop.f32.mrf.mxu1 }
 0x2f8   :  { %v10370_v36 = vld [vmem:[#allocation2 + $0xde8] sm:$0xf0]  ;;  %6962 = vmatmul.bf16.vlgmr.msra.gmra.mxu3 %v14184_v20 }
 0x2f9   :  { %v13455_v45 = vld [vmem:[#allocation2 + $0xfcc] sm:$0xf]  ;;  %v10373_v50 = vor.u32 %v13391_v34, %v10370_v36  ;;  %6980 = vmatpush.bf16.msrb.mxu1 %v10117_v49  ;;  %v6716_v34 = vpop.f32.mrf.mxu0 }
 0x2fa   :  { %v10626_v46 = vld [vmem:[#allocation2 + $0xfe8] sm:$0xf0]  ;;  %v6717_v47 = vadd.f32 %v6716_v34, %v1101_v15 }
 0x2fb   :  { %v13255_v51 = vld [vmem:[#allocation2 + $0x98c] sm:$0xf]  ;;  %v10629_v16 = vor.u32 %v13455_v45, %v10626_v46  ;;  %6993 = vmatpush.bf16.msrb.mxu2 %v10373_v50 }
 0x2fc   :  { %v9826_v52 = vld [vmem:[#allocation2 + $0x9a8] sm:$0xf0] }
 0x2fd   :  { %v13319_v53 = vld [vmem:[#allocation2 + $0xb8c] sm:$0xf]  ;;  %v9829_v60 = vor.u32 %v13255_v51, %v9826_v52  ;;  %7006 = vmatpush.bf16.msrb.mxu3 %v10629_v16 }
 0x2fe   :  { %v10082_v54 = vld [vmem:[#allocation2 + $0xba8] sm:$0xf0] }
 0x2ff   :  { %v13383_v55 = vld [vmem:[#allocation2 + $0xd8c] sm:$0xf]  ;;  %v10085_v61 = vor.u32 %v13319_v53, %v10082_v54  ;;  %6968 = vmatpush.bf16.msrb.mxu0 %v9829_v60  ;;  %v6730_v54 = vadd.f32 %v6729_v48, %v6717_v47  ;;  %v6731_v15 = vpop.f32.mrf.mxu1 }
 0x300   :  { %v10338_v58 = vld [vmem:[#allocation2 + $0xda8] sm:$0xf0] }
 0x301   :  { %v13447_v59 = vld [vmem:[#allocation2 + $0xf8c] sm:$0xf]  ;;  %v10341_v56 = vor.u32 %v13383_v55, %v10338_v58  ;;  %6981 = vmatpush.bf16.msrb.mxu1 %v10085_v61 }
 0x302   :  { %v10594_v62 = vld [vmem:[#allocation2 + $0xfa8] sm:$0xf0] }
 0x303   :  { %v13247_v63 = vld [vmem:[#allocation2 + $0x94c] sm:$0xf]  ;;  %v10597_v2 = vor.u32 %v13447_v59, %v10594_v62  ;;  %6994 = vmatpush.bf16.msrb.mxu2 %v10341_v56  ;;  %v6742_v56 = vpop.f32.mrf.mxu2 }
 0x304   :  { %v9794_v0 = vld [vmem:[#allocation2 + $0x968] sm:$0xf0] }
 0x305   :  { %v13311_v1 = vld [vmem:[#allocation2 + $0xb4c] sm:$0xf]  ;;  %v9797_v8 = vor.u32 %v13247_v63, %v9794_v0  ;;  %7007 = vmatpush.bf16.msrb.mxu3 %v10597_v2 }
 0x306   :  { %v10050_v3 = vld [vmem:[#allocation2 + $0xb68] sm:$0xf0] }
 0x307   :  { %v13375_v4 = vld [vmem:[#allocation2 + $0xd4c] sm:$0xf]  ;;  %v10053_v9 = vor.u32 %v13311_v1, %v10050_v3  ;;  %6969 = vmatpush.bf16.msrb.mxu0 %v9797_v8  ;;  %v6743_v3 = vadd.f32 %v6742_v56, %v6730_v54 }
 0x308   :  { %v10306_v5 = vld [vmem:[#allocation2 + $0xd68] sm:$0xf0] }
 0x309   :  { %v13439_v6 = vld [vmem:[#allocation2 + $0xf4c] sm:$0xf]  ;;  %v10309_v10 = vor.u32 %v13375_v4, %v10306_v5  ;;  %6982 = vmatpush.bf16.msrb.mxu1 %v10053_v9  ;;  %v6755_v4 = vpop.f32.mrf.mxu3 }
 0x30a   :  { %v10562_v7 = vld [vmem:[#allocation2 + $0xf68] sm:$0xf0]  ;;  %v14304_v8 = vadd.f32 %v6755_v4, %v6743_v3 }
 0x30b   :  { %v13239_v13 = vld [vmem:[#allocation2 + $0x90c] sm:$0xf]  ;;  %v10565_v17 = vor.u32 %v13439_v6, %v10562_v7  ;;  %6995 = vmatpush.bf16.msrb.mxu2 %v10309_v10  ;;  %v6744_v48 = vpop.f32.mrf.mxu2 }
 0x30c   :  { %v9762_v11 = vld [vmem:[#allocation2 + $0x928] sm:$0xf0] }
 0x30d   :  { %v13303_v12 = vld [vmem:[#allocation2 + $0xb0c] sm:$0xf]  ;;  %v9765_v37 = vor.u32 %v13239_v13, %v9762_v11  ;;  %7008 = vmatpush.bf16.msrb.mxu3 %v10565_v17  ;;  %v6718_v13 = vpop.f32.mrf.mxu0 }
 0x30e   :  { %v10018_v21 = vld [vmem:[#allocation2 + $0xb28] sm:$0xf0] }
 0x30f   :  { %v13367_v24 = vld [vmem:[#allocation2 + $0xd0c] sm:$0xf]  ;;  %v10021_v36 = vor.u32 %v13303_v12, %v10018_v21  ;;  %6970 = vmatpush.bf16.msrb.mxu0 %v9765_v37 }
 0x310   :  { %v10274_v26 = vld [vmem:[#allocation2 + $0xd28] sm:$0xf0] }
 0x311   :  { %v13431_v27 = vld [vmem:[#allocation2 + $0xf0c] sm:$0xf]  ;;  %v10277_v39 = vor.u32 %v13367_v24, %v10274_v26  ;;  %6983 = vmatpush.bf16.msrb.mxu1 %v10021_v36 }
 0x312   :  { %v10530_v32 = vld [vmem:[#allocation2 + $0xf28] sm:$0xf0] }
 0x313   :  { %v13231_v43 = vld [vmem:[#allocation2 + $0x8cc] sm:$0xf]  ;;  %v10533_v49 = vor.u32 %v13431_v27, %v10530_v32  ;;  %6996 = vmatpush.bf16.msrb.mxu2 %v10277_v39 }
 0x314   :  { %v9730_v45 = vld [vmem:[#allocation2 + $0x8e8] sm:$0xf0] }
 0x315   :  { %v13295_v46 = vld [vmem:[#allocation2 + $0xacc] sm:$0xf]  ;;  %v9733_v55 = vor.u32 %v13231_v43, %v9730_v45  ;;  %7009 = vmatpush.bf16.msrb.mxu3 %v10533_v49 }
 0x316   :  { %v9986_v50 = vld [vmem:[#allocation2 + $0xae8] sm:$0xf0] }
 0x317   :  { %v13359_v51 = vld [vmem:[#allocation2 + $0xccc] sm:$0xf]  ;;  %v9989_v58 = vor.u32 %v13295_v46, %v9986_v50  ;;  %6971 = vmatpush.bf16.msrb.mxu0 %v9733_v55 }
 0x318   :  { %v10242_v52 = vld [vmem:[#allocation2 + $0xce8] sm:$0xf0] }
 0x319   :  { %v13423_v53 = vld [vmem:[#allocation2 + $0xecc] sm:$0xf]  ;;  %v10245_v59 = vor.u32 %v13359_v51, %v10242_v52  ;;  %6984 = vmatpush.bf16.msrb.mxu1 %v9989_v58 }
 0x31a   :  { %v10498_v16 = vld [vmem:[#allocation2 + $0xee8] sm:$0xf0] }
 0x31b   :  { %v13223_v62 = vld [vmem:[#allocation2 + $0x88c] sm:$0xf]  ;;  %v10501_v63 = vor.u32 %v13423_v53, %v10498_v16  ;;  %6997 = vmatpush.bf16.msrb.mxu2 %v10245_v59  ;;  %v6757_v53 = vpop.f32.mrf.mxu3 }
 0x31c   :  { %v9698_v60 = vld [vmem:[#allocation2 + $0x8a8] sm:$0xf0] }
 0x31d   :  { %v13287_v61 = vld [vmem:[#allocation2 + $0xa8c] sm:$0xf]  ;;  %v9701_v7 = vor.u32 %v13223_v62, %v9698_v60  ;;  %7010 = vmatpush.bf16.msrb.mxu3 %v10501_v63 }
 0x31e   :  { %v9954_v0 = vld [vmem:[#allocation2 + $0xaa8] sm:$0xf0] }
 0x31f   :  { %v13351_v1 = vld [vmem:[#allocation2 + $0xc8c] sm:$0xf]  ;;  %v9957_v9 = vor.u32 %v13287_v61, %v9954_v0  ;;  %6972 = vmatpush.bf16.msrb.mxu0 %v9701_v7 }
 0x320   :  { %v10210_v2 = vld [vmem:[#allocation2 + $0xca8] sm:$0xf0] }
 0x321   :  { %v13415_v5 = vld [vmem:[#allocation2 + $0xe8c] sm:$0xf]  ;;  %v10213_v10 = vor.u32 %v13351_v1, %v10210_v2  ;;  %6985 = vmatpush.bf16.msrb.mxu1 %v9957_v9 }
 0x322   :  { %v10466_v6 = vld [vmem:[#allocation2 + $0xea8] sm:$0xf0] }
 0x323   :  { %v13215_v11 = vld [vmem:[#allocation2 + $0x84c] sm:$0xf]  ;;  %v10469_v17 = vor.u32 %v13415_v5, %v10466_v6  ;;  %6998 = vmatpush.bf16.msrb.mxu2 %v10213_v10 }
 0x324   :  { %v9666_v12 = vld [vmem:[#allocation2 + $0x868] sm:$0xf0] }
 0x325   :  { %v13279_v14 = vld [vmem:[#allocation2 + $0xa4c] sm:$0xf]  ;;  %v9669_v37 = vor.u32 %v13215_v11, %v9666_v12  ;;  %7011 = vmatpush.bf16.msrb.mxu3 %v10469_v17 }
 0x326   :  { %v9922_v21 = vld [vmem:[#allocation2 + $0xa68] sm:$0xf0] }
 0x327   :  { %v13343_v24 = vld [vmem:[#allocation2 + $0xc4c] sm:$0xf]  ;;  %v9925_v39 = vor.u32 %v13279_v14, %v9922_v21  ;;  %6973 = vmatpush.bf16.msrb.mxu0 %v9669_v37 }
 0x328   :  { %v10178_v26 = vld [vmem:[#allocation2 + $0xc68] sm:$0xf0] }
 0x329   :  { %v13407_v27 = vld [vmem:[#allocation2 + $0xe4c] sm:$0xf]  ;;  %v10181_v43 = vor.u32 %v13343_v24, %v10178_v26  ;;  %6986 = vmatpush.bf16.msrb.mxu1 %v9925_v39 }
 0x32a   :  { %v10434_v32 = vld [vmem:[#allocation2 + $0xe68] sm:$0xf0] }
 0x32b   :  { %v13207_v34 = vld [vmem:[#allocation2 + $0x80c] sm:$0xf]  ;;  %v10437_v49 = vor.u32 %v13407_v27, %v10434_v32  ;;  %6999 = vmatpush.bf16.msrb.mxu2 %v10181_v43 }
 0x32c   :  { %v9634_v36 = vld [vmem:[#allocation2 + $0x828] sm:$0xf0] }
 0x32d   :  { %v13271_v45 = vld [vmem:[#allocation2 + $0xa0c] sm:$0xf]  ;;  %v9637_v58 = vor.u32 %v13207_v34, %v9634_v36  ;;  %7012 = vmatpush.bf16.msrb.mxu3 %v10437_v49 }
 0x32e   :  { %v9890_v46 = vld [vmem:[#allocation2 + $0xa28] sm:$0xf0] }
 0x32f   :  { %v13335_v47 = vld [vmem:[#allocation2 + $0xc0c] sm:$0xf]  ;;  %v9893_v61 = vor.u32 %v13271_v45, %v9890_v46  ;;  %6974 = vmatpush.bf16.msrb.mxu0 %v9637_v58 }
 0x330   :  { %v10146_v50 = vld [vmem:[#allocation2 + $0xc28] sm:$0xf0] }
 0x331   :  { %v13399_v51 = vld [vmem:[#allocation2 + $0xe0c] sm:$0xf]  ;;  %v10149_v56 = vor.u32 %v13335_v47, %v10146_v50  ;;  %6987 = vmatpush.bf16.msrb.mxu1 %v9893_v61 }
 0x332   :  { %v10402_v52 = vld [vmem:[#allocation2 + $0xe28] sm:$0xf0]  ;;  %6975 = vmatmul.bf16.vlgmr.msrb.gmra.mxu0 %v14200_v41 }
 0x333   :  { %v13519_v16 = vld [vmem:[#allocation2 + $0x11cc] sm:$0xf]  ;;  %v10405_v1 = vor.u32 %v13399_v51, %v10402_v52  ;;  %7000 = vmatpush.bf16.msrb.mxu2 %v10149_v56 }
 0x334   :  { %v10882_v54 = vld [vmem:[#allocation2 + $0x11e8] sm:$0xf0]  ;;  %6988 = vmatmul.bf16.vlgmr.msrb.gmra.mxu1 %v14204_v44 }
 0x335   :  { %v13583_v55 = vld [vmem:[#allocation2 + $0x13cc] sm:$0xf]  ;;  %v10885_v2 = vor.u32 %v13519_v16, %v10882_v54  ;;  %7013 = vmatpush.bf16.msrb.mxu3 %v10405_v1  ;;  %v6781_v1 = vpop.f32.mrf.mxu1 }
 0x336   :  { %v11138_v59 = vld [vmem:[#allocation2 + $0x13e8] sm:$0xf0]  ;;  %7001 = vmatmul.bf16.vlgmr.msrb.gmra.mxu2 %v14198_v38 }
 0x337   :  { %v13647_v62 = vld [vmem:[#allocation2 + $0x15cc] sm:$0xf]  ;;  %v11141_v3 = vor.u32 %v13583_v55, %v11138_v59  ;;  %7019 = vmatpush.bf16.msra.mxu0 %v10885_v2  ;;  %v6768_v59 = vpop.f32.mrf.mxu0 }
 0x338   :  { %v11394_v60 = vld [vmem:[#allocation2 + $0x15e8] sm:$0xf0]  ;;  %7014 = vmatmul.bf16.vlgmr.msrb.gmra.mxu3 %v14202_v42 }
 0x339   :  { %v13711_v63 = vld [vmem:[#allocation2 + $0x17cc] sm:$0xf]  ;;  %v11397_v4 = vor.u32 %v13647_v62, %v11394_v60  ;;  %7032 = vmatpush.bf16.msra.mxu1 %v11141_v3 }
 0x33a   :  { %v11650_v0 = vld [vmem:[#allocation2 + $0x17e8] sm:$0xf0] }
 0x33b   :  { %v13511_v5 = vld [vmem:[#allocation2 + $0x118c] sm:$0xf]  ;;  %v11653_v13 = vor.u32 %v13711_v63, %v11650_v0  ;;  %7045 = vmatpush.bf16.msra.mxu2 %v11397_v4  ;;  %v6769_v0 = vadd.f32 %v6768_v59, %v14304_v8 }
 0x33c   :  { %v10850_v6 = vld [vmem:[#allocation2 + $0x11a8] sm:$0xf0] }
 0x33d   :  { %v13575_v7 = vld [vmem:[#allocation2 + $0x138c] sm:$0xf]  ;;  %v10853_v15 = vor.u32 %v13511_v5, %v10850_v6  ;;  %7058 = vmatpush.bf16.msra.mxu3 %v11653_v13  ;;  %v6782_v13 = vadd.f32 %v6781_v1, %v6769_v0 }
 0x33e   :  { %v11106_v9 = vld [vmem:[#allocation2 + $0x13a8] sm:$0xf0] }
 0x33f   :  { %v13639_v10 = vld [vmem:[#allocation2 + $0x158c] sm:$0xf]  ;;  %v11109_v17 = vor.u32 %v13575_v7, %v11106_v9  ;;  %7020 = vmatpush.bf16.msra.mxu0 %v10853_v15 }
 0x340   :  { %v11362_v11 = vld [vmem:[#allocation2 + $0x15a8] sm:$0xf0] }
 0x341   :  { %v13703_v12 = vld [vmem:[#allocation2 + $0x178c] sm:$0xf]  ;;  %v11365_v21 = vor.u32 %v13639_v10, %v11362_v11  ;;  %7033 = vmatpush.bf16.msra.mxu1 %v11109_v17  ;;  %v6794_v17 = vpop.f32.mrf.mxu2 }
 0x342   :  { %v11618_v14 = vld [vmem:[#allocation2 + $0x17a8] sm:$0xf0] }
 0x343   :  { %v13503_v24 = vld [vmem:[#allocation2 + $0x114c] sm:$0xf]  ;;  %v11621_v32 = vor.u32 %v13703_v12, %v11618_v14  ;;  %7046 = vmatpush.bf16.msra.mxu2 %v11365_v21 }
 0x344   :  { %v10818_v26 = vld [vmem:[#allocation2 + $0x1168] sm:$0xf0] }
 0x345   :  { %v13567_v27 = vld [vmem:[#allocation2 + $0x134c] sm:$0xf]  ;;  %v10821_v45 = vor.u32 %v13503_v24, %v10818_v26  ;;  %7059 = vmatpush.bf16.msra.mxu3 %v11621_v32  ;;  %v6807_v32 = vpop.f32.mrf.mxu3 }
 0x346   :  { %v11074_v37 = vld [vmem:[#allocation2 + $0x1368] sm:$0xf0] }
 0x347   :  { %v13631_v34 = vld [vmem:[#allocation2 + $0x154c] sm:$0xf]  ;;  %v11077_v46 = vor.u32 %v13567_v27, %v11074_v37  ;;  %7021 = vmatpush.bf16.msra.mxu0 %v10821_v45  ;;  %v6795_v27 = vadd.f32 %v6794_v17, %v6782_v13 }
 0x348   :  { %v11330_v36 = vld [vmem:[#allocation2 + $0x1568] sm:$0xf0] }
 0x349   :  { %v13695_v39 = vld [vmem:[#allocation2 + $0x174c] sm:$0xf]  ;;  %v11333_v47 = vor.u32 %v13631_v34, %v11330_v36  ;;  %7034 = vmatpush.bf16.msra.mxu1 %v11077_v46  ;;  %v6796_v1 = vpop.f32.mrf.mxu2 }
 0x34a   :  { %v11586_v43 = vld [vmem:[#allocation2 + $0x1768] sm:$0xf0] }
 0x34b   :  { %v13495_v48 = vld [vmem:[#allocation2 + $0x110c] sm:$0xf]  ;;  %v11589_v51 = vor.u32 %v13695_v39, %v11586_v43  ;;  %7047 = vmatpush.bf16.msra.mxu2 %v11333_v47  ;;  %v14311_v39 = vadd.f32 %v6807_v32, %v6795_v27  ;;  %v6770_v43 = vpop.f32.mrf.mxu0 }
 0x34c   :  { %v10786_v49 = vld [vmem:[#allocation2 + $0x1128] sm:$0xf0] }
 0x34d   :  { %v13559_v50 = vld [vmem:[#allocation2 + $0x130c] sm:$0xf]  ;;  %v10789_v58 = vor.u32 %v13495_v48, %v10786_v49  ;;  %7060 = vmatpush.bf16.msra.mxu3 %v11589_v51 }
 0x34e   :  { %v11042_v52 = vld [vmem:[#allocation2 + $0x1328] sm:$0xf0] }
 0x34f   :  { %v13623_v53 = vld [vmem:[#allocation2 + $0x150c] sm:$0xf]  ;;  %v11045_v62 = vor.u32 %v13559_v50, %v11042_v52  ;;  %7022 = vmatpush.bf16.msra.mxu0 %v10789_v58  ;;  %v6783_v50 = vpop.f32.mrf.mxu1 }
 0x350   :  { %v11298_v16 = vld [vmem:[#allocation2 + $0x1528] sm:$0xf0] }
 0x351   :  { %v13687_v54 = vld [vmem:[#allocation2 + $0x170c] sm:$0xf]  ;;  %v11301_v60 = vor.u32 %v13623_v53, %v11298_v16  ;;  %7035 = vmatpush.bf16.msra.mxu1 %v11045_v62 }
 0x352   :  { %v11554_v55 = vld [vmem:[#allocation2 + $0x1728] sm:$0xf0] }
 0x353   :  { %v13487_v61 = vld [vmem:[#allocation2 + $0x10cc] sm:$0xf]  ;;  %v11557_v2 = vor.u32 %v13687_v54, %v11554_v55  ;;  %7048 = vmatpush.bf16.msra.mxu2 %v11301_v60 }
 0x354   :  { %v10754_v56 = vld [vmem:[#allocation2 + $0x10e8] sm:$0xf0] }
 0x355   :  { %v13551_v63 = vld [vmem:[#allocation2 + $0x12cc] sm:$0xf]  ;;  %v10757_v9 = vor.u32 %v13487_v61, %v10754_v56  ;;  %7061 = vmatpush.bf16.msra.mxu3 %v11557_v2 }
 0x356   :  { %v11010_v3 = vld [vmem:[#allocation2 + $0x12e8] sm:$0xf0] }
 0x357   :  { %v13615_v4 = vld [vmem:[#allocation2 + $0x14cc] sm:$0xf]  ;;  %v11013_v10 = vor.u32 %v13551_v63, %v11010_v3  ;;  %7023 = vmatpush.bf16.msra.mxu0 %v10757_v9 }
 0x358   :  { %v11266_v5 = vld [vmem:[#allocation2 + $0x14e8] sm:$0xf0] }
 0x359   :  { %v13679_v6 = vld [vmem:[#allocation2 + $0x16cc] sm:$0xf]  ;;  %v11269_v11 = vor.u32 %v13615_v4, %v11266_v5  ;;  %7036 = vmatpush.bf16.msra.mxu1 %v11013_v10 }
 0x35a   :  { %v11522_v7 = vld [vmem:[#allocation2 + $0x16e8] sm:$0xf0] }
 0x35b   :  { %v13479_v12 = vld [vmem:[#allocation2 + $0x108c] sm:$0xf]  ;;  %v11525_v8 = vor.u32 %v13679_v6, %v11522_v7  ;;  %7049 = vmatpush.bf16.msra.mxu2 %v11269_v11  ;;  %v6809_v6 = vpop.f32.mrf.mxu3 }
 0x35c   :  { %v10722_v14 = vld [vmem:[#allocation2 + $0x10a8] sm:$0xf0] }
 0x35d   :  { %v13543_v15 = vld [vmem:[#allocation2 + $0x128c] sm:$0xf]  ;;  %v10725_v36 = vor.u32 %v13479_v12, %v10722_v14  ;;  %7062 = vmatpush.bf16.msra.mxu3 %v11525_v8 }
 0x35e   :  { %v10978_v21 = vld [vmem:[#allocation2 + $0x12a8] sm:$0xf0] }
 0x35f   :  { %v13607_v24 = vld [vmem:[#allocation2 + $0x148c] sm:$0xf]  ;;  %v10981_v45 = vor.u32 %v13543_v15, %v10978_v21  ;;  %7024 = vmatpush.bf16.msra.mxu0 %v10725_v36 }
 0x360   :  { %v11234_v26 = vld [vmem:[#allocation2 + $0x14a8] sm:$0xf0] }
 0x361   :  { %v13671_v37 = vld [vmem:[#allocation2 + $0x168c] sm:$0xf]  ;;  %v11237_v46 = vor.u32 %v13607_v24, %v11234_v26  ;;  %7037 = vmatpush.bf16.msra.mxu1 %v10981_v45 }
 0x362   :  { %v11490_v34 = vld [vmem:[#allocation2 + $0x16a8] sm:$0xf0] }
 0x363   :  { %v13471_v47 = vld [vmem:[#allocation2 + $0x104c] sm:$0xf]  ;;  %v11493_v51 = vor.u32 %v13671_v37, %v11490_v34  ;;  %7050 = vmatpush.bf16.msra.mxu2 %v11237_v46 }
 0x364   :  { %v10690_v48 = vld [vmem:[#allocation2 + $0x1068] sm:$0xf0] }
 0x365   :  { %v13535_v49 = vld [vmem:[#allocation2 + $0x124c] sm:$0xf]  ;;  %v10693_v58 = vor.u32 %v13471_v47, %v10690_v48  ;;  %7063 = vmatpush.bf16.msra.mxu3 %v11493_v51 }
 0x366   :  { %v10946_v52 = vld [vmem:[#allocation2 + $0x1268] sm:$0xf0] }
 0x367   :  { %v13599_v53 = vld [vmem:[#allocation2 + $0x144c] sm:$0xf]  ;;  %v10949_v60 = vor.u32 %v13535_v49, %v10946_v52  ;;  %7025 = vmatpush.bf16.msra.mxu0 %v10693_v58 }
 0x368   :  { %v11202_v16 = vld [vmem:[#allocation2 + $0x1468] sm:$0xf0] }
 0x369   :  { %v13663_v54 = vld [vmem:[#allocation2 + $0x164c] sm:$0xf]  ;;  %v11205_v61 = vor.u32 %v13599_v53, %v11202_v16  ;;  %7038 = vmatpush.bf16.msra.mxu1 %v10949_v60 }
 0x36a   :  { %v11458_v55 = vld [vmem:[#allocation2 + $0x1668] sm:$0xf0] }
 0x36b   :  { %v13463_v59 = vld [vmem:[#allocation2 + $0x100c] sm:$0xf]  ;;  %v11461_v2 = vor.u32 %v13663_v54, %v11458_v55  ;;  %7051 = vmatpush.bf16.msra.mxu2 %v11205_v61 }
 0x36c   :  { %v10658_v62 = vld [vmem:[#allocation2 + $0x1028] sm:$0xf0] }
 0x36d   :  { %v13527_v56 = vld [vmem:[#allocation2 + $0x120c] sm:$0xf]  ;;  %v10661_v10 = vor.u32 %v13463_v59, %v10658_v62  ;;  %7064 = vmatpush.bf16.msra.mxu3 %v11461_v2 }
 0x36e   :  { %v10914_v63 = vld [vmem:[#allocation2 + $0x1228] sm:$0xf0] }
 0x36f   :  { %v13591_v0 = vld [vmem:[#allocation2 + $0x140c] sm:$0xf]  ;;  %v10917_v15 = vor.u32 %v13527_v56, %v10914_v63  ;;  %7026 = vmatpush.bf16.msra.mxu0 %v10661_v10 }
 0x370   :  { %v11170_v3 = vld [vmem:[#allocation2 + $0x1428] sm:$0xf0] }
 0x371   :  { %v13655_v4 = vld [vmem:[#allocation2 + $0x160c] sm:$0xf]  ;;  %v11173_v17 = vor.u32 %v13591_v0, %v11170_v3  ;;  %7039 = vmatpush.bf16.msra.mxu1 %v10917_v15 }
 0x372   :  { %v11426_v5 = vld [vmem:[#allocation2 + $0x1628] sm:$0xf0]  ;;  %7027 = vmatmul.bf16.vlgmr.msra.gmra.mxu0 %v14216_v25 }
 0x373   :  { %v13775_v7 = vld [vmem:[#allocation2 + $0x19cc] sm:$0xf]  ;;  %v11429_v24 = vor.u32 %v13655_v4, %v11426_v5  ;;  %7052 = vmatpush.bf16.msra.mxu2 %v11173_v17 }
 0x374   :  { %v11906_v13 = vld [vmem:[#allocation2 + $0x19e8] sm:$0xf0]  ;;  %7040 = vmatmul.bf16.vlgmr.msra.gmra.mxu1 %v14220_v30 }
 0x375   :  { %v13839_v9 = vld [vmem:[#allocation2 + $0x1bcc] sm:$0xf]  ;;  %v11909_v26 = vor.u32 %v13775_v7, %v11906_v13  ;;  %7065 = vmatpush.bf16.msra.mxu3 %v11429_v24  ;;  %v6820_v13 = vpop.f32.mrf.mxu0 }
 0x376   :  { %v12162_v11 = vld [vmem:[#allocation2 + $0x1be8] sm:$0xf0]  ;;  %7053 = vmatmul.bf16.vlgmr.msra.gmra.mxu2 %v14218_v29 }
 0x377   :  { %v13903_v12 = vld [vmem:[#allocation2 + $0x1dcc] sm:$0xf]  ;;  %v12165_v27 = vor.u32 %v13839_v9, %v12162_v11  ;;  %7071 = vmatpush.bf16.msrb.mxu0 %v11909_v26  ;;  %v6821_v11 = vadd.f32 %v6820_v13, %v14311_v39 }
 0x378   :  { %v12418_v14 = vld [vmem:[#allocation2 + $0x1de8] sm:$0xf0]  ;;  %7066 = vmatmul.bf16.vlgmr.msra.gmra.mxu3 %v14222_v33 }
 0x379   :  { %v13967_v8 = vld [vmem:[#allocation2 + $0x1fcc] sm:$0xf]  ;;  %v12421_v32 = vor.u32 %v13903_v12, %v12418_v14  ;;  %7084 = vmatpush.bf16.msrb.mxu1 %v12165_v27  ;;  %v6833_v14 = vpop.f32.mrf.mxu1 }
 0x37a   :  { %v12674_v21 = vld [vmem:[#allocation2 + $0x1fe8] sm:$0xf0]  ;;  %v6834_v27 = vadd.f32 %v6833_v14, %v6821_v11 }
 0x37b   :  { %v13767_v37 = vld [vmem:[#allocation2 + $0x198c] sm:$0xf]  ;;  %v12677_v43 = vor.u32 %v13967_v8, %v12674_v21  ;;  %7097 = vmatpush.bf16.msrb.mxu2 %v12421_v32 }
 0x37c   :  { %v11874_v34 = vld [vmem:[#allocation2 + $0x19a8] sm:$0xf0] }
 0x37d   :  { %v13831_v36 = vld [vmem:[#allocation2 + $0x1b8c] sm:$0xf]  ;;  %v11877_v50 = vor.u32 %v13767_v37, %v11874_v34  ;;  %7110 = vmatpush.bf16.msrb.mxu3 %v12677_v43 }
 0x37e   :  { %v12130_v45 = vld [vmem:[#allocation2 + $0x1ba8] sm:$0xf0] }
 0x37f   :  { %v13895_v46 = vld [vmem:[#allocation2 + $0x1d8c] sm:$0xf]  ;;  %v12133_v51 = vor.u32 %v13831_v36, %v12130_v45  ;;  %7072 = vmatpush.bf16.msrb.mxu0 %v11877_v50 }
 0x380   :  { %v12386_v47 = vld [vmem:[#allocation2 + $0x1da8] sm:$0xf0] }
 0x381   :  { %v13959_v48 = vld [vmem:[#allocation2 + $0x1f8c] sm:$0xf]  ;;  %v12389_v52 = vor.u32 %v13895_v46, %v12386_v47  ;;  %7085 = vmatpush.bf16.msrb.mxu1 %v12133_v51  ;;  %v6846_v51 = vpop.f32.mrf.mxu2 }
 0x382   :  { %v12642_v49 = vld [vmem:[#allocation2 + $0x1fa8] sm:$0xf0] }
 0x383   :  { %v13759_v53 = vld [vmem:[#allocation2 + $0x194c] sm:$0xf]  ;;  %v12645_v55 = vor.u32 %v13959_v48, %v12642_v49  ;;  %7098 = vmatpush.bf16.msrb.mxu2 %v12389_v52 }
 0x384   :  { %v11842_v16 = vld [vmem:[#allocation2 + $0x1968] sm:$0xf0] }
 0x385   :  { %v13823_v54 = vld [vmem:[#allocation2 + $0x1b4c] sm:$0xf]  ;;  %v11845_v56 = vor.u32 %v13759_v53, %v11842_v16  ;;  %7111 = vmatpush.bf16.msrb.mxu3 %v12645_v55  ;;  %v6859_v55 = vpop.f32.mrf.mxu3 }
 0x386   :  { %v12098_v58 = vld [vmem:[#allocation2 + $0x1b68] sm:$0xf0] }
 0x387   :  { %v13887_v59 = vld [vmem:[#allocation2 + $0x1d4c] sm:$0xf]  ;;  %v12101_v63 = vor.u32 %v13823_v54, %v12098_v58  ;;  %7073 = vmatpush.bf16.msrb.mxu0 %v11845_v56  ;;  %v6847_v54 = vadd.f32 %v6846_v51, %v6834_v27  ;;  %v9608_v51 = vld [vmem:[#allocation2 + $0x7d0] sm:$0xf] }
 0x388   :  { %v12354_v62 = vld [vmem:[#allocation2 + $0x1d68] sm:$0xf0] }
 0x389   :  { %v13951_v60 = vld [vmem:[#allocation2 + $0x1f4c] sm:$0xf]  ;;  %v12357_v0 = vor.u32 %v13887_v59, %v12354_v62  ;;  %7086 = vmatpush.bf16.msrb.mxu1 %v12101_v63  ;;  %v6822_v62 = vpop.f32.mrf.mxu0  ;;  %v14318_v56 = vadd.f32 %v6859_v55, %v6847_v54 }
 0x38a   :  { %v12610_v61 = vld [vmem:[#allocation2 + $0x1f68] sm:$0xf0]  ;;  %v9064_v62 = vld [vmem:[#allocation2 + $0x390] sm:$0xf] }
 0x38b   :  { %v13751_v1 = vld [vmem:[#allocation2 + $0x190c] sm:$0xf]  ;;  %v12613_v4 = vor.u32 %v13951_v60, %v12610_v61  ;;  %7099 = vmatpush.bf16.msrb.mxu2 %v12357_v0  ;;  %v6835_v61 = vpop.f32.mrf.mxu1 }
 0x38c   :  { %v11810_v2 = vld [vmem:[#allocation2 + $0x1928] sm:$0xf0]  ;;  %v13068_v61 = vld [vmem:[#allocation2 + $0x3ac] sm:$0xf0] }
 0x38d   :  { %v13815_v3 = vld [vmem:[#allocation2 + $0x1b0c] sm:$0xf]  ;;  %v11813_v12 = vor.u32 %v13751_v1, %v11810_v2  ;;  %7112 = vmatpush.bf16.msrb.mxu3 %v12613_v4 }
 0x38e   :  { %v12066_v5 = vld [vmem:[#allocation2 + $0x1b28] sm:$0xf0] }
 0x38f   :  { %v13879_v6 = vld [vmem:[#allocation2 + $0x1d0c] sm:$0xf]  ;;  %v12069_v15 = vor.u32 %v13815_v3, %v12066_v5  ;;  %7074 = vmatpush.bf16.msrb.mxu0 %v11813_v12 }
 0x390   :  { %v12322_v7 = vld [vmem:[#allocation2 + $0x1d28] sm:$0xf0] }
 0x391   :  { %v13943_v9 = vld [vmem:[#allocation2 + $0x1f0c] sm:$0xf]  ;;  %v12325_v17 = vor.u32 %v13879_v6, %v12322_v7  ;;  %7087 = vmatpush.bf16.msrb.mxu1 %v12069_v15 }
 0x392   :  { %v12578_v10 = vld [vmem:[#allocation2 + $0x1f28] sm:$0xf0] }
 0x393   :  { %v13743_v8 = vld [vmem:[#allocation2 + $0x18cc] sm:$0xf]  ;;  %v12581_v26 = vor.u32 %v13943_v9, %v12578_v10  ;;  %7100 = vmatpush.bf16.msrb.mxu2 %v12325_v17 }
 0x394   :  { %v11778_v21 = vld [vmem:[#allocation2 + $0x18e8] sm:$0xf0] }
 0x395   :  { %v13807_v24 = vld [vmem:[#allocation2 + $0x1acc] sm:$0xf]  ;;  %v11781_v45 = vor.u32 %v13743_v8, %v11778_v21  ;;  %7113 = vmatpush.bf16.msrb.mxu3 %v12581_v26 }
 0x396   :  { %v12034_v32 = vld [vmem:[#allocation2 + $0x1ae8] sm:$0xf0] }
 0x397   :  { %v13871_v37 = vld [vmem:[#allocation2 + $0x1ccc] sm:$0xf]  ;;  %v12037_v39 = vor.u32 %v13807_v24, %v12034_v32  ;;  %7075 = vmatpush.bf16.msrb.mxu0 %v11781_v45  ;;  %v6861_v45 = vpop.f32.mrf.mxu3 }
 0x398   :  { %v12290_v34 = vld [vmem:[#allocation2 + $0x1ce8] sm:$0xf0]  ;;  %v9512_v45 = vld [vmem:[#allocation2 + $0x710] sm:$0xf] }
 0x399   :  { %v13935_v36 = vld [vmem:[#allocation2 + $0x1ecc] sm:$0xf]  ;;  %v12293_v46 = vor.u32 %v13871_v37, %v12290_v34  ;;  %7088 = vmatpush.bf16.msrb.mxu1 %v12037_v39  ;;  %v6848_v37 = vpop.f32.mrf.mxu2  ;;  %v8840_v34 = vld [vmem:[#allocation2 + $0x1d0] sm:$0xf] }
 0x39a   :  { %v12546_v43 = vld [vmem:[#allocation2 + $0x1ee8] sm:$0xf0]  ;;  %v13052_v37 = vld [vmem:[#allocation2 + $0x32c] sm:$0xf0] }
 0x39b   :  { %v13735_v47 = vld [vmem:[#allocation2 + $0x188c] sm:$0xf]  ;;  %v12549_v50 = vor.u32 %v13935_v36, %v12546_v43  ;;  %7101 = vmatpush.bf16.msrb.mxu2 %v12293_v46  ;;  %v13012_v36 = vld [vmem:[#allocation2 + $0x1ec] sm:$0xf0] }
 0x39c   :  { %v11746_v48 = vld [vmem:[#allocation2 + $0x18a8] sm:$0xf0]  ;;  %v9096_v43 = vld [vmem:[#allocation2 + $0x3d0] sm:$0xf] }
 0x39d   :  { %v13799_v49 = vld [vmem:[#allocation2 + $0x1a8c] sm:$0xf]  ;;  %v11749_v60 = vor.u32 %v13735_v47, %v11746_v48  ;;  %7114 = vmatpush.bf16.msrb.mxu3 %v12549_v50  ;;  %v13076_v46 = vld [vmem:[#allocation2 + $0x3ec] sm:$0xf0] }
 0x39e   :  { %v12002_v52 = vld [vmem:[#allocation2 + $0x1aa8] sm:$0xf0]  ;;  %v9352_v47 = vld [vmem:[#allocation2 + $0x5d0] sm:$0xf]  ;;  %v9097_v54 = vor.u32 %v13076_v46, %v9096_v43  ;;  %v6872_v43 = vpop.f32.mrf.mxu0 }
 0x39f   :  { %v13863_v53 = vld [vmem:[#allocation2 + $0x1c8c] sm:$0xf]  ;;  %v12005_v63 = vor.u32 %v13799_v49, %v12002_v52  ;;  %7076 = vmatpush.bf16.msrb.mxu0 %v11749_v60  ;;  %v13140_v48 = vld [vmem:[#allocation2 + $0x5ec] sm:$0xf0]  ;;  %v6873_v46 = vadd.f32 %v6872_v43, %v14318_v56 }
 0x3a0   :  { %v12258_v16 = vld [vmem:[#allocation2 + $0x1ca8] sm:$0xf0]  ;;  %v13204_v52 = vld [vmem:[#allocation2 + $0x7ec] sm:$0xf0]  ;;  %v9353_v55 = vor.u32 %v13140_v48, %v9352_v47  ;;  %v6885_v48 = vpop.f32.mrf.mxu1 }
 0x3a1   :  { %v13927_v58 = vld [vmem:[#allocation2 + $0x1e8c] sm:$0xf]  ;;  %v12261_v0 = vor.u32 %v13863_v53, %v12258_v16  ;;  %7089 = vmatpush.bf16.msrb.mxu1 %v12005_v63  ;;  %v8841_v16 = vor.u32 %v13012_v36, %v8840_v34  ;;  %v9609_v60 = vor.u32 %v13204_v52, %v9608_v51  ;;  %v9320_v63 = vld [vmem:[#allocation2 + $0x590] sm:$0xf] }
 0x3a2   :  { %v12514_v59 = vld [vmem:[#allocation2 + $0x1ea8] sm:$0xf0]  ;;  %v9256_v34 = vld [vmem:[#allocation2 + $0x510] sm:$0xf] }
 0x3a3   :  { %v13727_v1 = vld [vmem:[#allocation2 + $0x184c] sm:$0xf]  ;;  %v12517_v4 = vor.u32 %v13927_v58, %v12514_v59  ;;  %7102 = vmatpush.bf16.msrb.mxu2 %v12261_v0  ;;  %v8808_v58 = vld [vmem:[#allocation2 + $0x190] sm:$0xf] }
 0x3a4   :  { %v11714_v2 = vld [vmem:[#allocation2 + $0x1868] sm:$0xf0]  ;;  %v13004_v59 = vld [vmem:[#allocation2 + $0x1ac] sm:$0xf0] }
 0x3a5   :  { %v13791_v3 = vld [vmem:[#allocation2 + $0x1a4c] sm:$0xf]  ;;  %v11717_v10 = vor.u32 %v13727_v1, %v11714_v2  ;;  %7115 = vmatpush.bf16.msrb.mxu3 %v12517_v4  ;;  %v13132_v0 = vld [vmem:[#allocation2 + $0x5ac] sm:$0xf0]  ;;  %v9065_v4 = vor.u32 %v13068_v61, %v9064_v62 }
 0x3a6   :  { %v11970_v5 = vld [vmem:[#allocation2 + $0x1a68] sm:$0xf0]  ;;  %v9576_v1 = vld [vmem:[#allocation2 + $0x790] sm:$0xf] }
 0x3a7   :  { %v13855_v6 = vld [vmem:[#allocation2 + $0x1c4c] sm:$0xf]  ;;  %v11973_v14 = vor.u32 %v13791_v3, %v11970_v5  ;;  %7077 = vmatpush.bf16.msrb.mxu0 %v11717_v10  ;;  %v13196_v2 = vld [vmem:[#allocation2 + $0x7ac] sm:$0xf0]  ;;  %v8809_v3 = vor.u32 %v13004_v59, %v8808_v58  ;;  %v9321_v5 = vor.u32 %v13132_v0, %v9320_v63 }
 0x3a8   :  { %v12226_v7 = vld [vmem:[#allocation2 + $0x1c68] sm:$0xf0]  ;;  %v13060_v10 = vld [vmem:[#allocation2 + $0x36c] sm:$0xf0] }
 0x3a9   :  { %v13919_v13 = vld [vmem:[#allocation2 + $0x1e4c] sm:$0xf]  ;;  %v12229_v15 = vor.u32 %v13855_v6, %v12226_v7  ;;  %7090 = vmatpush.bf16.msrb.mxu1 %v11973_v14  ;;  %v8776_v6 = vld [vmem:[#allocation2 + $0x150] sm:$0xf] }
 0x3aa   :  { %v12482_v9 = vld [vmem:[#allocation2 + $0x1e68] sm:$0xf0]  ;;  %v12996_v7 = vld [vmem:[#allocation2 + $0x16c] sm:$0xf0] }
 0x3ab   :  { %v13719_v11 = vld [vmem:[#allocation2 + $0x180c] sm:$0xf]  ;;  %v12485_v24 = vor.u32 %v13919_v13, %v12482_v9  ;;  %7103 = vmatpush.bf16.msrb.mxu2 %v12229_v15  ;;  %v9032_v13 = vld [vmem:[#allocation2 + $0x350] sm:$0xf]  ;;  %v9577_v9 = vor.u32 %v13196_v2, %v9576_v1 }
 0x3ac   :  { %v11682_v12 = vld [vmem:[#allocation2 + $0x1828] sm:$0xf0]  ;;  %v9544_v14 = vld [vmem:[#allocation2 + $0x750] sm:$0xf] }
 0x3ad   :  { %v13783_v17 = vld [vmem:[#allocation2 + $0x1a0c] sm:$0xf]  ;;  %v11685_v39 = vor.u32 %v13719_v11, %v11682_v12  ;;  %7116 = vmatpush.bf16.msrb.mxu3 %v12485_v24  ;;  %v9288_v11 = vld [vmem:[#allocation2 + $0x550] sm:$0xf] }
 0x3ae   :  { %v11938_v8 = vld [vmem:[#allocation2 + $0x1a28] sm:$0xf0]  ;;  %v13124_v12 = vld [vmem:[#allocation2 + $0x56c] sm:$0xf0] }
 0x3af   :  { %v13847_v21 = vld [vmem:[#allocation2 + $0x1c0c] sm:$0xf]  ;;  %v11941_v49 = vor.u32 %v13783_v17, %v11938_v8  ;;  %7078 = vmatpush.bf16.msrb.mxu0 %v11685_v39  ;;  %v13188_v15 = vld [vmem:[#allocation2 + $0x76c] sm:$0xf0]  ;;  %v8777_v17 = vor.u32 %v12996_v7, %v8776_v6  ;;  %v9033_v8 = vor.u32 %v13060_v10, %v9032_v13 }
 0x3b0   :  { %v12194_v26 = vld [vmem:[#allocation2 + $0x1c28] sm:$0xf0]  ;;  %v8744_v24 = vld [vmem:[#allocation2 + $0x110] sm:$0xf] }
 0x3b1   :  { %v13911_v27 = vld [vmem:[#allocation2 + $0x1e0c] sm:$0xf]  ;;  %v12197_v50 = vor.u32 %v13847_v21, %v12194_v26  ;;  %7091 = vmatpush.bf16.msrb.mxu1 %v11941_v49  ;;  %v9289_v21 = vor.u32 %v13124_v12, %v9288_v11  ;;  %v12988_v26 = vld [vmem:[#allocation2 + $0x12c] sm:$0xf0]  ;;  %v6874_v12 = vpop.f32.mrf.mxu0 }
 0x3b2   :  { %v12450_v32 = vld [vmem:[#allocation2 + $0x1e28] sm:$0xf0]  ;;  %7079 = vmatmul.bf16.vlgmr.msrb.gmra.mxu0 %v14234_v23  ;;  %v13116_v36 = vld [vmem:[#allocation2 + $0x52c] sm:$0xf0]  ;;  %v8745_v47 = vor.u32 %v12988_v26, %v8744_v24 }
 0x3b3   :  { %v12453_v53 = vor.u32 %v13911_v27, %v12450_v32  ;;  %7104 = vmatpush.bf16.msrb.mxu2 %v12197_v50  ;;  %7123 = vmatpush.bf16.msra.mxu0 %v8841_v16  ;;  %v9000_v27 = vld [vmem:[#allocation2 + $0x310] sm:$0xf]  ;;  %v9545_v32 = vor.u32 %v13188_v15, %v9544_v14  ;;  %v9257_v50 = vor.u32 %v13116_v36, %v9256_v34  ;;  %v6887_v15 = vpop.f32.mrf.mxu1 }
 0x3b4   :  { %7092 = vmatmul.bf16.vlgmr.msrb.gmra.mxu1 %v14238_v31  ;;  %v13180_v39 = vld [vmem:[#allocation2 + $0x72c] sm:$0xf0]  ;;  %v9001_v49 = vor.u32 %v13052_v37, %v9000_v27 }
 0x3b5   :  { %7117 = vmatpush.bf16.msrb.mxu3 %v12453_v53  ;;  %7136 = vmatpush.bf16.msra.mxu1 %v9097_v54  ;;  %v8712_v51 = vld [vmem:[#allocation2 + $0xd0] sm:$0xf]  ;;  %v9513_v16 = vor.u32 %v13180_v39, %v9512_v45  ;;  %v6886_v54 = vadd.f32 %v6885_v48, %v6873_v46 }
 0x3b6   :  { %7105 = vmatmul.bf16.vlgmr.msrb.gmra.mxu2 %v14236_v28  ;;  %v12980_v52 = vld [vmem:[#allocation2 + $0xec] sm:$0xf0] }
 0x3b7   :  { %7149 = vmatpush.bf16.msra.mxu2 %v9353_v55  ;;  %7124 = vmatpush.bf16.msra.mxu0 %v8809_v3  ;;  %v8968_v53 = vld [vmem:[#allocation2 + $0x2d0] sm:$0xf]  ;;  %v8713_v61 = vor.u32 %v12980_v52, %v8712_v51 }
 0x3b8   :  { %7118 = vmatmul.bf16.vlgmr.msrb.gmra.mxu3 %v14240_v35  ;;  %v13044_v55 = vld [vmem:[#allocation2 + $0x2ec] sm:$0xf0] }
 0x3b9   :  { %7162 = vmatpush.bf16.msra.mxu3 %v9609_v60  ;;  %7137 = vmatpush.bf16.msra.mxu1 %v9065_v4  ;;  %v9224_v58 = vld [vmem:[#allocation2 + $0x4d0] sm:$0xf]  ;;  %v8969_v56 = vor.u32 %v13044_v55, %v8968_v53  ;;  %v6898_v4 = vpop.f32.mrf.mxu2 }
 0x3ba   :  { %v13108_v59 = vld [vmem:[#allocation2 + $0x4ec] sm:$0xf0]  ;;  %v6899_v13 = vadd.f32 %v6898_v4, %v6886_v54 }
 0x3bb   :  { %7150 = vmatpush.bf16.msra.mxu2 %v9321_v5  ;;  %7125 = vmatpush.bf16.msra.mxu0 %v8777_v17  ;;  %v9480_v62 = vld [vmem:[#allocation2 + $0x6d0] sm:$0xf]  ;;  %v9225_v63 = vor.u32 %v13108_v59, %v9224_v58 }
 0x3bc   :  { %v13172_v60 = vld [vmem:[#allocation2 + $0x6ec] sm:$0xf0] }
 0x3bd   :  { %7163 = vmatpush.bf16.msra.mxu3 %v9577_v9  ;;  %7138 = vmatpush.bf16.msra.mxu1 %v9033_v8  ;;  %v8680_v0 = vld [vmem:[#allocation2 + $0x90] sm:$0xf]  ;;  %v9481_v3 = vor.u32 %v13172_v60, %v9480_v62  ;;  %v6911_v9 = vpop.f32.mrf.mxu3 }
 0x3be   :  { %v12972_v1 = vld [vmem:[#allocation2 + $0xac] sm:$0xf0]  ;;  %v14325_v17 = vadd.f32 %v6911_v9, %v6899_v13 }
 0x3bf   :  { %7151 = vmatpush.bf16.msra.mxu2 %v9289_v21  ;;  %7126 = vmatpush.bf16.msra.mxu0 %v8745_v47  ;;  %v8936_v2 = vld [vmem:[#allocation2 + $0x290] sm:$0xf]  ;;  %v8681_v14 = vor.u32 %v12972_v1, %v8680_v0 }
 0x3c0   :  { %v13036_v5 = vld [vmem:[#allocation2 + $0x2ac] sm:$0xf0] }
 0x3c1   :  { %7164 = vmatpush.bf16.msra.mxu3 %v9545_v32  ;;  %7139 = vmatpush.bf16.msra.mxu1 %v9001_v49  ;;  %v9192_v6 = vld [vmem:[#allocation2 + $0x490] sm:$0xf]  ;;  %v8937_v8 = vor.u32 %v13036_v5, %v8936_v2  ;;  %v6900_v58 = vpop.f32.mrf.mxu2 }
 0x3c2   :  { %v13100_v7 = vld [vmem:[#allocation2 + $0x4ac] sm:$0xf0] }
 0x3c3   :  { %7152 = vmatpush.bf16.msra.mxu2 %v9257_v50  ;;  %v9448_v10 = vld [vmem:[#allocation2 + $0x690] sm:$0xf]  ;;  %7127 = vmatpush.bf16.msra.mxu0 %v8713_v61  ;;  %v9193_v21 = vor.u32 %v13100_v7, %v9192_v6 }
 0x3c4   :  { %v13164_v11 = vld [vmem:[#allocation2 + $0x6ac] sm:$0xf0] }
 0x3c5   :  { %7165 = vmatpush.bf16.msra.mxu3 %v9513_v16  ;;  %7140 = vmatpush.bf16.msra.mxu1 %v8969_v56  ;;  %v8648_v24 = vld [vmem:[#allocation2 + $0x50] sm:$0xf]  ;;  %v9449_v32 = vor.u32 %v13164_v11, %v9448_v10  ;;  %v6913_v61 = vpop.f32.mrf.mxu3 }
 0x3c6   :  { %v12964_v26 = vld [vmem:[#allocation2 + $0x6c] sm:$0xf0] }
 0x3c7   :  { %7153 = vmatpush.bf16.msra.mxu2 %v9225_v63  ;;  %v8904_v27 = vld [vmem:[#allocation2 + $0x250] sm:$0xf]  ;;  %7128 = vmatpush.bf16.msra.mxu0 %v8681_v14  ;;  %v8649_v39 = vor.u32 %v12964_v26, %v8648_v24 }
 0x3c8   :  { %v13028_v37 = vld [vmem:[#allocation2 + $0x26c] sm:$0xf0] }
 0x3c9   :  { %7166 = vmatpush.bf16.msra.mxu3 %v9481_v3  ;;  %v9160_v34 = vld [vmem:[#allocation2 + $0x450] sm:$0xf]  ;;  %7141 = vmatpush.bf16.msra.mxu1 %v8937_v8  ;;  %v8905_v48 = vor.u32 %v13028_v37, %v8904_v27 }
 0x3ca   :  { %v13092_v36 = vld [vmem:[#allocation2 + $0x46c] sm:$0xf0] }
 0x3cb   :  { %v9416_v43 = vld [vmem:[#allocation2 + $0x650] sm:$0xf]  ;;  %7154 = vmatpush.bf16.msra.mxu2 %v9193_v21  ;;  %v9161_v49 = vor.u32 %v13092_v36, %v9160_v34  ;;  %7129 = vmatpush.bf16.msra.mxu0 %v8649_v39 }
 0x3cc   :  { %v13156_v45 = vld [vmem:[#allocation2 + $0x66c] sm:$0xf0] }
 0x3cd   :  { %v8616_v46 = vld [vmem:[#allocation2 + $0x10] sm:$0xf]  ;;  %7167 = vmatpush.bf16.msra.mxu3 %v9449_v32  ;;  %v9417_v53 = vor.u32 %v13156_v45, %v9416_v43  ;;  %7142 = vmatpush.bf16.msra.mxu1 %v8905_v48 }
 0x3ce   :  { %v12956_v47 = vld [vmem:[#allocation2 + $0x2c] sm:$0xf0] }
 0x3cf   :  { %v8872_v50 = vld [vmem:[#allocation2 + $0x210] sm:$0xf]  ;;  %v8617_v56 = vor.u32 %v12956_v47, %v8616_v46  ;;  %7155 = vmatpush.bf16.msra.mxu2 %v9161_v49 }
 0x3d0   :  { %v13020_v51 = vld [vmem:[#allocation2 + $0x22c] sm:$0xf0] }
 0x3d1   :  { %v9128_v52 = vld [vmem:[#allocation2 + $0x410] sm:$0xf]  ;;  %v8873_v2 = vor.u32 %v13020_v51, %v8872_v50  ;;  %7168 = vmatpush.bf16.msra.mxu3 %v9417_v53  ;;  %7130 = vmatpush.bf16.msra.mxu0 %v8617_v56 }
 0x3d2   :  { %v13084_v16 = vld [vmem:[#allocation2 + $0x42c] sm:$0xf0] }
 0x3d3   :  { %v9384_v54 = vld [vmem:[#allocation2 + $0x610] sm:$0xf]  ;;  %v9129_v3 = vor.u32 %v13084_v16, %v9128_v52  ;;  %7143 = vmatpush.bf16.msra.mxu1 %v8873_v2 }
 0x3d4   :  { %v13148_v55 = vld [vmem:[#allocation2 + $0x62c] sm:$0xf0]  ;;  %7131 = vmatmul.bf16.vlgmr.msra.gmra.mxu0 %v14182_v19 }
 0x3d5   :  { %v9864_v59 = vld [vmem:[#allocation2 + $0x9d0] sm:$0xf]  ;;  %v9385_v6 = vor.u32 %v13148_v55, %v9384_v54  ;;  %7156 = vmatpush.bf16.msra.mxu2 %v9129_v3  ;;  %v14048_v55 = vld [vmem:[#allocation4] sm:$0xff] }
 0x3d6   :  { %v13268_v62 = vld [vmem:[#allocation2 + $0x9ec] sm:$0xf0]  ;;  %7144 = vmatmul.bf16.vlgmr.msra.gmra.mxu1 %v14186_v22  ;;  %v1102_v58 = vperm.slane %v14048_v55, 3 }
 0x3d7   :  { %v10120_v60 = vld [vmem:[#allocation2 + $0xbd0] sm:$0xf]  ;;  %v9865_v7 = vor.u32 %v13268_v62, %v9864_v59  ;;  %7169 = vmatpush.bf16.msra.mxu3 %v9385_v6 }
 0x3d8   :  { %v13332_v63 = vld [vmem:[#allocation2 + $0xbec] sm:$0xf0]  ;;  %7157 = vmatmul.bf16.vlgmr.msra.gmra.mxu2 %v14180_v18 }
 0x3d9   :  { %v10376_v0 = vld [vmem:[#allocation2 + $0xdd0] sm:$0xf]  ;;  %v10121_v13 = vor.u32 %v13332_v63, %v10120_v60  ;;  %7175 = vmatpush.bf16.msrb.mxu0 %v9865_v7 }
 0x3da   :  { %v13396_v1 = vld [vmem:[#allocation2 + $0xdec] sm:$0xf0]  ;;  %7170 = vmatmul.bf16.vlgmr.msra.gmra.mxu3 %v14184_v20 }
 0x3db   :  { %v10632_v4 = vld [vmem:[#allocation2 + $0xfd0] sm:$0xf]  ;;  %v10377_v9 = vor.u32 %v13396_v1, %v10376_v0  ;;  %7188 = vmatpush.bf16.msrb.mxu1 %v10121_v13  ;;  %v6924_v1 = vpop.f32.mrf.mxu0  ;;  %v6937_v13 = vpop.f32.mrf.mxu1 }
 0x3dc   :  { %v13460_v5 = vld [vmem:[#allocation2 + $0xfec] sm:$0xf0]  ;;  %v6925_v7 = vadd.f32 %v6924_v1, %v1102_v58 }
 0x3dd   :  { %v9832_v10 = vld [vmem:[#allocation2 + $0x990] sm:$0xf]  ;;  %v10633_v14 = vor.u32 %v13460_v5, %v10632_v4  ;;  %7201 = vmatpush.bf16.msrb.mxu2 %v10377_v9 }
 0x3de   :  { %v13260_v11 = vld [vmem:[#allocation2 + $0x9ac] sm:$0xf0] }
 0x3df   :  { %v10088_v12 = vld [vmem:[#allocation2 + $0xb90] sm:$0xf]  ;;  %v9833_v27 = vor.u32 %v13260_v11, %v9832_v10  ;;  %7214 = vmatpush.bf16.msrb.mxu3 %v10633_v14 }
 0x3e0   :  { %v13324_v15 = vld [vmem:[#allocation2 + $0xbac] sm:$0xf0] }
 0x3e1   :  { %v10344_v8 = vld [vmem:[#allocation2 + $0xd90] sm:$0xf]  ;;  %v10089_v32 = vor.u32 %v13324_v15, %v10088_v12  ;;  %7176 = vmatpush.bf16.msrb.mxu0 %v9833_v27 }
 0x3e2   :  { %v13388_v21 = vld [vmem:[#allocation2 + $0xdac] sm:$0xf0] }
 0x3e3   :  { %v10600_v24 = vld [vmem:[#allocation2 + $0xf90] sm:$0xf]  ;;  %v10345_v37 = vor.u32 %v13388_v21, %v10344_v8  ;;  %7189 = vmatpush.bf16.msrb.mxu1 %v10089_v32  ;;  %v6938_v8 = vadd.f32 %v6937_v13, %v6925_v7 }
 0x3e4   :  { %v13452_v26 = vld [vmem:[#allocation2 + $0xfac] sm:$0xf0] }
 0x3e5   :  { %v9800_v34 = vld [vmem:[#allocation2 + $0x950] sm:$0xf]  ;;  %v10601_v45 = vor.u32 %v13452_v26, %v10600_v24  ;;  %7202 = vmatpush.bf16.msrb.mxu2 %v10345_v37 }
 0x3e6   :  { %v13252_v36 = vld [vmem:[#allocation2 + $0x96c] sm:$0xf0] }
 0x3e7   :  { %v10056_v43 = vld [vmem:[#allocation2 + $0xb50] sm:$0xf]  ;;  %v9801_v50 = vor.u32 %v13252_v36, %v9800_v34  ;;  %7215 = vmatpush.bf16.msrb.mxu3 %v10601_v45  ;;  %v6950_v34 = vpop.f32.mrf.mxu2 }
 0x3e8   :  { %v13316_v39 = vld [vmem:[#allocation2 + $0xb6c] sm:$0xf0] }
 0x3e9   :  { %v10312_v46 = vld [vmem:[#allocation2 + $0xd50] sm:$0xf]  ;;  %v10057_v52 = vor.u32 %v13316_v39, %v10056_v43  ;;  %7177 = vmatpush.bf16.msrb.mxu0 %v9801_v50 }
 0x3ea   :  { %v13380_v47 = vld [vmem:[#allocation2 + $0xd6c] sm:$0xf0] }
 0x3eb   :  { %v10568_v48 = vld [vmem:[#allocation2 + $0xf50] sm:$0xf]  ;;  %v10313_v53 = vor.u32 %v13380_v47, %v10312_v46  ;;  %7190 = vmatpush.bf16.msrb.mxu1 %v10057_v52  ;;  %v6951_v46 = vadd.f32 %v6950_v34, %v6938_v8  ;;  %v6963_v47 = vpop.f32.mrf.mxu3  ;;  %v6926_v52 = vpop.f32.mrf.mxu0 }
 0x3ec   :  { %v13444_v49 = vld [vmem:[#allocation2 + $0xf6c] sm:$0xf0] }
 0x3ed   :  { %v9768_v51 = vld [vmem:[#allocation2 + $0x910] sm:$0xf]  ;;  %v10569_v59 = vor.u32 %v13444_v49, %v10568_v48  ;;  %7203 = vmatpush.bf16.msrb.mxu2 %v10313_v53 }
 0x3ee   :  { %v13244_v16 = vld [vmem:[#allocation2 + $0x92c] sm:$0xf0] }
 0x3ef   :  { %v10024_v54 = vld [vmem:[#allocation2 + $0xb10] sm:$0xf]  ;;  %v9769_v0 = vor.u32 %v13244_v16, %v9768_v51  ;;  %7216 = vmatpush.bf16.msrb.mxu3 %v10569_v59  ;;  %v14331_v51 = vadd.f32 %v6963_v47, %v6951_v46  ;;  %v6939_v59 = vpop.f32.mrf.mxu1 }
 0x3f0   :  { %v13308_v62 = vld [vmem:[#allocation2 + $0xb2c] sm:$0xf0] }
 0x3f1   :  { %v10280_v60 = vld [vmem:[#allocation2 + $0xd10] sm:$0xf]  ;;  %v10025_v2 = vor.u32 %v13308_v62, %v10024_v54  ;;  %7178 = vmatpush.bf16.msrb.mxu0 %v9769_v0 }
 0x3f2   :  { %v13372_v61 = vld [vmem:[#allocation2 + $0xd2c] sm:$0xf0] }
 0x3f3   :  { %v10536_v56 = vld [vmem:[#allocation2 + $0xf10] sm:$0xf]  ;;  %v10281_v3 = vor.u32 %v13372_v61, %v10280_v60  ;;  %7191 = vmatpush.bf16.msrb.mxu1 %v10025_v2 }
 0x3f4   :  { %v13436_v63 = vld [vmem:[#allocation2 + $0xf2c] sm:$0xf0] }
 0x3f5   :  { %v9736_v4 = vld [vmem:[#allocation2 + $0x8d0] sm:$0xf]  ;;  %v10537_v9 = vor.u32 %v13436_v63, %v10536_v56  ;;  %7204 = vmatpush.bf16.msrb.mxu2 %v10281_v3 }
 0x3f6   :  { %v13236_v5 = vld [vmem:[#allocation2 + $0x8ec] sm:$0xf0] }
 0x3f7   :  { %v9992_v6 = vld [vmem:[#allocation2 + $0xad0] sm:$0xf]  ;;  %v9737_v21 = vor.u32 %v13236_v5, %v9736_v4  ;;  %7217 = vmatpush.bf16.msrb.mxu3 %v10537_v9  ;;  %v6952_v9 = vpop.f32.mrf.mxu2 }
 0x3f8   :  { %v13300_v10 = vld [vmem:[#allocation2 + $0xaec] sm:$0xf0] }
 0x3f9   :  { %v10248_v11 = vld [vmem:[#allocation2 + $0xcd0] sm:$0xf]  ;;  %v9993_v24 = vor.u32 %v13300_v10, %v9992_v6  ;;  %7179 = vmatpush.bf16.msrb.mxu0 %v9737_v21 }
 0x3fa   :  { %v13364_v12 = vld [vmem:[#allocation2 + $0xcec] sm:$0xf0] }
 0x3fb   :  { %v10504_v14 = vld [vmem:[#allocation2 + $0xed0] sm:$0xf]  ;;  %v10249_v26 = vor.u32 %v13364_v12, %v10248_v11  ;;  %7192 = vmatpush.bf16.msrb.mxu1 %v9993_v24 }
 0x3fc   :  { %v13428_v15 = vld [vmem:[#allocation2 + $0xeec] sm:$0xf0] }
 0x3fd   :  { %v9704_v27 = vld [vmem:[#allocation2 + $0x890] sm:$0xf]  ;;  %v10505_v36 = vor.u32 %v13428_v15, %v10504_v14  ;;  %7205 = vmatpush.bf16.msrb.mxu2 %v10249_v26  ;;  %v6965_v15 = vpop.f32.mrf.mxu3 }
 0x3fe   :  { %v13228_v32 = vld [vmem:[#allocation2 + $0x8ac] sm:$0xf0] }
 0x3ff   :  { %v9960_v37 = vld [vmem:[#allocation2 + $0xa90] sm:$0xf]  ;;  %v9705_v50 = vor.u32 %v13228_v32, %v9704_v27  ;;  %7218 = vmatpush.bf16.msrb.mxu3 %v10505_v36 }
 0x400   :  { %v13292_v43 = vld [vmem:[#allocation2 + $0xaac] sm:$0xf0] }
 0x401   :  { %v10216_v45 = vld [vmem:[#allocation2 + $0xc90] sm:$0xf]  ;;  %v9961_v53 = vor.u32 %v13292_v43, %v9960_v37  ;;  %7180 = vmatpush.bf16.msrb.mxu0 %v9705_v50 }
 0x402   :  { %v13356_v39 = vld [vmem:[#allocation2 + $0xcac] sm:$0xf0] }
 0x403   :  { %v10472_v48 = vld [vmem:[#allocation2 + $0xe90] sm:$0xf]  ;;  %v10217_v16 = vor.u32 %v13356_v39, %v10216_v45  ;;  %7193 = vmatpush.bf16.msrb.mxu1 %v9961_v53 }
 0x404   :  { %v13420_v49 = vld [vmem:[#allocation2 + $0xeac] sm:$0xf0] }
 0x405   :  { %v9672_v54 = vld [vmem:[#allocation2 + $0x850] sm:$0xf]  ;;  %v10473_v62 = vor.u32 %v13420_v49, %v10472_v48  ;;  %7206 = vmatpush.bf16.msrb.mxu2 %v10217_v16 }
 0x406   :  { %v13220_v55 = vld [vmem:[#allocation2 + $0x86c] sm:$0xf0] }
 0x407   :  { %v9928_v58 = vld [vmem:[#allocation2 + $0xa50] sm:$0xf]  ;;  %v9673_v1 = vor.u32 %v13220_v55, %v9672_v54  ;;  %7219 = vmatpush.bf16.msrb.mxu3 %v10473_v62 }
 0x408   :  { %v13284_v60 = vld [vmem:[#allocation2 + $0xa6c] sm:$0xf0] }
 0x409   :  { %v10184_v61 = vld [vmem:[#allocation2 + $0xc50] sm:$0xf]  ;;  %v9929_v4 = vor.u32 %v13284_v60, %v9928_v58  ;;  %7181 = vmatpush.bf16.msrb.mxu0 %v9673_v1 }
 0x40a   :  { %v13348_v56 = vld [vmem:[#allocation2 + $0xc6c] sm:$0xf0] }
 0x40b   :  { %v10440_v63 = vld [vmem:[#allocation2 + $0xe50] sm:$0xf]  ;;  %v10185_v5 = vor.u32 %v13348_v56, %v10184_v61  ;;  %7194 = vmatpush.bf16.msrb.mxu1 %v9929_v4 }
 0x40c   :  { %v13412_v0 = vld [vmem:[#allocation2 + $0xe6c] sm:$0xf0] }
 0x40d   :  { %v9640_v2 = vld [vmem:[#allocation2 + $0x810] sm:$0xf]  ;;  %v10441_v10 = vor.u32 %v13412_v0, %v10440_v63  ;;  %7207 = vmatpush.bf16.msrb.mxu2 %v10185_v5 }
 0x40e   :  { %v13212_v3 = vld [vmem:[#allocation2 + $0x82c] sm:$0xf0] }
 0x40f   :  { %v9896_v6 = vld [vmem:[#allocation2 + $0xa10] sm:$0xf]  ;;  %v9641_v26 = vor.u32 %v13212_v3, %v9640_v2  ;;  %7220 = vmatpush.bf16.msrb.mxu3 %v10441_v10 }
 0x410   :  { %v13276_v7 = vld [vmem:[#allocation2 + $0xa2c] sm:$0xf0] }
 0x411   :  { %v10152_v13 = vld [vmem:[#allocation2 + $0xc10] sm:$0xf]  ;;  %v9897_v34 = vor.u32 %v13276_v7, %v9896_v6  ;;  %7182 = vmatpush.bf16.msrb.mxu0 %v9641_v26 }
 0x412   :  { %v13340_v11 = vld [vmem:[#allocation2 + $0xc2c] sm:$0xf0] }
 0x413   :  { %v10408_v12 = vld [vmem:[#allocation2 + $0xe10] sm:$0xf]  ;;  %v10153_v36 = vor.u32 %v13340_v11, %v10152_v13  ;;  %7195 = vmatpush.bf16.msrb.mxu1 %v9897_v34 }
 0x414   :  { %v13404_v14 = vld [vmem:[#allocation2 + $0xe2c] sm:$0xf0]  ;;  %7183 = vmatmul.bf16.vlgmr.msrb.gmra.mxu0 %v14200_v41 }
 0x415   :  { %v10888_v8 = vld [vmem:[#allocation2 + $0x11d0] sm:$0xf]  ;;  %v10409_v39 = vor.u32 %v13404_v14, %v10408_v12  ;;  %7208 = vmatpush.bf16.msrb.mxu2 %v10153_v36 }
 0x416   :  { %v13524_v21 = vld [vmem:[#allocation2 + $0x11ec] sm:$0xf0]  ;;  %7196 = vmatmul.bf16.vlgmr.msrb.gmra.mxu1 %v14204_v44 }
 0x417   :  { %v11144_v24 = vld [vmem:[#allocation2 + $0x13d0] sm:$0xf]  ;;  %v10889_v46 = vor.u32 %v13524_v21, %v10888_v8  ;;  %7221 = vmatpush.bf16.msrb.mxu3 %v10409_v39 }
 0x418   :  { %v13588_v27 = vld [vmem:[#allocation2 + $0x13ec] sm:$0xf0]  ;;  %7209 = vmatmul.bf16.vlgmr.msrb.gmra.mxu2 %v14198_v38 }
 0x419   :  { %v11400_v32 = vld [vmem:[#allocation2 + $0x15d0] sm:$0xf]  ;;  %v11145_v47 = vor.u32 %v13588_v27, %v11144_v24  ;;  %7227 = vmatpush.bf16.msra.mxu0 %v10889_v46  ;;  %v6989_v46 = vpop.f32.mrf.mxu1 }
 0x41a   :  { %v13652_v37 = vld [vmem:[#allocation2 + $0x15ec] sm:$0xf0]  ;;  %7222 = vmatmul.bf16.vlgmr.msrb.gmra.mxu3 %v14202_v42 }
 0x41b   :  { %v11656_v43 = vld [vmem:[#allocation2 + $0x17d0] sm:$0xf]  ;;  %v11401_v48 = vor.u32 %v13652_v37, %v11400_v32  ;;  %7240 = vmatpush.bf16.msra.mxu1 %v11145_v47  ;;  %v6976_v32 = vpop.f32.mrf.mxu0 }
 0x41c   :  { %v13716_v45 = vld [vmem:[#allocation2 + $0x17ec] sm:$0xf0]  ;;  %v6977_v39 = vadd.f32 %v6976_v32, %v14331_v51 }
 0x41d   :  { %v10856_v49 = vld [vmem:[#allocation2 + $0x1190] sm:$0xf]  ;;  %v11657_v53 = vor.u32 %v13716_v45, %v11656_v43  ;;  %7253 = vmatpush.bf16.msra.mxu2 %v11401_v48 }
 0x41e   :  { %v13516_v50 = vld [vmem:[#allocation2 + $0x11ac] sm:$0xf0] }
 0x41f   :  { %v11112_v52 = vld [vmem:[#allocation2 + $0x1390] sm:$0xf]  ;;  %v10857_v62 = vor.u32 %v13516_v50, %v10856_v49  ;;  %7266 = vmatpush.bf16.msra.mxu3 %v11657_v53 }
 0x420   :  { %v13580_v16 = vld [vmem:[#allocation2 + $0x13ac] sm:$0xf0] }
 0x421   :  { %v11368_v54 = vld [vmem:[#allocation2 + $0x1590] sm:$0xf]  ;;  %v11113_v60 = vor.u32 %v13580_v16, %v11112_v52  ;;  %7228 = vmatpush.bf16.msra.mxu0 %v10857_v62  ;;  %v6990_v16 = vadd.f32 %v6989_v46, %v6977_v39 }
 0x422   :  { %v13644_v55 = vld [vmem:[#allocation2 + $0x15ac] sm:$0xf0] }
 0x423   :  { %v11624_v58 = vld [vmem:[#allocation2 + $0x1790] sm:$0xf]  ;;  %v11369_v61 = vor.u32 %v13644_v55, %v11368_v54  ;;  %7241 = vmatpush.bf16.msra.mxu1 %v11113_v60 }
 0x424   :  { %v13708_v59 = vld [vmem:[#allocation2 + $0x17ac] sm:$0xf0] }
 0x425   :  { %v10824_v56 = vld [vmem:[#allocation2 + $0x1150] sm:$0xf]  ;;  %v11625_v1 = vor.u32 %v13708_v59, %v11624_v58  ;;  %7254 = vmatpush.bf16.msra.mxu2 %v11369_v61  ;;  %v7002_v61 = vpop.f32.mrf.mxu2 }
 0x426   :  { %v13508_v63 = vld [vmem:[#allocation2 + $0x116c] sm:$0xf0] }
 0x427   :  { %v11080_v0 = vld [vmem:[#allocation2 + $0x1350] sm:$0xf]  ;;  %v10825_v7 = vor.u32 %v13508_v63, %v10824_v56  ;;  %7267 = vmatpush.bf16.msra.mxu3 %v11625_v1  ;;  %v7003_v1 = vadd.f32 %v7002_v61, %v6990_v16 }
 0x428   :  { %v13572_v2 = vld [vmem:[#allocation2 + $0x136c] sm:$0xf0] }
 0x429   :  { %v11336_v3 = vld [vmem:[#allocation2 + $0x1550] sm:$0xf]  ;;  %v11081_v13 = vor.u32 %v13572_v2, %v11080_v0  ;;  %7229 = vmatpush.bf16.msra.mxu0 %v10825_v7  ;;  %v7015_v2 = vpop.f32.mrf.mxu3  ;;  %v6978_v7 = vpop.f32.mrf.mxu0 }
 0x42a   :  { %v13636_v4 = vld [vmem:[#allocation2 + $0x156c] sm:$0xf0] }
 0x42b   :  { %v11592_v5 = vld [vmem:[#allocation2 + $0x1750] sm:$0xf]  ;;  %v11337_v9 = vor.u32 %v13636_v4, %v11336_v3  ;;  %7242 = vmatpush.bf16.msra.mxu1 %v11081_v13 }
 0x42c   :  { %v13700_v6 = vld [vmem:[#allocation2 + $0x176c] sm:$0xf0] }
 0x42d   :  { %v10792_v10 = vld [vmem:[#allocation2 + $0x1110] sm:$0xf]  ;;  %v11593_v14 = vor.u32 %v13700_v6, %v11592_v5  ;;  %7255 = vmatpush.bf16.msra.mxu2 %v11337_v9  ;;  %v14338_v6 = vadd.f32 %v7015_v2, %v7003_v1 }
 0x42e   :  { %v13500_v11 = vld [vmem:[#allocation2 + $0x112c] sm:$0xf0] }
 0x42f   :  { %v11048_v12 = vld [vmem:[#allocation2 + $0x1310] sm:$0xf]  ;;  %v10793_v27 = vor.u32 %v13500_v11, %v10792_v10  ;;  %7268 = vmatpush.bf16.msra.mxu3 %v11593_v14  ;;  %v6991_v14 = vpop.f32.mrf.mxu1 }
 0x430   :  { %v13564_v15 = vld [vmem:[#allocation2 + $0x132c] sm:$0xf0] }
 0x431   :  { %v11304_v8 = vld [vmem:[#allocation2 + $0x1510] sm:$0xf]  ;;  %v11049_v37 = vor.u32 %v13564_v15, %v11048_v12  ;;  %7230 = vmatpush.bf16.msra.mxu0 %v10793_v27 }
 0x432   :  { %v13628_v21 = vld [vmem:[#allocation2 + $0x152c] sm:$0xf0] }
 0x433   :  { %v11560_v24 = vld [vmem:[#allocation2 + $0x1710] sm:$0xf]  ;;  %v11305_v34 = vor.u32 %v13628_v21, %v11304_v8  ;;  %7243 = vmatpush.bf16.msra.mxu1 %v11049_v37 }
 0x434   :  { %v13692_v26 = vld [vmem:[#allocation2 + $0x172c] sm:$0xf0] }
 0x435   :  { %v10760_v36 = vld [vmem:[#allocation2 + $0x10d0] sm:$0xf]  ;;  %v11561_v47 = vor.u32 %v13692_v26, %v11560_v24  ;;  %7256 = vmatpush.bf16.msra.mxu2 %v11305_v34 }
 0x436   :  { %v13492_v43 = vld [vmem:[#allocation2 + $0x10ec] sm:$0xf0] }
 0x437   :  { %v11016_v45 = vld [vmem:[#allocation2 + $0x12d0] sm:$0xf]  ;;  %v10761_v54 = vor.u32 %v13492_v43, %v10760_v36  ;;  %7269 = vmatpush.bf16.msra.mxu3 %v11561_v47  ;;  %v7004_v47 = vpop.f32.mrf.mxu2 }
 0x438   :  { %v13556_v48 = vld [vmem:[#allocation2 + $0x12ec] sm:$0xf0] }
 0x439   :  { %v11272_v49 = vld [vmem:[#allocation2 + $0x14d0] sm:$0xf]  ;;  %v11017_v55 = vor.u32 %v13556_v48, %v11016_v45  ;;  %7231 = vmatpush.bf16.msra.mxu0 %v10761_v54 }
 0x43a   :  { %v13620_v50 = vld [vmem:[#allocation2 + $0x14ec] sm:$0xf0] }
 0x43b   :  { %v11528_v52 = vld [vmem:[#allocation2 + $0x16d0] sm:$0xf]  ;;  %v11273_v58 = vor.u32 %v13620_v50, %v11272_v49  ;;  %7244 = vmatpush.bf16.msra.mxu1 %v11017_v55 }
 0x43c   :  { %v13684_v53 = vld [vmem:[#allocation2 + $0x16ec] sm:$0xf0] }
 0x43d   :  { %v10728_v59 = vld [vmem:[#allocation2 + $0x1090] sm:$0xf]  ;;  %v11529_v51 = vor.u32 %v13684_v53, %v11528_v52  ;;  %7257 = vmatpush.bf16.msra.mxu2 %v11273_v58  ;;  %v7017_v53 = vpop.f32.mrf.mxu3 }
 0x43e   :  { %v13484_v62 = vld [vmem:[#allocation2 + $0x10ac] sm:$0xf0] }
 0x43f   :  { %v10984_v60 = vld [vmem:[#allocation2 + $0x1290] sm:$0xf]  ;;  %v10729_v5 = vor.u32 %v13484_v62, %v10728_v59  ;;  %7270 = vmatpush.bf16.msra.mxu3 %v11529_v51 }
 0x440   :  { %v13548_v56 = vld [vmem:[#allocation2 + $0x12ac] sm:$0xf0] }
 0x441   :  { %v11240_v63 = vld [vmem:[#allocation2 + $0x1490] sm:$0xf]  ;;  %v10985_v13 = vor.u32 %v13548_v56, %v10984_v60  ;;  %7232 = vmatpush.bf16.msra.mxu0 %v10729_v5 }
 0x442   :  { %v13612_v0 = vld [vmem:[#allocation2 + $0x14ac] sm:$0xf0] }
 0x443   :  { %v11496_v3 = vld [vmem:[#allocation2 + $0x1690] sm:$0xf]  ;;  %v11241_v9 = vor.u32 %v13612_v0, %v11240_v63  ;;  %7245 = vmatpush.bf16.msra.mxu1 %v10985_v13 }
 0x444   :  { %v13676_v4 = vld [vmem:[#allocation2 + $0x16ac] sm:$0xf0] }
 0x445   :  { %v10696_v10 = vld [vmem:[#allocation2 + $0x1050] sm:$0xf]  ;;  %v11497_v15 = vor.u32 %v13676_v4, %v11496_v3  ;;  %7258 = vmatpush.bf16.msra.mxu2 %v11241_v9 }
 0x446   :  { %v13476_v11 = vld [vmem:[#allocation2 + $0x106c] sm:$0xf0] }
 0x447   :  { %v10952_v12 = vld [vmem:[#allocation2 + $0x1250] sm:$0xf]  ;;  %v10697_v32 = vor.u32 %v13476_v11, %v10696_v10  ;;  %7271 = vmatpush.bf16.msra.mxu3 %v11497_v15 }
 0x448   :  { %v13540_v8 = vld [vmem:[#allocation2 + $0x126c] sm:$0xf0] }
 0x449   :  { %v11208_v21 = vld [vmem:[#allocation2 + $0x1450] sm:$0xf]  ;;  %v10953_v36 = vor.u32 %v13540_v8, %v10952_v12  ;;  %7233 = vmatpush.bf16.msra.mxu0 %v10697_v32 }
 0x44a   :  { %v13604_v24 = vld [vmem:[#allocation2 + $0x146c] sm:$0xf0] }
 0x44b   :  { %v11464_v26 = vld [vmem:[#allocation2 + $0x1650] sm:$0xf]  ;;  %v11209_v43 = vor.u32 %v13604_v24, %v11208_v21  ;;  %7246 = vmatpush.bf16.msra.mxu1 %v10953_v36 }
 0x44c   :  { %v13668_v27 = vld [vmem:[#allocation2 + $0x166c] sm:$0xf0] }
 0x44d   :  { %v10664_v37 = vld [vmem:[#allocation2 + $0x1010] sm:$0xf]  ;;  %v11465_v48 = vor.u32 %v13668_v27, %v11464_v26  ;;  %7259 = vmatpush.bf16.msra.mxu2 %v11209_v43 }
 0x44e   :  { %v13468_v34 = vld [vmem:[#allocation2 + $0x102c] sm:$0xf0] }
 0x44f   :  { %v10920_v45 = vld [vmem:[#allocation2 + $0x1210] sm:$0xf]  ;;  %v10665_v58 = vor.u32 %v13468_v34, %v10664_v37  ;;  %7272 = vmatpush.bf16.msra.mxu3 %v11465_v48 }
 0x450   :  { %v13532_v39 = vld [vmem:[#allocation2 + $0x122c] sm:$0xf0] }
 0x451   :  { %v11176_v46 = vld [vmem:[#allocation2 + $0x1410] sm:$0xf]  ;;  %v10921_v61 = vor.u32 %v13532_v39, %v10920_v45  ;;  %7234 = vmatpush.bf16.msra.mxu0 %v10665_v58 }
 0x452   :  { %v13596_v49 = vld [vmem:[#allocation2 + $0x142c] sm:$0xf0] }
 0x453   :  { %v11432_v50 = vld [vmem:[#allocation2 + $0x1610] sm:$0xf]  ;;  %v11177_v51 = vor.u32 %v13596_v49, %v11176_v46  ;;  %7247 = vmatpush.bf16.msra.mxu1 %v10921_v61  ;;  %v7041_v61 = vpop.f32.mrf.mxu1 }
 0x454   :  { %v13660_v52 = vld [vmem:[#allocation2 + $0x162c] sm:$0xf0]  ;;  %7235 = vmatmul.bf16.vlgmr.msra.gmra.mxu0 %v14216_v25 }
 0x455   :  { %v11912_v16 = vld [vmem:[#allocation2 + $0x19d0] sm:$0xf]  ;;  %v11433_v0 = vor.u32 %v13660_v52, %v11432_v50  ;;  %7260 = vmatpush.bf16.msra.mxu2 %v11177_v51 }
 0x456   :  { %v13780_v54 = vld [vmem:[#allocation2 + $0x19ec] sm:$0xf0]  ;;  %7248 = vmatmul.bf16.vlgmr.msra.gmra.mxu1 %v14220_v30 }
 0x457   :  { %v12168_v55 = vld [vmem:[#allocation2 + $0x1bd0] sm:$0xf]  ;;  %v11913_v1 = vor.u32 %v13780_v54, %v11912_v16  ;;  %7273 = vmatpush.bf16.msra.mxu3 %v11433_v0 }
 0x458   :  { %v13844_v59 = vld [vmem:[#allocation2 + $0x1bec] sm:$0xf0]  ;;  %7261 = vmatmul.bf16.vlgmr.msra.gmra.mxu2 %v14218_v29 }
 0x459   :  { %v12424_v62 = vld [vmem:[#allocation2 + $0x1dd0] sm:$0xf]  ;;  %v12169_v2 = vor.u32 %v13844_v59, %v12168_v55  ;;  %7279 = vmatpush.bf16.msrb.mxu0 %v11913_v1  ;;  %v7028_v55 = vpop.f32.mrf.mxu0 }
 0x45a   :  { %v13908_v60 = vld [vmem:[#allocation2 + $0x1dec] sm:$0xf0]  ;;  %7274 = vmatmul.bf16.vlgmr.msra.gmra.mxu3 %v14222_v33 }
 0x45b   :  { %v12680_v56 = vld [vmem:[#allocation2 + $0x1fd0] sm:$0xf]  ;;  %v12425_v3 = vor.u32 %v13908_v60, %v12424_v62  ;;  %7292 = vmatpush.bf16.msrb.mxu1 %v12169_v2  ;;  %v7029_v62 = vadd.f32 %v7028_v55, %v14338_v6 }
 0x45c   :  { %v13972_v63 = vld [vmem:[#allocation2 + $0x1fec] sm:$0xf0] }
 0x45d   :  { %v11880_v4 = vld [vmem:[#allocation2 + $0x1990] sm:$0xf]  ;;  %v12681_v13 = vor.u32 %v13972_v63, %v12680_v56  ;;  %7305 = vmatpush.bf16.msrb.mxu2 %v12425_v3  ;;  %v7042_v3 = vadd.f32 %v7041_v61, %v7029_v62 }
 0x45e   :  { %v13772_v5 = vld [vmem:[#allocation2 + $0x19ac] sm:$0xf0] }
 0x45f   :  { %v12136_v7 = vld [vmem:[#allocation2 + $0x1b90] sm:$0xf]  ;;  %v11881_v15 = vor.u32 %v13772_v5, %v11880_v4  ;;  %7318 = vmatpush.bf16.msrb.mxu3 %v12681_v13 }
 0x460   :  { %v13836_v9 = vld [vmem:[#allocation2 + $0x1bac] sm:$0xf0] }
 0x461   :  { %v12392_v10 = vld [vmem:[#allocation2 + $0x1d90] sm:$0xf]  ;;  %v12137_v8 = vor.u32 %v13836_v9, %v12136_v7  ;;  %7280 = vmatpush.bf16.msrb.mxu0 %v11881_v15 }
 0x462   :  { %v13900_v11 = vld [vmem:[#allocation2 + $0x1dac] sm:$0xf0] }
 0x463   :  { %v12648_v12 = vld [vmem:[#allocation2 + $0x1f90] sm:$0xf]  ;;  %v12393_v21 = vor.u32 %v13900_v11, %v12392_v10  ;;  %7293 = vmatpush.bf16.msrb.mxu1 %v12137_v8 }
 0x464   :  { %v13964_v14 = vld [vmem:[#allocation2 + $0x1fac] sm:$0xf0] }
 0x465   :  { %v11848_v24 = vld [vmem:[#allocation2 + $0x1950] sm:$0xf]  ;;  %v12649_v32 = vor.u32 %v13964_v14, %v12648_v12  ;;  %7306 = vmatpush.bf16.msrb.mxu2 %v12393_v21  ;;  %v7054_v21 = vpop.f32.mrf.mxu2 }
 0x466   :  { %v13764_v26 = vld [vmem:[#allocation2 + $0x196c] sm:$0xf0] }
 0x467   :  { %v12104_v27 = vld [vmem:[#allocation2 + $0x1b50] sm:$0xf]  ;;  %v11849_v39 = vor.u32 %v13764_v26, %v11848_v24  ;;  %7319 = vmatpush.bf16.msrb.mxu3 %v12649_v32  ;;  %v7055_v32 = vadd.f32 %v7054_v21, %v7042_v3 }
 0x468   :  { %v13828_v37 = vld [vmem:[#allocation2 + $0x1b6c] sm:$0xf0] }
 0x469   :  { %v12360_v34 = vld [vmem:[#allocation2 + $0x1d50] sm:$0xf]  ;;  %v12105_v46 = vor.u32 %v13828_v37, %v12104_v27  ;;  %7281 = vmatpush.bf16.msrb.mxu0 %v11849_v39  ;;  %v7067_v37 = vpop.f32.mrf.mxu3  ;;  %v7043_v39 = vpop.f32.mrf.mxu1 }
 0x46a   :  { %v13892_v36 = vld [vmem:[#allocation2 + $0x1d6c] sm:$0xf0] }
 0x46b   :  { %v12616_v43 = vld [vmem:[#allocation2 + $0x1f50] sm:$0xf]  ;;  %v12361_v47 = vor.u32 %v13892_v36, %v12360_v34  ;;  %7294 = vmatpush.bf16.msrb.mxu1 %v12105_v46  ;;  %v14345_v46 = vadd.f32 %v7067_v37, %v7055_v32 }
 0x46c   :  { %v13956_v45 = vld [vmem:[#allocation2 + $0x1f6c] sm:$0xf0] }
 0x46d   :  { %v11816_v48 = vld [vmem:[#allocation2 + $0x1910] sm:$0xf]  ;;  %v12617_v52 = vor.u32 %v13956_v45, %v12616_v43  ;;  %7307 = vmatpush.bf16.msrb.mxu2 %v12361_v47  ;;  %v7030_v43 = vpop.f32.mrf.mxu0 }
 0x46e   :  { %v13756_v49 = vld [vmem:[#allocation2 + $0x192c] sm:$0xf0]  ;;  %v8810_v43 = vld [vmem:[#allocation2 + $0x1b0] sm:$0xf0] }
 0x46f   :  { %v12072_v50 = vld [vmem:[#allocation2 + $0x1b10] sm:$0xf]  ;;  %v11817_v60 = vor.u32 %v13756_v49, %v11816_v48  ;;  %7320 = vmatpush.bf16.msrb.mxu3 %v12617_v52 }
 0x470   :  { %v13820_v53 = vld [vmem:[#allocation2 + $0x1b2c] sm:$0xf0] }
 0x471   :  { %v12328_v16 = vld [vmem:[#allocation2 + $0x1d10] sm:$0xf]  ;;  %v12073_v51 = vor.u32 %v13820_v53, %v12072_v50  ;;  %7282 = vmatpush.bf16.msrb.mxu0 %v11817_v60 }
 0x472   :  { %v13884_v54 = vld [vmem:[#allocation2 + $0x1d2c] sm:$0xf0] }
 0x473   :  { %v12584_v58 = vld [vmem:[#allocation2 + $0x1f10] sm:$0xf]  ;;  %v12329_v56 = vor.u32 %v13884_v54, %v12328_v16  ;;  %7295 = vmatpush.bf16.msrb.mxu1 %v12073_v51 }
 0x474   :  { %v13948_v59 = vld [vmem:[#allocation2 + $0x1f2c] sm:$0xf0] }
 0x475   :  { %v11784_v63 = vld [vmem:[#allocation2 + $0x18d0] sm:$0xf]  ;;  %v12585_v2 = vor.u32 %v13948_v59, %v12584_v58  ;;  %7308 = vmatpush.bf16.msrb.mxu2 %v12329_v56 }
 0x476   :  { %v13748_v0 = vld [vmem:[#allocation2 + $0x18ec] sm:$0xf0] }
 0x477   :  { %v12040_v1 = vld [vmem:[#allocation2 + $0x1ad0] sm:$0xf]  ;;  %v11785_v10 = vor.u32 %v13748_v0, %v11784_v63  ;;  %7321 = vmatpush.bf16.msrb.mxu3 %v12585_v2 }
 0x478   :  { %v13812_v4 = vld [vmem:[#allocation2 + $0x1aec] sm:$0xf0] }
 0x479   :  { %v12296_v5 = vld [vmem:[#allocation2 + $0x1cd0] sm:$0xf]  ;;  %v12041_v6 = vor.u32 %v13812_v4, %v12040_v1  ;;  %7283 = vmatpush.bf16.msrb.mxu0 %v11785_v10  ;;  %v13072_v10 = vld [vmem:[#allocation2 + $0x3d4] sm:$0xf] }
 0x47a   :  { %v13876_v7 = vld [vmem:[#allocation2 + $0x1cec] sm:$0xf0] }
 0x47b   :  { %v12552_v13 = vld [vmem:[#allocation2 + $0x1ed0] sm:$0xf]  ;;  %v12297_v11 = vor.u32 %v13876_v7, %v12296_v5  ;;  %7296 = vmatpush.bf16.msrb.mxu1 %v12041_v6  ;;  %v7056_v7 = vpop.f32.mrf.mxu2  ;;  %v7069_v6 = vpop.f32.mrf.mxu3 }
 0x47c   :  { %v13940_v9 = vld [vmem:[#allocation2 + $0x1eec] sm:$0xf0]  ;;  %v7080_v6 = vpop.f32.mrf.mxu0 }
 0x47d   :  { %v11752_v12 = vld [vmem:[#allocation2 + $0x1890] sm:$0xf]  ;;  %v12553_v8 = vor.u32 %v13940_v9, %v12552_v13  ;;  %7309 = vmatpush.bf16.msrb.mxu2 %v12297_v11  ;;  %v13008_v13 = vld [vmem:[#allocation2 + $0x1d4] sm:$0xf] }
 0x47e   :  { %v13740_v14 = vld [vmem:[#allocation2 + $0x18ac] sm:$0xf0]  ;;  %v8842_v9 = vld [vmem:[#allocation2 + $0x1f0] sm:$0xf0] }
 0x47f   :  { %v12008_v15 = vld [vmem:[#allocation2 + $0x1a90] sm:$0xf]  ;;  %v11753_v45 = vor.u32 %v13740_v14, %v11752_v12  ;;  %7322 = vmatpush.bf16.msrb.mxu3 %v12553_v8  ;;  %v9098_v12 = vld [vmem:[#allocation2 + $0x3f0] sm:$0xf0]  ;;  %v8845_v32 = vor.u32 %v13008_v13, %v8842_v9 }
 0x480   :  { %v13804_v24 = vld [vmem:[#allocation2 + $0x1aac] sm:$0xf0]  ;;  %v13136_v14 = vld [vmem:[#allocation2 + $0x5d4] sm:$0xf]  ;;  %v9101_v37 = vor.u32 %v13072_v10, %v9098_v12 }
 0x481   :  { %v12264_v26 = vld [vmem:[#allocation2 + $0x1c90] sm:$0xf]  ;;  %v12009_v47 = vor.u32 %v13804_v24, %v12008_v15  ;;  %7284 = vmatpush.bf16.msrb.mxu0 %v11753_v45  ;;  %v9354_v15 = vld [vmem:[#allocation2 + $0x5f0] sm:$0xf0] }
 0x482   :  { %v13868_v27 = vld [vmem:[#allocation2 + $0x1cac] sm:$0xf0]  ;;  %v13200_v24 = vld [vmem:[#allocation2 + $0x7d4] sm:$0xf] }
 0x483   :  { %v12520_v34 = vld [vmem:[#allocation2 + $0x1e90] sm:$0xf]  ;;  %v12265_v48 = vor.u32 %v13868_v27, %v12264_v26  ;;  %7297 = vmatpush.bf16.msrb.mxu1 %v12009_v47  ;;  %v9610_v26 = vld [vmem:[#allocation2 + $0x7f0] sm:$0xf0] }
 0x484   :  { %v13932_v36 = vld [vmem:[#allocation2 + $0x1eac] sm:$0xf0]  ;;  %v13064_v45 = vld [vmem:[#allocation2 + $0x394] sm:$0xf]  ;;  %v9613_v39 = vor.u32 %v13200_v24, %v9610_v26 }
 0x485   :  { %v11720_v49 = vld [vmem:[#allocation2 + $0x1850] sm:$0xf]  ;;  %v12521_v53 = vor.u32 %v13932_v36, %v12520_v34  ;;  %7310 = vmatpush.bf16.msrb.mxu2 %v12265_v48  ;;  %v9357_v34 = vor.u32 %v13136_v14, %v9354_v15  ;;  %v13000_v36 = vld [vmem:[#allocation2 + $0x194] sm:$0xf]  ;;  %v7081_v14 = vadd.f32 %v7080_v6, %v14345_v46 }
 0x486   :  { %v13732_v50 = vld [vmem:[#allocation2 + $0x186c] sm:$0xf0]  ;;  %v9066_v47 = vld [vmem:[#allocation2 + $0x3b0] sm:$0xf0] }
 0x487   :  { %v11976_v52 = vld [vmem:[#allocation2 + $0x1a50] sm:$0xf]  ;;  %v11721_v62 = vor.u32 %v13732_v50, %v11720_v49  ;;  %7323 = vmatpush.bf16.msrb.mxu3 %v12521_v53  ;;  %v13128_v48 = vld [vmem:[#allocation2 + $0x594] sm:$0xf]  ;;  %v8813_v53 = vor.u32 %v13000_v36, %v8810_v43 }
 0x488   :  { %v13796_v16 = vld [vmem:[#allocation2 + $0x1a6c] sm:$0xf0]  ;;  %v9322_v49 = vld [vmem:[#allocation2 + $0x5b0] sm:$0xf0] }
 0x489   :  { %v12232_v54 = vld [vmem:[#allocation2 + $0x1c50] sm:$0xf]  ;;  %v11977_v51 = vor.u32 %v13796_v16, %v11976_v52  ;;  %7285 = vmatpush.bf16.msrb.mxu0 %v11721_v62  ;;  %v13192_v50 = vld [vmem:[#allocation2 + $0x794] sm:$0xf]  ;;  %v9069_v16 = vor.u32 %v13064_v45, %v9066_v47 }
 0x48a   :  { %v13860_v55 = vld [vmem:[#allocation2 + $0x1c6c] sm:$0xf0]  ;;  %v9578_v52 = vld [vmem:[#allocation2 + $0x7b0] sm:$0xf0] }
 0x48b   :  { %v12488_v58 = vld [vmem:[#allocation2 + $0x1e50] sm:$0xf]  ;;  %v12233_v56 = vor.u32 %v13860_v55, %v12232_v54  ;;  %7298 = vmatpush.bf16.msrb.mxu1 %v11977_v51  ;;  %v9325_v54 = vor.u32 %v13128_v48, %v9322_v49  ;;  %v12992_v55 = vld [vmem:[#allocation2 + $0x154] sm:$0xf]  ;;  %v9581_v62 = vor.u32 %v13192_v50, %v9578_v52 }
 0x48c   :  { %v13924_v59 = vld [vmem:[#allocation2 + $0x1e6c] sm:$0xf0]  ;;  %v9290_v51 = vld [vmem:[#allocation2 + $0x570] sm:$0xf0] }
 0x48d   :  { %v11688_v60 = vld [vmem:[#allocation2 + $0x1810] sm:$0xf]  ;;  %v12489_v2 = vor.u32 %v13924_v59, %v12488_v58  ;;  %7311 = vmatpush.bf16.msrb.mxu2 %v12233_v56  ;;  %v8778_v58 = vld [vmem:[#allocation2 + $0x170] sm:$0xf0] }
 0x48e   :  { %v13724_v61 = vld [vmem:[#allocation2 + $0x182c] sm:$0xf0]  ;;  %v13056_v59 = vld [vmem:[#allocation2 + $0x354] sm:$0xf] }
 0x48f   :  { %v11944_v63 = vld [vmem:[#allocation2 + $0x1a10] sm:$0xf]  ;;  %v11689_v11 = vor.u32 %v13724_v61, %v11688_v60  ;;  %7324 = vmatpush.bf16.msrb.mxu3 %v12489_v2  ;;  %v9034_v60 = vld [vmem:[#allocation2 + $0x370] sm:$0xf0] }
 0x490   :  { %v13788_v0 = vld [vmem:[#allocation2 + $0x1a2c] sm:$0xf0]  ;;  %v13120_v61 = vld [vmem:[#allocation2 + $0x554] sm:$0xf] }
 0x491   :  { %v12200_v1 = vld [vmem:[#allocation2 + $0x1c10] sm:$0xf]  ;;  %v11945_v8 = vor.u32 %v13788_v0, %v11944_v63  ;;  %7286 = vmatpush.bf16.msrb.mxu0 %v11689_v11  ;;  %v13184_v56 = vld [vmem:[#allocation2 + $0x754] sm:$0xf]  ;;  %v8781_v0 = vor.u32 %v12992_v55, %v8778_v58  ;;  %v9293_v2 = vor.u32 %v13120_v61, %v9290_v51 }
 0x492   :  { %v13852_v3 = vld [vmem:[#allocation2 + $0x1c2c] sm:$0xf0]  ;;  %v9546_v63 = vld [vmem:[#allocation2 + $0x770] sm:$0xf0] }
 0x493   :  { %v12456_v4 = vld [vmem:[#allocation2 + $0x1e10] sm:$0xf]  ;;  %v12201_v21 = vor.u32 %v13852_v3, %v12200_v1  ;;  %7299 = vmatpush.bf16.msrb.mxu1 %v11945_v8  ;;  %v9037_v1 = vor.u32 %v13056_v59, %v9034_v60  ;;  %v12984_v3 = vld [vmem:[#allocation2 + $0x114] sm:$0xf]  ;;  %v9549_v7 = vor.u32 %v13184_v56, %v9546_v63  ;;  %v7093_v8 = vpop.f32.mrf.mxu1  ;;  %v7119_v60 = vpop.f32.mrf.mxu3 }
 0x494   :  { %v13916_v5 = vld [vmem:[#allocation2 + $0x1e2c] sm:$0xf0]  ;;  %7287 = vmatmul.bf16.vlgmr.msrb.gmra.mxu0 %v14234_v23  ;;  %v9002_v13 = vld [vmem:[#allocation2 + $0x330] sm:$0xf0]  ;;  %v7082_v56 = vpop.f32.mrf.mxu0 }
 0x495   :  { %v12457_v27 = vor.u32 %v13916_v5, %v12456_v4  ;;  %7312 = vmatpush.bf16.msrb.mxu2 %v12201_v21  ;;  %7331 = vmatpush.bf16.msra.mxu0 %v8845_v32  ;;  %v8746_v4 = vld [vmem:[#allocation2 + $0x130] sm:$0xf0] }
 0x496   :  { %7300 = vmatmul.bf16.vlgmr.msrb.gmra.mxu1 %v14238_v31  ;;  %v13048_v5 = vld [vmem:[#allocation2 + $0x314] sm:$0xf]  ;;  %v8749_v15 = vor.u32 %v12984_v3, %v8746_v4 }
 0x497   :  { %7325 = vmatpush.bf16.msrb.mxu3 %v12457_v27  ;;  %7344 = vmatpush.bf16.msra.mxu1 %v9101_v37  ;;  %v13112_v9 = vld [vmem:[#allocation2 + $0x514] sm:$0xf]  ;;  %v9005_v21 = vor.u32 %v13048_v5, %v9002_v13 }
 0x498   :  { %7313 = vmatmul.bf16.vlgmr.msrb.gmra.mxu2 %v14236_v28  ;;  %v9258_v10 = vld [vmem:[#allocation2 + $0x530] sm:$0xf0] }
 0x499   :  { %7357 = vmatpush.bf16.msra.mxu2 %v9357_v34  ;;  %7332 = vmatpush.bf16.msra.mxu0 %v8813_v53  ;;  %v13176_v11 = vld [vmem:[#allocation2 + $0x714] sm:$0xf]  ;;  %v9261_v24 = vor.u32 %v13112_v9, %v9258_v10  ;;  %v7094_v34 = vadd.f32 %v7093_v8, %v7081_v14 }
 0x49a   :  { %7326 = vmatmul.bf16.vlgmr.msrb.gmra.mxu3 %v14240_v35  ;;  %v9514_v12 = vld [vmem:[#allocation2 + $0x730] sm:$0xf0] }
 0x49b   :  { %7370 = vmatpush.bf16.msra.mxu3 %v9613_v39  ;;  %7345 = vmatpush.bf16.msra.mxu1 %v9069_v16  ;;  %v12976_v26 = vld [vmem:[#allocation2 + $0xd4] sm:$0xf]  ;;  %v9517_v37 = vor.u32 %v13176_v11, %v9514_v12 }
 0x49c   :  { %v8714_v27 = vld [vmem:[#allocation2 + $0xf0] sm:$0xf0] }
 0x49d   :  { %7358 = vmatpush.bf16.msra.mxu2 %v9325_v54  ;;  %7333 = vmatpush.bf16.msra.mxu0 %v8781_v0  ;;  %v13040_v32 = vld [vmem:[#allocation2 + $0x2d4] sm:$0xf]  ;;  %v8717_v48 = vor.u32 %v12976_v26, %v8714_v27  ;;  %v7106_v54 = vpop.f32.mrf.mxu2  ;;  %v7095_v0 = vpop.f32.mrf.mxu1 }
 0x49e   :  { %v8970_v36 = vld [vmem:[#allocation2 + $0x2f0] sm:$0xf0] }
 0x49f   :  { %7371 = vmatpush.bf16.msra.mxu3 %v9581_v62  ;;  %7346 = vmatpush.bf16.msra.mxu1 %v9037_v1  ;;  %v13104_v43 = vld [vmem:[#allocation2 + $0x4d4] sm:$0xf]  ;;  %v8973_v46 = vor.u32 %v13040_v32, %v8970_v36  ;;  %v7107_v62 = vadd.f32 %v7106_v54, %v7094_v34 }
 0x4a0   :  { %v9226_v45 = vld [vmem:[#allocation2 + $0x4f0] sm:$0xf0] }
 0x4a1   :  { %7359 = vmatpush.bf16.msra.mxu2 %v9293_v2  ;;  %v13168_v39 = vld [vmem:[#allocation2 + $0x6d4] sm:$0xf]  ;;  %7334 = vmatpush.bf16.msra.mxu0 %v8749_v15  ;;  %v9229_v49 = vor.u32 %v13104_v43, %v9226_v45  ;;  %v14352_v1 = vadd.f32 %v7119_v60, %v7107_v62 }
 0x4a2   :  { %v9482_v47 = vld [vmem:[#allocation2 + $0x6f0] sm:$0xf0] }
 0x4a3   :  { %7372 = vmatpush.bf16.msra.mxu3 %v9549_v7  ;;  %7347 = vmatpush.bf16.msra.mxu1 %v9005_v21  ;;  %v12968_v50 = vld [vmem:[#allocation2 + $0x94] sm:$0xf]  ;;  %v9485_v16 = vor.u32 %v13168_v39, %v9482_v47 }
 0x4a4   :  { %v8682_v52 = vld [vmem:[#allocation2 + $0xb0] sm:$0xf0] }
 0x4a5   :  { %7360 = vmatpush.bf16.msra.mxu2 %v9261_v24  ;;  %v13032_v53 = vld [vmem:[#allocation2 + $0x294] sm:$0xf]  ;;  %7335 = vmatpush.bf16.msra.mxu0 %v8717_v48  ;;  %v8685_v63 = vor.u32 %v12968_v50, %v8682_v52  ;;  %v7108_v45 = vpop.f32.mrf.mxu2 }
 0x4a6   :  { %v8938_v55 = vld [vmem:[#allocation2 + $0x2b0] sm:$0xf0]  ;;  %v14049_v45 = vld [vmem:[#allocation4] sm:$0xff] }
 0x4a7   :  { %7373 = vmatpush.bf16.msra.mxu3 %v9517_v37  ;;  %v13096_v58 = vld [vmem:[#allocation2 + $0x494] sm:$0xf]  ;;  %7348 = vmatpush.bf16.msra.mxu1 %v8973_v46  ;;  %v8941_v2 = vor.u32 %v13032_v53, %v8938_v55  ;;  %v7121_v46 = vpop.f32.mrf.mxu3 }
 0x4a8   :  { %v9194_v59 = vld [vmem:[#allocation2 + $0x4b0] sm:$0xf0] }
 0x4a9   :  { %v13160_v61 = vld [vmem:[#allocation2 + $0x694] sm:$0xf]  ;;  %7361 = vmatpush.bf16.msra.mxu2 %v9229_v49  ;;  %v9197_v3 = vor.u32 %v13096_v58, %v9194_v59  ;;  %7336 = vmatpush.bf16.msra.mxu0 %v8685_v63 }
 0x4aa   :  { %v9450_v51 = vld [vmem:[#allocation2 + $0x6b0] sm:$0xf0] }
 0x4ab   :  { %v12960_v4 = vld [vmem:[#allocation2 + $0x54] sm:$0xf]  ;;  %7374 = vmatpush.bf16.msra.mxu3 %v9485_v16  ;;  %v9453_v13 = vor.u32 %v13160_v61, %v9450_v51  ;;  %7349 = vmatpush.bf16.msra.mxu1 %v8941_v2 }
 0x4ac   :  { %v8650_v5 = vld [vmem:[#allocation2 + $0x70] sm:$0xf0] }
 0x4ad   :  { %v13024_v7 = vld [vmem:[#allocation2 + $0x254] sm:$0xf]  ;;  %v8653_v14 = vor.u32 %v12960_v4, %v8650_v5  ;;  %7362 = vmatpush.bf16.msra.mxu2 %v9197_v3 }
 0x4ae   :  { %v8906_v9 = vld [vmem:[#allocation2 + $0x270] sm:$0xf0] }
 0x4af   :  { %v13088_v10 = vld [vmem:[#allocation2 + $0x454] sm:$0xf]  ;;  %v8909_v21 = vor.u32 %v13024_v7, %v8906_v9  ;;  %7375 = vmatpush.bf16.msra.mxu3 %v9453_v13  ;;  %7337 = vmatpush.bf16.msra.mxu0 %v8653_v14 }
 0x4b0   :  { %v9162_v6 = vld [vmem:[#allocation2 + $0x470] sm:$0xf0] }
 0x4b1   :  { %v13152_v11 = vld [vmem:[#allocation2 + $0x654] sm:$0xf]  ;;  %v9165_v24 = vor.u32 %v13088_v10, %v9162_v6  ;;  %7350 = vmatpush.bf16.msra.mxu1 %v8909_v21 }
 0x4b2   :  { %v9418_v12 = vld [vmem:[#allocation2 + $0x670] sm:$0xf0] }
 0x4b3   :  { %v12952_v15 = vld [vmem:[#allocation2 + $0x14] sm:$0xf]  ;;  %v9421_v37 = vor.u32 %v13152_v11, %v9418_v12  ;;  %7363 = vmatpush.bf16.msra.mxu2 %v9165_v24 }
 0x4b4   :  { %v8618_v8 = vld [vmem:[#allocation2 + $0x30] sm:$0xf0] }
 0x4b5   :  { %v13016_v26 = vld [vmem:[#allocation2 + $0x214] sm:$0xf]  ;;  %v8621_v49 = vor.u32 %v12952_v15, %v8618_v8  ;;  %7376 = vmatpush.bf16.msra.mxu3 %v9421_v37 }
 0x4b6   :  { %v8874_v27 = vld [vmem:[#allocation2 + $0x230] sm:$0xf0] }
 0x4b7   :  { %v13080_v32 = vld [vmem:[#allocation2 + $0x414] sm:$0xf]  ;;  %v8877_v16 = vor.u32 %v13016_v26, %v8874_v27  ;;  %7338 = vmatpush.bf16.msra.mxu0 %v8621_v49 }
 0x4b8   :  { %v9130_v34 = vld [vmem:[#allocation2 + $0x430] sm:$0xf0] }
 0x4b9   :  { %v13144_v36 = vld [vmem:[#allocation2 + $0x614] sm:$0xf]  ;;  %v9133_v54 = vor.u32 %v13080_v32, %v9130_v34  ;;  %7351 = vmatpush.bf16.msra.mxu1 %v8877_v16  ;;  %v7132_v16 = vpop.f32.mrf.mxu0 }
 0x4ba   :  { %v9386_v43 = vld [vmem:[#allocation2 + $0x630] sm:$0xf0]  ;;  %7339 = vmatmul.bf16.vlgmr.msra.gmra.mxu0 %v14182_v19 }
 0x4bb   :  { %v13264_v39 = vld [vmem:[#allocation2 + $0x9d4] sm:$0xf]  ;;  %v9389_v59 = vor.u32 %v13144_v36, %v9386_v43  ;;  %7364 = vmatpush.bf16.msra.mxu2 %v9133_v54 }
 0x4bc   :  { %v9866_v47 = vld [vmem:[#allocation2 + $0x9f0] sm:$0xf0]  ;;  %7352 = vmatmul.bf16.vlgmr.msra.gmra.mxu1 %v14186_v22 }
 0x4bd   :  { %v13328_v48 = vld [vmem:[#allocation2 + $0xbd4] sm:$0xf]  ;;  %v9869_v62 = vor.u32 %v13264_v39, %v9866_v47  ;;  %7377 = vmatpush.bf16.msra.mxu3 %v9389_v59  ;;  %v1103_v39 = vperm.slane %v14049_v45, 4 }
 0x4be   :  { %v10122_v50 = vld [vmem:[#allocation2 + $0xbf0] sm:$0xf0]  ;;  %7365 = vmatmul.bf16.vlgmr.msra.gmra.mxu2 %v14180_v18 }
 0x4bf   :  { %v13392_v52 = vld [vmem:[#allocation2 + $0xdd4] sm:$0xf]  ;;  %v10125_v60 = vor.u32 %v13328_v48, %v10122_v50  ;;  %7383 = vmatpush.bf16.msrb.mxu0 %v9869_v62 }
 0x4c0   :  { %v10378_v53 = vld [vmem:[#allocation2 + $0xdf0] sm:$0xf0]  ;;  %7378 = vmatmul.bf16.vlgmr.msra.gmra.mxu3 %v14184_v20 }
 0x4c1   :  { %v13456_v55 = vld [vmem:[#allocation2 + $0xfd4] sm:$0xf]  ;;  %v10381_v61 = vor.u32 %v13392_v52, %v10378_v53  ;;  %7396 = vmatpush.bf16.msrb.mxu1 %v10125_v60  ;;  %v7133_v60 = vadd.f32 %v7132_v16, %v1103_v39 }
 0x4c2   :  { %v10634_v58 = vld [vmem:[#allocation2 + $0xff0] sm:$0xf0] }
 0x4c3   :  { %v13256_v51 = vld [vmem:[#allocation2 + $0x994] sm:$0xf]  ;;  %v10637_v0 = vor.u32 %v13456_v55, %v10634_v58  ;;  %7409 = vmatpush.bf16.msrb.mxu2 %v10381_v61  ;;  %v7145_v61 = vpop.f32.mrf.mxu1 }
 0x4c4   :  { %v9834_v56 = vld [vmem:[#allocation2 + $0x9b0] sm:$0xf0] }
 0x4c5   :  { %v13320_v63 = vld [vmem:[#allocation2 + $0xb94] sm:$0xf]  ;;  %v9837_v13 = vor.u32 %v13256_v51, %v9834_v56  ;;  %7422 = vmatpush.bf16.msrb.mxu3 %v10637_v0 }
 0x4c6   :  { %v10090_v2 = vld [vmem:[#allocation2 + $0xbb0] sm:$0xf0] }
 0x4c7   :  { %v13384_v3 = vld [vmem:[#allocation2 + $0xd94] sm:$0xf]  ;;  %v10093_v9 = vor.u32 %v13320_v63, %v10090_v2  ;;  %7384 = vmatpush.bf16.msrb.mxu0 %v9837_v13 }
 0x4c8   :  { %v10346_v4 = vld [vmem:[#allocation2 + $0xdb0] sm:$0xf0] }
 0x4c9   :  { %v13448_v5 = vld [vmem:[#allocation2 + $0xf94] sm:$0xf]  ;;  %v10349_v10 = vor.u32 %v13384_v3, %v10346_v4  ;;  %7397 = vmatpush.bf16.msrb.mxu1 %v10093_v9  ;;  %v7146_v4 = vadd.f32 %v7145_v61, %v7133_v60 }
 0x4ca   :  { %v10602_v7 = vld [vmem:[#allocation2 + $0xfb0] sm:$0xf0] }
 0x4cb   :  { %v13248_v6 = vld [vmem:[#allocation2 + $0x954] sm:$0xf]  ;;  %v10605_v14 = vor.u32 %v13448_v5, %v10602_v7  ;;  %7410 = vmatpush.bf16.msrb.mxu2 %v10349_v10 }
 0x4cc   :  { %v9802_v11 = vld [vmem:[#allocation2 + $0x970] sm:$0xf0] }
 0x4cd   :  { %v13312_v12 = vld [vmem:[#allocation2 + $0xb54] sm:$0xf]  ;;  %v9805_v27 = vor.u32 %v13248_v6, %v9802_v11  ;;  %7423 = vmatpush.bf16.msrb.mxu3 %v10605_v14  ;;  %v7158_v11 = vpop.f32.mrf.mxu2 }
 0x4ce   :  { %v10058_v15 = vld [vmem:[#allocation2 + $0xb70] sm:$0xf0] }
 0x4cf   :  { %v13376_v8 = vld [vmem:[#allocation2 + $0xd54] sm:$0xf]  ;;  %v10061_v37 = vor.u32 %v13312_v12, %v10058_v15  ;;  %7385 = vmatpush.bf16.msrb.mxu0 %v9805_v27 }
 0x4d0   :  { %v10314_v21 = vld [vmem:[#allocation2 + $0xd70] sm:$0xf0] }
 0x4d1   :  { %v13440_v24 = vld [vmem:[#allocation2 + $0xf54] sm:$0xf]  ;;  %v10317_v34 = vor.u32 %v13376_v8, %v10314_v21  ;;  %7398 = vmatpush.bf16.msrb.mxu1 %v10061_v37  ;;  %v7159_v21 = vadd.f32 %v7158_v11, %v7146_v4 }
 0x4d2   :  { %v10570_v26 = vld [vmem:[#allocation2 + $0xf70] sm:$0xf0] }
 0x4d3   :  { %v13240_v32 = vld [vmem:[#allocation2 + $0x914] sm:$0xf]  ;;  %v10573_v47 = vor.u32 %v13440_v24, %v10570_v26  ;;  %7411 = vmatpush.bf16.msrb.mxu2 %v10317_v34  ;;  %v7171_v24 = vpop.f32.mrf.mxu3  ;;  %v7134_v34 = vpop.f32.mrf.mxu0 }
 0x4d4   :  { %v9770_v36 = vld [vmem:[#allocation2 + $0x930] sm:$0xf0]  ;;  %v14358_v37 = vadd.f32 %v7171_v24, %v7159_v21 }
 0x4d5   :  { %v13304_v43 = vld [vmem:[#allocation2 + $0xb14] sm:$0xf]  ;;  %v9773_v53 = vor.u32 %v13240_v32, %v9770_v36  ;;  %7424 = vmatpush.bf16.msrb.mxu3 %v10573_v47 }
 0x4d6   :  { %v10026_v48 = vld [vmem:[#allocation2 + $0xb30] sm:$0xf0] }
 0x4d7   :  { %v13368_v46 = vld [vmem:[#allocation2 + $0xd14] sm:$0xf]  ;;  %v10029_v54 = vor.u32 %v13304_v43, %v10026_v48  ;;  %7386 = vmatpush.bf16.msrb.mxu0 %v9773_v53  ;;  %v7147_v48 = vpop.f32.mrf.mxu1 }
 0x4d8   :  { %v10282_v49 = vld [vmem:[#allocation2 + $0xd30] sm:$0xf0] }
 0x4d9   :  { %v13432_v50 = vld [vmem:[#allocation2 + $0xf14] sm:$0xf]  ;;  %v10285_v55 = vor.u32 %v13368_v46, %v10282_v49  ;;  %7399 = vmatpush.bf16.msrb.mxu1 %v10029_v54 }
 0x4da   :  { %v10538_v52 = vld [vmem:[#allocation2 + $0xf30] sm:$0xf0] }
 0x4db   :  { %v13232_v58 = vld [vmem:[#allocation2 + $0x8d4] sm:$0xf]  ;;  %v10541_v51 = vor.u32 %v13432_v50, %v10538_v52  ;;  %7412 = vmatpush.bf16.msrb.mxu2 %v10285_v55  ;;  %v7173_v4 = vpop.f32.mrf.mxu3 }
 0x4dc   :  { %v9738_v59 = vld [vmem:[#allocation2 + $0x8f0] sm:$0xf0] }
 0x4dd   :  { %v13296_v62 = vld [vmem:[#allocation2 + $0xad4] sm:$0xf]  ;;  %v9741_v5 = vor.u32 %v13232_v58, %v9738_v59  ;;  %7425 = vmatpush.bf16.msrb.mxu3 %v10541_v51 }
 0x4de   :  { %v9994_v56 = vld [vmem:[#allocation2 + $0xaf0] sm:$0xf0] }
 0x4df   :  { %v13360_v63 = vld [vmem:[#allocation2 + $0xcd4] sm:$0xf]  ;;  %v9997_v7 = vor.u32 %v13296_v62, %v9994_v56  ;;  %7387 = vmatpush.bf16.msrb.mxu0 %v9741_v5  ;;  %v7160_v56 = vpop.f32.mrf.mxu2 }
 0x4e0   :  { %v10250_v0 = vld [vmem:[#allocation2 + $0xcf0] sm:$0xf0] }
 0x4e1   :  { %v13424_v2 = vld [vmem:[#allocation2 + $0xed4] sm:$0xf]  ;;  %v10253_v13 = vor.u32 %v13360_v63, %v10250_v0  ;;  %7400 = vmatpush.bf16.msrb.mxu1 %v9997_v7 }
 0x4e2   :  { %v10506_v3 = vld [vmem:[#allocation2 + $0xef0] sm:$0xf0] }
 0x4e3   :  { %v13224_v9 = vld [vmem:[#allocation2 + $0x894] sm:$0xf]  ;;  %v10509_v12 = vor.u32 %v13424_v2, %v10506_v3  ;;  %7413 = vmatpush.bf16.msrb.mxu2 %v10253_v13 }
 0x4e4   :  { %v9706_v10 = vld [vmem:[#allocation2 + $0x8b0] sm:$0xf0] }
 0x4e5   :  { %v13288_v6 = vld [vmem:[#allocation2 + $0xa94] sm:$0xf]  ;;  %v9709_v32 = vor.u32 %v13224_v9, %v9706_v10  ;;  %7426 = vmatpush.bf16.msrb.mxu3 %v10509_v12 }
 0x4e6   :  { %v9962_v14 = vld [vmem:[#allocation2 + $0xab0] sm:$0xf0] }
 0x4e7   :  { %v13352_v15 = vld [vmem:[#allocation2 + $0xc94] sm:$0xf]  ;;  %v9965_v36 = vor.u32 %v13288_v6, %v9962_v14  ;;  %7388 = vmatpush.bf16.msrb.mxu0 %v9709_v32 }
 0x4e8   :  { %v10218_v8 = vld [vmem:[#allocation2 + $0xcb0] sm:$0xf0] }
 0x4e9   :  { %v13416_v26 = vld [vmem:[#allocation2 + $0xe94] sm:$0xf]  ;;  %v10221_v43 = vor.u32 %v13352_v15, %v10218_v8  ;;  %7401 = vmatpush.bf16.msrb.mxu1 %v9965_v36 }
 0x4ea   :  { %v10474_v27 = vld [vmem:[#allocation2 + $0xeb0] sm:$0xf0] }
 0x4eb   :  { %v13216_v45 = vld [vmem:[#allocation2 + $0x854] sm:$0xf]  ;;  %v10477_v46 = vor.u32 %v13416_v26, %v10474_v27  ;;  %7414 = vmatpush.bf16.msrb.mxu2 %v10221_v43 }
 0x4ec   :  { %v9674_v39 = vld [vmem:[#allocation2 + $0x870] sm:$0xf0] }
 0x4ed   :  { %v13280_v47 = vld [vmem:[#allocation2 + $0xa54] sm:$0xf]  ;;  %v9677_v54 = vor.u32 %v13216_v45, %v9674_v39  ;;  %7427 = vmatpush.bf16.msrb.mxu3 %v10477_v46 }
 0x4ee   :  { %v9930_v49 = vld [vmem:[#allocation2 + $0xa70] sm:$0xf0] }
 0x4ef   :  { %v13344_v50 = vld [vmem:[#allocation2 + $0xc54] sm:$0xf]  ;;  %v9933_v59 = vor.u32 %v13280_v47, %v9930_v49  ;;  %7389 = vmatpush.bf16.msrb.mxu0 %v9677_v54 }
 0x4f0   :  { %v10186_v52 = vld [vmem:[#allocation2 + $0xc70] sm:$0xf0] }
 0x4f1   :  { %v13408_v53 = vld [vmem:[#allocation2 + $0xe54] sm:$0xf]  ;;  %v10189_v62 = vor.u32 %v13344_v50, %v10186_v52  ;;  %7402 = vmatpush.bf16.msrb.mxu1 %v9933_v59 }
 0x4f2   :  { %v10442_v16 = vld [vmem:[#allocation2 + $0xe70] sm:$0xf0] }
 0x4f3   :  { %v13208_v55 = vld [vmem:[#allocation2 + $0x814] sm:$0xf]  ;;  %v10445_v63 = vor.u32 %v13408_v53, %v10442_v16  ;;  %7415 = vmatpush.bf16.msrb.mxu2 %v10189_v62 }
 0x4f4   :  { %v9642_v58 = vld [vmem:[#allocation2 + $0x830] sm:$0xf0] }
 0x4f5   :  { %v13272_v60 = vld [vmem:[#allocation2 + $0xa14] sm:$0xf]  ;;  %v9645_v9 = vor.u32 %v13208_v55, %v9642_v58  ;;  %7428 = vmatpush.bf16.msrb.mxu3 %v10445_v63 }
 0x4f6   :  { %v9898_v61 = vld [vmem:[#allocation2 + $0xa30] sm:$0xf0] }
 0x4f7   :  { %v13336_v51 = vld [vmem:[#allocation2 + $0xc14] sm:$0xf]  ;;  %v9901_v12 = vor.u32 %v13272_v60, %v9898_v61  ;;  %7390 = vmatpush.bf16.msrb.mxu0 %v9645_v9 }
 0x4f8   :  { %v10154_v0 = vld [vmem:[#allocation2 + $0xc30] sm:$0xf0] }
 0x4f9   :  { %v13400_v2 = vld [vmem:[#allocation2 + $0xe14] sm:$0xf]  ;;  %v10157_v14 = vor.u32 %v13336_v51, %v10154_v0  ;;  %7403 = vmatpush.bf16.msrb.mxu1 %v9901_v12 }
 0x4fa   :  { %v10410_v3 = vld [vmem:[#allocation2 + $0xe30] sm:$0xf0]  ;;  %7391 = vmatmul.bf16.vlgmr.msrb.gmra.mxu0 %v14200_v41 }
 0x4fb   :  { %v13520_v5 = vld [vmem:[#allocation2 + $0x11d4] sm:$0xf]  ;;  %v10413_v21 = vor.u32 %v13400_v2, %v10410_v3  ;;  %7416 = vmatpush.bf16.msrb.mxu2 %v10157_v14 }
 0x4fc   :  { %v10890_v7 = vld [vmem:[#allocation2 + $0x11f0] sm:$0xf0]  ;;  %7404 = vmatmul.bf16.vlgmr.msrb.gmra.mxu1 %v14204_v44 }
 0x4fd   :  { %v13584_v13 = vld [vmem:[#allocation2 + $0x13d4] sm:$0xf]  ;;  %v10893_v24 = vor.u32 %v13520_v5, %v10890_v7  ;;  %7429 = vmatpush.bf16.msrb.mxu3 %v10413_v21 }
 0x4fe   :  { %v11146_v10 = vld [vmem:[#allocation2 + $0x13f0] sm:$0xf0]  ;;  %7417 = vmatmul.bf16.vlgmr.msrb.gmra.mxu2 %v14198_v38 }
 0x4ff   :  { %v13648_v6 = vld [vmem:[#allocation2 + $0x15d4] sm:$0xf]  ;;  %v11149_v26 = vor.u32 %v13584_v13, %v11146_v10  ;;  %7435 = vmatpush.bf16.msra.mxu0 %v10893_v24 }
 0x500   :  { %v11402_v11 = vld [vmem:[#allocation2 + $0x15f0] sm:$0xf0]  ;;  %7430 = vmatmul.bf16.vlgmr.msrb.gmra.mxu3 %v14202_v42 }
 0x501   :  { %v13712_v15 = vld [vmem:[#allocation2 + $0x17d4] sm:$0xf]  ;;  %v11405_v27 = vor.u32 %v13648_v6, %v11402_v11  ;;  %7448 = vmatpush.bf16.msra.mxu1 %v11149_v26  ;;  %v7184_v11 = vpop.f32.mrf.mxu0  ;;  %v7197_v26 = vpop.f32.mrf.mxu1 }
 0x502   :  { %v11658_v8 = vld [vmem:[#allocation2 + $0x17f0] sm:$0xf0]  ;;  %v7185_v24 = vadd.f32 %v7184_v11, %v14358_v37 }
 0x503   :  { %v13512_v32 = vld [vmem:[#allocation2 + $0x1194] sm:$0xf]  ;;  %v11661_v43 = vor.u32 %v13712_v15, %v11658_v8  ;;  %7461 = vmatpush.bf16.msra.mxu2 %v11405_v27 }
 0x504   :  { %v10858_v34 = vld [vmem:[#allocation2 + $0x11b0] sm:$0xf0] }
 0x505   :  { %v13576_v36 = vld [vmem:[#allocation2 + $0x1394] sm:$0xf]  ;;  %v10861_v49 = vor.u32 %v13512_v32, %v10858_v34  ;;  %7474 = vmatpush.bf16.msra.mxu3 %v11661_v43 }
 0x506   :  { %v11114_v45 = vld [vmem:[#allocation2 + $0x13b0] sm:$0xf0] }
 0x507   :  { %v13640_v39 = vld [vmem:[#allocation2 + $0x1594] sm:$0xf]  ;;  %v11117_v50 = vor.u32 %v13576_v36, %v11114_v45  ;;  %7436 = vmatpush.bf16.msra.mxu0 %v10861_v49 }
 0x508   :  { %v11370_v47 = vld [vmem:[#allocation2 + $0x15b0] sm:$0xf0] }
 0x509   :  { %v13704_v48 = vld [vmem:[#allocation2 + $0x1794] sm:$0xf]  ;;  %v11373_v52 = vor.u32 %v13640_v39, %v11370_v47  ;;  %7449 = vmatpush.bf16.msra.mxu1 %v11117_v50  ;;  %v7198_v39 = vadd.f32 %v7197_v26, %v7185_v24 }
 0x50a   :  { %v11626_v46 = vld [vmem:[#allocation2 + $0x17b0] sm:$0xf0] }
 0x50b   :  { %v13504_v53 = vld [vmem:[#allocation2 + $0x1154] sm:$0xf]  ;;  %v11629_v55 = vor.u32 %v13704_v48, %v11626_v46  ;;  %7462 = vmatpush.bf16.msra.mxu2 %v11373_v52 }
 0x50c   :  { %v10826_v16 = vld [vmem:[#allocation2 + $0x1170] sm:$0xf0] }
 0x50d   :  { %v13568_v54 = vld [vmem:[#allocation2 + $0x1354] sm:$0xf]  ;;  %v10829_v51 = vor.u32 %v13504_v53, %v10826_v16  ;;  %7475 = vmatpush.bf16.msra.mxu3 %v11629_v55  ;;  %v7210_v53 = vpop.f32.mrf.mxu2 }
 0x50e   :  { %v11082_v58 = vld [vmem:[#allocation2 + $0x1370] sm:$0xf0] }
 0x50f   :  { %v13632_v59 = vld [vmem:[#allocation2 + $0x1554] sm:$0xf]  ;;  %v11085_v56 = vor.u32 %v13568_v54, %v11082_v58  ;;  %7437 = vmatpush.bf16.msra.mxu0 %v10829_v51  ;;  %v7211_v58 = vadd.f32 %v7210_v53, %v7198_v39 }
 0x510   :  { %v11338_v62 = vld [vmem:[#allocation2 + $0x1570] sm:$0xf0] }
 0x511   :  { %v13696_v60 = vld [vmem:[#allocation2 + $0x1754] sm:$0xf]  ;;  %v11341_v63 = vor.u32 %v13632_v59, %v11338_v62  ;;  %7450 = vmatpush.bf16.msra.mxu1 %v11085_v56  ;;  %v7223_v59 = vpop.f32.mrf.mxu3  ;;  %v7186_v56 = vpop.f32.mrf.mxu0 }
 0x512   :  { %v11594_v61 = vld [vmem:[#allocation2 + $0x1770] sm:$0xf0]  ;;  %v14365_v51 = vadd.f32 %v7223_v59, %v7211_v58 }
 0x513   :  { %v13496_v0 = vld [vmem:[#allocation2 + $0x1114] sm:$0xf]  ;;  %v11597_v4 = vor.u32 %v13696_v60, %v11594_v61  ;;  %7463 = vmatpush.bf16.msra.mxu2 %v11341_v63 }
 0x514   :  { %v10794_v2 = vld [vmem:[#allocation2 + $0x1130] sm:$0xf0] }
 0x515   :  { %v13560_v3 = vld [vmem:[#allocation2 + $0x1314] sm:$0xf]  ;;  %v10797_v6 = vor.u32 %v13496_v0, %v10794_v2  ;;  %7476 = vmatpush.bf16.msra.mxu3 %v11597_v4 }
 0x516   :  { %v11050_v5 = vld [vmem:[#allocation2 + $0x1330] sm:$0xf0] }
 0x517   :  { %v13624_v7 = vld [vmem:[#allocation2 + $0x1514] sm:$0xf]  ;;  %v11053_v12 = vor.u32 %v13560_v3, %v11050_v5  ;;  %7438 = vmatpush.bf16.msra.mxu0 %v10797_v6  ;;  %v7199_v5 = vpop.f32.mrf.mxu1 }
 0x518   :  { %v11306_v13 = vld [vmem:[#allocation2 + $0x1530] sm:$0xf0] }
 0x519   :  { %v13688_v9 = vld [vmem:[#allocation2 + $0x1714] sm:$0xf]  ;;  %v11309_v14 = vor.u32 %v13624_v7, %v11306_v13  ;;  %7451 = vmatpush.bf16.msra.mxu1 %v11053_v12  ;;  %v7225_v39 = vpop.f32.mrf.mxu3 }
 0x51a   :  { %v11562_v10 = vld [vmem:[#allocation2 + $0x1730] sm:$0xf0] }
 0x51b   :  { %v13488_v15 = vld [vmem:[#allocation2 + $0x10d4] sm:$0xf]  ;;  %v11565_v27 = vor.u32 %v13688_v9, %v11562_v10  ;;  %7464 = vmatpush.bf16.msra.mxu2 %v11309_v14 }
 0x51c   :  { %v10762_v8 = vld [vmem:[#allocation2 + $0x10f0] sm:$0xf0] }
 0x51d   :  { %v13552_v21 = vld [vmem:[#allocation2 + $0x12d4] sm:$0xf]  ;;  %v10765_v47 = vor.u32 %v13488_v15, %v10762_v8  ;;  %7477 = vmatpush.bf16.msra.mxu3 %v11565_v27 }
 0x51e   :  { %v11018_v32 = vld [vmem:[#allocation2 + $0x12f0] sm:$0xf0] }
 0x51f   :  { %v13616_v34 = vld [vmem:[#allocation2 + $0x14d4] sm:$0xf]  ;;  %v11021_v48 = vor.u32 %v13552_v21, %v11018_v32  ;;  %7439 = vmatpush.bf16.msra.mxu0 %v10765_v47  ;;  %v7212_v32 = vpop.f32.mrf.mxu2 }
 0x520   :  { %v11274_v36 = vld [vmem:[#allocation2 + $0x14f0] sm:$0xf0] }
 0x521   :  { %v13680_v43 = vld [vmem:[#allocation2 + $0x16d4] sm:$0xf]  ;;  %v11277_v46 = vor.u32 %v13616_v34, %v11274_v36  ;;  %7452 = vmatpush.bf16.msra.mxu1 %v11021_v48 }
 0x522   :  { %v11530_v45 = vld [vmem:[#allocation2 + $0x16f0] sm:$0xf0] }
 0x523   :  { %v13480_v49 = vld [vmem:[#allocation2 + $0x1094] sm:$0xf]  ;;  %v11533_v37 = vor.u32 %v13680_v43, %v11530_v45  ;;  %7465 = vmatpush.bf16.msra.mxu2 %v11277_v46 }
 0x524   :  { %v10730_v50 = vld [vmem:[#allocation2 + $0x10b0] sm:$0xf0] }
 0x525   :  { %v13544_v52 = vld [vmem:[#allocation2 + $0x1294] sm:$0xf]  ;;  %v10733_v61 = vor.u32 %v13480_v49, %v10730_v50  ;;  %7478 = vmatpush.bf16.msra.mxu3 %v11533_v37 }
 0x526   :  { %v10986_v16 = vld [vmem:[#allocation2 + $0x12b0] sm:$0xf0] }
 0x527   :  { %v13608_v54 = vld [vmem:[#allocation2 + $0x1494] sm:$0xf]  ;;  %v10989_v63 = vor.u32 %v13544_v52, %v10986_v16  ;;  %7440 = vmatpush.bf16.msra.mxu0 %v10733_v61 }
 0x528   :  { %v11242_v55 = vld [vmem:[#allocation2 + $0x14b0] sm:$0xf0] }
 0x529   :  { %v13672_v62 = vld [vmem:[#allocation2 + $0x1694] sm:$0xf]  ;;  %v11245_v0 = vor.u32 %v13608_v54, %v11242_v55  ;;  %7453 = vmatpush.bf16.msra.mxu1 %v10989_v63 }
 0x52a   :  { %v11498_v60 = vld [vmem:[#allocation2 + $0x16b0] sm:$0xf0] }
 0x52b   :  { %v13472_v2 = vld [vmem:[#allocation2 + $0x1054] sm:$0xf]  ;;  %v11501_v7 = vor.u32 %v13672_v62, %v11498_v60  ;;  %7466 = vmatpush.bf16.msra.mxu2 %v11245_v0 }
 0x52c   :  { %v10698_v3 = vld [vmem:[#allocation2 + $0x1070] sm:$0xf0] }
 0x52d   :  { %v13536_v4 = vld [vmem:[#allocation2 + $0x1254] sm:$0xf]  ;;  %v10701_v12 = vor.u32 %v13472_v2, %v10698_v3  ;;  %7479 = vmatpush.bf16.msra.mxu3 %v11501_v7 }
 0x52e   :  { %v10954_v13 = vld [vmem:[#allocation2 + $0x1270] sm:$0xf0] }
 0x52f   :  { %v13600_v9 = vld [vmem:[#allocation2 + $0x1454] sm:$0xf]  ;;  %v10957_v8 = vor.u32 %v13536_v4, %v10954_v13  ;;  %7441 = vmatpush.bf16.msra.mxu0 %v10701_v12 }
 0x530   :  { %v11210_v10 = vld [vmem:[#allocation2 + $0x1470] sm:$0xf0] }
 0x531   :  { %v13664_v6 = vld [vmem:[#allocation2 + $0x1654] sm:$0xf]  ;;  %v11213_v21 = vor.u32 %v13600_v9, %v11210_v10  ;;  %7454 = vmatpush.bf16.msra.mxu1 %v10957_v8 }
 0x532   :  { %v11466_v11 = vld [vmem:[#allocation2 + $0x1670] sm:$0xf0] }
 0x533   :  { %v13464_v14 = vld [vmem:[#allocation2 + $0x1014] sm:$0xf]  ;;  %v11469_v34 = vor.u32 %v13664_v6, %v11466_v11  ;;  %7467 = vmatpush.bf16.msra.mxu2 %v11213_v21 }
 0x534   :  { %v10666_v15 = vld [vmem:[#allocation2 + $0x1030] sm:$0xf0] }
 0x535   :  { %v13528_v24 = vld [vmem:[#allocation2 + $0x1214] sm:$0xf]  ;;  %v10669_v49 = vor.u32 %v13464_v14, %v10666_v15  ;;  %7480 = vmatpush.bf16.msra.mxu3 %v11469_v34 }
 0x536   :  { %v10922_v26 = vld [vmem:[#allocation2 + $0x1230] sm:$0xf0] }
 0x537   :  { %v13592_v27 = vld [vmem:[#allocation2 + $0x1414] sm:$0xf]  ;;  %v10925_v37 = vor.u32 %v13528_v24, %v10922_v26  ;;  %7442 = vmatpush.bf16.msra.mxu0 %v10669_v49  ;;  %v7236_v49 = vpop.f32.mrf.mxu0 }
 0x538   :  { %v11178_v36 = vld [vmem:[#allocation2 + $0x1430] sm:$0xf0] }
 0x539   :  { %v13656_v43 = vld [vmem:[#allocation2 + $0x1614] sm:$0xf]  ;;  %v11181_v16 = vor.u32 %v13592_v27, %v11178_v36  ;;  %7455 = vmatpush.bf16.msra.mxu1 %v10925_v37 }
 0x53a   :  { %v11434_v45 = vld [vmem:[#allocation2 + $0x1630] sm:$0xf0]  ;;  %7443 = vmatmul.bf16.vlgmr.msra.gmra.mxu0 %v14216_v25 }
 0x53b   :  { %v13776_v47 = vld [vmem:[#allocation2 + $0x19d4] sm:$0xf]  ;;  %v11437_v58 = vor.u32 %v13656_v43, %v11434_v45  ;;  %7468 = vmatpush.bf16.msra.mxu2 %v11181_v16  ;;  %v7249_v16 = vpop.f32.mrf.mxu1 }
 0x53c   :  { %v11914_v48 = vld [vmem:[#allocation2 + $0x19f0] sm:$0xf0]  ;;  %7456 = vmatmul.bf16.vlgmr.msra.gmra.mxu1 %v14220_v30 }
 0x53d   :  { %v13840_v46 = vld [vmem:[#allocation2 + $0x1bd4] sm:$0xf]  ;;  %v11917_v59 = vor.u32 %v13776_v47, %v11914_v48  ;;  %7481 = vmatpush.bf16.msra.mxu3 %v11437_v58 }
 0x53e   :  { %v12170_v50 = vld [vmem:[#allocation2 + $0x1bf0] sm:$0xf0]  ;;  %7469 = vmatmul.bf16.vlgmr.msra.gmra.mxu2 %v14218_v29 }
 0x53f   :  { %v13904_v52 = vld [vmem:[#allocation2 + $0x1dd4] sm:$0xf]  ;;  %v12173_v62 = vor.u32 %v13840_v46, %v12170_v50  ;;  %7487 = vmatpush.bf16.msrb.mxu0 %v11917_v59 }
 0x540   :  { %v12426_v53 = vld [vmem:[#allocation2 + $0x1df0] sm:$0xf0]  ;;  %7482 = vmatmul.bf16.vlgmr.msra.gmra.mxu3 %v14222_v33 }
 0x541   :  { %v13968_v54 = vld [vmem:[#allocation2 + $0x1fd4] sm:$0xf]  ;;  %v12429_v60 = vor.u32 %v13904_v52, %v12426_v53  ;;  %7500 = vmatpush.bf16.msrb.mxu1 %v12173_v62  ;;  %v7237_v53 = vadd.f32 %v7236_v49, %v14365_v51 }
 0x542   :  { %v12682_v55 = vld [vmem:[#allocation2 + $0x1ff0] sm:$0xf0] }
 0x543   :  { %v13768_v61 = vld [vmem:[#allocation2 + $0x1994] sm:$0xf]  ;;  %v12685_v0 = vor.u32 %v13968_v54, %v12682_v55  ;;  %7513 = vmatpush.bf16.msrb.mxu2 %v12429_v60 }
 0x544   :  { %v11882_v56 = vld [vmem:[#allocation2 + $0x19b0] sm:$0xf0] }
 0x545   :  { %v13832_v63 = vld [vmem:[#allocation2 + $0x1b94] sm:$0xf]  ;;  %v11885_v13 = vor.u32 %v13768_v61, %v11882_v56  ;;  %7526 = vmatpush.bf16.msrb.mxu3 %v12685_v0  ;;  %v7250_v61 = vadd.f32 %v7249_v16, %v7237_v53 }
 0x546   :  { %v12138_v2 = vld [vmem:[#allocation2 + $0x1bb0] sm:$0xf0] }
 0x547   :  { %v13896_v3 = vld [vmem:[#allocation2 + $0x1d94] sm:$0xf]  ;;  %v12141_v9 = vor.u32 %v13832_v63, %v12138_v2  ;;  %7488 = vmatpush.bf16.msrb.mxu0 %v11885_v13 }
 0x548   :  { %v12394_v4 = vld [vmem:[#allocation2 + $0x1db0] sm:$0xf0] }
 0x549   :  { %v13960_v5 = vld [vmem:[#allocation2 + $0x1f94] sm:$0xf]  ;;  %v12397_v10 = vor.u32 %v13896_v3, %v12394_v4  ;;  %7501 = vmatpush.bf16.msrb.mxu1 %v12141_v9 }
 0x54a   :  { %v12650_v7 = vld [vmem:[#allocation2 + $0x1fb0] sm:$0xf0] }
 0x54b   :  { %v13760_v6 = vld [vmem:[#allocation2 + $0x1954] sm:$0xf]  ;;  %v12653_v14 = vor.u32 %v13960_v5, %v12650_v7  ;;  %7514 = vmatpush.bf16.msrb.mxu2 %v12397_v10 }
 0x54c   :  { %v11850_v11 = vld [vmem:[#allocation2 + $0x1970] sm:$0xf0] }
 0x54d   :  { %v13824_v12 = vld [vmem:[#allocation2 + $0x1b54] sm:$0xf]  ;;  %v11853_v27 = vor.u32 %v13760_v6, %v11850_v11  ;;  %7527 = vmatpush.bf16.msrb.mxu3 %v12653_v14  ;;  %v7262_v6 = vpop.f32.mrf.mxu2 }
 0x54e   :  { %v12106_v15 = vld [vmem:[#allocation2 + $0x1b70] sm:$0xf0] }
 0x54f   :  { %v13888_v8 = vld [vmem:[#allocation2 + $0x1d54] sm:$0xf]  ;;  %v12109_v32 = vor.u32 %v13824_v12, %v12106_v15  ;;  %7489 = vmatpush.bf16.msrb.mxu0 %v11853_v27  ;;  %v7263_v15 = vadd.f32 %v7262_v6, %v7250_v61 }
 0x550   :  { %v12362_v21 = vld [vmem:[#allocation2 + $0x1d70] sm:$0xf0] }
 0x551   :  { %v13952_v24 = vld [vmem:[#allocation2 + $0x1f54] sm:$0xf]  ;;  %v12365_v34 = vor.u32 %v13888_v8, %v12362_v21  ;;  %7502 = vmatpush.bf16.msrb.mxu1 %v12109_v32  ;;  %v7275_v8 = vpop.f32.mrf.mxu3  ;;  %v7251_v32 = vpop.f32.mrf.mxu1 }
 0x552   :  { %v12618_v26 = vld [vmem:[#allocation2 + $0x1f70] sm:$0xf0]  ;;  %v9072_v32 = vld [vmem:[#allocation2 + $0x398] sm:$0xf] }
 0x553   :  { %v13752_v36 = vld [vmem:[#allocation2 + $0x1914] sm:$0xf]  ;;  %v12621_v39 = vor.u32 %v13952_v24, %v12618_v26  ;;  %7515 = vmatpush.bf16.msrb.mxu2 %v12365_v34  ;;  %v7238_v26 = vpop.f32.mrf.mxu0  ;;  %v14372_v34 = vadd.f32 %v7275_v8, %v7263_v15 }
 0x554   :  { %v11818_v43 = vld [vmem:[#allocation2 + $0x1930] sm:$0xf0]  ;;  %v8816_v26 = vld [vmem:[#allocation2 + $0x198] sm:$0xf] }
 0x555   :  { %v13816_v45 = vld [vmem:[#allocation2 + $0x1b14] sm:$0xf]  ;;  %v11821_v37 = vor.u32 %v13752_v36, %v11818_v43  ;;  %7528 = vmatpush.bf16.msrb.mxu3 %v12621_v39 }
 0x556   :  { %v12074_v47 = vld [vmem:[#allocation2 + $0x1b30] sm:$0xf0] }
 0x557   :  { %v13880_v48 = vld [vmem:[#allocation2 + $0x1d14] sm:$0xf]  ;;  %v12077_v54 = vor.u32 %v13816_v45, %v12074_v47  ;;  %7490 = vmatpush.bf16.msrb.mxu0 %v11821_v37 }
 0x558   :  { %v12330_v46 = vld [vmem:[#allocation2 + $0x1d30] sm:$0xf0] }
 0x559   :  { %v13944_v50 = vld [vmem:[#allocation2 + $0x1f14] sm:$0xf]  ;;  %v12333_v55 = vor.u32 %v13880_v48, %v12330_v46  ;;  %7503 = vmatpush.bf16.msrb.mxu1 %v12077_v54 }
 0x55a   :  { %v12586_v52 = vld [vmem:[#allocation2 + $0x1f30] sm:$0xf0] }
 0x55b   :  { %v13744_v58 = vld [vmem:[#allocation2 + $0x18d4] sm:$0xf]  ;;  %v12589_v60 = vor.u32 %v13944_v50, %v12586_v52  ;;  %7516 = vmatpush.bf16.msrb.mxu2 %v12333_v55 }
 0x55c   :  { %v11786_v59 = vld [vmem:[#allocation2 + $0x18f0] sm:$0xf0] }
 0x55d   :  { %v13808_v62 = vld [vmem:[#allocation2 + $0x1ad4] sm:$0xf]  ;;  %v11789_v4 = vor.u32 %v13744_v58, %v11786_v59  ;;  %7529 = vmatpush.bf16.msrb.mxu3 %v12589_v60 }
 0x55e   :  { %v12042_v56 = vld [vmem:[#allocation2 + $0x1af0] sm:$0xf0] }
 0x55f   :  { %v13872_v63 = vld [vmem:[#allocation2 + $0x1cd4] sm:$0xf]  ;;  %v12045_v51 = vor.u32 %v13808_v62, %v12042_v56  ;;  %7491 = vmatpush.bf16.msrb.mxu0 %v11789_v4  ;;  %v13013_v4 = vld [vmem:[#allocation2 + $0x1f4] sm:$0xf0] }
 0x560   :  { %v12298_v0 = vld [vmem:[#allocation2 + $0x1cf0] sm:$0xf0] }
 0x561   :  { %v13936_v2 = vld [vmem:[#allocation2 + $0x1ed4] sm:$0xf]  ;;  %v12301_v5 = vor.u32 %v13872_v63, %v12298_v0  ;;  %7504 = vmatpush.bf16.msrb.mxu1 %v12045_v51  ;;  %v9104_v51 = vld [vmem:[#allocation2 + $0x3d8] sm:$0xf] }
 0x562   :  { %v12554_v3 = vld [vmem:[#allocation2 + $0x1ef0] sm:$0xf0] }
 0x563   :  { %v13736_v7 = vld [vmem:[#allocation2 + $0x1894] sm:$0xf]  ;;  %v12557_v10 = vor.u32 %v13936_v2, %v12554_v3  ;;  %7517 = vmatpush.bf16.msrb.mxu2 %v12301_v5  ;;  %v7264_v2 = vpop.f32.mrf.mxu2  ;;  %v8848_v3 = vld [vmem:[#allocation2 + $0x1d8] sm:$0xf]  ;;  %v7277_v5 = vpop.f32.mrf.mxu3 }
 0x564   :  { %v11754_v13 = vld [vmem:[#allocation2 + $0x18b0] sm:$0xf0]  ;;  %v8849_v8 = vor.u32 %v13013_v4, %v8848_v3  ;;  %v9008_v2 = vld [vmem:[#allocation2 + $0x318] sm:$0xf] }
 0x565   :  { %v13800_v9 = vld [vmem:[#allocation2 + $0x1a94] sm:$0xf]  ;;  %v11757_v27 = vor.u32 %v13736_v7, %v11754_v13  ;;  %7530 = vmatpush.bf16.msrb.mxu3 %v12557_v10  ;;  %v13077_v13 = vld [vmem:[#allocation2 + $0x3f4] sm:$0xf0] }
 0x566   :  { %v12010_v11 = vld [vmem:[#allocation2 + $0x1ab0] sm:$0xf0]  ;;  %v13141_v10 = vld [vmem:[#allocation2 + $0x5f4] sm:$0xf0] }
 0x567   :  { %v13864_v12 = vld [vmem:[#allocation2 + $0x1c94] sm:$0xf]  ;;  %v12013_v36 = vor.u32 %v13800_v9, %v12010_v11  ;;  %7492 = vmatpush.bf16.msrb.mxu0 %v11757_v27  ;;  %v9360_v9 = vld [vmem:[#allocation2 + $0x5d8] sm:$0xf] }
 0x568   :  { %v12266_v14 = vld [vmem:[#allocation2 + $0x1cb0] sm:$0xf0]  ;;  %v13005_v27 = vld [vmem:[#allocation2 + $0x1b4] sm:$0xf0] }
 0x569   :  { %v13928_v21 = vld [vmem:[#allocation2 + $0x1e94] sm:$0xf]  ;;  %v12269_v43 = vor.u32 %v13864_v12, %v12266_v14  ;;  %7505 = vmatpush.bf16.msrb.mxu1 %v12013_v36  ;;  %v9616_v12 = vld [vmem:[#allocation2 + $0x7d8] sm:$0xf] }
 0x56a   :  { %v12522_v24 = vld [vmem:[#allocation2 + $0x1eb0] sm:$0xf0]  ;;  %v13205_v14 = vld [vmem:[#allocation2 + $0x7f4] sm:$0xf0] }
 0x56b   :  { %v13728_v45 = vld [vmem:[#allocation2 + $0x1854] sm:$0xf]  ;;  %v12525_v48 = vor.u32 %v13928_v21, %v12522_v24  ;;  %7518 = vmatpush.bf16.msrb.mxu2 %v12269_v43  ;;  %v9105_v21 = vor.u32 %v13077_v13, %v9104_v51  ;;  %v9361_v24 = vor.u32 %v13141_v10, %v9360_v9  ;;  %v9617_v36 = vor.u32 %v13205_v14, %v9616_v12  ;;  %v13069_v43 = vld [vmem:[#allocation2 + $0x3b4] sm:$0xf0] }
 0x56c   :  { %v11722_v39 = vld [vmem:[#allocation2 + $0x1870] sm:$0xf0]  ;;  %v13053_v4 = vld [vmem:[#allocation2 + $0x334] sm:$0xf0] }
 0x56d   :  { %v13792_v47 = vld [vmem:[#allocation2 + $0x1a54] sm:$0xf]  ;;  %v11725_v37 = vor.u32 %v13728_v45, %v11722_v39  ;;  %7531 = vmatpush.bf16.msrb.mxu3 %v12525_v48  ;;  %v9328_v45 = vld [vmem:[#allocation2 + $0x598] sm:$0xf]  ;;  %v9009_v12 = vor.u32 %v13053_v4, %v9008_v2 }
 0x56e   :  { %v11978_v46 = vld [vmem:[#allocation2 + $0x1a70] sm:$0xf0]  ;;  %v13133_v39 = vld [vmem:[#allocation2 + $0x5b4] sm:$0xf0] }
 0x56f   :  { %v13856_v49 = vld [vmem:[#allocation2 + $0x1c54] sm:$0xf]  ;;  %v11981_v55 = vor.u32 %v13792_v47, %v11978_v46  ;;  %7493 = vmatpush.bf16.msrb.mxu0 %v11725_v37  ;;  %v9584_v47 = vld [vmem:[#allocation2 + $0x798] sm:$0xf]  ;;  %v8817_v46 = vor.u32 %v13005_v27, %v8816_v26 }
 0x570   :  { %v12234_v50 = vld [vmem:[#allocation2 + $0x1c70] sm:$0xf0]  ;;  %v13197_v48 = vld [vmem:[#allocation2 + $0x7b4] sm:$0xf0] }
 0x571   :  { %v13920_v52 = vld [vmem:[#allocation2 + $0x1e54] sm:$0xf]  ;;  %v12237_v58 = vor.u32 %v13856_v49, %v12234_v50  ;;  %7506 = vmatpush.bf16.msrb.mxu1 %v11981_v55  ;;  %v9073_v49 = vor.u32 %v13069_v43, %v9072_v32  ;;  %v9329_v50 = vor.u32 %v13133_v39, %v9328_v45  ;;  %v9040_v37 = vld [vmem:[#allocation2 + $0x358] sm:$0xf] }
 0x572   :  { %v12490_v53 = vld [vmem:[#allocation2 + $0x1e70] sm:$0xf0]  ;;  %v9296_v55 = vld [vmem:[#allocation2 + $0x558] sm:$0xf] }
 0x573   :  { %v13720_v16 = vld [vmem:[#allocation2 + $0x1814] sm:$0xf]  ;;  %v12493_v61 = vor.u32 %v13920_v52, %v12490_v53  ;;  %7519 = vmatpush.bf16.msrb.mxu2 %v12237_v58  ;;  %v8784_v52 = vld [vmem:[#allocation2 + $0x158] sm:$0xf] }
 0x574   :  { %v11690_v54 = vld [vmem:[#allocation2 + $0x1830] sm:$0xf0]  ;;  %v12997_v53 = vld [vmem:[#allocation2 + $0x174] sm:$0xf0] }
 0x575   :  { %v13784_v59 = vld [vmem:[#allocation2 + $0x1a14] sm:$0xf]  ;;  %v11693_v7 = vor.u32 %v13720_v16, %v11690_v54  ;;  %7532 = vmatpush.bf16.msrb.mxu3 %v12493_v61  ;;  %v9585_v16 = vor.u32 %v13197_v48, %v9584_v47  ;;  %v13061_v54 = vld [vmem:[#allocation2 + $0x374] sm:$0xf0] }
 0x576   :  { %v11946_v62 = vld [vmem:[#allocation2 + $0x1a30] sm:$0xf0]  ;;  %v13125_v58 = vld [vmem:[#allocation2 + $0x574] sm:$0xf0]  ;;  %v9041_v61 = vor.u32 %v13061_v54, %v9040_v37 }
 0x577   :  { %v13848_v60 = vld [vmem:[#allocation2 + $0x1c14] sm:$0xf]  ;;  %v11949_v6 = vor.u32 %v13784_v59, %v11946_v62  ;;  %7494 = vmatpush.bf16.msrb.mxu0 %v11693_v7  ;;  %v9552_v59 = vld [vmem:[#allocation2 + $0x758] sm:$0xf]  ;;  %v7288_v7 = vpop.f32.mrf.mxu0 }
 0x578   :  { %v12202_v56 = vld [vmem:[#allocation2 + $0x1c30] sm:$0xf0]  ;;  %v13189_v62 = vld [vmem:[#allocation2 + $0x774] sm:$0xf0]  ;;  %v7289_v10 = vadd.f32 %v7288_v7, %v14372_v34 }
 0x579   :  { %v13912_v63 = vld [vmem:[#allocation2 + $0x1e14] sm:$0xf]  ;;  %v12205_v11 = vor.u32 %v13848_v60, %v12202_v56  ;;  %7507 = vmatpush.bf16.msrb.mxu1 %v11949_v6  ;;  %v8785_v60 = vor.u32 %v12997_v53, %v8784_v52  ;;  %v9297_v56 = vor.u32 %v13125_v58, %v9296_v55  ;;  %v9553_v3 = vor.u32 %v13189_v62, %v9552_v59  ;;  %v9264_v51 = vld [vmem:[#allocation2 + $0x518] sm:$0xf]  ;;  %v7314_v52 = vpop.f32.mrf.mxu2  ;;  %v7327_v55 = vpop.f32.mrf.mxu3 }
 0x57a   :  { %v12458_v0 = vld [vmem:[#allocation2 + $0x1e30] sm:$0xf0]  ;;  %7495 = vmatmul.bf16.vlgmr.msrb.gmra.mxu0 %v14234_v23  ;;  %v13117_v5 = vld [vmem:[#allocation2 + $0x534] sm:$0xf0] }
 0x57b   :  { %v12461_v15 = vor.u32 %v13912_v63, %v12458_v0  ;;  %7520 = vmatpush.bf16.msrb.mxu2 %v12205_v11  ;;  %7539 = vmatpush.bf16.msra.mxu0 %v8849_v8  ;;  %v8752_v63 = vld [vmem:[#allocation2 + $0x118] sm:$0xf]  ;;  %v7301_v11 = vpop.f32.mrf.mxu1  ;;  %v9265_v14 = vor.u32 %v13117_v5, %v9264_v51 }
 0x57c   :  { %7508 = vmatmul.bf16.vlgmr.msrb.gmra.mxu1 %v14238_v31  ;;  %v12989_v0 = vld [vmem:[#allocation2 + $0x134] sm:$0xf0]  ;;  %v7302_v26 = vadd.f32 %v7301_v11, %v7289_v10 }
 0x57d   :  { %7533 = vmatpush.bf16.msrb.mxu3 %v12461_v15  ;;  %7552 = vmatpush.bf16.msra.mxu1 %v9105_v21  ;;  %v9520_v13 = vld [vmem:[#allocation2 + $0x718] sm:$0xf]  ;;  %v8753_v6 = vor.u32 %v12989_v0, %v8752_v63 }
 0x57e   :  { %7521 = vmatmul.bf16.vlgmr.msrb.gmra.mxu2 %v14236_v28  ;;  %v13181_v9 = vld [vmem:[#allocation2 + $0x734] sm:$0xf0]  ;;  %v7315_v54 = vadd.f32 %v7314_v52, %v7302_v26 }
 0x57f   :  { %7565 = vmatpush.bf16.msra.mxu2 %v9361_v24  ;;  %7540 = vmatpush.bf16.msra.mxu0 %v8817_v46  ;;  %v8720_v15 = vld [vmem:[#allocation2 + $0xd8] sm:$0xf]  ;;  %v9521_v24 = vor.u32 %v13181_v9, %v9520_v13  ;;  %v7290_v62 = vpop.f32.mrf.mxu0 }
 0x580   :  { %7534 = vmatmul.bf16.vlgmr.msrb.gmra.mxu3 %v14240_v35  ;;  %v12981_v8 = vld [vmem:[#allocation2 + $0xf4] sm:$0xf0] }
 0x581   :  { %7578 = vmatpush.bf16.msra.mxu3 %v9617_v36  ;;  %7553 = vmatpush.bf16.msra.mxu1 %v9073_v49  ;;  %v8976_v21 = vld [vmem:[#allocation2 + $0x2d8] sm:$0xf]  ;;  %v8721_v39 = vor.u32 %v12981_v8, %v8720_v15 }
 0x582   :  { %v13045_v27 = vld [vmem:[#allocation2 + $0x2f4] sm:$0xf0] }
 0x583   :  { %7566 = vmatpush.bf16.msra.mxu2 %v9329_v50  ;;  %7541 = vmatpush.bf16.msra.mxu0 %v8785_v60  ;;  %v9232_v32 = vld [vmem:[#allocation2 + $0x4d8] sm:$0xf]  ;;  %v8977_v34 = vor.u32 %v13045_v27, %v8976_v21 }
 0x584   :  { %v13109_v36 = vld [vmem:[#allocation2 + $0x4f4] sm:$0xf0] }
 0x585   :  { %7579 = vmatpush.bf16.msra.mxu3 %v9585_v16  ;;  %7554 = vmatpush.bf16.msra.mxu1 %v9041_v61  ;;  %v9488_v43 = vld [vmem:[#allocation2 + $0x6d8] sm:$0xf]  ;;  %v9233_v47 = vor.u32 %v13109_v36, %v9232_v32  ;;  %v7303_v61 = vpop.f32.mrf.mxu1 }
 0x586   :  { %v13173_v45 = vld [vmem:[#allocation2 + $0x6f4] sm:$0xf0] }
 0x587   :  { %7567 = vmatpush.bf16.msra.mxu2 %v9297_v56  ;;  %7542 = vmatpush.bf16.msra.mxu0 %v8753_v6  ;;  %v8688_v48 = vld [vmem:[#allocation2 + $0x98] sm:$0xf]  ;;  %v9489_v50 = vor.u32 %v13173_v45, %v9488_v43  ;;  %v14379_v56 = vadd.f32 %v7327_v55, %v7315_v54  ;;  %v7316_v43 = vpop.f32.mrf.mxu2 }
 0x588   :  { %v12973_v46 = vld [vmem:[#allocation2 + $0xb4] sm:$0xf0] }
 0x589   :  { %7580 = vmatpush.bf16.msra.mxu3 %v9553_v3  ;;  %7555 = vmatpush.bf16.msra.mxu1 %v9009_v12  ;;  %v8944_v49 = vld [vmem:[#allocation2 + $0x298] sm:$0xf]  ;;  %v8689_v60 = vor.u32 %v12973_v46, %v8688_v48 }
 0x58a   :  { %v13037_v53 = vld [vmem:[#allocation2 + $0x2b4] sm:$0xf0] }
 0x58b   :  { %7568 = vmatpush.bf16.msra.mxu2 %v9265_v14  ;;  %v9200_v37 = vld [vmem:[#allocation2 + $0x498] sm:$0xf]  ;;  %7543 = vmatpush.bf16.msra.mxu0 %v8721_v39  ;;  %v8945_v63 = vor.u32 %v13037_v53, %v8944_v49 }
 0x58c   :  { %v13101_v16 = vld [vmem:[#allocation2 + $0x4b4] sm:$0xf0] }
 0x58d   :  { %7581 = vmatpush.bf16.msra.mxu3 %v9521_v24  ;;  %v9456_v58 = vld [vmem:[#allocation2 + $0x698] sm:$0xf]  ;;  %7556 = vmatpush.bf16.msra.mxu1 %v8977_v34  ;;  %v9201_v0 = vor.u32 %v13101_v16, %v9200_v37 }
 0x58e   :  { %v13165_v59 = vld [vmem:[#allocation2 + $0x6b4] sm:$0xf0] }
 0x58f   :  { %7569 = vmatpush.bf16.msra.mxu2 %v9233_v47  ;;  %v8656_v2 = vld [vmem:[#allocation2 + $0x58] sm:$0xf]  ;;  %v9457_v51 = vor.u32 %v13165_v59, %v9456_v58  ;;  %7544 = vmatpush.bf16.msra.mxu0 %v8689_v60  ;;  %v7329_v47 = vpop.f32.mrf.mxu3 }
 0x590   :  { %v12965_v3 = vld [vmem:[#allocation2 + $0x74] sm:$0xf0] }
 0x591   :  { %v8912_v4 = vld [vmem:[#allocation2 + $0x258] sm:$0xf]  ;;  %7582 = vmatpush.bf16.msra.mxu3 %v9489_v50  ;;  %v8657_v6 = vor.u32 %v12965_v3, %v8656_v2  ;;  %7557 = vmatpush.bf16.msra.mxu1 %v8945_v63 }
 0x592   :  { %v13029_v5 = vld [vmem:[#allocation2 + $0x274] sm:$0xf0] }
 0x593   :  { %v9168_v7 = vld [vmem:[#allocation2 + $0x458] sm:$0xf]  ;;  %7570 = vmatpush.bf16.msra.mxu2 %v9201_v0  ;;  %v8913_v14 = vor.u32 %v13029_v5, %v8912_v4  ;;  %7545 = vmatpush.bf16.msra.mxu0 %v8657_v6 }
 0x594   :  { %v13093_v13 = vld [vmem:[#allocation2 + $0x474] sm:$0xf0] }
 0x595   :  { %v9424_v9 = vld [vmem:[#allocation2 + $0x658] sm:$0xf]  ;;  %v9169_v15 = vor.u32 %v13093_v13, %v9168_v7  ;;  %7583 = vmatpush.bf16.msra.mxu3 %v9457_v51  ;;  %7558 = vmatpush.bf16.msra.mxu1 %v8913_v14 }
 0x596   :  { %v13157_v10 = vld [vmem:[#allocation2 + $0x674] sm:$0xf0] }
 0x597   :  { %v8624_v11 = vld [vmem:[#allocation2 + $0x18] sm:$0xf]  ;;  %v9425_v26 = vor.u32 %v13157_v10, %v9424_v9  ;;  %7571 = vmatpush.bf16.msra.mxu2 %v9169_v15 }
 0x598   :  { %v12957_v12 = vld [vmem:[#allocation2 + $0x34] sm:$0xf0] }
 0x599   :  { %v8880_v8 = vld [vmem:[#allocation2 + $0x218] sm:$0xf]  ;;  %v8625_v48 = vor.u32 %v12957_v12, %v8624_v11  ;;  %7584 = vmatpush.bf16.msra.mxu3 %v9425_v26 }
 0x59a   :  { %v13021_v21 = vld [vmem:[#allocation2 + $0x234] sm:$0xf0] }
 0x59b   :  { %v9136_v24 = vld [vmem:[#allocation2 + $0x418] sm:$0xf]  ;;  %v8881_v52 = vor.u32 %v13021_v21, %v8880_v8  ;;  %7546 = vmatpush.bf16.msra.mxu0 %v8625_v48 }
 0x59c   :  { %v13085_v27 = vld [vmem:[#allocation2 + $0x434] sm:$0xf0] }
 0x59d   :  { %v9392_v32 = vld [vmem:[#allocation2 + $0x618] sm:$0xf]  ;;  %v9137_v53 = vor.u32 %v13085_v27, %v9136_v24  ;;  %7559 = vmatpush.bf16.msra.mxu1 %v8881_v52 }
 0x59e   :  { %v13149_v36 = vld [vmem:[#allocation2 + $0x634] sm:$0xf0]  ;;  %7547 = vmatmul.bf16.vlgmr.msra.gmra.mxu0 %v14182_v19 }
 0x59f   :  { %v9872_v45 = vld [vmem:[#allocation2 + $0x9d8] sm:$0xf]  ;;  %v9393_v54 = vor.u32 %v13149_v36, %v9392_v32  ;;  %7572 = vmatpush.bf16.msra.mxu2 %v9137_v53  ;;  %v7340_v53 = vpop.f32.mrf.mxu0 }
 0x5a0   :  { %v13269_v39 = vld [vmem:[#allocation2 + $0x9f4] sm:$0xf0]  ;;  %7560 = vmatmul.bf16.vlgmr.msra.gmra.mxu1 %v14186_v22 }
 0x5a1   :  { %v10128_v34 = vld [vmem:[#allocation2 + $0xbd8] sm:$0xf]  ;;  %v9873_v55 = vor.u32 %v13269_v39, %v9872_v45  ;;  %7585 = vmatpush.bf16.msra.mxu3 %v9393_v54  ;;  %v14050_v45 = vld [vmem:[#allocation4] sm:$0xff] }
 0x5a2   :  { %v13333_v46 = vld [vmem:[#allocation2 + $0xbf4] sm:$0xf0]  ;;  %7573 = vmatmul.bf16.vlgmr.msra.gmra.mxu2 %v14180_v18  ;;  %v1104_v39 = vperm.slane %v14050_v45, 5 }
 0x5a3   :  { %v10384_v49 = vld [vmem:[#allocation2 + $0xdd8] sm:$0xf]  ;;  %v10129_v58 = vor.u32 %v13333_v46, %v10128_v34  ;;  %7591 = vmatpush.bf16.msrb.mxu0 %v9873_v55 }
 0x5a4   :  { %v13397_v50 = vld [vmem:[#allocation2 + $0xdf4] sm:$0xf0]  ;;  %7586 = vmatmul.bf16.vlgmr.msra.gmra.mxu3 %v14184_v20 }
 0x5a5   :  { %v10640_v37 = vld [vmem:[#allocation2 + $0xfd8] sm:$0xf]  ;;  %v10385_v59 = vor.u32 %v13397_v50, %v10384_v49  ;;  %7604 = vmatpush.bf16.msrb.mxu1 %v10129_v58 }
 0x5a6   :  { %v13461_v16 = vld [vmem:[#allocation2 + $0xff4] sm:$0xf0] }
 0x5a7   :  { %v9840_v62 = vld [vmem:[#allocation2 + $0x998] sm:$0xf]  ;;  %v10641_v63 = vor.u32 %v13461_v16, %v10640_v37  ;;  %7617 = vmatpush.bf16.msrb.mxu2 %v10385_v59  ;;  %v7341_v59 = vadd.f32 %v7340_v53, %v1104_v39 }
 0x5a8   :  { %v13261_v60 = vld [vmem:[#allocation2 + $0x9b4] sm:$0xf0] }
 0x5a9   :  { %v10096_v61 = vld [vmem:[#allocation2 + $0xb98] sm:$0xf]  ;;  %v9841_v5 = vor.u32 %v13261_v60, %v9840_v62  ;;  %7630 = vmatpush.bf16.msrb.mxu3 %v10641_v63  ;;  %v7353_v62 = vpop.f32.mrf.mxu1 }
 0x5aa   :  { %v13325_v0 = vld [vmem:[#allocation2 + $0xbb4] sm:$0xf0] }
 0x5ab   :  { %v10352_v2 = vld [vmem:[#allocation2 + $0xd98] sm:$0xf]  ;;  %v10097_v7 = vor.u32 %v13325_v0, %v10096_v61  ;;  %7592 = vmatpush.bf16.msrb.mxu0 %v9841_v5 }
 0x5ac   :  { %v13389_v3 = vld [vmem:[#allocation2 + $0xdb4] sm:$0xf0] }
 0x5ad   :  { %v10608_v4 = vld [vmem:[#allocation2 + $0xf98] sm:$0xf]  ;;  %v10353_v13 = vor.u32 %v13389_v3, %v10352_v2  ;;  %7605 = vmatpush.bf16.msrb.mxu1 %v10097_v7 }
 0x5ae   :  { %v13453_v51 = vld [vmem:[#allocation2 + $0xfb4] sm:$0xf0] }
 0x5af   :  { %v9808_v9 = vld [vmem:[#allocation2 + $0x958] sm:$0xf]  ;;  %v10609_v11 = vor.u32 %v13453_v51, %v10608_v4  ;;  %7618 = vmatpush.bf16.msrb.mxu2 %v10353_v13  ;;  %v7354_v4 = vadd.f32 %v7353_v62, %v7341_v59 }
 0x5b0   :  { %v13253_v10 = vld [vmem:[#allocation2 + $0x974] sm:$0xf0] }
 0x5b1   :  { %v10064_v6 = vld [vmem:[#allocation2 + $0xb58] sm:$0xf]  ;;  %v9809_v24 = vor.u32 %v13253_v10, %v9808_v9  ;;  %7631 = vmatpush.bf16.msrb.mxu3 %v10609_v11 }
 0x5b2   :  { %v13317_v12 = vld [vmem:[#allocation2 + $0xb74] sm:$0xf0] }
 0x5b3   :  { %v10320_v14 = vld [vmem:[#allocation2 + $0xd58] sm:$0xf]  ;;  %v10065_v27 = vor.u32 %v13317_v12, %v10064_v6  ;;  %7593 = vmatpush.bf16.msrb.mxu0 %v9809_v24  ;;  %v7366_v6 = vpop.f32.mrf.mxu2 }
 0x5b4   :  { %v13381_v15 = vld [vmem:[#allocation2 + $0xd74] sm:$0xf0] }
 0x5b5   :  { %v10576_v8 = vld [vmem:[#allocation2 + $0xf58] sm:$0xf]  ;;  %v10321_v32 = vor.u32 %v13381_v15, %v10320_v14  ;;  %7606 = vmatpush.bf16.msrb.mxu1 %v10065_v27 }
 0x5b6   :  { %v13445_v21 = vld [vmem:[#allocation2 + $0xf74] sm:$0xf0] }
 0x5b7   :  { %v9776_v26 = vld [vmem:[#allocation2 + $0x918] sm:$0xf]  ;;  %v10577_v34 = vor.u32 %v13445_v21, %v10576_v8  ;;  %7619 = vmatpush.bf16.msrb.mxu2 %v10321_v32  ;;  %v7367_v8 = vadd.f32 %v7366_v6, %v7354_v4  ;;  %v7379_v21 = vpop.f32.mrf.mxu3 }
 0x5b8   :  { %v13245_v36 = vld [vmem:[#allocation2 + $0x934] sm:$0xf0] }
 0x5b9   :  { %v10032_v43 = vld [vmem:[#allocation2 + $0xb18] sm:$0xf]  ;;  %v9777_v52 = vor.u32 %v13245_v36, %v9776_v26  ;;  %7632 = vmatpush.bf16.msrb.mxu3 %v10577_v34  ;;  %v14385_v32 = vadd.f32 %v7379_v21, %v7367_v8  ;;  %v7342_v36 = vpop.f32.mrf.mxu0 }
 0x5ba   :  { %v13309_v47 = vld [vmem:[#allocation2 + $0xb34] sm:$0xf0] }
 0x5bb   :  { %v10288_v48 = vld [vmem:[#allocation2 + $0xd18] sm:$0xf]  ;;  %v10033_v37 = vor.u32 %v13309_v47, %v10032_v43  ;;  %7594 = vmatpush.bf16.msrb.mxu0 %v9777_v52 }
 0x5bc   :  { %v13373_v46 = vld [vmem:[#allocation2 + $0xd34] sm:$0xf0] }
 0x5bd   :  { %v10544_v49 = vld [vmem:[#allocation2 + $0xf18] sm:$0xf]  ;;  %v10289_v16 = vor.u32 %v13373_v46, %v10288_v48  ;;  %7607 = vmatpush.bf16.msrb.mxu1 %v10033_v37  ;;  %v7355_v48 = vpop.f32.mrf.mxu1 }
 0x5be   :  { %v13437_v50 = vld [vmem:[#allocation2 + $0xf34] sm:$0xf0] }
 0x5bf   :  { %v9744_v54 = vld [vmem:[#allocation2 + $0x8d8] sm:$0xf]  ;;  %v10545_v60 = vor.u32 %v13437_v50, %v10544_v49  ;;  %7620 = vmatpush.bf16.msrb.mxu2 %v10289_v16 }
 0x5c0   :  { %v13237_v55 = vld [vmem:[#allocation2 + $0x8f4] sm:$0xf0] }
 0x5c1   :  { %v10000_v58 = vld [vmem:[#allocation2 + $0xad8] sm:$0xf]  ;;  %v9745_v51 = vor.u32 %v13237_v55, %v9744_v54  ;;  %7633 = vmatpush.bf16.msrb.mxu3 %v10545_v60 }
 0x5c2   :  { %v13301_v61 = vld [vmem:[#allocation2 + $0xaf4] sm:$0xf0] }
 0x5c3   :  { %v10256_v63 = vld [vmem:[#allocation2 + $0xcd8] sm:$0xf]  ;;  %v10001_v5 = vor.u32 %v13301_v61, %v10000_v58  ;;  %7595 = vmatpush.bf16.msrb.mxu0 %v9745_v51  ;;  %v7381_v51 = vpop.f32.mrf.mxu3 }
 0x5c4   :  { %v13365_v0 = vld [vmem:[#allocation2 + $0xcf4] sm:$0xf0] }
 0x5c5   :  { %v10512_v2 = vld [vmem:[#allocation2 + $0xed8] sm:$0xf]  ;;  %v10257_v7 = vor.u32 %v13365_v0, %v10256_v63  ;;  %7608 = vmatpush.bf16.msrb.mxu1 %v10001_v5  ;;  %v7368_v63 = vpop.f32.mrf.mxu2 }
 0x5c6   :  { %v13429_v3 = vld [vmem:[#allocation2 + $0xef4] sm:$0xf0] }
 0x5c7   :  { %v9712_v13 = vld [vmem:[#allocation2 + $0x898] sm:$0xf]  ;;  %v10513_v11 = vor.u32 %v13429_v3, %v10512_v2  ;;  %7621 = vmatpush.bf16.msrb.mxu2 %v10257_v7 }
 0x5c8   :  { %v13229_v9 = vld [vmem:[#allocation2 + $0x8b4] sm:$0xf0] }
 0x5c9   :  { %v9968_v10 = vld [vmem:[#allocation2 + $0xa98] sm:$0xf]  ;;  %v9713_v27 = vor.u32 %v13229_v9, %v9712_v13  ;;  %7634 = vmatpush.bf16.msrb.mxu3 %v10513_v11 }
 0x5ca   :  { %v13293_v12 = vld [vmem:[#allocation2 + $0xab4] sm:$0xf0] }
 0x5cb   :  { %v10224_v14 = vld [vmem:[#allocation2 + $0xc98] sm:$0xf]  ;;  %v9969_v43 = vor.u32 %v13293_v12, %v9968_v10  ;;  %7596 = vmatpush.bf16.msrb.mxu0 %v9713_v27 }
 0x5cc   :  { %v13357_v15 = vld [vmem:[#allocation2 + $0xcb4] sm:$0xf0] }
 0x5cd   :  { %v10480_v24 = vld [vmem:[#allocation2 + $0xe98] sm:$0xf]  ;;  %v10225_v45 = vor.u32 %v13357_v15, %v10224_v14  ;;  %7609 = vmatpush.bf16.msrb.mxu1 %v9969_v43 }
 0x5ce   :  { %v13421_v26 = vld [vmem:[#allocation2 + $0xeb4] sm:$0xf0] }
 0x5cf   :  { %v9680_v39 = vld [vmem:[#allocation2 + $0x858] sm:$0xf]  ;;  %v10481_v46 = vor.u32 %v13421_v26, %v10480_v24  ;;  %7622 = vmatpush.bf16.msrb.mxu2 %v10225_v45 }
 0x5d0   :  { %v13221_v34 = vld [vmem:[#allocation2 + $0x874] sm:$0xf0] }
 0x5d1   :  { %v9936_v47 = vld [vmem:[#allocation2 + $0xa58] sm:$0xf]  ;;  %v9681_v16 = vor.u32 %v13221_v34, %v9680_v39  ;;  %7635 = vmatpush.bf16.msrb.mxu3 %v10481_v46 }
 0x5d2   :  { %v13285_v49 = vld [vmem:[#allocation2 + $0xa74] sm:$0xf0] }
 0x5d3   :  { %v10192_v50 = vld [vmem:[#allocation2 + $0xc58] sm:$0xf]  ;;  %v9937_v58 = vor.u32 %v13285_v49, %v9936_v47  ;;  %7597 = vmatpush.bf16.msrb.mxu0 %v9681_v16 }
 0x5d4   :  { %v13349_v52 = vld [vmem:[#allocation2 + $0xc74] sm:$0xf0] }
 0x5d5   :  { %v10448_v53 = vld [vmem:[#allocation2 + $0xe58] sm:$0xf]  ;;  %v10193_v59 = vor.u32 %v13349_v52, %v10192_v50  ;;  %7610 = vmatpush.bf16.msrb.mxu1 %v9937_v58 }
 0x5d6   :  { %v13413_v37 = vld [vmem:[#allocation2 + $0xe74] sm:$0xf0] }
 0x5d7   :  { %v9648_v54 = vld [vmem:[#allocation2 + $0x818] sm:$0xf]  ;;  %v10449_v0 = vor.u32 %v13413_v37, %v10448_v53  ;;  %7623 = vmatpush.bf16.msrb.mxu2 %v10193_v59 }
 0x5d8   :  { %v13213_v55 = vld [vmem:[#allocation2 + $0x834] sm:$0xf0] }
 0x5d9   :  { %v9904_v62 = vld [vmem:[#allocation2 + $0xa18] sm:$0xf]  ;;  %v9649_v9 = vor.u32 %v13213_v55, %v9648_v54  ;;  %7636 = vmatpush.bf16.msrb.mxu3 %v10449_v0 }
 0x5da   :  { %v13277_v60 = vld [vmem:[#allocation2 + $0xa34] sm:$0xf0] }
 0x5db   :  { %v10160_v61 = vld [vmem:[#allocation2 + $0xc18] sm:$0xf]  ;;  %v9905_v12 = vor.u32 %v13277_v60, %v9904_v62  ;;  %7598 = vmatpush.bf16.msrb.mxu0 %v9649_v9 }
 0x5dc   :  { %v13341_v2 = vld [vmem:[#allocation2 + $0xc34] sm:$0xf0] }
 0x5dd   :  { %v10416_v3 = vld [vmem:[#allocation2 + $0xe18] sm:$0xf]  ;;  %v10161_v14 = vor.u32 %v13341_v2, %v10160_v61  ;;  %7611 = vmatpush.bf16.msrb.mxu1 %v9905_v12  ;;  %v7392_v12 = vpop.f32.mrf.mxu0 }
 0x5de   :  { %v13405_v4 = vld [vmem:[#allocation2 + $0xe34] sm:$0xf0]  ;;  %7599 = vmatmul.bf16.vlgmr.msrb.gmra.mxu0 %v14200_v41 }
 0x5df   :  { %v10896_v5 = vld [vmem:[#allocation2 + $0x11d8] sm:$0xf]  ;;  %v10417_v21 = vor.u32 %v13405_v4, %v10416_v3  ;;  %7624 = vmatpush.bf16.msrb.mxu2 %v10161_v14 }
 0x5e0   :  { %v13525_v7 = vld [vmem:[#allocation2 + $0x11f4] sm:$0xf0]  ;;  %7612 = vmatmul.bf16.vlgmr.msrb.gmra.mxu1 %v14204_v44 }
 0x5e1   :  { %v11152_v13 = vld [vmem:[#allocation2 + $0x13d8] sm:$0xf]  ;;  %v10897_v24 = vor.u32 %v13525_v7, %v10896_v5  ;;  %7637 = vmatpush.bf16.msrb.mxu3 %v10417_v21 }
 0x5e2   :  { %v13589_v10 = vld [vmem:[#allocation2 + $0x13f4] sm:$0xf0]  ;;  %7625 = vmatmul.bf16.vlgmr.msrb.gmra.mxu2 %v14198_v38 }
 0x5e3   :  { %v11408_v6 = vld [vmem:[#allocation2 + $0x15d8] sm:$0xf]  ;;  %v11153_v26 = vor.u32 %v13589_v10, %v11152_v13  ;;  %7643 = vmatpush.bf16.msra.mxu0 %v10897_v24 }
 0x5e4   :  { %v13653_v11 = vld [vmem:[#allocation2 + $0x15f4] sm:$0xf0]  ;;  %7638 = vmatmul.bf16.vlgmr.msrb.gmra.mxu3 %v14202_v42 }
 0x5e5   :  { %v11664_v15 = vld [vmem:[#allocation2 + $0x17d8] sm:$0xf]  ;;  %v11409_v27 = vor.u32 %v13653_v11, %v11408_v6  ;;  %7656 = vmatpush.bf16.msra.mxu1 %v11153_v26  ;;  %v7393_v26 = vadd.f32 %v7392_v12, %v14385_v32 }
 0x5e6   :  { %v13717_v8 = vld [vmem:[#allocation2 + $0x17f4] sm:$0xf0] }
 0x5e7   :  { %v10864_v36 = vld [vmem:[#allocation2 + $0x1198] sm:$0xf]  ;;  %v11665_v39 = vor.u32 %v13717_v8, %v11664_v15  ;;  %7669 = vmatpush.bf16.msra.mxu2 %v11409_v27  ;;  %v7405_v27 = vpop.f32.mrf.mxu1 }
 0x5e8   :  { %v13517_v43 = vld [vmem:[#allocation2 + $0x11b4] sm:$0xf0] }
 0x5e9   :  { %v11120_v45 = vld [vmem:[#allocation2 + $0x1398] sm:$0xf]  ;;  %v10865_v50 = vor.u32 %v13517_v43, %v10864_v36  ;;  %7682 = vmatpush.bf16.msra.mxu3 %v11665_v39 }
 0x5ea   :  { %v13581_v34 = vld [vmem:[#allocation2 + $0x13b4] sm:$0xf0] }
 0x5eb   :  { %v11376_v47 = vld [vmem:[#allocation2 + $0x1598] sm:$0xf]  ;;  %v11121_v52 = vor.u32 %v13581_v34, %v11120_v45  ;;  %7644 = vmatpush.bf16.msra.mxu0 %v10865_v50 }
 0x5ec   :  { %v13645_v48 = vld [vmem:[#allocation2 + $0x15b4] sm:$0xf0] }
 0x5ed   :  { %v11632_v46 = vld [vmem:[#allocation2 + $0x1798] sm:$0xf]  ;;  %v11377_v53 = vor.u32 %v13645_v48, %v11376_v47  ;;  %7657 = vmatpush.bf16.msra.mxu1 %v11121_v52  ;;  %v7406_v48 = vadd.f32 %v7405_v27, %v7393_v26 }
 0x5ee   :  { %v13709_v49 = vld [vmem:[#allocation2 + $0x17b4] sm:$0xf0] }
 0x5ef   :  { %v10832_v37 = vld [vmem:[#allocation2 + $0x1158] sm:$0xf]  ;;  %v11633_v55 = vor.u32 %v13709_v49, %v11632_v46  ;;  %7670 = vmatpush.bf16.msra.mxu2 %v11377_v53 }
 0x5f0   :  { %v13509_v16 = vld [vmem:[#allocation2 + $0x1174] sm:$0xf0] }
 0x5f1   :  { %v11088_v54 = vld [vmem:[#allocation2 + $0x1358] sm:$0xf]  ;;  %v10833_v63 = vor.u32 %v13509_v16, %v10832_v37  ;;  %7683 = vmatpush.bf16.msra.mxu3 %v11633_v55  ;;  %v7418_v16 = vpop.f32.mrf.mxu2 }
 0x5f2   :  { %v13573_v58 = vld [vmem:[#allocation2 + $0x1374] sm:$0xf0] }
 0x5f3   :  { %v11344_v59 = vld [vmem:[#allocation2 + $0x1558] sm:$0xf]  ;;  %v11089_v0 = vor.u32 %v13573_v58, %v11088_v54  ;;  %7645 = vmatpush.bf16.msra.mxu0 %v10833_v63 }
 0x5f4   :  { %v13637_v62 = vld [vmem:[#allocation2 + $0x1574] sm:$0xf0] }
 0x5f5   :  { %v11600_v60 = vld [vmem:[#allocation2 + $0x1758] sm:$0xf]  ;;  %v11345_v2 = vor.u32 %v13637_v62, %v11344_v59  ;;  %7658 = vmatpush.bf16.msra.mxu1 %v11089_v0  ;;  %v7419_v59 = vadd.f32 %v7418_v16, %v7406_v48  ;;  %v7431_v62 = vpop.f32.mrf.mxu3 }
 0x5f6   :  { %v13701_v61 = vld [vmem:[#allocation2 + $0x1774] sm:$0xf0] }
 0x5f7   :  { %v10800_v3 = vld [vmem:[#allocation2 + $0x1118] sm:$0xf]  ;;  %v11601_v5 = vor.u32 %v13701_v61, %v11600_v60  ;;  %7671 = vmatpush.bf16.msra.mxu2 %v11345_v2  ;;  %v14392_v0 = vadd.f32 %v7431_v62, %v7419_v59  ;;  %v7394_v2 = vpop.f32.mrf.mxu0 }
 0x5f8   :  { %v13501_v4 = vld [vmem:[#allocation2 + $0x1134] sm:$0xf0] }
 0x5f9   :  { %v11056_v51 = vld [vmem:[#allocation2 + $0x1318] sm:$0xf]  ;;  %v10801_v11 = vor.u32 %v13501_v4, %v10800_v3  ;;  %7684 = vmatpush.bf16.msra.mxu3 %v11601_v5 }
 0x5fa   :  { %v13565_v7 = vld [vmem:[#allocation2 + $0x1334] sm:$0xf0] }
 0x5fb   :  { %v11312_v13 = vld [vmem:[#allocation2 + $0x1518] sm:$0xf]  ;;  %v11057_v14 = vor.u32 %v13565_v7, %v11056_v51  ;;  %7646 = vmatpush.bf16.msra.mxu0 %v10801_v11 }
 0x5fc   :  { %v13629_v9 = vld [vmem:[#allocation2 + $0x1534] sm:$0xf0] }
 0x5fd   :  { %v11568_v10 = vld [vmem:[#allocation2 + $0x1718] sm:$0xf]  ;;  %v11313_v15 = vor.u32 %v13629_v9, %v11312_v13  ;;  %7659 = vmatpush.bf16.msra.mxu1 %v11057_v14  ;;  %v7407_v13 = vpop.f32.mrf.mxu1 }
 0x5fe   :  { %v13693_v6 = vld [vmem:[#allocation2 + $0x1734] sm:$0xf0] }
 0x5ff   :  { %v10768_v8 = vld [vmem:[#allocation2 + $0x10d8] sm:$0xf]  ;;  %v11569_v36 = vor.u32 %v13693_v6, %v11568_v10  ;;  %7672 = vmatpush.bf16.msra.mxu2 %v11313_v15 }
 0x600   :  { %v13493_v21 = vld [vmem:[#allocation2 + $0x10f4] sm:$0xf0] }
 0x601   :  { %v11024_v24 = vld [vmem:[#allocation2 + $0x12d8] sm:$0xf]  ;;  %v10769_v46 = vor.u32 %v13493_v21, %v10768_v8  ;;  %7685 = vmatpush.bf16.msra.mxu3 %v11569_v36 }
 0x602   :  { %v13557_v43 = vld [vmem:[#allocation2 + $0x12f4] sm:$0xf0] }
 0x603   :  { %v11280_v45 = vld [vmem:[#allocation2 + $0x14d8] sm:$0xf]  ;;  %v11025_v49 = vor.u32 %v13557_v43, %v11024_v24  ;;  %7647 = vmatpush.bf16.msra.mxu0 %v10769_v46  ;;  %v7433_v46 = vpop.f32.mrf.mxu3 }
 0x604   :  { %v13621_v39 = vld [vmem:[#allocation2 + $0x14f4] sm:$0xf0] }
 0x605   :  { %v11536_v34 = vld [vmem:[#allocation2 + $0x16d8] sm:$0xf]  ;;  %v11281_v50 = vor.u32 %v13621_v39, %v11280_v45  ;;  %7660 = vmatpush.bf16.msra.mxu1 %v11025_v49  ;;  %v7420_v45 = vpop.f32.mrf.mxu2 }
 0x606   :  { %v13685_v47 = vld [vmem:[#allocation2 + $0x16f4] sm:$0xf0] }
 0x607   :  { %v10736_v52 = vld [vmem:[#allocation2 + $0x1098] sm:$0xf]  ;;  %v11537_v32 = vor.u32 %v13685_v47, %v11536_v34  ;;  %7673 = vmatpush.bf16.msra.mxu2 %v11281_v50 }
 0x608   :  { %v13485_v53 = vld [vmem:[#allocation2 + $0x10b4] sm:$0xf0] }
 0x609   :  { %v10992_v37 = vld [vmem:[#allocation2 + $0x1298] sm:$0xf]  ;;  %v10737_v63 = vor.u32 %v13485_v53, %v10736_v52  ;;  %7686 = vmatpush.bf16.msra.mxu3 %v11537_v32 }
 0x60a   :  { %v13549_v54 = vld [vmem:[#allocation2 + $0x12b4] sm:$0xf0] }
 0x60b   :  { %v11248_v55 = vld [vmem:[#allocation2 + $0x1498] sm:$0xf]  ;;  %v10993_v3 = vor.u32 %v13549_v54, %v10992_v37  ;;  %7648 = vmatpush.bf16.msra.mxu0 %v10737_v63 }
 0x60c   :  { %v13613_v58 = vld [vmem:[#allocation2 + $0x14b4] sm:$0xf0] }
 0x60d   :  { %v11504_v60 = vld [vmem:[#allocation2 + $0x1698] sm:$0xf]  ;;  %v11249_v4 = vor.u32 %v13613_v58, %v11248_v55  ;;  %7661 = vmatpush.bf16.msra.mxu1 %v10993_v3 }
 0x60e   :  { %v13677_v61 = vld [vmem:[#allocation2 + $0x16b4] sm:$0xf0] }
 0x60f   :  { %v10704_v51 = vld [vmem:[#allocation2 + $0x1058] sm:$0xf]  ;;  %v11505_v9 = vor.u32 %v13677_v61, %v11504_v60  ;;  %7674 = vmatpush.bf16.msra.mxu2 %v11249_v4 }
 0x610   :  { %v13477_v5 = vld [vmem:[#allocation2 + $0x1074] sm:$0xf0] }
 0x611   :  { %v10960_v7 = vld [vmem:[#allocation2 + $0x1258] sm:$0xf]  ;;  %v10705_v15 = vor.u32 %v13477_v5, %v10704_v51  ;;  %7687 = vmatpush.bf16.msra.mxu3 %v11505_v9 }
 0x612   :  { %v13541_v10 = vld [vmem:[#allocation2 + $0x1274] sm:$0xf0] }
 0x613   :  { %v11216_v6 = vld [vmem:[#allocation2 + $0x1458] sm:$0xf]  ;;  %v10961_v24 = vor.u32 %v13541_v10, %v10960_v7  ;;  %7649 = vmatpush.bf16.msra.mxu0 %v10705_v15 }
 0x614   :  { %v13605_v11 = vld [vmem:[#allocation2 + $0x1474] sm:$0xf0] }
 0x615   :  { %v11472_v12 = vld [vmem:[#allocation2 + $0x1658] sm:$0xf]  ;;  %v11217_v26 = vor.u32 %v13605_v11, %v11216_v6  ;;  %7662 = vmatpush.bf16.msra.mxu1 %v10961_v24 }
 0x616   :  { %v13669_v14 = vld [vmem:[#allocation2 + $0x1674] sm:$0xf0] }
 0x617   :  { %v10672_v8 = vld [vmem:[#allocation2 + $0x1018] sm:$0xf]  ;;  %v11473_v39 = vor.u32 %v13669_v14, %v11472_v12  ;;  %7675 = vmatpush.bf16.msra.mxu2 %v11217_v26 }
 0x618   :  { %v13469_v21 = vld [vmem:[#allocation2 + $0x1034] sm:$0xf0] }
 0x619   :  { %v10928_v27 = vld [vmem:[#allocation2 + $0x1218] sm:$0xf]  ;;  %v10673_v53 = vor.u32 %v13469_v21, %v10672_v8  ;;  %7688 = vmatpush.bf16.msra.mxu3 %v11473_v39 }
 0x61a   :  { %v13533_v36 = vld [vmem:[#allocation2 + $0x1234] sm:$0xf0] }
 0x61b   :  { %v11184_v43 = vld [vmem:[#allocation2 + $0x1418] sm:$0xf]  ;;  %v10929_v54 = vor.u32 %v13533_v36, %v10928_v27  ;;  %7650 = vmatpush.bf16.msra.mxu0 %v10673_v53 }
 0x61c   :  { %v13597_v34 = vld [vmem:[#allocation2 + $0x1434] sm:$0xf0] }
 0x61d   :  { %v11440_v47 = vld [vmem:[#allocation2 + $0x1618] sm:$0xf]  ;;  %v11185_v55 = vor.u32 %v13597_v34, %v11184_v43  ;;  %7663 = vmatpush.bf16.msra.mxu1 %v10929_v54 }
 0x61e   :  { %v13661_v48 = vld [vmem:[#allocation2 + $0x1634] sm:$0xf0]  ;;  %7651 = vmatmul.bf16.vlgmr.msra.gmra.mxu0 %v14216_v25 }
 0x61f   :  { %v11920_v49 = vld [vmem:[#allocation2 + $0x19d8] sm:$0xf]  ;;  %v11441_v62 = vor.u32 %v13661_v48, %v11440_v47  ;;  %7676 = vmatpush.bf16.msra.mxu2 %v11185_v55 }
 0x620   :  { %v13781_v50 = vld [vmem:[#allocation2 + $0x19f4] sm:$0xf0]  ;;  %7664 = vmatmul.bf16.vlgmr.msra.gmra.mxu1 %v14220_v30 }
 0x621   :  { %v12176_v52 = vld [vmem:[#allocation2 + $0x1bd8] sm:$0xf]  ;;  %v11921_v60 = vor.u32 %v13781_v50, %v11920_v49  ;;  %7689 = vmatpush.bf16.msra.mxu3 %v11441_v62 }
 0x622   :  { %v13845_v37 = vld [vmem:[#allocation2 + $0x1bf4] sm:$0xf0]  ;;  %7677 = vmatmul.bf16.vlgmr.msra.gmra.mxu2 %v14218_v29 }
 0x623   :  { %v12432_v16 = vld [vmem:[#allocation2 + $0x1dd8] sm:$0xf]  ;;  %v12177_v61 = vor.u32 %v13845_v37, %v12176_v52  ;;  %7695 = vmatpush.bf16.msrb.mxu0 %v11921_v60  ;;  %v7444_v37 = vpop.f32.mrf.mxu0 }
 0x624   :  { %v13909_v32 = vld [vmem:[#allocation2 + $0x1df4] sm:$0xf0]  ;;  %7690 = vmatmul.bf16.vlgmr.msra.gmra.mxu3 %v14222_v33  ;;  %v7445_v54 = vadd.f32 %v7444_v37, %v14392_v0 }
 0x625   :  { %v12688_v58 = vld [vmem:[#allocation2 + $0x1fd8] sm:$0xf]  ;;  %v12433_v63 = vor.u32 %v13909_v32, %v12432_v16  ;;  %7708 = vmatpush.bf16.msrb.mxu1 %v12177_v61 }
 0x626   :  { %v13973_v59 = vld [vmem:[#allocation2 + $0x1ff4] sm:$0xf0] }
 0x627   :  { %v11888_v2 = vld [vmem:[#allocation2 + $0x1998] sm:$0xf]  ;;  %v12689_v51 = vor.u32 %v13973_v59, %v12688_v58  ;;  %7721 = vmatpush.bf16.msrb.mxu2 %v12433_v63  ;;  %v7457_v58 = vpop.f32.mrf.mxu1 }
 0x628   :  { %v13773_v3 = vld [vmem:[#allocation2 + $0x19b4] sm:$0xf0] }
 0x629   :  { %v12144_v4 = vld [vmem:[#allocation2 + $0x1b98] sm:$0xf]  ;;  %v11889_v6 = vor.u32 %v13773_v3, %v11888_v2  ;;  %7734 = vmatpush.bf16.msrb.mxu3 %v12689_v51  ;;  %v7458_v3 = vadd.f32 %v7457_v58, %v7445_v54 }
 0x62a   :  { %v13837_v5 = vld [vmem:[#allocation2 + $0x1bb4] sm:$0xf0] }
 0x62b   :  { %v12400_v7 = vld [vmem:[#allocation2 + $0x1d98] sm:$0xf]  ;;  %v12145_v11 = vor.u32 %v13837_v5, %v12144_v4  ;;  %7696 = vmatpush.bf16.msrb.mxu0 %v11889_v6 }
 0x62c   :  { %v13901_v13 = vld [vmem:[#allocation2 + $0x1db4] sm:$0xf0] }
 0x62d   :  { %v12656_v9 = vld [vmem:[#allocation2 + $0x1f98] sm:$0xf]  ;;  %v12401_v12 = vor.u32 %v13901_v13, %v12400_v7  ;;  %7709 = vmatpush.bf16.msrb.mxu1 %v12145_v11 }
 0x62e   :  { %v13965_v10 = vld [vmem:[#allocation2 + $0x1fb4] sm:$0xf0] }
 0x62f   :  { %v11856_v14 = vld [vmem:[#allocation2 + $0x1958] sm:$0xf]  ;;  %v12657_v21 = vor.u32 %v13965_v10, %v12656_v9  ;;  %7722 = vmatpush.bf16.msrb.mxu2 %v12401_v12 }
 0x630   :  { %v13765_v15 = vld [vmem:[#allocation2 + $0x1974] sm:$0xf0] }
 0x631   :  { %v12112_v8 = vld [vmem:[#allocation2 + $0x1b58] sm:$0xf]  ;;  %v11857_v45 = vor.u32 %v13765_v15, %v11856_v14  ;;  %7735 = vmatpush.bf16.msrb.mxu3 %v12657_v21  ;;  %v7470_v15 = vpop.f32.mrf.mxu2 }
 0x632   :  { %v13829_v24 = vld [vmem:[#allocation2 + $0x1b74] sm:$0xf0] }
 0x633   :  { %v12368_v26 = vld [vmem:[#allocation2 + $0x1d58] sm:$0xf]  ;;  %v12113_v39 = vor.u32 %v13829_v24, %v12112_v8  ;;  %7697 = vmatpush.bf16.msrb.mxu0 %v11857_v45  ;;  %v7446_v45 = vpop.f32.mrf.mxu0 }
 0x634   :  { %v13893_v27 = vld [vmem:[#allocation2 + $0x1d74] sm:$0xf0] }
 0x635   :  { %v12624_v36 = vld [vmem:[#allocation2 + $0x1f58] sm:$0xf]  ;;  %v12369_v34 = vor.u32 %v13893_v27, %v12368_v26  ;;  %7710 = vmatpush.bf16.msrb.mxu1 %v12113_v39  ;;  %v7471_v26 = vadd.f32 %v7470_v15, %v7458_v3  ;;  %v7483_v27 = vpop.f32.mrf.mxu3  ;;  %v9362_v15 = vld [vmem:[#allocation2 + $0x5f8] sm:$0xf0] }
 0x636   :  { %v13957_v43 = vld [vmem:[#allocation2 + $0x1f74] sm:$0xf0] }
 0x637   :  { %v11824_v47 = vld [vmem:[#allocation2 + $0x1918] sm:$0xf]  ;;  %v12625_v49 = vor.u32 %v13957_v43, %v12624_v36  ;;  %7723 = vmatpush.bf16.msrb.mxu2 %v12369_v34  ;;  %v7459_v34 = vpop.f32.mrf.mxu1 }
 0x638   :  { %v13757_v48 = vld [vmem:[#allocation2 + $0x1934] sm:$0xf0]  ;;  %v8818_v34 = vld [vmem:[#allocation2 + $0x1b8] sm:$0xf0] }
 0x639   :  { %v12080_v46 = vld [vmem:[#allocation2 + $0x1b18] sm:$0xf]  ;;  %v11825_v55 = vor.u32 %v13757_v48, %v11824_v47  ;;  %7736 = vmatpush.bf16.msrb.mxu3 %v12625_v49  ;;  %v14399_v47 = vadd.f32 %v7483_v27, %v7471_v26  ;;  %v9618_v26 = vld [vmem:[#allocation2 + $0x7f8] sm:$0xf0] }
 0x63a   :  { %v13821_v50 = vld [vmem:[#allocation2 + $0x1b34] sm:$0xf0] }
 0x63b   :  { %v12336_v52 = vld [vmem:[#allocation2 + $0x1d18] sm:$0xf]  ;;  %v12081_v59 = vor.u32 %v13821_v50, %v12080_v46  ;;  %7698 = vmatpush.bf16.msrb.mxu0 %v11825_v55 }
 0x63c   :  { %v13885_v53 = vld [vmem:[#allocation2 + $0x1d34] sm:$0xf0] }
 0x63d   :  { %v12592_v16 = vld [vmem:[#allocation2 + $0x1f18] sm:$0xf]  ;;  %v12337_v62 = vor.u32 %v13885_v53, %v12336_v52  ;;  %7711 = vmatpush.bf16.msrb.mxu1 %v12081_v59 }
 0x63e   :  { %v13949_v32 = vld [vmem:[#allocation2 + $0x1f34] sm:$0xf0] }
 0x63f   :  { %v11792_v60 = vld [vmem:[#allocation2 + $0x18d8] sm:$0xf]  ;;  %v12593_v2 = vor.u32 %v13949_v32, %v12592_v16  ;;  %7724 = vmatpush.bf16.msrb.mxu2 %v12337_v62 }
 0x640   :  { %v13749_v61 = vld [vmem:[#allocation2 + $0x18f4] sm:$0xf0] }
 0x641   :  { %v12048_v63 = vld [vmem:[#allocation2 + $0x1ad8] sm:$0xf]  ;;  %v11793_v9 = vor.u32 %v13749_v61, %v11792_v60  ;;  %7737 = vmatpush.bf16.msrb.mxu3 %v12593_v2 }
 0x642   :  { %v13813_v4 = vld [vmem:[#allocation2 + $0x1af4] sm:$0xf0] }
 0x643   :  { %v12304_v51 = vld [vmem:[#allocation2 + $0x1cd8] sm:$0xf]  ;;  %v12049_v0 = vor.u32 %v13813_v4, %v12048_v63  ;;  %7699 = vmatpush.bf16.msrb.mxu0 %v11793_v9  ;;  %v13009_v9 = vld [vmem:[#allocation2 + $0x1dc] sm:$0xf] }
 0x644   :  { %v13877_v5 = vld [vmem:[#allocation2 + $0x1cf4] sm:$0xf0] }
 0x645   :  { %v12560_v7 = vld [vmem:[#allocation2 + $0x1ed8] sm:$0xf]  ;;  %v12305_v10 = vor.u32 %v13877_v5, %v12304_v51  ;;  %7712 = vmatpush.bf16.msrb.mxu1 %v12049_v0  ;;  %v8850_v0 = vld [vmem:[#allocation2 + $0x1f8] sm:$0xf0] }
 0x646   :  { %v13941_v13 = vld [vmem:[#allocation2 + $0x1ef4] sm:$0xf0] }
 0x647   :  { %v11760_v6 = vld [vmem:[#allocation2 + $0x1898] sm:$0xf]  ;;  %v12561_v14 = vor.u32 %v13941_v13, %v12560_v7  ;;  %7725 = vmatpush.bf16.msrb.mxu2 %v12305_v10  ;;  %v7472_v13 = vpop.f32.mrf.mxu2  ;;  %v13073_v10 = vld [vmem:[#allocation2 + $0x3dc] sm:$0xf] }
 0x648   :  { %v13741_v11 = vld [vmem:[#allocation2 + $0x18b4] sm:$0xf0]  ;;  %v8754_v13 = vld [vmem:[#allocation2 + $0x138] sm:$0xf0] }
 0x649   :  { %v12016_v12 = vld [vmem:[#allocation2 + $0x1a98] sm:$0xf]  ;;  %v11761_v39 = vor.u32 %v13741_v11, %v11760_v6  ;;  %7738 = vmatpush.bf16.msrb.mxu3 %v12561_v14  ;;  %v7485_v6 = vpop.f32.mrf.mxu3  ;;  %v13137_v14 = vld [vmem:[#allocation2 + $0x5dc] sm:$0xf] }
 0x64a   :  { %v13805_v8 = vld [vmem:[#allocation2 + $0x1ab4] sm:$0xf0]  ;;  %v9365_v45 = vor.u32 %v13137_v14, %v9362_v15  ;;  %v13113_v6 = vld [vmem:[#allocation2 + $0x51c] sm:$0xf] }
 0x64b   :  { %v12272_v21 = vld [vmem:[#allocation2 + $0x1c98] sm:$0xf]  ;;  %v12017_v48 = vor.u32 %v13805_v8, %v12016_v12  ;;  %7700 = vmatpush.bf16.msrb.mxu0 %v11761_v39  ;;  %v9106_v12 = vld [vmem:[#allocation2 + $0x3f8] sm:$0xf0] }
 0x64c   :  { %v13869_v24 = vld [vmem:[#allocation2 + $0x1cb4] sm:$0xf0]  ;;  %v13001_v39 = vld [vmem:[#allocation2 + $0x19c] sm:$0xf] }
 0x64d   :  { %v12528_v36 = vld [vmem:[#allocation2 + $0x1e98] sm:$0xf]  ;;  %v12273_v46 = vor.u32 %v13869_v24, %v12272_v21  ;;  %7713 = vmatpush.bf16.msrb.mxu1 %v12017_v48  ;;  %v13201_v24 = vld [vmem:[#allocation2 + $0x7dc] sm:$0xf] }
 0x64e   :  { %v13933_v43 = vld [vmem:[#allocation2 + $0x1eb4] sm:$0xf0]  ;;  %v13065_v48 = vld [vmem:[#allocation2 + $0x39c] sm:$0xf] }
 0x64f   :  { %v11728_v49 = vld [vmem:[#allocation2 + $0x1858] sm:$0xf]  ;;  %v12529_v53 = vor.u32 %v13933_v43, %v12528_v36  ;;  %7726 = vmatpush.bf16.msrb.mxu2 %v12273_v46  ;;  %v8853_v36 = vor.u32 %v13009_v9, %v8850_v0  ;;  %v9109_v43 = vor.u32 %v13073_v10, %v9106_v12  ;;  %v9621_v46 = vor.u32 %v13201_v24, %v9618_v26  ;;  %v13049_v9 = vld [vmem:[#allocation2 + $0x31c] sm:$0xf]  ;;  %v7496_v12 = vpop.f32.mrf.mxu0  ;;  %v7509_v24 = vpop.f32.mrf.mxu1 }
 0x650   :  { %v13733_v50 = vld [vmem:[#allocation2 + $0x1874] sm:$0xf0]  ;;  %v9010_v10 = vld [vmem:[#allocation2 + $0x338] sm:$0xf0] }
 0x651   :  { %v11984_v52 = vld [vmem:[#allocation2 + $0x1a58] sm:$0xf]  ;;  %v11729_v58 = vor.u32 %v13733_v50, %v11728_v49  ;;  %7739 = vmatpush.bf16.msrb.mxu3 %v12529_v53  ;;  %v9074_v49 = vld [vmem:[#allocation2 + $0x3b8] sm:$0xf0]  ;;  %v9013_v26 = vor.u32 %v13049_v9, %v9010_v10 }
 0x652   :  { %v13797_v37 = vld [vmem:[#allocation2 + $0x1a74] sm:$0xf0]  ;;  %v13129_v50 = vld [vmem:[#allocation2 + $0x59c] sm:$0xf] }
 0x653   :  { %v12240_v16 = vld [vmem:[#allocation2 + $0x1c58] sm:$0xf]  ;;  %v11985_v60 = vor.u32 %v13797_v37, %v11984_v52  ;;  %7701 = vmatpush.bf16.msrb.mxu0 %v11729_v58  ;;  %v9330_v52 = vld [vmem:[#allocation2 + $0x5b8] sm:$0xf0] }
 0x654   :  { %v13861_v32 = vld [vmem:[#allocation2 + $0x1c74] sm:$0xf0]  ;;  %v13193_v53 = vld [vmem:[#allocation2 + $0x79c] sm:$0xf] }
 0x655   :  { %v12496_v54 = vld [vmem:[#allocation2 + $0x1e58] sm:$0xf]  ;;  %v12241_v61 = vor.u32 %v13861_v32, %v12240_v16  ;;  %7714 = vmatpush.bf16.msrb.mxu1 %v11985_v60  ;;  %v9586_v37 = vld [vmem:[#allocation2 + $0x7b8] sm:$0xf0]  ;;  %v8821_v16 = vor.u32 %v13001_v39, %v8818_v34  ;;  %v9077_v32 = vor.u32 %v13065_v48, %v9074_v49 }
 0x656   :  { %v13925_v55 = vld [vmem:[#allocation2 + $0x1e74] sm:$0xf0]  ;;  %v8786_v58 = vld [vmem:[#allocation2 + $0x178] sm:$0xf0] }
 0x657   :  { %v11696_v59 = vld [vmem:[#allocation2 + $0x1818] sm:$0xf]  ;;  %v12497_v4 = vor.u32 %v13925_v55, %v12496_v54  ;;  %7727 = vmatpush.bf16.msrb.mxu2 %v12241_v61  ;;  %v9333_v54 = vor.u32 %v13129_v50, %v9330_v52  ;;  %v12993_v55 = vld [vmem:[#allocation2 + $0x15c] sm:$0xf] }
 0x658   :  { %v13725_v62 = vld [vmem:[#allocation2 + $0x1834] sm:$0xf0]  ;;  %v9042_v60 = vld [vmem:[#allocation2 + $0x378] sm:$0xf0] }
 0x659   :  { %v11952_v63 = vld [vmem:[#allocation2 + $0x1a18] sm:$0xf]  ;;  %v11697_v11 = vor.u32 %v13725_v62, %v11696_v59  ;;  %7740 = vmatpush.bf16.msrb.mxu3 %v12497_v4  ;;  %v13057_v59 = vld [vmem:[#allocation2 + $0x35c] sm:$0xf]  ;;  %v9589_v62 = vor.u32 %v13193_v53, %v9586_v37  ;;  %v8789_v4 = vor.u32 %v12993_v55, %v8786_v58  ;;  %v7522_v58 = vpop.f32.mrf.mxu2 }
 0x65a   :  { %v13789_v2 = vld [vmem:[#allocation2 + $0x1a34] sm:$0xf0]  ;;  %v13121_v61 = vld [vmem:[#allocation2 + $0x55c] sm:$0xf] }
 0x65b   :  { %v12208_v3 = vld [vmem:[#allocation2 + $0x1c18] sm:$0xf]  ;;  %v11953_v8 = vor.u32 %v13789_v2, %v11952_v63  ;;  %7702 = vmatpush.bf16.msrb.mxu0 %v11697_v11  ;;  %v9298_v63 = vld [vmem:[#allocation2 + $0x578] sm:$0xf0] }
 0x65c   :  { %v13853_v51 = vld [vmem:[#allocation2 + $0x1c34] sm:$0xf0]  ;;  %v13185_v2 = vld [vmem:[#allocation2 + $0x75c] sm:$0xf] }
 0x65d   :  { %v12464_v5 = vld [vmem:[#allocation2 + $0x1e18] sm:$0xf]  ;;  %v12209_v21 = vor.u32 %v13853_v51, %v12208_v3  ;;  %7715 = vmatpush.bf16.msrb.mxu1 %v11953_v8  ;;  %v9554_v3 = vld [vmem:[#allocation2 + $0x778] sm:$0xf0]  ;;  %v9045_v51 = vor.u32 %v13057_v59, %v9042_v60  ;;  %v7497_v8 = vadd.f32 %v7496_v12, %v14399_v47 }
 0x65e   :  { %v13917_v7 = vld [vmem:[#allocation2 + $0x1e34] sm:$0xf0]  ;;  %7703 = vmatmul.bf16.vlgmr.msrb.gmra.mxu0 %v14234_v23  ;;  %v9557_v0 = vor.u32 %v13185_v2, %v9554_v3  ;;  %v9266_v11 = vld [vmem:[#allocation2 + $0x538] sm:$0xf0] }
 0x65f   :  { %v12465_v27 = vor.u32 %v13917_v7, %v12464_v5  ;;  %7728 = vmatpush.bf16.msrb.mxu2 %v12209_v21  ;;  %7747 = vmatpush.bf16.msra.mxu0 %v8853_v36  ;;  %v9301_v5 = vor.u32 %v13121_v61, %v9298_v63  ;;  %v12985_v7 = vld [vmem:[#allocation2 + $0x11c] sm:$0xf]  ;;  %v7510_v34 = vadd.f32 %v7509_v24, %v7497_v8  ;;  %v7535_v63 = vpop.f32.mrf.mxu3 }
 0x660   :  { %7716 = vmatmul.bf16.vlgmr.msrb.gmra.mxu1 %v14238_v31  ;;  %v13177_v14 = vld [vmem:[#allocation2 + $0x71c] sm:$0xf]  ;;  %v8757_v21 = vor.u32 %v12985_v7, %v8754_v13 }
 0x661   :  { %7741 = vmatpush.bf16.msrb.mxu3 %v12465_v27  ;;  %7760 = vmatpush.bf16.msra.mxu1 %v9109_v43  ;;  %v9522_v15 = vld [vmem:[#allocation2 + $0x738] sm:$0xf0]  ;;  %v9269_v27 = vor.u32 %v13113_v6, %v9266_v11  ;;  %v7523_v61 = vadd.f32 %v7522_v58, %v7510_v34 }
 0x662   :  { %7729 = vmatmul.bf16.vlgmr.msrb.gmra.mxu2 %v14236_v28  ;;  %v12977_v36 = vld [vmem:[#allocation2 + $0xdc] sm:$0xf]  ;;  %v9525_v39 = vor.u32 %v13177_v14, %v9522_v15 }
 0x663   :  { %7773 = vmatpush.bf16.msra.mxu2 %v9365_v45  ;;  %7748 = vmatpush.bf16.msra.mxu0 %v8821_v16  ;;  %v8722_v43 = vld [vmem:[#allocation2 + $0xf8] sm:$0xf0]  ;;  %v14406_v7 = vadd.f32 %v7535_v63, %v7523_v61 }
 0x664   :  { %7742 = vmatmul.bf16.vlgmr.msrb.gmra.mxu3 %v14240_v35  ;;  %v13041_v45 = vld [vmem:[#allocation2 + $0x2dc] sm:$0xf]  ;;  %v8725_v53 = vor.u32 %v12977_v36, %v8722_v43 }
 0x665   :  { %7786 = vmatpush.bf16.msra.mxu3 %v9621_v46  ;;  %7761 = vmatpush.bf16.msra.mxu1 %v9077_v32  ;;  %v8978_v48 = vld [vmem:[#allocation2 + $0x2f8] sm:$0xf0] }
 0x666   :  { %v13105_v46 = vld [vmem:[#allocation2 + $0x4dc] sm:$0xf]  ;;  %v8981_v47 = vor.u32 %v13041_v45, %v8978_v48 }
 0x667   :  { %7774 = vmatpush.bf16.msra.mxu2 %v9333_v54  ;;  %7749 = vmatpush.bf16.msra.mxu0 %v8789_v4  ;;  %v9234_v49 = vld [vmem:[#allocation2 + $0x4f8] sm:$0xf0]  ;;  %v7498_v4 = vpop.f32.mrf.mxu0 }
 0x668   :  { %v13169_v50 = vld [vmem:[#allocation2 + $0x6dc] sm:$0xf]  ;;  %v9237_v37 = vor.u32 %v13105_v46, %v9234_v49 }
 0x669   :  { %7787 = vmatpush.bf16.msra.mxu3 %v9589_v62  ;;  %7762 = vmatpush.bf16.msra.mxu1 %v9045_v51  ;;  %v9490_v52 = vld [vmem:[#allocation2 + $0x6f8] sm:$0xf0] }
 0x66a   :  { %v12969_v16 = vld [vmem:[#allocation2 + $0x9c] sm:$0xf]  ;;  %v9493_v55 = vor.u32 %v13169_v50, %v9490_v52  ;;  %v7524_v52 = vpop.f32.mrf.mxu2 }
 0x66b   :  { %7775 = vmatpush.bf16.msra.mxu2 %v9301_v5  ;;  %7750 = vmatpush.bf16.msra.mxu0 %v8757_v21  ;;  %v8690_v32 = vld [vmem:[#allocation2 + $0xb8] sm:$0xf0]  ;;  %v7511_v5 = vpop.f32.mrf.mxu1 }
 0x66c   :  { %v13033_v54 = vld [vmem:[#allocation2 + $0x29c] sm:$0xf]  ;;  %v8693_v51 = vor.u32 %v12969_v16, %v8690_v32  ;;  %v7537_v16 = vpop.f32.mrf.mxu3 }
 0x66d   :  { %7788 = vmatpush.bf16.msra.mxu3 %v9557_v0  ;;  %7763 = vmatpush.bf16.msra.mxu1 %v9013_v26  ;;  %v8946_v59 = vld [vmem:[#allocation2 + $0x2b8] sm:$0xf0] }
 0x66e   :  { %v13097_v62 = vld [vmem:[#allocation2 + $0x49c] sm:$0xf]  ;;  %v8949_v13 = vor.u32 %v13033_v54, %v8946_v59 }
 0x66f   :  { %7776 = vmatpush.bf16.msra.mxu2 %v9269_v27  ;;  %v9202_v60 = vld [vmem:[#allocation2 + $0x4b8] sm:$0xf0]  ;;  %7751 = vmatpush.bf16.msra.mxu0 %v8725_v53 }
 0x670   :  { %v13161_v2 = vld [vmem:[#allocation2 + $0x69c] sm:$0xf]  ;;  %v9205_v9 = vor.u32 %v13097_v62, %v9202_v60 }
 0x671   :  { %7789 = vmatpush.bf16.msra.mxu3 %v9525_v39  ;;  %v9458_v3 = vld [vmem:[#allocation2 + $0x6b8] sm:$0xf0]  ;;  %7764 = vmatpush.bf16.msra.mxu1 %v8981_v47 }
 0x672   :  { %v12961_v0 = vld [vmem:[#allocation2 + $0x5c] sm:$0xf]  ;;  %v9461_v11 = vor.u32 %v13161_v2, %v9458_v3 }
 0x673   :  { %7777 = vmatpush.bf16.msra.mxu2 %v9237_v37  ;;  %v8658_v10 = vld [vmem:[#allocation2 + $0x78] sm:$0xf0]  ;;  %7752 = vmatpush.bf16.msra.mxu0 %v8693_v51 }
 0x674   :  { %v13025_v6 = vld [vmem:[#allocation2 + $0x25c] sm:$0xf]  ;;  %v8661_v24 = vor.u32 %v12961_v0, %v8658_v10 }
 0x675   :  { %7790 = vmatpush.bf16.msra.mxu3 %v9493_v55  ;;  %v8914_v12 = vld [vmem:[#allocation2 + $0x278] sm:$0xf0]  ;;  %7765 = vmatpush.bf16.msra.mxu1 %v8949_v13 }
 0x676   :  { %v13089_v14 = vld [vmem:[#allocation2 + $0x45c] sm:$0xf]  ;;  %v8917_v36 = vor.u32 %v13025_v6, %v8914_v12 }
 0x677   :  { %v9170_v15 = vld [vmem:[#allocation2 + $0x478] sm:$0xf0]  ;;  %7778 = vmatpush.bf16.msra.mxu2 %v9205_v9  ;;  %7753 = vmatpush.bf16.msra.mxu0 %v8661_v24 }
 0x678   :  { %v13153_v8 = vld [vmem:[#allocation2 + $0x65c] sm:$0xf]  ;;  %v9173_v43 = vor.u32 %v13089_v14, %v9170_v15 }
 0x679   :  { %v9426_v21 = vld [vmem:[#allocation2 + $0x678] sm:$0xf0]  ;;  %7791 = vmatpush.bf16.msra.mxu3 %v9461_v11  ;;  %7766 = vmatpush.bf16.msra.mxu1 %v8917_v36 }
 0x67a   :  { %v12953_v26 = vld [vmem:[#allocation2 + $0x1c] sm:$0xf]  ;;  %v9429_v48 = vor.u32 %v13153_v8, %v9426_v21 }
 0x67b   :  { %v8626_v27 = vld [vmem:[#allocation2 + $0x38] sm:$0xf0]  ;;  %7779 = vmatpush.bf16.msra.mxu2 %v9173_v43 }
 0x67c   :  { %v13017_v45 = vld [vmem:[#allocation2 + $0x21c] sm:$0xf]  ;;  %v8629_v32 = vor.u32 %v12953_v26, %v8626_v27 }
 0x67d   :  { %v8882_v39 = vld [vmem:[#allocation2 + $0x238] sm:$0xf0]  ;;  %7792 = vmatpush.bf16.msra.mxu3 %v9429_v48 }
 0x67e   :  { %v13081_v34 = vld [vmem:[#allocation2 + $0x41c] sm:$0xf]  ;;  %v8885_v59 = vor.u32 %v13017_v45, %v8882_v39  ;;  %7754 = vmatpush.bf16.msra.mxu0 %v8629_v32 }
 0x67f   :  { %v9138_v46 = vld [vmem:[#allocation2 + $0x438] sm:$0xf0] }
 0x680   :  { %v13145_v49 = vld [vmem:[#allocation2 + $0x61c] sm:$0xf]  ;;  %v9141_v62 = vor.u32 %v13081_v34, %v9138_v46  ;;  %7767 = vmatpush.bf16.msra.mxu1 %v8885_v59 }
 0x681   :  { %v9394_v50 = vld [vmem:[#allocation2 + $0x638] sm:$0xf0]  ;;  %7755 = vmatmul.bf16.vlgmr.msra.gmra.mxu0 %v14182_v19 }
 0x682   :  { %v13265_v53 = vld [vmem:[#allocation2 + $0x9dc] sm:$0xf]  ;;  %v9397_v63 = vor.u32 %v13145_v49, %v9394_v50  ;;  %7780 = vmatpush.bf16.msra.mxu2 %v9141_v62 }
 0x683   :  { %v9874_v47 = vld [vmem:[#allocation2 + $0x9f8] sm:$0xf0]  ;;  %7768 = vmatmul.bf16.vlgmr.msra.gmra.mxu1 %v14186_v22  ;;  %v7548_v22 = vpop.f32.mrf.mxu0 }
 0x684   :  { %v13329_v37 = vld [vmem:[#allocation2 + $0xbdc] sm:$0xf]  ;;  %v9877_v2 = vor.u32 %v13265_v53, %v9874_v47  ;;  %7793 = vmatpush.bf16.msra.mxu3 %v9397_v63  ;;  %v14412_v47 = vld [vmem:[#allocation4] sm:$0xff] }
 0x685   :  { %v10130_v54 = vld [vmem:[#allocation2 + $0xbf8] sm:$0xf0]  ;;  %7781 = vmatmul.bf16.vlgmr.msra.gmra.mxu2 %v14180_v18  ;;  %v1105_v18 = vperm.slane %v14412_v47, 6 }
 0x686   :  { %v13393_v55 = vld [vmem:[#allocation2 + $0xddc] sm:$0xf]  ;;  %v10133_v3 = vor.u32 %v13329_v37, %v10130_v54  ;;  %7799 = vmatpush.bf16.msrb.mxu0 %v9877_v2  ;;  %v7561_v2 = vpop.f32.mrf.mxu1 }
 0x687   :  { %v10386_v58 = vld [vmem:[#allocation2 + $0xdf8] sm:$0xf0]  ;;  %7794 = vmatmul.bf16.vlgmr.msra.gmra.mxu3 %v14184_v20  ;;  %v7549_v63 = vadd.f32 %v7548_v22, %v1105_v18 }
 0x688   :  { %v13457_v60 = vld [vmem:[#allocation2 + $0xfdc] sm:$0xf]  ;;  %v10389_v4 = vor.u32 %v13393_v55, %v10386_v58  ;;  %7812 = vmatpush.bf16.msrb.mxu1 %v10133_v3 }
 0x689   :  { %v10642_v61 = vld [vmem:[#allocation2 + $0xff8] sm:$0xf0] }
 0x68a   :  { %v13257_v51 = vld [vmem:[#allocation2 + $0x99c] sm:$0xf]  ;;  %v10645_v9 = vor.u32 %v13457_v60, %v10642_v61  ;;  %7825 = vmatpush.bf16.msrb.mxu2 %v10389_v4 }
 0x68b   :  { %v9842_v5 = vld [vmem:[#allocation2 + $0x9b8] sm:$0xf0] }
 0x68c   :  { %v13321_v13 = vld [vmem:[#allocation2 + $0xb9c] sm:$0xf]  ;;  %v9845_v14 = vor.u32 %v13257_v51, %v9842_v5  ;;  %7838 = vmatpush.bf16.msrb.mxu3 %v10645_v9 }
 0x68d   :  { %v10098_v0 = vld [vmem:[#allocation2 + $0xbb8] sm:$0xf0] }
 0x68e   :  { %v13385_v10 = vld [vmem:[#allocation2 + $0xd9c] sm:$0xf]  ;;  %v10101_v15 = vor.u32 %v13321_v13, %v10098_v0  ;;  %7800 = vmatpush.bf16.msrb.mxu0 %v9845_v14  ;;  %v7562_v0 = vadd.f32 %v7561_v2, %v7549_v63 }
 0x68f   :  { %v10354_v6 = vld [vmem:[#allocation2 + $0xdb8] sm:$0xf0] }
 0x690   :  { %v13449_v11 = vld [vmem:[#allocation2 + $0xf9c] sm:$0xf]  ;;  %v10357_v8 = vor.u32 %v13385_v10, %v10354_v6  ;;  %7813 = vmatpush.bf16.msrb.mxu1 %v10101_v15 }
 0x691   :  { %v10610_v12 = vld [vmem:[#allocation2 + $0xfb8] sm:$0xf0] }
 0x692   :  { %v13249_v21 = vld [vmem:[#allocation2 + $0x95c] sm:$0xf]  ;;  %v10613_v27 = vor.u32 %v13449_v11, %v10610_v12  ;;  %7826 = vmatpush.bf16.msrb.mxu2 %v10357_v8  ;;  %v7574_v8 = vpop.f32.mrf.mxu2 }
 0x693   :  { %v9810_v24 = vld [vmem:[#allocation2 + $0x978] sm:$0xf0] }
 0x694   :  { %v13313_v26 = vld [vmem:[#allocation2 + $0xb5c] sm:$0xf]  ;;  %v9813_v48 = vor.u32 %v13249_v21, %v9810_v24  ;;  %7839 = vmatpush.bf16.msrb.mxu3 %v10613_v27 }
 0x695   :  { %v10066_v36 = vld [vmem:[#allocation2 + $0xb78] sm:$0xf0] }
 0x696   :  { %v13377_v43 = vld [vmem:[#allocation2 + $0xd5c] sm:$0xf]  ;;  %v10069_v49 = vor.u32 %v13313_v26, %v10066_v36  ;;  %7801 = vmatpush.bf16.msrb.mxu0 %v9813_v48  ;;  %v7575_v36 = vadd.f32 %v7574_v8, %v7562_v0 }
 0x697   :  { %v10322_v45 = vld [vmem:[#allocation2 + $0xd78] sm:$0xf0] }
 0x698   :  { %v13441_v39 = vld [vmem:[#allocation2 + $0xf5c] sm:$0xf]  ;;  %v10325_v50 = vor.u32 %v13377_v43, %v10322_v45  ;;  %7814 = vmatpush.bf16.msrb.mxu1 %v10069_v49  ;;  %v7587_v43 = vpop.f32.mrf.mxu3 }
 0x699   :  { %v10578_v34 = vld [vmem:[#allocation2 + $0xf78] sm:$0xf0]  ;;  %v14415_v48 = vadd.f32 %v7587_v43, %v7575_v36 }
 0x69a   :  { %v13241_v46 = vld [vmem:[#allocation2 + $0x91c] sm:$0xf]  ;;  %v10581_v37 = vor.u32 %v13441_v39, %v10578_v34  ;;  %7827 = vmatpush.bf16.msrb.mxu2 %v10325_v50 }
 0x69b   :  { %v9778_v52 = vld [vmem:[#allocation2 + $0x938] sm:$0xf0] }
 0x69c   :  { %v13305_v53 = vld [vmem:[#allocation2 + $0xb1c] sm:$0xf]  ;;  %v9781_v55 = vor.u32 %v13241_v46, %v9778_v52  ;;  %7840 = vmatpush.bf16.msrb.mxu3 %v10581_v37  ;;  %v7550_v46 = vpop.f32.mrf.mxu0  ;;  %v7563_v37 = vpop.f32.mrf.mxu1 }
 0x69d   :  { %v10034_v19 = vld [vmem:[#allocation2 + $0xb38] sm:$0xf0] }
 0x69e   :  { %v13369_v16 = vld [vmem:[#allocation2 + $0xd1c] sm:$0xf]  ;;  %v10037_v58 = vor.u32 %v13305_v53, %v10034_v19  ;;  %7802 = vmatpush.bf16.msrb.mxu0 %v9781_v55 }
 0x69f   :  { %v10290_v20 = vld [vmem:[#allocation2 + $0xd38] sm:$0xf0] }
 0x6a0   :  { %v13433_v32 = vld [vmem:[#allocation2 + $0xf1c] sm:$0xf]  ;;  %v10293_v59 = vor.u32 %v13369_v16, %v10290_v20  ;;  %7815 = vmatpush.bf16.msrb.mxu1 %v10037_v58 }
 0x6a1   :  { %v10546_v54 = vld [vmem:[#allocation2 + $0xf38] sm:$0xf0] }
 0x6a2   :  { %v13233_v62 = vld [vmem:[#allocation2 + $0x8dc] sm:$0xf]  ;;  %v10549_v3 = vor.u32 %v13433_v32, %v10546_v54  ;;  %7828 = vmatpush.bf16.msrb.mxu2 %v10293_v59 }
 0x6a3   :  { %v9746_v60 = vld [vmem:[#allocation2 + $0x8f8] sm:$0xf0] }
 0x6a4   :  { %v13297_v61 = vld [vmem:[#allocation2 + $0xadc] sm:$0xf]  ;;  %v9749_v10 = vor.u32 %v13233_v62, %v9746_v60  ;;  %7841 = vmatpush.bf16.msrb.mxu3 %v10549_v3  ;;  %v7576_v3 = vpop.f32.mrf.mxu2 }
 0x6a5   :  { %v10002_v4 = vld [vmem:[#allocation2 + $0xaf8] sm:$0xf0] }
 0x6a6   :  { %v13361_v51 = vld [vmem:[#allocation2 + $0xcdc] sm:$0xf]  ;;  %v10005_v6 = vor.u32 %v13297_v61, %v10002_v4  ;;  %7803 = vmatpush.bf16.msrb.mxu0 %v9749_v10 }
 0x6a7   :  { %v10258_v5 = vld [vmem:[#allocation2 + $0xcf8] sm:$0xf0] }
 0x6a8   :  { %v13425_v13 = vld [vmem:[#allocation2 + $0xedc] sm:$0xf]  ;;  %v10261_v11 = vor.u32 %v13361_v51, %v10258_v5  ;;  %7816 = vmatpush.bf16.msrb.mxu1 %v10005_v6 }
 0x6a9   :  { %v10514_v9 = vld [vmem:[#allocation2 + $0xef8] sm:$0xf0] }
 0x6aa   :  { %v13225_v12 = vld [vmem:[#allocation2 + $0x89c] sm:$0xf]  ;;  %v10517_v21 = vor.u32 %v13425_v13, %v10514_v9  ;;  %7829 = vmatpush.bf16.msrb.mxu2 %v10261_v11  ;;  %v7589_v9 = vpop.f32.mrf.mxu3 }
 0x6ab   :  { %v9714_v14 = vld [vmem:[#allocation2 + $0x8b8] sm:$0xf0] }
 0x6ac   :  { %v13289_v15 = vld [vmem:[#allocation2 + $0xa9c] sm:$0xf]  ;;  %v9717_v34 = vor.u32 %v13225_v12, %v9714_v14  ;;  %7842 = vmatpush.bf16.msrb.mxu3 %v10517_v21 }
 0x6ad   :  { %v9970_v24 = vld [vmem:[#allocation2 + $0xab8] sm:$0xf0] }
 0x6ae   :  { %v13353_v26 = vld [vmem:[#allocation2 + $0xc9c] sm:$0xf]  ;;  %v9973_v49 = vor.u32 %v13289_v15, %v9970_v24  ;;  %7804 = vmatpush.bf16.msrb.mxu0 %v9717_v34 }
 0x6af   :  { %v10226_v27 = vld [vmem:[#allocation2 + $0xcb8] sm:$0xf0] }
 0x6b0   :  { %v13417_v45 = vld [vmem:[#allocation2 + $0xe9c] sm:$0xf]  ;;  %v10229_v50 = vor.u32 %v13353_v26, %v10226_v27  ;;  %7817 = vmatpush.bf16.msrb.mxu1 %v9973_v49 }
 0x6b1   :  { %v10482_v39 = vld [vmem:[#allocation2 + $0xeb8] sm:$0xf0] }
 0x6b2   :  { %v13217_v52 = vld [vmem:[#allocation2 + $0x85c] sm:$0xf]  ;;  %v10485_v19 = vor.u32 %v13417_v45, %v10482_v39  ;;  %7830 = vmatpush.bf16.msrb.mxu2 %v10229_v50 }
 0x6b3   :  { %v9682_v53 = vld [vmem:[#allocation2 + $0x878] sm:$0xf0] }
 0x6b4   :  { %v13281_v18 = vld [vmem:[#allocation2 + $0xa5c] sm:$0xf]  ;;  %v9685_v22 = vor.u32 %v13217_v52, %v9682_v53  ;;  %7843 = vmatpush.bf16.msrb.mxu3 %v10485_v19 }
 0x6b5   :  { %v9938_v16 = vld [vmem:[#allocation2 + $0xa78] sm:$0xf0] }
 0x6b6   :  { %v13345_v20 = vld [vmem:[#allocation2 + $0xc5c] sm:$0xf]  ;;  %v9941_v62 = vor.u32 %v13281_v18, %v9938_v16  ;;  %7805 = vmatpush.bf16.msrb.mxu0 %v9685_v22 }
 0x6b7   :  { %v10194_v32 = vld [vmem:[#allocation2 + $0xc78] sm:$0xf0] }
 0x6b8   :  { %v13409_v54 = vld [vmem:[#allocation2 + $0xe5c] sm:$0xf]  ;;  %v10197_v60 = vor.u32 %v13345_v20, %v10194_v32  ;;  %7818 = vmatpush.bf16.msrb.mxu1 %v9941_v62 }
 0x6b9   :  { %v10450_v55 = vld [vmem:[#allocation2 + $0xe78] sm:$0xf0] }
 0x6ba   :  { %v13209_v58 = vld [vmem:[#allocation2 + $0x81c] sm:$0xf]  ;;  %v10453_v4 = vor.u32 %v13409_v54, %v10450_v55  ;;  %7831 = vmatpush.bf16.msrb.mxu2 %v10197_v60 }
 0x6bb   :  { %v9650_v59 = vld [vmem:[#allocation2 + $0x838] sm:$0xf0] }
 0x6bc   :  { %v13273_v61 = vld [vmem:[#allocation2 + $0xa1c] sm:$0xf]  ;;  %v9653_v11 = vor.u32 %v13209_v58, %v9650_v59  ;;  %7844 = vmatpush.bf16.msrb.mxu3 %v10453_v4 }
 0x6bd   :  { %v9906_v63 = vld [vmem:[#allocation2 + $0xa38] sm:$0xf0] }
 0x6be   :  { %v13337_v2 = vld [vmem:[#allocation2 + $0xc1c] sm:$0xf]  ;;  %v9909_v8 = vor.u32 %v13273_v61, %v9906_v63  ;;  %7806 = vmatpush.bf16.msrb.mxu0 %v9653_v11 }
 0x6bf   :  { %v10162_v51 = vld [vmem:[#allocation2 + $0xc38] sm:$0xf0] }
 0x6c0   :  { %v13401_v5 = vld [vmem:[#allocation2 + $0xe1c] sm:$0xf]  ;;  %v10165_v21 = vor.u32 %v13337_v2, %v10162_v51  ;;  %7819 = vmatpush.bf16.msrb.mxu1 %v9909_v8 }
 0x6c1   :  { %v10418_v13 = vld [vmem:[#allocation2 + $0xe38] sm:$0xf0]  ;;  %7807 = vmatmul.bf16.vlgmr.msrb.gmra.mxu0 %v14200_v41 }
 0x6c2   :  { %v13521_v0 = vld [vmem:[#allocation2 + $0x11dc] sm:$0xf]  ;;  %v10421_v27 = vor.u32 %v13401_v5, %v10418_v13  ;;  %7832 = vmatpush.bf16.msrb.mxu2 %v10165_v21  ;;  %v7613_v21 = vpop.f32.mrf.mxu1 }
 0x6c3   :  { %v10898_v10 = vld [vmem:[#allocation2 + $0x11f8] sm:$0xf0]  ;;  %7820 = vmatmul.bf16.vlgmr.msrb.gmra.mxu1 %v14204_v44 }
 0x6c4   :  { %v13585_v6 = vld [vmem:[#allocation2 + $0x13dc] sm:$0xf]  ;;  %v10901_v36 = vor.u32 %v13521_v0, %v10898_v10  ;;  %7845 = vmatpush.bf16.msrb.mxu3 %v10421_v27 }
 0x6c5   :  { %v11154_v12 = vld [vmem:[#allocation2 + $0x13f8] sm:$0xf0]  ;;  %7833 = vmatmul.bf16.vlgmr.msrb.gmra.mxu2 %v14198_v38 }
 0x6c6   :  { %v13649_v14 = vld [vmem:[#allocation2 + $0x15dc] sm:$0xf]  ;;  %v11157_v43 = vor.u32 %v13585_v6, %v11154_v12  ;;  %7851 = vmatpush.bf16.msra.mxu0 %v10901_v36  ;;  %v7600_v6 = vpop.f32.mrf.mxu0 }
 0x6c7   :  { %v11410_v15 = vld [vmem:[#allocation2 + $0x15f8] sm:$0xf0]  ;;  %7846 = vmatmul.bf16.vlgmr.msrb.gmra.mxu3 %v14202_v42  ;;  %v7601_v8 = vadd.f32 %v7600_v6, %v14415_v48 }
 0x6c8   :  { %v13713_v24 = vld [vmem:[#allocation2 + $0x17dc] sm:$0xf]  ;;  %v11413_v45 = vor.u32 %v13649_v14, %v11410_v15  ;;  %7864 = vmatpush.bf16.msra.mxu1 %v11157_v43 }
 0x6c9   :  { %v11666_v26 = vld [vmem:[#allocation2 + $0x17f8] sm:$0xf0] }
 0x6ca   :  { %v13513_v39 = vld [vmem:[#allocation2 + $0x119c] sm:$0xf]  ;;  %v11669_v49 = vor.u32 %v13713_v24, %v11666_v26  ;;  %7877 = vmatpush.bf16.msra.mxu2 %v11413_v45 }
 0x6cb   :  { %v10866_v34 = vld [vmem:[#allocation2 + $0x11b8] sm:$0xf0] }
 0x6cc   :  { %v13577_v46 = vld [vmem:[#allocation2 + $0x139c] sm:$0xf]  ;;  %v10869_v19 = vor.u32 %v13513_v39, %v10866_v34  ;;  %7890 = vmatpush.bf16.msra.mxu3 %v11669_v49  ;;  %v7614_v39 = vadd.f32 %v7613_v21, %v7601_v8 }
 0x6cd   :  { %v11122_v50 = vld [vmem:[#allocation2 + $0x13b8] sm:$0xf0] }
 0x6ce   :  { %v13641_v52 = vld [vmem:[#allocation2 + $0x159c] sm:$0xf]  ;;  %v11125_v16 = vor.u32 %v13577_v46, %v11122_v50  ;;  %7852 = vmatpush.bf16.msra.mxu0 %v10869_v19 }
 0x6cf   :  { %v11378_v53 = vld [vmem:[#allocation2 + $0x15b8] sm:$0xf0] }
 0x6d0   :  { %v13705_v18 = vld [vmem:[#allocation2 + $0x179c] sm:$0xf]  ;;  %v11381_v20 = vor.u32 %v13641_v52, %v11378_v53  ;;  %7865 = vmatpush.bf16.msra.mxu1 %v11125_v16 }
 0x6d1   :  { %v11634_v37 = vld [vmem:[#allocation2 + $0x17b8] sm:$0xf0] }
 0x6d2   :  { %v13505_v32 = vld [vmem:[#allocation2 + $0x115c] sm:$0xf]  ;;  %v11637_v22 = vor.u32 %v13705_v18, %v11634_v37  ;;  %7878 = vmatpush.bf16.msra.mxu2 %v11381_v20  ;;  %v7626_v18 = vpop.f32.mrf.mxu2 }
 0x6d3   :  { %v10834_v54 = vld [vmem:[#allocation2 + $0x1178] sm:$0xf0]  ;;  %v7627_v20 = vadd.f32 %v7626_v18, %v7614_v39 }
 0x6d4   :  { %v13569_v55 = vld [vmem:[#allocation2 + $0x135c] sm:$0xf]  ;;  %v10837_v63 = vor.u32 %v13505_v32, %v10834_v54  ;;  %7891 = vmatpush.bf16.msra.mxu3 %v11637_v22  ;;  %v7639_v32 = vpop.f32.mrf.mxu3 }
 0x6d5   :  { %v11090_v58 = vld [vmem:[#allocation2 + $0x1378] sm:$0xf0] }
 0x6d6   :  { %v13633_v59 = vld [vmem:[#allocation2 + $0x155c] sm:$0xf]  ;;  %v11093_v2 = vor.u32 %v13569_v55, %v11090_v58  ;;  %7853 = vmatpush.bf16.msra.mxu0 %v10837_v63  ;;  %v14422_v58 = vadd.f32 %v7639_v32, %v7627_v20 }
 0x6d7   :  { %v11346_v62 = vld [vmem:[#allocation2 + $0x1578] sm:$0xf0] }
 0x6d8   :  { %v13697_v60 = vld [vmem:[#allocation2 + $0x175c] sm:$0xf]  ;;  %v11349_v3 = vor.u32 %v13633_v59, %v11346_v62  ;;  %7866 = vmatpush.bf16.msra.mxu1 %v11093_v2  ;;  %v7602_v59 = vpop.f32.mrf.mxu0 }
 0x6d9   :  { %v11602_v61 = vld [vmem:[#allocation2 + $0x1778] sm:$0xf0] }
 0x6da   :  { %v13497_v4 = vld [vmem:[#allocation2 + $0x111c] sm:$0xf]  ;;  %v11605_v5 = vor.u32 %v13697_v60, %v11602_v61  ;;  %7879 = vmatpush.bf16.msra.mxu2 %v11349_v3  ;;  %v7615_v3 = vpop.f32.mrf.mxu1 }
 0x6db   :  { %v10802_v51 = vld [vmem:[#allocation2 + $0x1138] sm:$0xf0] }
 0x6dc   :  { %v13561_v38 = vld [vmem:[#allocation2 + $0x131c] sm:$0xf]  ;;  %v10805_v42 = vor.u32 %v13497_v4, %v10802_v51  ;;  %7892 = vmatpush.bf16.msra.mxu3 %v11605_v5 }
 0x6dd   :  { %v11058_v13 = vld [vmem:[#allocation2 + $0x1338] sm:$0xf0] }
 0x6de   :  { %v13625_v9 = vld [vmem:[#allocation2 + $0x151c] sm:$0xf]  ;;  %v11061_v44 = vor.u32 %v13561_v38, %v11058_v13  ;;  %7854 = vmatpush.bf16.msra.mxu0 %v10805_v42 }
 0x6df   :  { %v11314_v0 = vld [vmem:[#allocation2 + $0x1538] sm:$0xf0] }
 0x6e0   :  { %v13689_v10 = vld [vmem:[#allocation2 + $0x171c] sm:$0xf]  ;;  %v11317_v11 = vor.u32 %v13625_v9, %v11314_v0  ;;  %7867 = vmatpush.bf16.msra.mxu1 %v11061_v44 }
 0x6e1   :  { %v11570_v41 = vld [vmem:[#allocation2 + $0x1738] sm:$0xf0] }
 0x6e2   :  { %v13489_v12 = vld [vmem:[#allocation2 + $0x10dc] sm:$0xf]  ;;  %v11573_v24 = vor.u32 %v13689_v10, %v11570_v41  ;;  %7880 = vmatpush.bf16.msra.mxu2 %v11317_v11 }
 0x6e3   :  { %v10770_v14 = vld [vmem:[#allocation2 + $0x10f8] sm:$0xf0] }
 0x6e4   :  { %v13553_v15 = vld [vmem:[#allocation2 + $0x12dc] sm:$0xf]  ;;  %v10773_v34 = vor.u32 %v13489_v12, %v10770_v14  ;;  %7893 = vmatpush.bf16.msra.mxu3 %v11573_v24  ;;  %v7628_v14 = vpop.f32.mrf.mxu2 }
 0x6e5   :  { %v11026_v26 = vld [vmem:[#allocation2 + $0x12f8] sm:$0xf0] }
 0x6e6   :  { %v13617_v27 = vld [vmem:[#allocation2 + $0x14dc] sm:$0xf]  ;;  %v11029_v46 = vor.u32 %v13553_v15, %v11026_v26  ;;  %7855 = vmatpush.bf16.msra.mxu0 %v10773_v34  ;;  %v7641_v26 = vpop.f32.mrf.mxu3 }
 0x6e7   :  { %v11282_v36 = vld [vmem:[#allocation2 + $0x14f8] sm:$0xf0]  ;;  %v7665_v26 = vpop.f32.mrf.mxu1 }
 0x6e8   :  { %v13681_v43 = vld [vmem:[#allocation2 + $0x16dc] sm:$0xf]  ;;  %v11285_v49 = vor.u32 %v13617_v27, %v11282_v36  ;;  %7868 = vmatpush.bf16.msra.mxu1 %v11029_v46 }
 0x6e9   :  { %v11538_v45 = vld [vmem:[#allocation2 + $0x16f8] sm:$0xf0] }
 0x6ea   :  { %v13481_v50 = vld [vmem:[#allocation2 + $0x109c] sm:$0xf]  ;;  %v11541_v48 = vor.u32 %v13681_v43, %v11538_v45  ;;  %7881 = vmatpush.bf16.msra.mxu2 %v11285_v49 }
 0x6eb   :  { %v10738_v52 = vld [vmem:[#allocation2 + $0x10b8] sm:$0xf0] }
 0x6ec   :  { %v13545_v53 = vld [vmem:[#allocation2 + $0x129c] sm:$0xf]  ;;  %v10741_v22 = vor.u32 %v13481_v50, %v10738_v52  ;;  %7894 = vmatpush.bf16.msra.mxu3 %v11541_v48 }
 0x6ed   :  { %v10994_v37 = vld [vmem:[#allocation2 + $0x12b8] sm:$0xf0] }
 0x6ee   :  { %v13609_v19 = vld [vmem:[#allocation2 + $0x149c] sm:$0xf]  ;;  %v10997_v62 = vor.u32 %v13545_v53, %v10994_v37  ;;  %7856 = vmatpush.bf16.msra.mxu0 %v10741_v22 }
 0x6ef   :  { %v11250_v16 = vld [vmem:[#allocation2 + $0x14b8] sm:$0xf0] }
 0x6f0   :  { %v13673_v54 = vld [vmem:[#allocation2 + $0x169c] sm:$0xf]  ;;  %v11253_v60 = vor.u32 %v13609_v19, %v11250_v16  ;;  %7869 = vmatpush.bf16.msra.mxu1 %v10997_v62 }
 0x6f1   :  { %v11506_v55 = vld [vmem:[#allocation2 + $0x16b8] sm:$0xf0] }
 0x6f2   :  { %v13473_v61 = vld [vmem:[#allocation2 + $0x105c] sm:$0xf]  ;;  %v11509_v4 = vor.u32 %v13673_v54, %v11506_v55  ;;  %7882 = vmatpush.bf16.msra.mxu2 %v11253_v60 }
 0x6f3   :  { %v10706_v63 = vld [vmem:[#allocation2 + $0x1078] sm:$0xf0] }
 0x6f4   :  { %v13537_v2 = vld [vmem:[#allocation2 + $0x125c] sm:$0xf]  ;;  %v10709_v0 = vor.u32 %v13473_v61, %v10706_v63  ;;  %7895 = vmatpush.bf16.msra.mxu3 %v11509_v4 }
 0x6f5   :  { %v10962_v51 = vld [vmem:[#allocation2 + $0x1278] sm:$0xf0] }
 0x6f6   :  { %v13601_v38 = vld [vmem:[#allocation2 + $0x145c] sm:$0xf]  ;;  %v10965_v42 = vor.u32 %v13537_v2, %v10962_v51  ;;  %7857 = vmatpush.bf16.msra.mxu0 %v10709_v0 }
 0x6f7   :  { %v11218_v5 = vld [vmem:[#allocation2 + $0x1478] sm:$0xf0] }
 0x6f8   :  { %v13665_v13 = vld [vmem:[#allocation2 + $0x165c] sm:$0xf]  ;;  %v11221_v6 = vor.u32 %v13601_v38, %v11218_v5  ;;  %7870 = vmatpush.bf16.msra.mxu1 %v10965_v42 }
 0x6f9   :  { %v11474_v9 = vld [vmem:[#allocation2 + $0x1678] sm:$0xf0] }
 0x6fa   :  { %v13465_v10 = vld [vmem:[#allocation2 + $0x101c] sm:$0xf]  ;;  %v11477_v15 = vor.u32 %v13665_v13, %v11474_v9  ;;  %7883 = vmatpush.bf16.msra.mxu2 %v11221_v6 }
 0x6fb   :  { %v10674_v41 = vld [vmem:[#allocation2 + $0x1038] sm:$0xf0] }
 0x6fc   :  { %v13529_v44 = vld [vmem:[#allocation2 + $0x121c] sm:$0xf]  ;;  %v10677_v45 = vor.u32 %v13465_v10, %v10674_v41  ;;  %7896 = vmatpush.bf16.msra.mxu3 %v11477_v15 }
 0x6fd   :  { %v10930_v11 = vld [vmem:[#allocation2 + $0x1238] sm:$0xf0] }
 0x6fe   :  { %v13593_v12 = vld [vmem:[#allocation2 + $0x141c] sm:$0xf]  ;;  %v10933_v49 = vor.u32 %v13529_v44, %v10930_v11  ;;  %7858 = vmatpush.bf16.msra.mxu0 %v10677_v45 }
 0x6ff   :  { %v11186_v8 = vld [vmem:[#allocation2 + $0x1438] sm:$0xf0] }
 0x700   :  { %v13657_v21 = vld [vmem:[#allocation2 + $0x161c] sm:$0xf]  ;;  %v11189_v50 = vor.u32 %v13593_v12, %v11186_v8  ;;  %7871 = vmatpush.bf16.msra.mxu1 %v10933_v49  ;;  %v7652_v8 = vpop.f32.mrf.mxu0 }
 0x701   :  { %v11442_v24 = vld [vmem:[#allocation2 + $0x1638] sm:$0xf0]  ;;  %7859 = vmatmul.bf16.vlgmr.msra.gmra.mxu0 %v14216_v25 }
 0x702   :  { %v13777_v27 = vld [vmem:[#allocation2 + $0x19dc] sm:$0xf]  ;;  %v11445_v18 = vor.u32 %v13657_v21, %v11442_v24  ;;  %7884 = vmatpush.bf16.msra.mxu2 %v11189_v50 }
 0x703   :  { %v11922_v36 = vld [vmem:[#allocation2 + $0x19f8] sm:$0xf0]  ;;  %7872 = vmatmul.bf16.vlgmr.msra.gmra.mxu1 %v14220_v30 }
 0x704   :  { %v13841_v43 = vld [vmem:[#allocation2 + $0x1bdc] sm:$0xf]  ;;  %v11925_v48 = vor.u32 %v13777_v27, %v11922_v36  ;;  %7897 = vmatpush.bf16.msra.mxu3 %v11445_v18 }
 0x705   :  { %v12178_v39 = vld [vmem:[#allocation2 + $0x1bf8] sm:$0xf0]  ;;  %7885 = vmatmul.bf16.vlgmr.msra.gmra.mxu2 %v14218_v29 }
 0x706   :  { %v13905_v34 = vld [vmem:[#allocation2 + $0x1ddc] sm:$0xf]  ;;  %v12181_v37 = vor.u32 %v13841_v43, %v12178_v39  ;;  %7903 = vmatpush.bf16.msrb.mxu0 %v11925_v48 }
 0x707   :  { %v12434_v46 = vld [vmem:[#allocation2 + $0x1df8] sm:$0xf0]  ;;  %7898 = vmatmul.bf16.vlgmr.msra.gmra.mxu3 %v14222_v33  ;;  %v7653_v33 = vadd.f32 %v7652_v8, %v14422_v58 }
 0x708   :  { %v13969_v52 = vld [vmem:[#allocation2 + $0x1fdc] sm:$0xf]  ;;  %v12437_v19 = vor.u32 %v13905_v34, %v12434_v46  ;;  %7916 = vmatpush.bf16.msrb.mxu1 %v12181_v37 }
 0x709   :  { %v12690_v53 = vld [vmem:[#allocation2 + $0x1ff8] sm:$0xf0]  ;;  %v14429_v46 = vadd.f32 %v7665_v26, %v7653_v33 }
 0x70a   :  { %v13769_v16 = vld [vmem:[#allocation2 + $0x199c] sm:$0xf]  ;;  %v12693_v54 = vor.u32 %v13969_v52, %v12690_v53  ;;  %7929 = vmatpush.bf16.msrb.mxu2 %v12437_v19 }
 0x70b   :  { %v11890_v20 = vld [vmem:[#allocation2 + $0x19b8] sm:$0xf0] }
 0x70c   :  { %v13833_v32 = vld [vmem:[#allocation2 + $0x1b9c] sm:$0xf]  ;;  %v11893_v61 = vor.u32 %v13769_v16, %v11890_v20  ;;  %7942 = vmatpush.bf16.msrb.mxu3 %v12693_v54  ;;  %v14431_v54 = vpop.f32.mrf.mxu2 }
 0x70d   :  { %v12146_v55 = vld [vmem:[#allocation2 + $0x1bb8] sm:$0xf0] }
 0x70e   :  { %v13897_v22 = vld [vmem:[#allocation2 + $0x1d9c] sm:$0xf]  ;;  %v12149_v63 = vor.u32 %v13833_v32, %v12146_v55  ;;  %7904 = vmatpush.bf16.msrb.mxu0 %v11893_v61 }
 0x70f   :  { %v12402_v59 = vld [vmem:[#allocation2 + $0x1db8] sm:$0xf0] }
 0x710   :  { %v13961_v62 = vld [vmem:[#allocation2 + $0x1f9c] sm:$0xf]  ;;  %v12405_v2 = vor.u32 %v13897_v22, %v12402_v59  ;;  %7917 = vmatpush.bf16.msrb.mxu1 %v12149_v63  ;;  %v7654_v63 = vpop.f32.mrf.mxu0 }
 0x711   :  { %v12658_v60 = vld [vmem:[#allocation2 + $0x1fb8] sm:$0xf0] }
 0x712   :  { %v13761_v3 = vld [vmem:[#allocation2 + $0x195c] sm:$0xf]  ;;  %v12661_v38 = vor.u32 %v13961_v62, %v12658_v60  ;;  %7930 = vmatpush.bf16.msrb.mxu2 %v12405_v2  ;;  %v14433_v62 = vpop.f32.mrf.mxu3 }
 0x713   :  { %v11858_v4 = vld [vmem:[#allocation2 + $0x1978] sm:$0xf0] }
 0x714   :  { %v13825_v51 = vld [vmem:[#allocation2 + $0x1b5c] sm:$0xf]  ;;  %v11861_v41 = vor.u32 %v13761_v3, %v11858_v4  ;;  %7943 = vmatpush.bf16.msrb.mxu3 %v12661_v38  ;;  %v7667_v3 = vpop.f32.mrf.mxu1  ;;  %v7680_v33 = vpop.f32.mrf.mxu2 }
 0x715   :  { %v12114_v5 = vld [vmem:[#allocation2 + $0x1b78] sm:$0xf0]  ;;  %v14029_v33 = vld [vmem:[#allocation6 + $0x1b8] sm:$0xff] }
 0x716   :  { %v13889_v13 = vld [vmem:[#allocation2 + $0x1d5c] sm:$0xf]  ;;  %v12117_v42 = vor.u32 %v13825_v51, %v12114_v5  ;;  %7905 = vmatpush.bf16.msrb.mxu0 %v11861_v41 }
 0x717   :  { %v12370_v9 = vld [vmem:[#allocation2 + $0x1d78] sm:$0xf0] }
 0x718   :  { %v13953_v0 = vld [vmem:[#allocation2 + $0x1f5c] sm:$0xf]  ;;  %v12373_v6 = vor.u32 %v13889_v13, %v12370_v9  ;;  %7918 = vmatpush.bf16.msrb.mxu1 %v12117_v42 }
 0x719   :  { %v12626_v10 = vld [vmem:[#allocation2 + $0x1f78] sm:$0xf0] }
 0x71a   :  { %v13753_v44 = vld [vmem:[#allocation2 + $0x191c] sm:$0xf]  ;;  %v12629_v12 = vor.u32 %v13953_v0, %v12626_v10  ;;  %7931 = vmatpush.bf16.msrb.mxu2 %v12373_v6 }
 0x71b   :  { %v11826_v25 = vld [vmem:[#allocation2 + $0x1938] sm:$0xf0] }
 0x71c   :  { %v13817_v11 = vld [vmem:[#allocation2 + $0x1b1c] sm:$0xf]  ;;  %v11829_v24 = vor.u32 %v13753_v44, %v11826_v25  ;;  %7944 = vmatpush.bf16.msrb.mxu3 %v12629_v12  ;;  %v14443_v63 = vpop.f32.mrf.mxu2 }
 0x71d   :  { %v12082_v14 = vld [vmem:[#allocation2 + $0x1b38] sm:$0xf0] }
 0x71e   :  { %v13881_v15 = vld [vmem:[#allocation2 + $0x1d1c] sm:$0xf]  ;;  %v12085_v27 = vor.u32 %v13817_v11, %v12082_v14  ;;  %7906 = vmatpush.bf16.msrb.mxu0 %v11829_v24 }
 0x71f   :  { %v12338_v29 = vld [vmem:[#allocation2 + $0x1d38] sm:$0xf0] }
 0x720   :  { %v13945_v30 = vld [vmem:[#allocation2 + $0x1f1c] sm:$0xf]  ;;  %v12341_v36 = vor.u32 %v13881_v15, %v12338_v29  ;;  %7919 = vmatpush.bf16.msrb.mxu1 %v12085_v27  ;;  %v7693_v27 = vpop.f32.mrf.mxu3 }
 0x721   :  { %v12594_v21 = vld [vmem:[#allocation2 + $0x1f38] sm:$0xf0] }
 0x722   :  { %v13745_v43 = vld [vmem:[#allocation2 + $0x18dc] sm:$0xf]  ;;  %v12597_v34 = vor.u32 %v13945_v30, %v12594_v21  ;;  %7932 = vmatpush.bf16.msrb.mxu2 %v12341_v36 }
 0x723   :  { %v11794_v45 = vld [vmem:[#allocation2 + $0x18f8] sm:$0xf0] }
 0x724   :  { %v13809_v39 = vld [vmem:[#allocation2 + $0x1adc] sm:$0xf]  ;;  %v11797_v58 = vor.u32 %v13745_v43, %v11794_v45  ;;  %7945 = vmatpush.bf16.msrb.mxu3 %v12597_v34  ;;  %v13981_v34 = vld [vmem:[#allocation6 + $0x38] sm:$0xff] }
 0x725   :  { %v12050_v49 = vld [vmem:[#allocation2 + $0x1af8] sm:$0xf0] }
 0x726   :  { %v13873_v50 = vld [vmem:[#allocation2 + $0x1cdc] sm:$0xf]  ;;  %v12053_v48 = vor.u32 %v13809_v39, %v12050_v49  ;;  %7907 = vmatpush.bf16.msrb.mxu0 %v11797_v58  ;;  %v13989_v49 = vld [vmem:[#allocation6 + $0x78] sm:$0xff] }
 0x727   :  { %v12306_v52 = vld [vmem:[#allocation2 + $0x1cf8] sm:$0xf0] }
 0x728   :  { %v13937_v53 = vld [vmem:[#allocation2 + $0x1edc] sm:$0xf]  ;;  %v12309_v37 = vor.u32 %v13873_v50, %v12306_v52  ;;  %7920 = vmatpush.bf16.msrb.mxu1 %v12053_v48  ;;  %v13997_v50 = vld [vmem:[#allocation6 + $0xb8] sm:$0xff] }
 0x729   :  { %v12562_v18 = vld [vmem:[#allocation2 + $0x1ef8] sm:$0xf0]  ;;  %v14005_v52 = vld [vmem:[#allocation6 + $0xf8] sm:$0xff] }
 0x72a   :  { %v13737_v19 = vld [vmem:[#allocation2 + $0x189c] sm:$0xf]  ;;  %v12565_v32 = vor.u32 %v13937_v53, %v12562_v18  ;;  %7933 = vmatpush.bf16.msrb.mxu2 %v12309_v37  ;;  %v13979_v37 = vld [vmem:[#allocation6 + $0x28] sm:$0xff] }
 0x72b   :  { %v11762_v16 = vld [vmem:[#allocation2 + $0x18b8] sm:$0xf0] }
 0x72c   :  { %v13801_v20 = vld [vmem:[#allocation2 + $0x1a9c] sm:$0xf]  ;;  %v11765_v2 = vor.u32 %v13737_v19, %v11762_v16  ;;  %7946 = vmatpush.bf16.msrb.mxu3 %v12565_v32  ;;  %v13987_v19 = vld [vmem:[#allocation6 + $0x68] sm:$0xff]  ;;  %v14439_v32 = vpop.f32.mrf.mxu0 }
 0x72d   :  { %v12018_v55 = vld [vmem:[#allocation2 + $0x1ab8] sm:$0xf0]  ;;  %v13995_v16 = vld [vmem:[#allocation6 + $0xa8] sm:$0xff] }
 0x72e   :  { %v13865_v22 = vld [vmem:[#allocation2 + $0x1c9c] sm:$0xf]  ;;  %v12021_v4 = vor.u32 %v13801_v20, %v12018_v55  ;;  %7908 = vmatpush.bf16.msrb.mxu0 %v11765_v2  ;;  %v14003_v20 = vld [vmem:[#allocation6 + $0xe8] sm:$0xff]  ;;  %v13978_v55 = vld [vmem:[#allocation6 + $0x20] sm:$0xff]  ;;  %v14445_v2 = vpop.f32.mrf.mxu3 }
 0x72f   :  { %v12274_v59 = vld [vmem:[#allocation2 + $0x1cb8] sm:$0xf0] }
 0x730   :  { %v13929_v60 = vld [vmem:[#allocation2 + $0x1e9c] sm:$0xf]  ;;  %v12277_v51 = vor.u32 %v13865_v22, %v12274_v59  ;;  %7921 = vmatpush.bf16.msrb.mxu1 %v12021_v4  ;;  %v13977_v22 = vld [vmem:[#allocation6 + $0x18] sm:$0xff] }
 0x731   :  { %v12530_v61 = vld [vmem:[#allocation2 + $0x1eb8] sm:$0xf0]  ;;  %v13985_v59 = vld [vmem:[#allocation6 + $0x58] sm:$0xff] }
 0x732   :  { %v13729_v38 = vld [vmem:[#allocation2 + $0x185c] sm:$0xf]  ;;  %v12533_v9 = vor.u32 %v13929_v60, %v12530_v61  ;;  %7934 = vmatpush.bf16.msrb.mxu2 %v12277_v51  ;;  %v13993_v60 = vld [vmem:[#allocation6 + $0x98] sm:$0xff] }
 0x733   :  { %v11730_v5 = vld [vmem:[#allocation2 + $0x1878] sm:$0xf0]  ;;  %v14001_v61 = vld [vmem:[#allocation6 + $0xd8] sm:$0xff] }
 0x734   :  { %v13793_v13 = vld [vmem:[#allocation2 + $0x1a5c] sm:$0xf]  ;;  %v11733_v44 = vor.u32 %v13729_v38, %v11730_v5  ;;  %7947 = vmatpush.bf16.msrb.mxu3 %v12533_v9  ;;  %v7706_v3 = vpop.f32.mrf.mxu0  ;;  %v13975_v9 = vld [vmem:[#allocation6 + $0x8] sm:$0xff] }
 0x735   :  { %v11986_v0 = vld [vmem:[#allocation2 + $0x1a78] sm:$0xf0]  ;;  %v14015_v3 = vld [vmem:[#allocation6 + $0x148] sm:$0xff] }
 0x736   :  { %v13857_v10 = vld [vmem:[#allocation2 + $0x1c5c] sm:$0xf]  ;;  %v11989_v25 = vor.u32 %v13793_v13, %v11986_v0  ;;  %7909 = vmatpush.bf16.msrb.mxu0 %v11733_v44  ;;  %v13983_v0 = vld [vmem:[#allocation6 + $0x48] sm:$0xff]  ;;  %v13974_v44 = vld [vmem:[#allocation6] sm:$0xff] }
 0x737   :  { %v12242_v41 = vld [vmem:[#allocation2 + $0x1c78] sm:$0xf0] }
 0x738   :  { %v13921_v42 = vld [vmem:[#allocation2 + $0x1e5c] sm:$0xf]  ;;  %v12245_v11 = vor.u32 %v13857_v10, %v12242_v41  ;;  %7922 = vmatpush.bf16.msrb.mxu1 %v11989_v25  ;;  %v13991_v10 = vld [vmem:[#allocation6 + $0x88] sm:$0xff]  ;;  %v13982_v25 = vld [vmem:[#allocation6 + $0x40] sm:$0xff] }
 0x739   :  { %v12498_v6 = vld [vmem:[#allocation2 + $0x1e78] sm:$0xf0]  ;;  %v13999_v41 = vld [vmem:[#allocation6 + $0xc8] sm:$0xff] }
 0x73a   :  { %v13721_v12 = vld [vmem:[#allocation2 + $0x181c] sm:$0xf]  ;;  %v12501_v29 = vor.u32 %v13921_v42, %v12498_v6  ;;  %7935 = vmatpush.bf16.msrb.mxu2 %v12245_v11  ;;  %v7732_v42 = vpop.f32.mrf.mxu2  ;;  %v7745_v6 = vpop.f32.mrf.mxu3  ;;  %v13990_v11 = vld [vmem:[#allocation6 + $0x80] sm:$0xff] }
 0x73b   :  { %v11698_v14 = vld [vmem:[#allocation2 + $0x1838] sm:$0xf0] }
 0x73c   :  { %v13785_v15 = vld [vmem:[#allocation2 + $0x1a1c] sm:$0xf]  ;;  %v11701_v36 = vor.u32 %v13721_v12, %v11698_v14  ;;  %7948 = vmatpush.bf16.msrb.mxu3 %v12501_v29  ;;  %v7955_v12 = vmax.f32 %v14271_v40, 0.0  ;;  %v7956_v14 = vmax.f32 %v14298_v57, 0.0  ;;  %v14013_v29 = vld [vmem:[#allocation6 + $0x138] sm:$0xff] }
 0x73d   :  { %v11954_v8 = vld [vmem:[#allocation2 + $0x1a38] sm:$0xf0] }
 0x73e   :  { %v13849_v30 = vld [vmem:[#allocation2 + $0x1c1c] sm:$0xf]  ;;  %v11957_v43 = vor.u32 %v13785_v15, %v11954_v8  ;;  %7910 = vmatpush.bf16.msrb.mxu0 %v11701_v36  ;;  %v13998_v15 = vld [vmem:[#allocation6 + $0xc0] sm:$0xff]  ;;  %v7957_v8 = vmax.f32 %v14325_v17, 0.0  ;;  %v14011_v17 = vld [vmem:[#allocation6 + $0x128] sm:$0xff] }
 0x73f   :  { %v12210_v21 = vld [vmem:[#allocation2 + $0x1c38] sm:$0xf0] }
 0x740   :  { %v13913_v24 = vld [vmem:[#allocation2 + $0x1e1c] sm:$0xf]  ;;  %v12213_v45 = vor.u32 %v13849_v30, %v12210_v21  ;;  %7923 = vmatpush.bf16.msrb.mxu1 %v11957_v43  ;;  %v7958_v30 = vmax.f32 %v14352_v1, 0.0  ;;  %v14021_v21 = vld [vmem:[#allocation6 + $0x178] sm:$0xff]  ;;  %v7965_v40 = vpack.c.bf16 %v7957_v8, %v7957_v8  ;;  %v14019_v1 = vld [vmem:[#allocation6 + $0x168] sm:$0xff] }
 0x741   :  { %v12466_v26 = vld [vmem:[#allocation2 + $0x1e38] sm:$0xf0]  ;;  %7911 = vmatmul.bf16.vlgmr.msrb.gmra.mxu0 %v14234_v23  ;;  %v14441_v23 = vpop.f32.mrf.mxu1 }
 0x742   :  { %v12469_v39 = vor.u32 %v13913_v24, %v12466_v26  ;;  %7936 = vmatpush.bf16.msrb.mxu2 %v12213_v45  ;;  %8487 = vmatpush.bf16.msra.mxu0 %v13981_v34  ;;  %v13980_v53 = vld [vmem:[#allocation6 + $0x30] sm:$0xff]  ;;  %v7963_v24 = vpack.c.bf16 %v7955_v12, %v7955_v12  ;;  %v7964_v26 = vpack.c.bf16 %v7956_v14, %v7956_v14  ;;  %v14027_v45 = vld [vmem:[#allocation6 + $0x1a8] sm:$0xff] }
 0x743   :  { %v13988_v18 = vld [vmem:[#allocation6 + $0x70] sm:$0xff]  ;;  %7924 = vmatmul.bf16.vlgmr.msrb.gmra.mxu1 %v14238_v31  ;;  %v13986_v31 = vld [vmem:[#allocation6 + $0x60] sm:$0xff]  ;;  %v7966_v36 = vpack.c.bf16 %v7958_v30, %v7958_v30  ;;  %v7679_v34 = vadd.f32 %v14431_v54, %v14429_v46  ;;  %v14025_v46 = vld [vmem:[#allocation6 + $0x198] sm:$0xff]  ;;  %v7782_v54 = vpop.f32.mrf.mxu2 }
 0x744   :  { %7949 = vmatpush.bf16.msrb.mxu3 %v12469_v39  ;;  %8500 = vmatpush.bf16.msra.mxu1 %v13989_v49  ;;  %v13996_v58 = vld [vmem:[#allocation6 + $0xb0] sm:$0xff]  ;;  %v1106_v39 = vperm.slane %v14412_v47, 7  ;;  %v14010_v49 = vld [vmem:[#allocation6 + $0x120] sm:$0xff]  ;;  %v14017_v47 = vld [vmem:[#allocation6 + $0x158] sm:$0xff] }
 0x745   :  { %v14004_v48 = vld [vmem:[#allocation6 + $0xf0] sm:$0xff]  ;;  %7937 = vmatmul.bf16.vlgmr.msrb.gmra.mxu2 %v14236_v28  ;;  %v13994_v28 = vld [vmem:[#allocation6 + $0xa0] sm:$0xff] }
 0x746   :  { %8513 = vmatpush.bf16.msra.mxu2 %v13997_v50  ;;  %8488 = vmatpush.bf16.msra.mxu0 %v13980_v53  ;;  %v13976_v4 = vld [vmem:[#allocation6 + $0x10] sm:$0xff]  ;;  %v7756_v50 = vpop.f32.mrf.mxu0  ;;  %v14026_v53 = vld [vmem:[#allocation6 + $0x1a0] sm:$0xff] }
 0x747   :  { %7950 = vmatmul.bf16.vlgmr.msrb.gmra.mxu3 %v14240_v35  ;;  %v14002_v35 = vld [vmem:[#allocation6 + $0xe0] sm:$0xff]  ;;  %v13984_v38 = vld [vmem:[#allocation6 + $0x50] sm:$0xff] }
 0x748   :  { %8526 = vmatpush.bf16.msra.mxu3 %v14005_v52  ;;  %8501 = vmatpush.bf16.msra.mxu1 %v13988_v18  ;;  %v13992_v5 = vld [vmem:[#allocation6 + $0x90] sm:$0xff]  ;;  %v14018_v52 = vld [vmem:[#allocation6 + $0x160] sm:$0xff]  ;;  %v7757_v18 = vadd.f32 %v7756_v50, %v1106_v39 }
 0x749   :  { %v7719_v51 = vpop.f32.mrf.mxu1  ;;  %v14000_v13 = vld [vmem:[#allocation6 + $0xd0] sm:$0xff]  ;;  %v14034_v30 = vld [vmem:[#allocation6 + $0x1e0] sm:$0xff] }
 0x74a   :  { %8514 = vmatpush.bf16.msra.mxu2 %v13996_v58  ;;  %8489 = vmatpush.bf16.msra.mxu0 %v13979_v37  ;;  %v14012_v27 = vld [vmem:[#allocation6 + $0x130] sm:$0xff] }
 0x74b   :  { %v14020_v57 = vld [vmem:[#allocation6 + $0x170] sm:$0xff]  ;;  %v7784_v51 = vpop.f32.mrf.mxu2 }
 0x74c   :  { %8527 = vmatpush.bf16.msra.mxu3 %v14004_v48  ;;  %8502 = vmatpush.bf16.msra.mxu1 %v13987_v19  ;;  %v14028_v43 = vld [vmem:[#allocation6 + $0x1b0] sm:$0xff]  ;;  %v7692_v48 = vadd.f32 %v14433_v62, %v7679_v34 }
 0x74d   :  { %v14016_v62 = vld [vmem:[#allocation6 + $0x150] sm:$0xff] }
 0x74e   :  { %8515 = vmatpush.bf16.msra.mxu2 %v13995_v16  ;;  %8490 = vmatpush.bf16.msra.mxu0 %v13978_v55  ;;  %v7705_v19 = vadd.f32 %v14439_v32, %v7692_v48  ;;  %v14009_v16 = vld [vmem:[#allocation6 + $0x118] sm:$0xff]  ;;  %v7795_v55 = vpop.f32.mrf.mxu3 }
 0x750   :  { %8528 = vmatpush.bf16.msra.mxu3 %v14003_v20  ;;  %8503 = vmatpush.bf16.msra.mxu1 %v13986_v31  ;;  %v7718_v31 = vadd.f32 %v14441_v23, %v7705_v19 }
 0x751   :  { %v7769_v58 = vpop.f32.mrf.mxu1 }
 0x752   :  { %8516 = vmatpush.bf16.msra.mxu2 %v13994_v28  ;;  %8491 = vmatpush.bf16.msra.mxu0 %v13977_v22  ;;  %v7770_v37 = vadd.f32 %v7769_v58, %v7757_v18  ;;  %v14008_v28 = vld [vmem:[#allocation6 + $0x110] sm:$0xff]  ;;  %v7758_v22 = vpop.f32.mrf.mxu0 }
 0x754   :  { %8529 = vmatpush.bf16.msra.mxu3 %v14002_v35  ;;  %8504 = vmatpush.bf16.msra.mxu1 %v13985_v59  ;;  %v7783_v20 = vadd.f32 %v7782_v54, %v7770_v37  ;;  %v14024_v59 = vld [vmem:[#allocation6 + $0x190] sm:$0xff] }
 0x756   :  { %8517 = vmatpush.bf16.msra.mxu2 %v13993_v60  ;;  %8492 = vmatpush.bf16.msra.mxu0 %v13976_v4  ;;  %v7796_v35 = vadd.f32 %v7795_v55, %v7783_v20  ;;  %v7731_v60 = vadd.f32 %v14443_v63, %v7718_v31  ;;  %v14023_v4 = vld [vmem:[#allocation6 + $0x188] sm:$0xff]  ;;  %v7960_v63 = vmax.f32 %v14406_v7, 0.0 }
 0x758   :  { %8530 = vmatpush.bf16.msra.mxu3 %v14001_v61  ;;  %8505 = vmatpush.bf16.msra.mxu1 %v13984_v38  ;;  %v14007_v61 = vld [vmem:[#allocation6 + $0x108] sm:$0xff]  ;;  %v7744_v23 = vadd.f32 %v14445_v2, %v7731_v60  ;;  %v7797_v38 = vpop.f32.mrf.mxu3  ;;  %v7968_v42 = vpack.c.bf16 %v7960_v63, %v7960_v63 }
 0x759   :  { %v7771_v32 = vpop.f32.mrf.mxu1 }
 0x75a   :  { %8518 = vmatpush.bf16.msra.mxu2 %v13992_v5  ;;  %8493 = vmatpush.bf16.msra.mxu0 %v13975_v9  ;;  %v14006_v5 = vld [vmem:[#allocation6 + $0x100] sm:$0xff]  ;;  %v7808_v2 = vpop.f32.mrf.mxu0 }
 0x75b   :  { %v14014_v9 = vld [vmem:[#allocation6 + $0x140] sm:$0xff] }
 0x75c   :  { %8531 = vmatpush.bf16.msra.mxu3 %v14000_v13  ;;  %8506 = vmatpush.bf16.msra.mxu1 %v13983_v0  ;;  %v7959_v13 = vmax.f32 %v14379_v56, 0.0  ;;  %v14022_v0 = vld [vmem:[#allocation6 + $0x180] sm:$0xff] }
 0x75e   :  { %8519 = vmatpush.bf16.msra.mxu2 %v13991_v10  ;;  %8494 = vmatpush.bf16.msra.mxu0 %v13974_v44  ;;  %v7961_v10 = vmax.f32 %v7744_v23, 0.0 }
 0x760   :  { %8532 = vmatpush.bf16.msra.mxu3 %v13999_v41  ;;  %8507 = vmatpush.bf16.msra.mxu1 %v13982_v25  ;;  %v7967_v41 = vpack.c.bf16 %v7959_v13, %v7959_v13  ;;  %v7969_v6 = vpack.c.bf16 %v7961_v10, %v7961_v10  ;;  %v7834_v25 = vpop.f32.mrf.mxu2  ;;  %v7847_v56 = vpop.f32.mrf.mxu3 }
 0x761   :  { %8495 = vmatmul.bf16.vlgmr.msra.gmra.mxu0 %v7963_v24  ;;  %v7821_v44 = vpop.f32.mrf.mxu1 }
 0x762   :  { %8520 = vmatpush.bf16.msra.mxu2 %v13990_v11  ;;  %8539 = vmatpush.bf16.msrb.mxu0 %v14013_v29  ;;  %v14037_v11 = vld [vmem:[#allocation6 + $0x1f8] sm:$0xff]  ;;  %v7810_v12 = vpop.f32.mrf.mxu0  ;;  %v14035_v29 = vld [vmem:[#allocation6 + $0x1e8] sm:$0xff] }
 0x763   :  { %8508 = vmatmul.bf16.vlgmr.msra.gmra.mxu1 %v7964_v26  ;;  %v14032_v26 = vld [vmem:[#allocation6 + $0x1d0] sm:$0xff] }
 0x764   :  { %8533 = vmatpush.bf16.msra.mxu3 %v13998_v15  ;;  %8552 = vmatpush.bf16.msrb.mxu1 %v14021_v21  ;;  %v14036_v15 = vld [vmem:[#allocation6 + $0x1f0] sm:$0xff]  ;;  %v14033_v21 = vld [vmem:[#allocation6 + $0x1d8] sm:$0xff] }
 0x765   :  { %8521 = vmatmul.bf16.vlgmr.msra.gmra.mxu2 %v7965_v40  ;;  %v14031_v40 = vld [vmem:[#allocation6 + $0x1c8] sm:$0xff] }
 0x766   :  { %8565 = vmatpush.bf16.msrb.mxu2 %v14029_v33  ;;  %8540 = vmatpush.bf16.msrb.mxu0 %v14012_v27  ;;  %v7809_v27 = vadd.f32 %v7808_v2, %v7796_v35 }
 0x767   :  { %8534 = vmatmul.bf16.vlgmr.msra.gmra.mxu3 %v7966_v36 }
 0x768   :  { %8553 = vmatpush.bf16.msrb.mxu1 %v14020_v57  ;;  %8578 = vmatpush.bf16.msrb.mxu3 %v14037_v11  ;;  %v7836_v7 = vpop.f32.mrf.mxu2  ;;  %v7849_v8 = vpop.f32.mrf.mxu3 }
 0x769   :  { %v7823_v14 = vpop.f32.mrf.mxu1 }
 0x76a   :  { %8566 = vmatpush.bf16.msrb.mxu2 %v14028_v43  ;;  %8541 = vmatpush.bf16.msrb.mxu0 %v14011_v17 }
 0x76c   :  { %8554 = vmatpush.bf16.msrb.mxu1 %v14019_v1  ;;  %8579 = vmatpush.bf16.msrb.mxu3 %v14036_v15  ;;  %v7822_v1 = vadd.f32 %v7821_v44, %v7809_v27 }
 0x76e   :  { %8567 = vmatpush.bf16.msrb.mxu2 %v14027_v45  ;;  %8542 = vmatpush.bf16.msrb.mxu0 %v14010_v49  ;;  %v14030_v45 = vld [vmem:[#allocation6 + $0x1c0] sm:$0xff]  ;;  %v7835_v39 = vadd.f32 %v7834_v25, %v7822_v1 }
 0x770   :  { %8555 = vmatpush.bf16.msrb.mxu1 %v14018_v52  ;;  %8580 = vmatpush.bf16.msrb.mxu3 %v14035_v29  ;;  %v7848_v50 = vadd.f32 %v7847_v56, %v7835_v39 }
 0x772   :  { %8568 = vmatpush.bf16.msrb.mxu2 %v14026_v53  ;;  %8543 = vmatpush.bf16.msrb.mxu0 %v14009_v16 }
 0x774   :  { %8556 = vmatpush.bf16.msrb.mxu1 %v14017_v47  ;;  %8581 = vmatpush.bf16.msrb.mxu3 %v14034_v30 }
 0x776   :  { %8569 = vmatpush.bf16.msrb.mxu2 %v14025_v46  ;;  %8544 = vmatpush.bf16.msrb.mxu0 %v14008_v28 }
 0x778   :  { %8557 = vmatpush.bf16.msrb.mxu1 %v14016_v62  ;;  %8582 = vmatpush.bf16.msrb.mxu3 %v14033_v21 }
 0x77a   :  { %8570 = vmatpush.bf16.msrb.mxu2 %v14024_v59  ;;  %8545 = vmatpush.bf16.msrb.mxu0 %v14007_v61  ;;  %v14045_v59 = vld [vmem:[%s14471_s4] ss:$0 sm:$0xff] }
 0x77c   :  { %8558 = vmatpush.bf16.msrb.mxu1 %v14015_v3  ;;  %8583 = vmatpush.bf16.msrb.mxu3 %v14032_v26 }
 0x77e   :  { %8571 = vmatpush.bf16.msrb.mxu2 %v14023_v4  ;;  %8546 = vmatpush.bf16.msrb.mxu0 %v14006_v5  ;;  %v7860_v33 = vpop.f32.mrf.mxu0 }
 0x77f   :  { %v7861_v52 = vadd.f32 %v7860_v33, %v7848_v50 }
 0x780   :  { %8559 = vmatpush.bf16.msrb.mxu1 %v14014_v9  ;;  %v7873_v24 = vpop.f32.mrf.mxu1  ;;  %8584 = vmatpush.bf16.msrb.mxu3 %v14031_v40 }
 0x781   :  { %8547 = vmatmul.bf16.vlgmr.msrb.gmra.mxu0 %v7967_v41  ;;  %v7874_v53 = vadd.f32 %v7873_v24, %v7861_v52 }
 0x782   :  { %8572 = vmatpush.bf16.msrb.mxu2 %v14022_v0 }
 0x783   :  { %8560 = vmatmul.bf16.vlgmr.msrb.gmra.mxu1 %v7968_v42 }
 0x784   :  { %8585 = vmatpush.bf16.msrb.mxu3 %v14030_v45 }
 0x785   :  { %8573 = vmatmul.bf16.vlgmr.msrb.gmra.mxu2 %v7969_v6 }
 0x786   :  { %v7862_v43 = vpop.f32.mrf.mxu0 }
 0x788   :  { %v7886_v36 = vpop.f32.mrf.mxu2  ;;  %v7875_v17 = vpop.f32.mrf.mxu1 }
 0x789   :  { %v7887_v18 = vadd.f32 %v7886_v36, %v7874_v53 }
 0x78a   :  { %v7899_v57 = vpop.f32.mrf.mxu3 }
 0x78b   :  { %v7900_v58 = vadd.f32 %v7899_v57, %v7887_v18 }
 0x790   :  { %v7888_v34 = vpop.f32.mrf.mxu2 }
 0x792   :  { %v7901_v49 = vpop.f32.mrf.mxu3 }
 0x7be   :  { %v7912_v48 = vpop.f32.mrf.mxu0 }
 0x7bf   :  { %v7913_v19 = vadd.f32 %v7912_v48, %v7900_v58 }
 0x7c0   :  { %v7925_v37 = vpop.f32.mrf.mxu1 }
 0x7c1   :  { %v7926_v16 = vadd.f32 %v7925_v37, %v7913_v19 }
 0x7c6   :  { %v7914_v20 = vpop.f32.mrf.mxu0 }
 0x7c8   :  { %v7938_v47 = vpop.f32.mrf.mxu2  ;;  %v7927_v55 = vpop.f32.mrf.mxu1 }
 0x7c9   :  { %v7939_v46 = vadd.f32 %v7938_v47, %v7926_v16 }
 0x7ca   :  { %v7951_v54 = vpop.f32.mrf.mxu3 }
 0x7cb   :  { %v7952_v31 = vadd.f32 %v7951_v54, %v7939_v46 }
 0x7cd   :  { %v7962_v28 = vmax.f32 %v7952_v31, 0.0 }
 0x7cf   :  { %v7970_v35 = vpack.c.bf16 %v7962_v28, %v7962_v28 }
 0x7d0   :  { %v7940_v22 = vpop.f32.mrf.mxu2 }
 0x7d1   :  { %8586 = vmatmul.bf16.vlgmr.msrb.gmra.mxu3 %v7970_v35 }
 0x7d2   :  { %v7953_v62 = vpop.f32.mrf.mxu3 }
 0x7de   :  { %v8496_v32 = vpop.f32.mrf.mxu0 }
 0x7df   :  { %v8497_v61 = vadd.f32 %v14045_v59, %v8496_v32 }
 0x7e0   :  { %v8509_v60 = vpop.f32.mrf.mxu1 }
 0x7e1   :  { %v8510_v3 = vadd.f32 %v8509_v60, %v8497_v61 }
 0x7e6   :  { %v8498_v38 = vpop.f32.mrf.mxu0 }
 0x7e8   :  { %v8522_v4 = vpop.f32.mrf.mxu2  ;;  %v8511_v5 = vpop.f32.mrf.mxu1 }
 0x7e9   :  { %v8523_v23 = vadd.f32 %v8522_v4, %v8510_v3 }
 0x7ea   :  { %v8535_v51 = vpop.f32.mrf.mxu3 }
 0x7eb   :  { %v8536_v13 = vadd.f32 %v8535_v51, %v8523_v23 }
 0x7f0   :  { %v8524_v9 = vpop.f32.mrf.mxu2 }
 0x7f2   :  { %v8537_v0 = vpop.f32.mrf.mxu3 }
 0x7fe   :  { %v8548_v63 = vpop.f32.mrf.mxu0 }
 0x7ff   :  { %v8549_v10 = vadd.f32 %v8548_v63, %v8536_v13 }
 0x800   :  { %v8561_v41 = vpop.f32.mrf.mxu1 }
 0x801   :  { %v8562_v42 = vadd.f32 %v8561_v41, %v8549_v10 }
 0x806   :  { %v8550_v44 = vpop.f32.mrf.mxu0 }
 0x808   :  { %v8574_v6 = vpop.f32.mrf.mxu2  ;;  %v8563_v25 = vpop.f32.mrf.mxu1 }
 0x809   :  { %v8575_v2 = vadd.f32 %v8574_v6, %v8562_v42 }
 0x810   :  { %v8576_v56 = vpop.f32.mrf.mxu2 }
 0x854   :  { %v8587_v11 = vpop.f32.mrf.mxu3 }
 0x855   :  { %v8588_v12 = vadd.f32 %v8587_v11, %v8575_v2 }
 0x857   :  { %8591 = vst [vmem:[%s14472_s5] sm:$0xff] %v8588_v12 }
 0x85c   :  { %v8589_v14 = vpop.f32.mrf.mxu3 }
 0x85d   :  { %8596 = vsyncpa [#allocation3], 1 }
 0x85e   :  { %8597 = vsyncpa [#allocation5], 1 }

</bundles_post_ra>
